<compile_context>
chip_gen: v7x
topology: tpu7x:2x2x1
jax: 0.10.0
libtpu: 0.0.40
codegen_flags: <defaults>
</compile_context>

<pallas_src>
import functools

import jax
import jax.numpy as jnp
from jax.experimental import pallas as pl
from jax.experimental.pallas import tpu as pltpu


# ----------------------------------------------------------------------------
# Fused kernel: whole GumbelTreeLSTM forward for a block of NB examples.
# ----------------------------------------------------------------------------
def _gumbel_tree_kernel(x_ref, lmask_ref, w_word_ref, b_word_ref,
                        w_comp_ref, b_comp_ref, w_dec_ref, b_dec_ref, out_ref):
    NB, S, D = x_ref.shape          # S == 8 keeps the (NB, S, D) <-> (NB*S, D)
    R = NB * S                      # reshape sublane-aligned (layout no-op).

    x = x_ref[...]                  # (NB, S, D)
    lm = lmask_ref[...]             # (NB, S, 1) length mask
    w_word = w_word_ref[...]        # (D, 2D)
    b_word = b_word_ref[...]        # (1, 2D)
    w_comp = w_comp_ref[...]        # (2D, 5D)  fused [i|fl|fr|u|o] gate weight
    b_comp = b_comp_ref[...]        # (1, 5D)
    b_dec = b_dec_ref[...]          # (1, 1)

    # Hoisted loop-invariant constants (JAX does not CSE broadcast/iota).
    row_pos = jax.lax.broadcasted_iota(jnp.int32, (NB, S, 1), 1).astype(jnp.float32)
    w_dec_b = jnp.broadcast_to(w_dec_ref[...].reshape(1, 1, D), (NB, S, D))
    zrow = jnp.zeros((NB, 1, D), jnp.float32)
    zcol = jnp.zeros((NB, S, 1), jnp.float32)

    # word_linear: one (R, D) @ (D, 2D) MXU pass; split h/c with static lane slices.
    hc = jnp.dot(x.reshape(R, D), w_word, preferred_element_type=jnp.float32) + b_word
    hc = hc.reshape(NB, S, 2 * D)
    h = hc[:, :, :D]
    c = hc[:, :, D:]

    # Fully unrolled recurrence (S - 1 static steps).  The state keeps a constant
    # (NB, S, D) shape; at step i only positions p < S - i are live, trailing rows
    # hold don't-care values that never feed live rows.
    for i in range(S - 1):
        hl, cl = h, c                                            # left children
        hr = jnp.concatenate([h[:, 1:, :], zrow], axis=1)        # right children
        cr = jnp.concatenate([c[:, 1:, :], zrow], axis=1)

        # BinaryTreeLSTMLayer: one fused (R, 2D) @ (2D, 5D) MXU pass per step.
        lhs = jnp.concatenate([hl, hr], axis=-1)                 # (NB, S, 2D)
        gates = jnp.dot(lhs.reshape(R, 2 * D), w_comp,
                        preferred_element_type=jnp.float32) + b_comp
        gates = gates.reshape(NB, S, 5 * D)
        g_i = gates[:, :, 0 * D:1 * D]
        g_fl = gates[:, :, 1 * D:2 * D]
        g_fr = gates[:, :, 2 * D:3 * D]
        g_u = gates[:, :, 3 * D:4 * D]
        g_o = gates[:, :, 4 * D:5 * D]
        new_c = (cl * jax.nn.sigmoid(g_fl + 1.0)
                 + cr * jax.nn.sigmoid(g_fr + 1.0)
                 + jnp.tanh(g_u) * jax.nn.sigmoid(g_i))
        new_h = jax.nn.sigmoid(g_o) * jnp.tanh(new_c)

        if i < S - 2:
            # --- select_composition (eval mode) ---
            # decide_linear on the VPU/XLU (lane-dense reduce): logits (NB, S, 1).
            logits = jnp.sum(new_h * w_dec_b, axis=-1, keepdims=True) + b_dec
            # Mask for merge positions 0..S-2-i == length_mask[:, i+1:]; the dead
            # tail rows are zero-padded so they can never win the argmax.
            kept = jnp.concatenate([lm[:, i + 1:, :], zcol[:, :i + 1, :]],
                                   axis=1) > 0.0                 # (NB, S, 1) bool
            # Eval: noiseless st_gumbel_softmax == hard argmax of the masked
            # (monotone) softmax == argmax of masked logits (first index on ties).
            scored = jnp.where(kept, logits, -1e30)
            pmax = jnp.max(scored, axis=1, keepdims=True)        # (NB, 1, 1)
            is_max = jnp.logical_and(scored >= pmax, kept)
            first = jnp.min(jnp.where(is_max, row_pos, float(S)),
                            axis=1, keepdims=True)               # (NB, 1, 1)
            # cumsum of a one-hot is a step function -> position compares.
            sel = (row_pos == first).astype(jnp.float32)
            left = (row_pos < first).astype(jnp.float32)
            right = (row_pos > first).astype(jnp.float32)
            new_h = sel * new_h + left * hl + right * hr
            new_c = sel * new_c + left * cl + right * cr

        # --- update_state ---
        done = lm[:, i + 1:i + 2, :]                             # (NB, 1, 1)
        h = done * new_h + (1.0 - done) * hl
        c = done * new_c + (1.0 - done) * cl

    out_ref[...] = h[:, 0, :]                                    # final h: (NB, D)


# ----------------------------------------------------------------------------
# Forward wrapper: one pallas_call for the whole module, NB examples / program.
# ----------------------------------------------------------------------------
def gumbel_tree_lstm_forward(params, x, input_mask, *, block_n=32):
    N, S, D = x.shape
    # NB must be a multiple of 8 (sublane-aligned output block / trivial reshapes).
    nb = max(8, min((int(block_n) // 8) * 8, ((N + 7) // 8) * 8))
    n_pad = pl.cdiv(N, nb) * nb

    lmask = input_mask.astype(jnp.float32).reshape(N, S, 1)
    xp = x
    if n_pad != N:
        xp = jnp.pad(xp, ((0, n_pad - N), (0, 0), (0, 0)))
        lmask = jnp.pad(lmask, ((0, n_pad - N), (0, 0), (0, 0)))

    def rep2(shape):  # weights: same block every grid step -> fetched once
        return pl.BlockSpec(shape, lambda g: (0, 0))

    out = pl.pallas_call(
        _gumbel_tree_kernel,
        out_shape=jax.ShapeDtypeStruct((n_pad, D), jnp.float32),
        grid=(n_pad // nb,),
        in_specs=[
            pl.BlockSpec((nb, S, D), lambda g: (g, 0, 0)),   # x (block of examples)
            pl.BlockSpec((nb, S, 1), lambda g: (g, 0, 0)),   # length mask
            rep2((D, 2 * D)), rep2((1, 2 * D)),              # word_linear W, b
            rep2((2 * D, 5 * D)), rep2((1, 5 * D)),          # comp_linear W, b (fused gates)
            rep2((1, D)), rep2((1, 1)),                      # decide_linear W, b
        ],
        out_specs=pl.BlockSpec((nb, D), lambda g: (g, 0)),   # lane-dense final h
        compiler_params=pltpu.CompilerParams(
            dimension_semantics=("parallel",)),
    )(xp, lmask,
      params["w_word"], params["b_word"],
      params["w_comp"], params["b_comp"],
      params["w_dec"], params["b_dec"])

    return {
        "sequence": x,
        "global_state": out[:N],
        "input_mask": input_mask[..., None],
        "aux_loss": None,
    }


# ----------------------------------------------------------------------------
# Deterministic synthetic parameters (shapes from the PyTorch __init__), packed
# host-side into kernel-friendly fused layouts (done once).
# ----------------------------------------------------------------------------
def init_params(key, hidden_dim):
    D = hidden_dim
    k1, k2, k3 = jax.random.split(key, 3)

    # word_linear: Linear(D -> 2D), stored as (in, out) = W.T, outputs [h | c].
    w_word = jax.random.normal(k1, (D, 2 * D), jnp.float32) * (1.0 / jnp.sqrt(D))
    b_word = jnp.zeros((1, 2 * D), jnp.float32)
    # comp_linear: Linear(2D -> 5D), orthogonal weight, zero bias.
    # Input features ordered [hl | hr]; output gates ordered [i | fl | fr | u | o].
    w_comp = jax.nn.initializers.orthogonal()(k2, (2 * D, 5 * D), jnp.float32)
    b_comp = jnp.zeros((1, 5 * D), jnp.float32)
    # decide_linear: Linear(D -> 1)  (conv_decision=False)
    # TODO(synk): conv_decision=True windowed (5D -> 1) branch not implemented.
    w_dec = jax.random.normal(k3, (1, D), jnp.float32) * (1.0 / jnp.sqrt(D))
    b_dec = jnp.zeros((1, 1), jnp.float32)

    # TODO(synk): training-mode Gumbel noise, dropout and the straight-through
    # gradient path are not replicated (eval-mode forward only).
    return {"w_word": w_word, "b_word": b_word,
            "w_comp": w_comp, "b_comp": b_comp,
            "w_dec": w_dec, "b_dec": b_dec}


if __name__ == "__main__":
    N, S, D = 16, 8, 32  # batch, sequence length, hidden_size

    key = jax.random.PRNGKey(0)
    k_param, k_input = jax.random.split(key)
    params = init_params(k_param, D)

    x = jax.random.normal(k_input, (N, S, D), jnp.float32)
    lengths = (jnp.arange(N) % S) + 1                     # mix of short / full sequences
    input_mask = (jnp.arange(S)[None, :] < lengths[:, None]).astype(jnp.float32)

    fwd = jax.jit(functools.partial(gumbel_tree_lstm_forward, params, block_n=8))
    out = fwd(x, input_mask)
    jax.block_until_ready(out["global_state"])

    assert out["sequence"].shape == (N, S, D)
    assert out["global_state"].shape == (N, D)
    assert out["input_mask"].shape == (N, S, 1)
    print("KERNEL_OK")
</pallas_src>

<mosaic_0001>
module attributes {stable_mosaic.version = 11 : i64} {
  func.func @_gumbel_tree_kernel(%arg0: i32, %arg1: memref<8x8x32xf32, #tpu.memory_space<vmem>>, %arg2: memref<8x8x1xf32, #tpu.memory_space<vmem>>, %arg3: memref<32x64xf32, #tpu.memory_space<vmem>>, %arg4: memref<1x64xf32, #tpu.memory_space<vmem>>, %arg5: memref<64x160xf32, #tpu.memory_space<vmem>>, %arg6: memref<1x160xf32, #tpu.memory_space<vmem>>, %arg7: memref<1x32xf32, #tpu.memory_space<vmem>>, %arg8: memref<1x1xf32, #tpu.memory_space<vmem>>, %arg9: memref<8x32xf32, #tpu.memory_space<vmem>>) attributes {dimension_semantics = [#tpu.dimension_semantics<parallel>], iteration_bounds = array<i64: 2>, scalar_prefetch = 0 : i64, scratch_operands = 0 : i64, tpu.core_type = #tpu.core_type<tc>, window_params = [{transform_indices = @transform_0, window_bounds = array<i64: 8, 8, 32>}, {transform_indices = @transform_1, window_bounds = array<i64: 8, 8, 1>}, {pipeline_mode = #tpu.pipeline_mode<synchronous>, transform_indices = @transform_2, window_bounds = array<i64: 32, 64>}, {pipeline_mode = #tpu.pipeline_mode<synchronous>, transform_indices = @transform_3, window_bounds = array<i64: 1, 64>}, {pipeline_mode = #tpu.pipeline_mode<synchronous>, transform_indices = @transform_4, window_bounds = array<i64: 64, 160>}, {pipeline_mode = #tpu.pipeline_mode<synchronous>, transform_indices = @transform_5, window_bounds = array<i64: 1, 160>}, {pipeline_mode = #tpu.pipeline_mode<synchronous>, transform_indices = @transform_6, window_bounds = array<i64: 1, 32>}, {pipeline_mode = #tpu.pipeline_mode<synchronous>, transform_indices = @transform_7, window_bounds = array<i64: 1, 1>}, {transform_indices = @transform_8, window_bounds = array<i64: 8, 32>}]} {
    %c0 = arith.constant 0 : index
    %c0_0 = arith.constant 0 : index
    %c0_1 = arith.constant 0 : index
    %0 = vector.load %arg1[%c0, %c0_0, %c0_1] : memref<8x8x32xf32, #tpu.memory_space<vmem>>, vector<8x8x32xf32>
    %c0_2 = arith.constant 0 : index
    %c0_3 = arith.constant 0 : index
    %c0_4 = arith.constant 0 : index
    %1 = vector.load %arg2[%c0_2, %c0_3, %c0_4] : memref<8x8x1xf32, #tpu.memory_space<vmem>>, vector<8x8x1xf32>
    %c0_5 = arith.constant 0 : index
    %c0_6 = arith.constant 0 : index
    %2 = vector.load %arg3[%c0_5, %c0_6] : memref<32x64xf32, #tpu.memory_space<vmem>>, vector<32x64xf32>
    %c0_7 = arith.constant 0 : index
    %c0_8 = arith.constant 0 : index
    %3 = vector.load %arg4[%c0_7, %c0_8] : memref<1x64xf32, #tpu.memory_space<vmem>>, vector<1x64xf32>
    %c0_9 = arith.constant 0 : index
    %c0_10 = arith.constant 0 : index
    %4 = vector.load %arg5[%c0_9, %c0_10] : memref<64x160xf32, #tpu.memory_space<vmem>>, vector<64x160xf32>
    %c0_11 = arith.constant 0 : index
    %c0_12 = arith.constant 0 : index
    %5 = vector.load %arg6[%c0_11, %c0_12] : memref<1x160xf32, #tpu.memory_space<vmem>>, vector<1x160xf32>
    %c0_13 = arith.constant 0 : index
    %c0_14 = arith.constant 0 : index
    %6 = vector.load %arg8[%c0_13, %c0_14] : memref<1x1xf32, #tpu.memory_space<vmem>>, vector<1x1xf32>
    %7 = tpu.iota {dimensions = array<i32: 1>} : vector<8x8x1xi32>
    %8 = arith.sitofp %7 : vector<8x8x1xi32> to vector<8x8x1xf32>
    %c0_15 = arith.constant 0 : index
    %c0_16 = arith.constant 0 : index
    %9 = vector.load %arg7[%c0_15, %c0_16] : memref<1x32xf32, #tpu.memory_space<vmem>>, vector<1x32xf32>
    %10 = vector.shape_cast %9 : vector<1x32xf32> to vector<1x1x32xf32>
    %11 = vector.shape_cast %10 : vector<1x1x32xf32> to vector<1x1x32xf32>
    %12 = vector.broadcast %11 : vector<1x1x32xf32> to vector<8x8x32xf32>
    %cst = arith.constant 0.000000e+00 : f32
    %13 = vector.broadcast %cst : f32 to vector<8x1x32xf32>
    %cst_17 = arith.constant 0.000000e+00 : f32
    %14 = vector.broadcast %cst_17 : f32 to vector<8x8x1xf32>
    %15 = vector.shape_cast %0 : vector<8x8x32xf32> to vector<64x32xf32>
    %cst_18 = arith.constant dense<0.000000e+00> : vector<64x64xf32>
    %16 = tpu.matmul %15, %2, %cst_18 {dimension_numbers = #tpu.dot_dimension_numbers<[1], [0], [0], [1], [0, 0, 1, 1], [], []>} : vector<64x32xf32>, vector<32x64xf32>, vector<64x64xf32> -> vector<64x64xf32>
    %17 = vector.broadcast %3 : vector<1x64xf32> to vector<64x64xf32>
    %18 = arith.addf %16, %17 : vector<64x64xf32>
    %19 = vector.shape_cast %18 : vector<64x64xf32> to vector<8x8x64xf32>
    %20 = vector.extract_strided_slice %19 {offsets = [0, 0, 0], sizes = [8, 8, 32], strides = [1, 1, 1]} : vector<8x8x64xf32> to vector<8x8x32xf32>
    %21 = vector.extract_strided_slice %19 {offsets = [0, 0, 32], sizes = [8, 8, 32], strides = [1, 1, 1]} : vector<8x8x64xf32> to vector<8x8x32xf32>
    %22 = vector.extract_strided_slice %20 {offsets = [0, 1, 0], sizes = [8, 7, 32], strides = [1, 1, 1]} : vector<8x8x32xf32> to vector<8x7x32xf32>
    %23 = tpu.concatenate %22, %13 in 1 : vector<8x7x32xf32>, vector<8x1x32xf32> -> vector<8x8x32xf32>
    %24 = vector.extract_strided_slice %21 {offsets = [0, 1, 0], sizes = [8, 7, 32], strides = [1, 1, 1]} : vector<8x8x32xf32> to vector<8x7x32xf32>
    %25 = tpu.concatenate %24, %13 in 1 : vector<8x7x32xf32>, vector<8x1x32xf32> -> vector<8x8x32xf32>
    %26 = tpu.concatenate %20, %23 in 2 : vector<8x8x32xf32>, vector<8x8x32xf32> -> vector<8x8x64xf32>
    %27 = vector.shape_cast %26 : vector<8x8x64xf32> to vector<64x64xf32>
    %cst_19 = arith.constant dense<0.000000e+00> : vector<64x160xf32>
    %28 = tpu.matmul %27, %4, %cst_19 {dimension_numbers = #tpu.dot_dimension_numbers<[1], [0], [0], [1], [0, 0, 1, 1], [], []>} : vector<64x64xf32>, vector<64x160xf32>, vector<64x160xf32> -> vector<64x160xf32>
    %29 = vector.broadcast %5 : vector<1x160xf32> to vector<64x160xf32>
    %30 = arith.addf %28, %29 : vector<64x160xf32>
    %31 = vector.shape_cast %30 : vector<64x160xf32> to vector<8x8x160xf32>
    %32 = vector.extract_strided_slice %31 {offsets = [0, 0, 0], sizes = [8, 8, 32], strides = [1, 1, 1]} : vector<8x8x160xf32> to vector<8x8x32xf32>
    %33 = vector.extract_strided_slice %31 {offsets = [0, 0, 32], sizes = [8, 8, 32], strides = [1, 1, 1]} : vector<8x8x160xf32> to vector<8x8x32xf32>
    %34 = vector.extract_strided_slice %31 {offsets = [0, 0, 64], sizes = [8, 8, 32], strides = [1, 1, 1]} : vector<8x8x160xf32> to vector<8x8x32xf32>
    %35 = vector.extract_strided_slice %31 {offsets = [0, 0, 96], sizes = [8, 8, 32], strides = [1, 1, 1]} : vector<8x8x160xf32> to vector<8x8x32xf32>
    %36 = vector.extract_strided_slice %31 {offsets = [0, 0, 128], sizes = [8, 8, 32], strides = [1, 1, 1]} : vector<8x8x160xf32> to vector<8x8x32xf32>
    %cst_20 = arith.constant 1.000000e+00 : f32
    %37 = vector.broadcast %cst_20 : f32 to vector<8x8x32xf32>
    %38 = arith.addf %33, %37 : vector<8x8x32xf32>
    %39 = arith.negf %38 : vector<8x8x32xf32>
    %40 = math.exp %39 : vector<8x8x32xf32>
    %cst_21 = arith.constant 1.000000e+00 : f32
    %41 = vector.broadcast %cst_21 : f32 to vector<8x8x32xf32>
    %42 = arith.addf %41, %40 : vector<8x8x32xf32>
    %43 = arith.divf %41, %42 : vector<8x8x32xf32>
    %44 = arith.mulf %21, %43 : vector<8x8x32xf32>
    %cst_22 = arith.constant 1.000000e+00 : f32
    %45 = vector.broadcast %cst_22 : f32 to vector<8x8x32xf32>
    %46 = arith.addf %34, %45 : vector<8x8x32xf32>
    %47 = arith.negf %46 : vector<8x8x32xf32>
    %48 = math.exp %47 : vector<8x8x32xf32>
    %cst_23 = arith.constant 1.000000e+00 : f32
    %49 = vector.broadcast %cst_23 : f32 to vector<8x8x32xf32>
    %50 = arith.addf %49, %48 : vector<8x8x32xf32>
    %51 = arith.divf %49, %50 : vector<8x8x32xf32>
    %52 = arith.mulf %25, %51 : vector<8x8x32xf32>
    %53 = arith.addf %44, %52 : vector<8x8x32xf32>
    %54 = math.tanh %35 : vector<8x8x32xf32>
    %55 = arith.negf %32 : vector<8x8x32xf32>
    %56 = math.exp %55 : vector<8x8x32xf32>
    %cst_24 = arith.constant 1.000000e+00 : f32
    %57 = vector.broadcast %cst_24 : f32 to vector<8x8x32xf32>
    %58 = arith.addf %57, %56 : vector<8x8x32xf32>
    %59 = arith.divf %57, %58 : vector<8x8x32xf32>
    %60 = arith.mulf %54, %59 : vector<8x8x32xf32>
    %61 = arith.addf %53, %60 : vector<8x8x32xf32>
    %62 = arith.negf %36 : vector<8x8x32xf32>
    %63 = math.exp %62 : vector<8x8x32xf32>
    %cst_25 = arith.constant 1.000000e+00 : f32
    %64 = vector.broadcast %cst_25 : f32 to vector<8x8x32xf32>
    %65 = arith.addf %64, %63 : vector<8x8x32xf32>
    %66 = arith.divf %64, %65 : vector<8x8x32xf32>
    %67 = math.tanh %61 : vector<8x8x32xf32>
    %68 = arith.mulf %66, %67 : vector<8x8x32xf32>
    %69 = arith.mulf %68, %12 : vector<8x8x32xf32>
    %cst_26 = arith.constant dense<0.000000e+00> : vector<8x8xf32>
    %70 = vector.multi_reduction <add>, %69, %cst_26 [2] : vector<8x8x32xf32> to vector<8x8xf32>
    %71 = vector.shape_cast %70 : vector<8x8xf32> to vector<8x8x1xf32>
    %72 = vector.shape_cast %6 : vector<1x1xf32> to vector<1x1x1xf32>
    %73 = vector.broadcast %72 : vector<1x1x1xf32> to vector<8x8x1xf32>
    %74 = arith.addf %71, %73 : vector<8x8x1xf32>
    %75 = vector.extract_strided_slice %1 {offsets = [0, 1, 0], sizes = [8, 7, 1], strides = [1, 1, 1]} : vector<8x8x1xf32> to vector<8x7x1xf32>
    %76 = vector.extract_strided_slice %14 {offsets = [0, 0, 0], sizes = [8, 1, 1], strides = [1, 1, 1]} : vector<8x8x1xf32> to vector<8x1x1xf32>
    %77 = tpu.concatenate %75, %76 in 1 : vector<8x7x1xf32>, vector<8x1x1xf32> -> vector<8x8x1xf32>
    %cst_27 = arith.constant 0.000000e+00 : f32
    %78 = vector.broadcast %cst_27 : f32 to vector<8x8x1xf32>
    %79 = arith.cmpf ogt, %77, %78 : vector<8x8x1xf32>
    %cst_28 = arith.constant -1.000000e+30 : f32
    %80 = vector.broadcast %cst_28 : f32 to vector<8x8x1xf32>
    %81 = arith.select %79, %74, %80 : vector<8x8x1xi1>, vector<8x8x1xf32>
    %cst_29 = arith.constant dense<0xFF800000> : vector<8x1xf32>
    %82 = vector.multi_reduction <maximumf>, %81, %cst_29 [1] : vector<8x8x1xf32> to vector<8x1xf32>
    %83 = vector.shape_cast %82 : vector<8x1xf32> to vector<8x1x1xf32>
    %84 = vector.broadcast %83 : vector<8x1x1xf32> to vector<8x8x1xf32>
    %85 = arith.cmpf oge, %81, %84 : vector<8x8x1xf32>
    %86 = arith.andi %85, %79 : vector<8x8x1xi1>
    %cst_30 = arith.constant 8.000000e+00 : f32
    %87 = vector.broadcast %cst_30 : f32 to vector<8x8x1xf32>
    %88 = arith.select %86, %8, %87 : vector<8x8x1xi1>, vector<8x8x1xf32>
    %cst_31 = arith.constant dense<0x7F800000> : vector<8x1xf32>
    %89 = vector.multi_reduction <minimumf>, %88, %cst_31 [1] : vector<8x8x1xf32> to vector<8x1xf32>
    %90 = vector.shape_cast %89 : vector<8x1xf32> to vector<8x1x1xf32>
    %91 = vector.broadcast %90 : vector<8x1x1xf32> to vector<8x8x1xf32>
    %92 = arith.cmpf oeq, %8, %91 : vector<8x8x1xf32>
    %93 = arith.extui %92 : vector<8x8x1xi1> to vector<8x8x1xi32>
    %94 = arith.sitofp %93 : vector<8x8x1xi32> to vector<8x8x1xf32>
    %95 = vector.broadcast %90 : vector<8x1x1xf32> to vector<8x8x1xf32>
    %96 = arith.cmpf olt, %8, %95 : vector<8x8x1xf32>
    %97 = arith.extui %96 : vector<8x8x1xi1> to vector<8x8x1xi32>
    %98 = arith.sitofp %97 : vector<8x8x1xi32> to vector<8x8x1xf32>
    %99 = vector.broadcast %90 : vector<8x1x1xf32> to vector<8x8x1xf32>
    %100 = arith.cmpf ogt, %8, %99 : vector<8x8x1xf32>
    %101 = arith.extui %100 : vector<8x8x1xi1> to vector<8x8x1xi32>
    %102 = arith.sitofp %101 : vector<8x8x1xi32> to vector<8x8x1xf32>
    %103 = vector.broadcast %94 : vector<8x8x1xf32> to vector<8x8x32xf32>
    %104 = arith.mulf %103, %68 : vector<8x8x32xf32>
    %105 = vector.broadcast %98 : vector<8x8x1xf32> to vector<8x8x32xf32>
    %106 = arith.mulf %105, %20 : vector<8x8x32xf32>
    %107 = arith.addf %104, %106 : vector<8x8x32xf32>
    %108 = vector.broadcast %102 : vector<8x8x1xf32> to vector<8x8x32xf32>
    %109 = arith.mulf %108, %23 : vector<8x8x32xf32>
    %110 = arith.addf %107, %109 : vector<8x8x32xf32>
    %111 = vector.broadcast %94 : vector<8x8x1xf32> to vector<8x8x32xf32>
    %112 = arith.mulf %111, %61 : vector<8x8x32xf32>
    %113 = vector.broadcast %98 : vector<8x8x1xf32> to vector<8x8x32xf32>
    %114 = arith.mulf %113, %21 : vector<8x8x32xf32>
    %115 = arith.addf %112, %114 : vector<8x8x32xf32>
    %116 = vector.broadcast %102 : vector<8x8x1xf32> to vector<8x8x32xf32>
    %117 = arith.mulf %116, %25 : vector<8x8x32xf32>
    %118 = arith.addf %115, %117 : vector<8x8x32xf32>
    %119 = vector.extract_strided_slice %1 {offsets = [0, 1, 0], sizes = [8, 1, 1], strides = [1, 1, 1]} : vector<8x8x1xf32> to vector<8x1x1xf32>
    %120 = vector.broadcast %119 : vector<8x1x1xf32> to vector<8x8x32xf32>
    %121 = arith.mulf %120, %110 : vector<8x8x32xf32>
    %cst_32 = arith.constant 1.000000e+00 : f32
    %122 = vector.broadcast %cst_32 : f32 to vector<8x1x1xf32>
    %123 = arith.subf %122, %119 : vector<8x1x1xf32>
    %124 = vector.broadcast %123 : vector<8x1x1xf32> to vector<8x8x32xf32>
    %125 = arith.mulf %124, %20 : vector<8x8x32xf32>
    %126 = arith.addf %121, %125 : vector<8x8x32xf32>
    %127 = vector.broadcast %119 : vector<8x1x1xf32> to vector<8x8x32xf32>
    %128 = arith.mulf %127, %118 : vector<8x8x32xf32>
    %cst_33 = arith.constant 1.000000e+00 : f32
    %129 = vector.broadcast %cst_33 : f32 to vector<8x1x1xf32>
    %130 = arith.subf %129, %119 : vector<8x1x1xf32>
    %131 = vector.broadcast %130 : vector<8x1x1xf32> to vector<8x8x32xf32>
    %132 = arith.mulf %131, %21 : vector<8x8x32xf32>
    %133 = arith.addf %128, %132 : vector<8x8x32xf32>
    %134 = vector.extract_strided_slice %126 {offsets = [0, 1, 0], sizes = [8, 7, 32], strides = [1, 1, 1]} : vector<8x8x32xf32> to vector<8x7x32xf32>
    %135 = tpu.concatenate %134, %13 in 1 : vector<8x7x32xf32>, vector<8x1x32xf32> -> vector<8x8x32xf32>
    %136 = vector.extract_strided_slice %133 {offsets = [0, 1, 0], sizes = [8, 7, 32], strides = [1, 1, 1]} : vector<8x8x32xf32> to vector<8x7x32xf32>
    %137 = tpu.concatenate %136, %13 in 1 : vector<8x7x32xf32>, vector<8x1x32xf32> -> vector<8x8x32xf32>
    %138 = tpu.concatenate %126, %135 in 2 : vector<8x8x32xf32>, vector<8x8x32xf32> -> vector<8x8x64xf32>
    %139 = vector.shape_cast %138 : vector<8x8x64xf32> to vector<64x64xf32>
    %cst_34 = arith.constant dense<0.000000e+00> : vector<64x160xf32>
    %140 = tpu.matmul %139, %4, %cst_34 {dimension_numbers = #tpu.dot_dimension_numbers<[1], [0], [0], [1], [0, 0, 1, 1], [], []>} : vector<64x64xf32>, vector<64x160xf32>, vector<64x160xf32> -> vector<64x160xf32>
    %141 = vector.broadcast %5 : vector<1x160xf32> to vector<64x160xf32>
    %142 = arith.addf %140, %141 : vector<64x160xf32>
    %143 = vector.shape_cast %142 : vector<64x160xf32> to vector<8x8x160xf32>
    %144 = vector.extract_strided_slice %143 {offsets = [0, 0, 0], sizes = [8, 8, 32], strides = [1, 1, 1]} : vector<8x8x160xf32> to vector<8x8x32xf32>
    %145 = vector.extract_strided_slice %143 {offsets = [0, 0, 32], sizes = [8, 8, 32], strides = [1, 1, 1]} : vector<8x8x160xf32> to vector<8x8x32xf32>
    %146 = vector.extract_strided_slice %143 {offsets = [0, 0, 64], sizes = [8, 8, 32], strides = [1, 1, 1]} : vector<8x8x160xf32> to vector<8x8x32xf32>
    %147 = vector.extract_strided_slice %143 {offsets = [0, 0, 96], sizes = [8, 8, 32], strides = [1, 1, 1]} : vector<8x8x160xf32> to vector<8x8x32xf32>
    %148 = vector.extract_strided_slice %143 {offsets = [0, 0, 128], sizes = [8, 8, 32], strides = [1, 1, 1]} : vector<8x8x160xf32> to vector<8x8x32xf32>
    %cst_35 = arith.constant 1.000000e+00 : f32
    %149 = vector.broadcast %cst_35 : f32 to vector<8x8x32xf32>
    %150 = arith.addf %145, %149 : vector<8x8x32xf32>
    %151 = arith.negf %150 : vector<8x8x32xf32>
    %152 = math.exp %151 : vector<8x8x32xf32>
    %cst_36 = arith.constant 1.000000e+00 : f32
    %153 = vector.broadcast %cst_36 : f32 to vector<8x8x32xf32>
    %154 = arith.addf %153, %152 : vector<8x8x32xf32>
    %155 = arith.divf %153, %154 : vector<8x8x32xf32>
    %156 = arith.mulf %133, %155 : vector<8x8x32xf32>
    %cst_37 = arith.constant 1.000000e+00 : f32
    %157 = vector.broadcast %cst_37 : f32 to vector<8x8x32xf32>
    %158 = arith.addf %146, %157 : vector<8x8x32xf32>
    %159 = arith.negf %158 : vector<8x8x32xf32>
    %160 = math.exp %159 : vector<8x8x32xf32>
    %cst_38 = arith.constant 1.000000e+00 : f32
    %161 = vector.broadcast %cst_38 : f32 to vector<8x8x32xf32>
    %162 = arith.addf %161, %160 : vector<8x8x32xf32>
    %163 = arith.divf %161, %162 : vector<8x8x32xf32>
    %164 = arith.mulf %137, %163 : vector<8x8x32xf32>
    %165 = arith.addf %156, %164 : vector<8x8x32xf32>
    %166 = math.tanh %147 : vector<8x8x32xf32>
    %167 = arith.negf %144 : vector<8x8x32xf32>
    %168 = math.exp %167 : vector<8x8x32xf32>
    %cst_39 = arith.constant 1.000000e+00 : f32
    %169 = vector.broadcast %cst_39 : f32 to vector<8x8x32xf32>
    %170 = arith.addf %169, %168 : vector<8x8x32xf32>
    %171 = arith.divf %169, %170 : vector<8x8x32xf32>
    %172 = arith.mulf %166, %171 : vector<8x8x32xf32>
    %173 = arith.addf %165, %172 : vector<8x8x32xf32>
    %174 = arith.negf %148 : vector<8x8x32xf32>
    %175 = math.exp %174 : vector<8x8x32xf32>
    %cst_40 = arith.constant 1.000000e+00 : f32
    %176 = vector.broadcast %cst_40 : f32 to vector<8x8x32xf32>
    %177 = arith.addf %176, %175 : vector<8x8x32xf32>
    %178 = arith.divf %176, %177 : vector<8x8x32xf32>
    %179 = math.tanh %173 : vector<8x8x32xf32>
    %180 = arith.mulf %178, %179 : vector<8x8x32xf32>
    %181 = arith.mulf %180, %12 : vector<8x8x32xf32>
    %cst_41 = arith.constant dense<0.000000e+00> : vector<8x8xf32>
    %182 = vector.multi_reduction <add>, %181, %cst_41 [2] : vector<8x8x32xf32> to vector<8x8xf32>
    %183 = vector.shape_cast %182 : vector<8x8xf32> to vector<8x8x1xf32>
    %184 = vector.shape_cast %6 : vector<1x1xf32> to vector<1x1x1xf32>
    %185 = vector.broadcast %184 : vector<1x1x1xf32> to vector<8x8x1xf32>
    %186 = arith.addf %183, %185 : vector<8x8x1xf32>
    %187 = vector.extract_strided_slice %1 {offsets = [0, 2, 0], sizes = [8, 6, 1], strides = [1, 1, 1]} : vector<8x8x1xf32> to vector<8x6x1xf32>
    %188 = vector.extract_strided_slice %14 {offsets = [0, 0, 0], sizes = [8, 2, 1], strides = [1, 1, 1]} : vector<8x8x1xf32> to vector<8x2x1xf32>
    %189 = tpu.concatenate %187, %188 in 1 : vector<8x6x1xf32>, vector<8x2x1xf32> -> vector<8x8x1xf32>
    %cst_42 = arith.constant 0.000000e+00 : f32
    %190 = vector.broadcast %cst_42 : f32 to vector<8x8x1xf32>
    %191 = arith.cmpf ogt, %189, %190 : vector<8x8x1xf32>
    %cst_43 = arith.constant -1.000000e+30 : f32
    %192 = vector.broadcast %cst_43 : f32 to vector<8x8x1xf32>
    %193 = arith.select %191, %186, %192 : vector<8x8x1xi1>, vector<8x8x1xf32>
    %cst_44 = arith.constant dense<0xFF800000> : vector<8x1xf32>
    %194 = vector.multi_reduction <maximumf>, %193, %cst_44 [1] : vector<8x8x1xf32> to vector<8x1xf32>
    %195 = vector.shape_cast %194 : vector<8x1xf32> to vector<8x1x1xf32>
    %196 = vector.broadcast %195 : vector<8x1x1xf32> to vector<8x8x1xf32>
    %197 = arith.cmpf oge, %193, %196 : vector<8x8x1xf32>
    %198 = arith.andi %197, %191 : vector<8x8x1xi1>
    %cst_45 = arith.constant 8.000000e+00 : f32
    %199 = vector.broadcast %cst_45 : f32 to vector<8x8x1xf32>
    %200 = arith.select %198, %8, %199 : vector<8x8x1xi1>, vector<8x8x1xf32>
    %cst_46 = arith.constant dense<0x7F800000> : vector<8x1xf32>
    %201 = vector.multi_reduction <minimumf>, %200, %cst_46 [1] : vector<8x8x1xf32> to vector<8x1xf32>
    %202 = vector.shape_cast %201 : vector<8x1xf32> to vector<8x1x1xf32>
    %203 = vector.broadcast %202 : vector<8x1x1xf32> to vector<8x8x1xf32>
    %204 = arith.cmpf oeq, %8, %203 : vector<8x8x1xf32>
    %205 = arith.extui %204 : vector<8x8x1xi1> to vector<8x8x1xi32>
    %206 = arith.sitofp %205 : vector<8x8x1xi32> to vector<8x8x1xf32>
    %207 = vector.broadcast %202 : vector<8x1x1xf32> to vector<8x8x1xf32>
    %208 = arith.cmpf olt, %8, %207 : vector<8x8x1xf32>
    %209 = arith.extui %208 : vector<8x8x1xi1> to vector<8x8x1xi32>
    %210 = arith.sitofp %209 : vector<8x8x1xi32> to vector<8x8x1xf32>
    %211 = vector.broadcast %202 : vector<8x1x1xf32> to vector<8x8x1xf32>
    %212 = arith.cmpf ogt, %8, %211 : vector<8x8x1xf32>
    %213 = arith.extui %212 : vector<8x8x1xi1> to vector<8x8x1xi32>
    %214 = arith.sitofp %213 : vector<8x8x1xi32> to vector<8x8x1xf32>
    %215 = vector.broadcast %206 : vector<8x8x1xf32> to vector<8x8x32xf32>
    %216 = arith.mulf %215, %180 : vector<8x8x32xf32>
    %217 = vector.broadcast %210 : vector<8x8x1xf32> to vector<8x8x32xf32>
    %218 = arith.mulf %217, %126 : vector<8x8x32xf32>
    %219 = arith.addf %216, %218 : vector<8x8x32xf32>
    %220 = vector.broadcast %214 : vector<8x8x1xf32> to vector<8x8x32xf32>
    %221 = arith.mulf %220, %135 : vector<8x8x32xf32>
    %222 = arith.addf %219, %221 : vector<8x8x32xf32>
    %223 = vector.broadcast %206 : vector<8x8x1xf32> to vector<8x8x32xf32>
    %224 = arith.mulf %223, %173 : vector<8x8x32xf32>
    %225 = vector.broadcast %210 : vector<8x8x1xf32> to vector<8x8x32xf32>
    %226 = arith.mulf %225, %133 : vector<8x8x32xf32>
    %227 = arith.addf %224, %226 : vector<8x8x32xf32>
    %228 = vector.broadcast %214 : vector<8x8x1xf32> to vector<8x8x32xf32>
    %229 = arith.mulf %228, %137 : vector<8x8x32xf32>
    %230 = arith.addf %227, %229 : vector<8x8x32xf32>
    %231 = vector.extract_strided_slice %1 {offsets = [0, 2, 0], sizes = [8, 1, 1], strides = [1, 1, 1]} : vector<8x8x1xf32> to vector<8x1x1xf32>
    %232 = vector.broadcast %231 : vector<8x1x1xf32> to vector<8x8x32xf32>
    %233 = arith.mulf %232, %222 : vector<8x8x32xf32>
    %cst_47 = arith.constant 1.000000e+00 : f32
    %234 = vector.broadcast %cst_47 : f32 to vector<8x1x1xf32>
    %235 = arith.subf %234, %231 : vector<8x1x1xf32>
    %236 = vector.broadcast %235 : vector<8x1x1xf32> to vector<8x8x32xf32>
    %237 = arith.mulf %236, %126 : vector<8x8x32xf32>
    %238 = arith.addf %233, %237 : vector<8x8x32xf32>
    %239 = vector.broadcast %231 : vector<8x1x1xf32> to vector<8x8x32xf32>
    %240 = arith.mulf %239, %230 : vector<8x8x32xf32>
    %cst_48 = arith.constant 1.000000e+00 : f32
    %241 = vector.broadcast %cst_48 : f32 to vector<8x1x1xf32>
    %242 = arith.subf %241, %231 : vector<8x1x1xf32>
    %243 = vector.broadcast %242 : vector<8x1x1xf32> to vector<8x8x32xf32>
    %244 = arith.mulf %243, %133 : vector<8x8x32xf32>
    %245 = arith.addf %240, %244 : vector<8x8x32xf32>
    %246 = vector.extract_strided_slice %238 {offsets = [0, 1, 0], sizes = [8, 7, 32], strides = [1, 1, 1]} : vector<8x8x32xf32> to vector<8x7x32xf32>
    %247 = tpu.concatenate %246, %13 in 1 : vector<8x7x32xf32>, vector<8x1x32xf32> -> vector<8x8x32xf32>
    %248 = vector.extract_strided_slice %245 {offsets = [0, 1, 0], sizes = [8, 7, 32], strides = [1, 1, 1]} : vector<8x8x32xf32> to vector<8x7x32xf32>
    %249 = tpu.concatenate %248, %13 in 1 : vector<8x7x32xf32>, vector<8x1x32xf32> -> vector<8x8x32xf32>
    %250 = tpu.concatenate %238, %247 in 2 : vector<8x8x32xf32>, vector<8x8x32xf32> -> vector<8x8x64xf32>
    %251 = vector.shape_cast %250 : vector<8x8x64xf32> to vector<64x64xf32>
    %cst_49 = arith.constant dense<0.000000e+00> : vector<64x160xf32>
    %252 = tpu.matmul %251, %4, %cst_49 {dimension_numbers = #tpu.dot_dimension_numbers<[1], [0], [0], [1], [0, 0, 1, 1], [], []>} : vector<64x64xf32>, vector<64x160xf32>, vector<64x160xf32> -> vector<64x160xf32>
    %253 = vector.broadcast %5 : vector<1x160xf32> to vector<64x160xf32>
    %254 = arith.addf %252, %253 : vector<64x160xf32>
    %255 = vector.shape_cast %254 : vector<64x160xf32> to vector<8x8x160xf32>
    %256 = vector.extract_strided_slice %255 {offsets = [0, 0, 0], sizes = [8, 8, 32], strides = [1, 1, 1]} : vector<8x8x160xf32> to vector<8x8x32xf32>
    %257 = vector.extract_strided_slice %255 {offsets = [0, 0, 32], sizes = [8, 8, 32], strides = [1, 1, 1]} : vector<8x8x160xf32> to vector<8x8x32xf32>
    %258 = vector.extract_strided_slice %255 {offsets = [0, 0, 64], sizes = [8, 8, 32], strides = [1, 1, 1]} : vector<8x8x160xf32> to vector<8x8x32xf32>
    %259 = vector.extract_strided_slice %255 {offsets = [0, 0, 96], sizes = [8, 8, 32], strides = [1, 1, 1]} : vector<8x8x160xf32> to vector<8x8x32xf32>
    %260 = vector.extract_strided_slice %255 {offsets = [0, 0, 128], sizes = [8, 8, 32], strides = [1, 1, 1]} : vector<8x8x160xf32> to vector<8x8x32xf32>
    %cst_50 = arith.constant 1.000000e+00 : f32
    %261 = vector.broadcast %cst_50 : f32 to vector<8x8x32xf32>
    %262 = arith.addf %257, %261 : vector<8x8x32xf32>
    %263 = arith.negf %262 : vector<8x8x32xf32>
    %264 = math.exp %263 : vector<8x8x32xf32>
    %cst_51 = arith.constant 1.000000e+00 : f32
    %265 = vector.broadcast %cst_51 : f32 to vector<8x8x32xf32>
    %266 = arith.addf %265, %264 : vector<8x8x32xf32>
    %267 = arith.divf %265, %266 : vector<8x8x32xf32>
    %268 = arith.mulf %245, %267 : vector<8x8x32xf32>
    %cst_52 = arith.constant 1.000000e+00 : f32
    %269 = vector.broadcast %cst_52 : f32 to vector<8x8x32xf32>
    %270 = arith.addf %258, %269 : vector<8x8x32xf32>
    %271 = arith.negf %270 : vector<8x8x32xf32>
    %272 = math.exp %271 : vector<8x8x32xf32>
    %cst_53 = arith.constant 1.000000e+00 : f32
    %273 = vector.broadcast %cst_53 : f32 to vector<8x8x32xf32>
    %274 = arith.addf %273, %272 : vector<8x8x32xf32>
    %275 = arith.divf %273, %274 : vector<8x8x32xf32>
    %276 = arith.mulf %249, %275 : vector<8x8x32xf32>
    %277 = arith.addf %268, %276 : vector<8x8x32xf32>
    %278 = math.tanh %259 : vector<8x8x32xf32>
    %279 = arith.negf %256 : vector<8x8x32xf32>
    %280 = math.exp %279 : vector<8x8x32xf32>
    %cst_54 = arith.constant 1.000000e+00 : f32
    %281 = vector.broadcast %cst_54 : f32 to vector<8x8x32xf32>
    %282 = arith.addf %281, %280 : vector<8x8x32xf32>
    %283 = arith.divf %281, %282 : vector<8x8x32xf32>
    %284 = arith.mulf %278, %283 : vector<8x8x32xf32>
    %285 = arith.addf %277, %284 : vector<8x8x32xf32>
    %286 = arith.negf %260 : vector<8x8x32xf32>
    %287 = math.exp %286 : vector<8x8x32xf32>
    %cst_55 = arith.constant 1.000000e+00 : f32
    %288 = vector.broadcast %cst_55 : f32 to vector<8x8x32xf32>
    %289 = arith.addf %288, %287 : vector<8x8x32xf32>
    %290 = arith.divf %288, %289 : vector<8x8x32xf32>
    %291 = math.tanh %285 : vector<8x8x32xf32>
    %292 = arith.mulf %290, %291 : vector<8x8x32xf32>
    %293 = arith.mulf %292, %12 : vector<8x8x32xf32>
    %cst_56 = arith.constant dense<0.000000e+00> : vector<8x8xf32>
    %294 = vector.multi_reduction <add>, %293, %cst_56 [2] : vector<8x8x32xf32> to vector<8x8xf32>
    %295 = vector.shape_cast %294 : vector<8x8xf32> to vector<8x8x1xf32>
    %296 = vector.shape_cast %6 : vector<1x1xf32> to vector<1x1x1xf32>
    %297 = vector.broadcast %296 : vector<1x1x1xf32> to vector<8x8x1xf32>
    %298 = arith.addf %295, %297 : vector<8x8x1xf32>
    %299 = vector.extract_strided_slice %1 {offsets = [0, 3, 0], sizes = [8, 5, 1], strides = [1, 1, 1]} : vector<8x8x1xf32> to vector<8x5x1xf32>
    %300 = vector.extract_strided_slice %14 {offsets = [0, 0, 0], sizes = [8, 3, 1], strides = [1, 1, 1]} : vector<8x8x1xf32> to vector<8x3x1xf32>
    %301 = tpu.concatenate %299, %300 in 1 : vector<8x5x1xf32>, vector<8x3x1xf32> -> vector<8x8x1xf32>
    %cst_57 = arith.constant 0.000000e+00 : f32
    %302 = vector.broadcast %cst_57 : f32 to vector<8x8x1xf32>
    %303 = arith.cmpf ogt, %301, %302 : vector<8x8x1xf32>
    %cst_58 = arith.constant -1.000000e+30 : f32
    %304 = vector.broadcast %cst_58 : f32 to vector<8x8x1xf32>
    %305 = arith.select %303, %298, %304 : vector<8x8x1xi1>, vector<8x8x1xf32>
    %cst_59 = arith.constant dense<0xFF800000> : vector<8x1xf32>
    %306 = vector.multi_reduction <maximumf>, %305, %cst_59 [1] : vector<8x8x1xf32> to vector<8x1xf32>
    %307 = vector.shape_cast %306 : vector<8x1xf32> to vector<8x1x1xf32>
    %308 = vector.broadcast %307 : vector<8x1x1xf32> to vector<8x8x1xf32>
    %309 = arith.cmpf oge, %305, %308 : vector<8x8x1xf32>
    %310 = arith.andi %309, %303 : vector<8x8x1xi1>
    %cst_60 = arith.constant 8.000000e+00 : f32
    %311 = vector.broadcast %cst_60 : f32 to vector<8x8x1xf32>
    %312 = arith.select %310, %8, %311 : vector<8x8x1xi1>, vector<8x8x1xf32>
    %cst_61 = arith.constant dense<0x7F800000> : vector<8x1xf32>
    %313 = vector.multi_reduction <minimumf>, %312, %cst_61 [1] : vector<8x8x1xf32> to vector<8x1xf32>
    %314 = vector.shape_cast %313 : vector<8x1xf32> to vector<8x1x1xf32>
    %315 = vector.broadcast %314 : vector<8x1x1xf32> to vector<8x8x1xf32>
    %316 = arith.cmpf oeq, %8, %315 : vector<8x8x1xf32>
    %317 = arith.extui %316 : vector<8x8x1xi1> to vector<8x8x1xi32>
    %318 = arith.sitofp %317 : vector<8x8x1xi32> to vector<8x8x1xf32>
    %319 = vector.broadcast %314 : vector<8x1x1xf32> to vector<8x8x1xf32>
    %320 = arith.cmpf olt, %8, %319 : vector<8x8x1xf32>
    %321 = arith.extui %320 : vector<8x8x1xi1> to vector<8x8x1xi32>
    %322 = arith.sitofp %321 : vector<8x8x1xi32> to vector<8x8x1xf32>
    %323 = vector.broadcast %314 : vector<8x1x1xf32> to vector<8x8x1xf32>
    %324 = arith.cmpf ogt, %8, %323 : vector<8x8x1xf32>
    %325 = arith.extui %324 : vector<8x8x1xi1> to vector<8x8x1xi32>
    %326 = arith.sitofp %325 : vector<8x8x1xi32> to vector<8x8x1xf32>
    %327 = vector.broadcast %318 : vector<8x8x1xf32> to vector<8x8x32xf32>
    %328 = arith.mulf %327, %292 : vector<8x8x32xf32>
    %329 = vector.broadcast %322 : vector<8x8x1xf32> to vector<8x8x32xf32>
    %330 = arith.mulf %329, %238 : vector<8x8x32xf32>
    %331 = arith.addf %328, %330 : vector<8x8x32xf32>
    %332 = vector.broadcast %326 : vector<8x8x1xf32> to vector<8x8x32xf32>
    %333 = arith.mulf %332, %247 : vector<8x8x32xf32>
    %334 = arith.addf %331, %333 : vector<8x8x32xf32>
    %335 = vector.broadcast %318 : vector<8x8x1xf32> to vector<8x8x32xf32>
    %336 = arith.mulf %335, %285 : vector<8x8x32xf32>
    %337 = vector.broadcast %322 : vector<8x8x1xf32> to vector<8x8x32xf32>
    %338 = arith.mulf %337, %245 : vector<8x8x32xf32>
    %339 = arith.addf %336, %338 : vector<8x8x32xf32>
    %340 = vector.broadcast %326 : vector<8x8x1xf32> to vector<8x8x32xf32>
    %341 = arith.mulf %340, %249 : vector<8x8x32xf32>
    %342 = arith.addf %339, %341 : vector<8x8x32xf32>
    %343 = vector.extract_strided_slice %1 {offsets = [0, 3, 0], sizes = [8, 1, 1], strides = [1, 1, 1]} : vector<8x8x1xf32> to vector<8x1x1xf32>
    %344 = vector.broadcast %343 : vector<8x1x1xf32> to vector<8x8x32xf32>
    %345 = arith.mulf %344, %334 : vector<8x8x32xf32>
    %cst_62 = arith.constant 1.000000e+00 : f32
    %346 = vector.broadcast %cst_62 : f32 to vector<8x1x1xf32>
    %347 = arith.subf %346, %343 : vector<8x1x1xf32>
    %348 = vector.broadcast %347 : vector<8x1x1xf32> to vector<8x8x32xf32>
    %349 = arith.mulf %348, %238 : vector<8x8x32xf32>
    %350 = arith.addf %345, %349 : vector<8x8x32xf32>
    %351 = vector.broadcast %343 : vector<8x1x1xf32> to vector<8x8x32xf32>
    %352 = arith.mulf %351, %342 : vector<8x8x32xf32>
    %cst_63 = arith.constant 1.000000e+00 : f32
    %353 = vector.broadcast %cst_63 : f32 to vector<8x1x1xf32>
    %354 = arith.subf %353, %343 : vector<8x1x1xf32>
    %355 = vector.broadcast %354 : vector<8x1x1xf32> to vector<8x8x32xf32>
    %356 = arith.mulf %355, %245 : vector<8x8x32xf32>
    %357 = arith.addf %352, %356 : vector<8x8x32xf32>
    %358 = vector.extract_strided_slice %350 {offsets = [0, 1, 0], sizes = [8, 7, 32], strides = [1, 1, 1]} : vector<8x8x32xf32> to vector<8x7x32xf32>
    %359 = tpu.concatenate %358, %13 in 1 : vector<8x7x32xf32>, vector<8x1x32xf32> -> vector<8x8x32xf32>
    %360 = vector.extract_strided_slice %357 {offsets = [0, 1, 0], sizes = [8, 7, 32], strides = [1, 1, 1]} : vector<8x8x32xf32> to vector<8x7x32xf32>
    %361 = tpu.concatenate %360, %13 in 1 : vector<8x7x32xf32>, vector<8x1x32xf32> -> vector<8x8x32xf32>
    %362 = tpu.concatenate %350, %359 in 2 : vector<8x8x32xf32>, vector<8x8x32xf32> -> vector<8x8x64xf32>
    %363 = vector.shape_cast %362 : vector<8x8x64xf32> to vector<64x64xf32>
    %cst_64 = arith.constant dense<0.000000e+00> : vector<64x160xf32>
    %364 = tpu.matmul %363, %4, %cst_64 {dimension_numbers = #tpu.dot_dimension_numbers<[1], [0], [0], [1], [0, 0, 1, 1], [], []>} : vector<64x64xf32>, vector<64x160xf32>, vector<64x160xf32> -> vector<64x160xf32>
    %365 = vector.broadcast %5 : vector<1x160xf32> to vector<64x160xf32>
    %366 = arith.addf %364, %365 : vector<64x160xf32>
    %367 = vector.shape_cast %366 : vector<64x160xf32> to vector<8x8x160xf32>
    %368 = vector.extract_strided_slice %367 {offsets = [0, 0, 0], sizes = [8, 8, 32], strides = [1, 1, 1]} : vector<8x8x160xf32> to vector<8x8x32xf32>
    %369 = vector.extract_strided_slice %367 {offsets = [0, 0, 32], sizes = [8, 8, 32], strides = [1, 1, 1]} : vector<8x8x160xf32> to vector<8x8x32xf32>
    %370 = vector.extract_strided_slice %367 {offsets = [0, 0, 64], sizes = [8, 8, 32], strides = [1, 1, 1]} : vector<8x8x160xf32> to vector<8x8x32xf32>
    %371 = vector.extract_strided_slice %367 {offsets = [0, 0, 96], sizes = [8, 8, 32], strides = [1, 1, 1]} : vector<8x8x160xf32> to vector<8x8x32xf32>
    %372 = vector.extract_strided_slice %367 {offsets = [0, 0, 128], sizes = [8, 8, 32], strides = [1, 1, 1]} : vector<8x8x160xf32> to vector<8x8x32xf32>
    %cst_65 = arith.constant 1.000000e+00 : f32
    %373 = vector.broadcast %cst_65 : f32 to vector<8x8x32xf32>
    %374 = arith.addf %369, %373 : vector<8x8x32xf32>
    %375 = arith.negf %374 : vector<8x8x32xf32>
    %376 = math.exp %375 : vector<8x8x32xf32>
    %cst_66 = arith.constant 1.000000e+00 : f32
    %377 = vector.broadcast %cst_66 : f32 to vector<8x8x32xf32>
    %378 = arith.addf %377, %376 : vector<8x8x32xf32>
    %379 = arith.divf %377, %378 : vector<8x8x32xf32>
    %380 = arith.mulf %357, %379 : vector<8x8x32xf32>
    %cst_67 = arith.constant 1.000000e+00 : f32
    %381 = vector.broadcast %cst_67 : f32 to vector<8x8x32xf32>
    %382 = arith.addf %370, %381 : vector<8x8x32xf32>
    %383 = arith.negf %382 : vector<8x8x32xf32>
    %384 = math.exp %383 : vector<8x8x32xf32>
    %cst_68 = arith.constant 1.000000e+00 : f32
    %385 = vector.broadcast %cst_68 : f32 to vector<8x8x32xf32>
    %386 = arith.addf %385, %384 : vector<8x8x32xf32>
    %387 = arith.divf %385, %386 : vector<8x8x32xf32>
    %388 = arith.mulf %361, %387 : vector<8x8x32xf32>
    %389 = arith.addf %380, %388 : vector<8x8x32xf32>
    %390 = math.tanh %371 : vector<8x8x32xf32>
    %391 = arith.negf %368 : vector<8x8x32xf32>
    %392 = math.exp %391 : vector<8x8x32xf32>
    %cst_69 = arith.constant 1.000000e+00 : f32
    %393 = vector.broadcast %cst_69 : f32 to vector<8x8x32xf32>
    %394 = arith.addf %393, %392 : vector<8x8x32xf32>
    %395 = arith.divf %393, %394 : vector<8x8x32xf32>
    %396 = arith.mulf %390, %395 : vector<8x8x32xf32>
    %397 = arith.addf %389, %396 : vector<8x8x32xf32>
    %398 = arith.negf %372 : vector<8x8x32xf32>
    %399 = math.exp %398 : vector<8x8x32xf32>
    %cst_70 = arith.constant 1.000000e+00 : f32
    %400 = vector.broadcast %cst_70 : f32 to vector<8x8x32xf32>
    %401 = arith.addf %400, %399 : vector<8x8x32xf32>
    %402 = arith.divf %400, %401 : vector<8x8x32xf32>
    %403 = math.tanh %397 : vector<8x8x32xf32>
    %404 = arith.mulf %402, %403 : vector<8x8x32xf32>
    %405 = arith.mulf %404, %12 : vector<8x8x32xf32>
    %cst_71 = arith.constant dense<0.000000e+00> : vector<8x8xf32>
    %406 = vector.multi_reduction <add>, %405, %cst_71 [2] : vector<8x8x32xf32> to vector<8x8xf32>
    %407 = vector.shape_cast %406 : vector<8x8xf32> to vector<8x8x1xf32>
    %408 = vector.shape_cast %6 : vector<1x1xf32> to vector<1x1x1xf32>
    %409 = vector.broadcast %408 : vector<1x1x1xf32> to vector<8x8x1xf32>
    %410 = arith.addf %407, %409 : vector<8x8x1xf32>
    %411 = vector.extract_strided_slice %1 {offsets = [0, 4, 0], sizes = [8, 4, 1], strides = [1, 1, 1]} : vector<8x8x1xf32> to vector<8x4x1xf32>
    %412 = vector.extract_strided_slice %14 {offsets = [0, 0, 0], sizes = [8, 4, 1], strides = [1, 1, 1]} : vector<8x8x1xf32> to vector<8x4x1xf32>
    %413 = tpu.concatenate %411, %412 in 1 : vector<8x4x1xf32>, vector<8x4x1xf32> -> vector<8x8x1xf32>
    %cst_72 = arith.constant 0.000000e+00 : f32
    %414 = vector.broadcast %cst_72 : f32 to vector<8x8x1xf32>
    %415 = arith.cmpf ogt, %413, %414 : vector<8x8x1xf32>
    %cst_73 = arith.constant -1.000000e+30 : f32
    %416 = vector.broadcast %cst_73 : f32 to vector<8x8x1xf32>
    %417 = arith.select %415, %410, %416 : vector<8x8x1xi1>, vector<8x8x1xf32>
    %cst_74 = arith.constant dense<0xFF800000> : vector<8x1xf32>
    %418 = vector.multi_reduction <maximumf>, %417, %cst_74 [1] : vector<8x8x1xf32> to vector<8x1xf32>
    %419 = vector.shape_cast %418 : vector<8x1xf32> to vector<8x1x1xf32>
    %420 = vector.broadcast %419 : vector<8x1x1xf32> to vector<8x8x1xf32>
    %421 = arith.cmpf oge, %417, %420 : vector<8x8x1xf32>
    %422 = arith.andi %421, %415 : vector<8x8x1xi1>
    %cst_75 = arith.constant 8.000000e+00 : f32
    %423 = vector.broadcast %cst_75 : f32 to vector<8x8x1xf32>
    %424 = arith.select %422, %8, %423 : vector<8x8x1xi1>, vector<8x8x1xf32>
    %cst_76 = arith.constant dense<0x7F800000> : vector<8x1xf32>
    %425 = vector.multi_reduction <minimumf>, %424, %cst_76 [1] : vector<8x8x1xf32> to vector<8x1xf32>
    %426 = vector.shape_cast %425 : vector<8x1xf32> to vector<8x1x1xf32>
    %427 = vector.broadcast %426 : vector<8x1x1xf32> to vector<8x8x1xf32>
    %428 = arith.cmpf oeq, %8, %427 : vector<8x8x1xf32>
    %429 = arith.extui %428 : vector<8x8x1xi1> to vector<8x8x1xi32>
    %430 = arith.sitofp %429 : vector<8x8x1xi32> to vector<8x8x1xf32>
    %431 = vector.broadcast %426 : vector<8x1x1xf32> to vector<8x8x1xf32>
    %432 = arith.cmpf olt, %8, %431 : vector<8x8x1xf32>
    %433 = arith.extui %432 : vector<8x8x1xi1> to vector<8x8x1xi32>
    %434 = arith.sitofp %433 : vector<8x8x1xi32> to vector<8x8x1xf32>
    %435 = vector.broadcast %426 : vector<8x1x1xf32> to vector<8x8x1xf32>
    %436 = arith.cmpf ogt, %8, %435 : vector<8x8x1xf32>
    %437 = arith.extui %436 : vector<8x8x1xi1> to vector<8x8x1xi32>
    %438 = arith.sitofp %437 : vector<8x8x1xi32> to vector<8x8x1xf32>
    %439 = vector.broadcast %430 : vector<8x8x1xf32> to vector<8x8x32xf32>
    %440 = arith.mulf %439, %404 : vector<8x8x32xf32>
    %441 = vector.broadcast %434 : vector<8x8x1xf32> to vector<8x8x32xf32>
    %442 = arith.mulf %441, %350 : vector<8x8x32xf32>
    %443 = arith.addf %440, %442 : vector<8x8x32xf32>
    %444 = vector.broadcast %438 : vector<8x8x1xf32> to vector<8x8x32xf32>
    %445 = arith.mulf %444, %359 : vector<8x8x32xf32>
    %446 = arith.addf %443, %445 : vector<8x8x32xf32>
    %447 = vector.broadcast %430 : vector<8x8x1xf32> to vector<8x8x32xf32>
    %448 = arith.mulf %447, %397 : vector<8x8x32xf32>
    %449 = vector.broadcast %434 : vector<8x8x1xf32> to vector<8x8x32xf32>
    %450 = arith.mulf %449, %357 : vector<8x8x32xf32>
    %451 = arith.addf %448, %450 : vector<8x8x32xf32>
    %452 = vector.broadcast %438 : vector<8x8x1xf32> to vector<8x8x32xf32>
    %453 = arith.mulf %452, %361 : vector<8x8x32xf32>
    %454 = arith.addf %451, %453 : vector<8x8x32xf32>
    %455 = vector.extract_strided_slice %1 {offsets = [0, 4, 0], sizes = [8, 1, 1], strides = [1, 1, 1]} : vector<8x8x1xf32> to vector<8x1x1xf32>
    %456 = vector.broadcast %455 : vector<8x1x1xf32> to vector<8x8x32xf32>
    %457 = arith.mulf %456, %446 : vector<8x8x32xf32>
    %cst_77 = arith.constant 1.000000e+00 : f32
    %458 = vector.broadcast %cst_77 : f32 to vector<8x1x1xf32>
    %459 = arith.subf %458, %455 : vector<8x1x1xf32>
    %460 = vector.broadcast %459 : vector<8x1x1xf32> to vector<8x8x32xf32>
    %461 = arith.mulf %460, %350 : vector<8x8x32xf32>
    %462 = arith.addf %457, %461 : vector<8x8x32xf32>
    %463 = vector.broadcast %455 : vector<8x1x1xf32> to vector<8x8x32xf32>
    %464 = arith.mulf %463, %454 : vector<8x8x32xf32>
    %cst_78 = arith.constant 1.000000e+00 : f32
    %465 = vector.broadcast %cst_78 : f32 to vector<8x1x1xf32>
    %466 = arith.subf %465, %455 : vector<8x1x1xf32>
    %467 = vector.broadcast %466 : vector<8x1x1xf32> to vector<8x8x32xf32>
    %468 = arith.mulf %467, %357 : vector<8x8x32xf32>
    %469 = arith.addf %464, %468 : vector<8x8x32xf32>
    %470 = vector.extract_strided_slice %462 {offsets = [0, 1, 0], sizes = [8, 7, 32], strides = [1, 1, 1]} : vector<8x8x32xf32> to vector<8x7x32xf32>
    %471 = tpu.concatenate %470, %13 in 1 : vector<8x7x32xf32>, vector<8x1x32xf32> -> vector<8x8x32xf32>
    %472 = vector.extract_strided_slice %469 {offsets = [0, 1, 0], sizes = [8, 7, 32], strides = [1, 1, 1]} : vector<8x8x32xf32> to vector<8x7x32xf32>
    %473 = tpu.concatenate %472, %13 in 1 : vector<8x7x32xf32>, vector<8x1x32xf32> -> vector<8x8x32xf32>
    %474 = tpu.concatenate %462, %471 in 2 : vector<8x8x32xf32>, vector<8x8x32xf32> -> vector<8x8x64xf32>
    %475 = vector.shape_cast %474 : vector<8x8x64xf32> to vector<64x64xf32>
    %cst_79 = arith.constant dense<0.000000e+00> : vector<64x160xf32>
    %476 = tpu.matmul %475, %4, %cst_79 {dimension_numbers = #tpu.dot_dimension_numbers<[1], [0], [0], [1], [0, 0, 1, 1], [], []>} : vector<64x64xf32>, vector<64x160xf32>, vector<64x160xf32> -> vector<64x160xf32>
    %477 = vector.broadcast %5 : vector<1x160xf32> to vector<64x160xf32>
    %478 = arith.addf %476, %477 : vector<64x160xf32>
    %479 = vector.shape_cast %478 : vector<64x160xf32> to vector<8x8x160xf32>
    %480 = vector.extract_strided_slice %479 {offsets = [0, 0, 0], sizes = [8, 8, 32], strides = [1, 1, 1]} : vector<8x8x160xf32> to vector<8x8x32xf32>
    %481 = vector.extract_strided_slice %479 {offsets = [0, 0, 32], sizes = [8, 8, 32], strides = [1, 1, 1]} : vector<8x8x160xf32> to vector<8x8x32xf32>
    %482 = vector.extract_strided_slice %479 {offsets = [0, 0, 64], sizes = [8, 8, 32], strides = [1, 1, 1]} : vector<8x8x160xf32> to vector<8x8x32xf32>
    %483 = vector.extract_strided_slice %479 {offsets = [0, 0, 96], sizes = [8, 8, 32], strides = [1, 1, 1]} : vector<8x8x160xf32> to vector<8x8x32xf32>
    %484 = vector.extract_strided_slice %479 {offsets = [0, 0, 128], sizes = [8, 8, 32], strides = [1, 1, 1]} : vector<8x8x160xf32> to vector<8x8x32xf32>
    %cst_80 = arith.constant 1.000000e+00 : f32
    %485 = vector.broadcast %cst_80 : f32 to vector<8x8x32xf32>
    %486 = arith.addf %481, %485 : vector<8x8x32xf32>
    %487 = arith.negf %486 : vector<8x8x32xf32>
    %488 = math.exp %487 : vector<8x8x32xf32>
    %cst_81 = arith.constant 1.000000e+00 : f32
    %489 = vector.broadcast %cst_81 : f32 to vector<8x8x32xf32>
    %490 = arith.addf %489, %488 : vector<8x8x32xf32>
    %491 = arith.divf %489, %490 : vector<8x8x32xf32>
    %492 = arith.mulf %469, %491 : vector<8x8x32xf32>
    %cst_82 = arith.constant 1.000000e+00 : f32
    %493 = vector.broadcast %cst_82 : f32 to vector<8x8x32xf32>
    %494 = arith.addf %482, %493 : vector<8x8x32xf32>
    %495 = arith.negf %494 : vector<8x8x32xf32>
    %496 = math.exp %495 : vector<8x8x32xf32>
    %cst_83 = arith.constant 1.000000e+00 : f32
    %497 = vector.broadcast %cst_83 : f32 to vector<8x8x32xf32>
    %498 = arith.addf %497, %496 : vector<8x8x32xf32>
    %499 = arith.divf %497, %498 : vector<8x8x32xf32>
    %500 = arith.mulf %473, %499 : vector<8x8x32xf32>
    %501 = arith.addf %492, %500 : vector<8x8x32xf32>
    %502 = math.tanh %483 : vector<8x8x32xf32>
    %503 = arith.negf %480 : vector<8x8x32xf32>
    %504 = math.exp %503 : vector<8x8x32xf32>
    %cst_84 = arith.constant 1.000000e+00 : f32
    %505 = vector.broadcast %cst_84 : f32 to vector<8x8x32xf32>
    %506 = arith.addf %505, %504 : vector<8x8x32xf32>
    %507 = arith.divf %505, %506 : vector<8x8x32xf32>
    %508 = arith.mulf %502, %507 : vector<8x8x32xf32>
    %509 = arith.addf %501, %508 : vector<8x8x32xf32>
    %510 = arith.negf %484 : vector<8x8x32xf32>
    %511 = math.exp %510 : vector<8x8x32xf32>
    %cst_85 = arith.constant 1.000000e+00 : f32
    %512 = vector.broadcast %cst_85 : f32 to vector<8x8x32xf32>
    %513 = arith.addf %512, %511 : vector<8x8x32xf32>
    %514 = arith.divf %512, %513 : vector<8x8x32xf32>
    %515 = math.tanh %509 : vector<8x8x32xf32>
    %516 = arith.mulf %514, %515 : vector<8x8x32xf32>
    %517 = arith.mulf %516, %12 : vector<8x8x32xf32>
    %cst_86 = arith.constant dense<0.000000e+00> : vector<8x8xf32>
    %518 = vector.multi_reduction <add>, %517, %cst_86 [2] : vector<8x8x32xf32> to vector<8x8xf32>
    %519 = vector.shape_cast %518 : vector<8x8xf32> to vector<8x8x1xf32>
    %520 = vector.shape_cast %6 : vector<1x1xf32> to vector<1x1x1xf32>
    %521 = vector.broadcast %520 : vector<1x1x1xf32> to vector<8x8x1xf32>
    %522 = arith.addf %519, %521 : vector<8x8x1xf32>
    %523 = vector.extract_strided_slice %1 {offsets = [0, 5, 0], sizes = [8, 3, 1], strides = [1, 1, 1]} : vector<8x8x1xf32> to vector<8x3x1xf32>
    %524 = vector.extract_strided_slice %14 {offsets = [0, 0, 0], sizes = [8, 5, 1], strides = [1, 1, 1]} : vector<8x8x1xf32> to vector<8x5x1xf32>
    %525 = tpu.concatenate %523, %524 in 1 : vector<8x3x1xf32>, vector<8x5x1xf32> -> vector<8x8x1xf32>
    %cst_87 = arith.constant 0.000000e+00 : f32
    %526 = vector.broadcast %cst_87 : f32 to vector<8x8x1xf32>
    %527 = arith.cmpf ogt, %525, %526 : vector<8x8x1xf32>
    %cst_88 = arith.constant -1.000000e+30 : f32
    %528 = vector.broadcast %cst_88 : f32 to vector<8x8x1xf32>
    %529 = arith.select %527, %522, %528 : vector<8x8x1xi1>, vector<8x8x1xf32>
    %cst_89 = arith.constant dense<0xFF800000> : vector<8x1xf32>
    %530 = vector.multi_reduction <maximumf>, %529, %cst_89 [1] : vector<8x8x1xf32> to vector<8x1xf32>
    %531 = vector.shape_cast %530 : vector<8x1xf32> to vector<8x1x1xf32>
    %532 = vector.broadcast %531 : vector<8x1x1xf32> to vector<8x8x1xf32>
    %533 = arith.cmpf oge, %529, %532 : vector<8x8x1xf32>
    %534 = arith.andi %533, %527 : vector<8x8x1xi1>
    %cst_90 = arith.constant 8.000000e+00 : f32
    %535 = vector.broadcast %cst_90 : f32 to vector<8x8x1xf32>
    %536 = arith.select %534, %8, %535 : vector<8x8x1xi1>, vector<8x8x1xf32>
    %cst_91 = arith.constant dense<0x7F800000> : vector<8x1xf32>
    %537 = vector.multi_reduction <minimumf>, %536, %cst_91 [1] : vector<8x8x1xf32> to vector<8x1xf32>
    %538 = vector.shape_cast %537 : vector<8x1xf32> to vector<8x1x1xf32>
    %539 = vector.broadcast %538 : vector<8x1x1xf32> to vector<8x8x1xf32>
    %540 = arith.cmpf oeq, %8, %539 : vector<8x8x1xf32>
    %541 = arith.extui %540 : vector<8x8x1xi1> to vector<8x8x1xi32>
    %542 = arith.sitofp %541 : vector<8x8x1xi32> to vector<8x8x1xf32>
    %543 = vector.broadcast %538 : vector<8x1x1xf32> to vector<8x8x1xf32>
    %544 = arith.cmpf olt, %8, %543 : vector<8x8x1xf32>
    %545 = arith.extui %544 : vector<8x8x1xi1> to vector<8x8x1xi32>
    %546 = arith.sitofp %545 : vector<8x8x1xi32> to vector<8x8x1xf32>
    %547 = vector.broadcast %538 : vector<8x1x1xf32> to vector<8x8x1xf32>
    %548 = arith.cmpf ogt, %8, %547 : vector<8x8x1xf32>
    %549 = arith.extui %548 : vector<8x8x1xi1> to vector<8x8x1xi32>
    %550 = arith.sitofp %549 : vector<8x8x1xi32> to vector<8x8x1xf32>
    %551 = vector.broadcast %542 : vector<8x8x1xf32> to vector<8x8x32xf32>
    %552 = arith.mulf %551, %516 : vector<8x8x32xf32>
    %553 = vector.broadcast %546 : vector<8x8x1xf32> to vector<8x8x32xf32>
    %554 = arith.mulf %553, %462 : vector<8x8x32xf32>
    %555 = arith.addf %552, %554 : vector<8x8x32xf32>
    %556 = vector.broadcast %550 : vector<8x8x1xf32> to vector<8x8x32xf32>
    %557 = arith.mulf %556, %471 : vector<8x8x32xf32>
    %558 = arith.addf %555, %557 : vector<8x8x32xf32>
    %559 = vector.broadcast %542 : vector<8x8x1xf32> to vector<8x8x32xf32>
    %560 = arith.mulf %559, %509 : vector<8x8x32xf32>
    %561 = vector.broadcast %546 : vector<8x8x1xf32> to vector<8x8x32xf32>
    %562 = arith.mulf %561, %469 : vector<8x8x32xf32>
    %563 = arith.addf %560, %562 : vector<8x8x32xf32>
    %564 = vector.broadcast %550 : vector<8x8x1xf32> to vector<8x8x32xf32>
    %565 = arith.mulf %564, %473 : vector<8x8x32xf32>
    %566 = arith.addf %563, %565 : vector<8x8x32xf32>
    %567 = vector.extract_strided_slice %1 {offsets = [0, 5, 0], sizes = [8, 1, 1], strides = [1, 1, 1]} : vector<8x8x1xf32> to vector<8x1x1xf32>
    %568 = vector.broadcast %567 : vector<8x1x1xf32> to vector<8x8x32xf32>
    %569 = arith.mulf %568, %558 : vector<8x8x32xf32>
    %cst_92 = arith.constant 1.000000e+00 : f32
    %570 = vector.broadcast %cst_92 : f32 to vector<8x1x1xf32>
    %571 = arith.subf %570, %567 : vector<8x1x1xf32>
    %572 = vector.broadcast %571 : vector<8x1x1xf32> to vector<8x8x32xf32>
    %573 = arith.mulf %572, %462 : vector<8x8x32xf32>
    %574 = arith.addf %569, %573 : vector<8x8x32xf32>
    %575 = vector.broadcast %567 : vector<8x1x1xf32> to vector<8x8x32xf32>
    %576 = arith.mulf %575, %566 : vector<8x8x32xf32>
    %cst_93 = arith.constant 1.000000e+00 : f32
    %577 = vector.broadcast %cst_93 : f32 to vector<8x1x1xf32>
    %578 = arith.subf %577, %567 : vector<8x1x1xf32>
    %579 = vector.broadcast %578 : vector<8x1x1xf32> to vector<8x8x32xf32>
    %580 = arith.mulf %579, %469 : vector<8x8x32xf32>
    %581 = arith.addf %576, %580 : vector<8x8x32xf32>
    %582 = vector.extract_strided_slice %574 {offsets = [0, 1, 0], sizes = [8, 7, 32], strides = [1, 1, 1]} : vector<8x8x32xf32> to vector<8x7x32xf32>
    %583 = tpu.concatenate %582, %13 in 1 : vector<8x7x32xf32>, vector<8x1x32xf32> -> vector<8x8x32xf32>
    %584 = vector.extract_strided_slice %581 {offsets = [0, 1, 0], sizes = [8, 7, 32], strides = [1, 1, 1]} : vector<8x8x32xf32> to vector<8x7x32xf32>
    %585 = tpu.concatenate %584, %13 in 1 : vector<8x7x32xf32>, vector<8x1x32xf32> -> vector<8x8x32xf32>
    %586 = tpu.concatenate %574, %583 in 2 : vector<8x8x32xf32>, vector<8x8x32xf32> -> vector<8x8x64xf32>
    %587 = vector.shape_cast %586 : vector<8x8x64xf32> to vector<64x64xf32>
    %cst_94 = arith.constant dense<0.000000e+00> : vector<64x160xf32>
    %588 = tpu.matmul %587, %4, %cst_94 {dimension_numbers = #tpu.dot_dimension_numbers<[1], [0], [0], [1], [0, 0, 1, 1], [], []>} : vector<64x64xf32>, vector<64x160xf32>, vector<64x160xf32> -> vector<64x160xf32>
    %589 = vector.broadcast %5 : vector<1x160xf32> to vector<64x160xf32>
    %590 = arith.addf %588, %589 : vector<64x160xf32>
    %591 = vector.shape_cast %590 : vector<64x160xf32> to vector<8x8x160xf32>
    %592 = vector.extract_strided_slice %591 {offsets = [0, 0, 0], sizes = [8, 8, 32], strides = [1, 1, 1]} : vector<8x8x160xf32> to vector<8x8x32xf32>
    %593 = vector.extract_strided_slice %591 {offsets = [0, 0, 32], sizes = [8, 8, 32], strides = [1, 1, 1]} : vector<8x8x160xf32> to vector<8x8x32xf32>
    %594 = vector.extract_strided_slice %591 {offsets = [0, 0, 64], sizes = [8, 8, 32], strides = [1, 1, 1]} : vector<8x8x160xf32> to vector<8x8x32xf32>
    %595 = vector.extract_strided_slice %591 {offsets = [0, 0, 96], sizes = [8, 8, 32], strides = [1, 1, 1]} : vector<8x8x160xf32> to vector<8x8x32xf32>
    %596 = vector.extract_strided_slice %591 {offsets = [0, 0, 128], sizes = [8, 8, 32], strides = [1, 1, 1]} : vector<8x8x160xf32> to vector<8x8x32xf32>
    %cst_95 = arith.constant 1.000000e+00 : f32
    %597 = vector.broadcast %cst_95 : f32 to vector<8x8x32xf32>
    %598 = arith.addf %593, %597 : vector<8x8x32xf32>
    %599 = arith.negf %598 : vector<8x8x32xf32>
    %600 = math.exp %599 : vector<8x8x32xf32>
    %cst_96 = arith.constant 1.000000e+00 : f32
    %601 = vector.broadcast %cst_96 : f32 to vector<8x8x32xf32>
    %602 = arith.addf %601, %600 : vector<8x8x32xf32>
    %603 = arith.divf %601, %602 : vector<8x8x32xf32>
    %604 = arith.mulf %581, %603 : vector<8x8x32xf32>
    %cst_97 = arith.constant 1.000000e+00 : f32
    %605 = vector.broadcast %cst_97 : f32 to vector<8x8x32xf32>
    %606 = arith.addf %594, %605 : vector<8x8x32xf32>
    %607 = arith.negf %606 : vector<8x8x32xf32>
    %608 = math.exp %607 : vector<8x8x32xf32>
    %cst_98 = arith.constant 1.000000e+00 : f32
    %609 = vector.broadcast %cst_98 : f32 to vector<8x8x32xf32>
    %610 = arith.addf %609, %608 : vector<8x8x32xf32>
    %611 = arith.divf %609, %610 : vector<8x8x32xf32>
    %612 = arith.mulf %585, %611 : vector<8x8x32xf32>
    %613 = arith.addf %604, %612 : vector<8x8x32xf32>
    %614 = math.tanh %595 : vector<8x8x32xf32>
    %615 = arith.negf %592 : vector<8x8x32xf32>
    %616 = math.exp %615 : vector<8x8x32xf32>
    %cst_99 = arith.constant 1.000000e+00 : f32
    %617 = vector.broadcast %cst_99 : f32 to vector<8x8x32xf32>
    %618 = arith.addf %617, %616 : vector<8x8x32xf32>
    %619 = arith.divf %617, %618 : vector<8x8x32xf32>
    %620 = arith.mulf %614, %619 : vector<8x8x32xf32>
    %621 = arith.addf %613, %620 : vector<8x8x32xf32>
    %622 = arith.negf %596 : vector<8x8x32xf32>
    %623 = math.exp %622 : vector<8x8x32xf32>
    %cst_100 = arith.constant 1.000000e+00 : f32
    %624 = vector.broadcast %cst_100 : f32 to vector<8x8x32xf32>
    %625 = arith.addf %624, %623 : vector<8x8x32xf32>
    %626 = arith.divf %624, %625 : vector<8x8x32xf32>
    %627 = math.tanh %621 : vector<8x8x32xf32>
    %628 = arith.mulf %626, %627 : vector<8x8x32xf32>
    %629 = arith.mulf %628, %12 : vector<8x8x32xf32>
    %cst_101 = arith.constant dense<0.000000e+00> : vector<8x8xf32>
    %630 = vector.multi_reduction <add>, %629, %cst_101 [2] : vector<8x8x32xf32> to vector<8x8xf32>
    %631 = vector.shape_cast %630 : vector<8x8xf32> to vector<8x8x1xf32>
    %632 = vector.shape_cast %6 : vector<1x1xf32> to vector<1x1x1xf32>
    %633 = vector.broadcast %632 : vector<1x1x1xf32> to vector<8x8x1xf32>
    %634 = arith.addf %631, %633 : vector<8x8x1xf32>
    %635 = vector.extract_strided_slice %1 {offsets = [0, 6, 0], sizes = [8, 2, 1], strides = [1, 1, 1]} : vector<8x8x1xf32> to vector<8x2x1xf32>
    %636 = vector.extract_strided_slice %14 {offsets = [0, 0, 0], sizes = [8, 6, 1], strides = [1, 1, 1]} : vector<8x8x1xf32> to vector<8x6x1xf32>
    %637 = tpu.concatenate %635, %636 in 1 : vector<8x2x1xf32>, vector<8x6x1xf32> -> vector<8x8x1xf32>
    %cst_102 = arith.constant 0.000000e+00 : f32
    %638 = vector.broadcast %cst_102 : f32 to vector<8x8x1xf32>
    %639 = arith.cmpf ogt, %637, %638 : vector<8x8x1xf32>
    %cst_103 = arith.constant -1.000000e+30 : f32
    %640 = vector.broadcast %cst_103 : f32 to vector<8x8x1xf32>
    %641 = arith.select %639, %634, %640 : vector<8x8x1xi1>, vector<8x8x1xf32>
    %cst_104 = arith.constant dense<0xFF800000> : vector<8x1xf32>
    %642 = vector.multi_reduction <maximumf>, %641, %cst_104 [1] : vector<8x8x1xf32> to vector<8x1xf32>
    %643 = vector.shape_cast %642 : vector<8x1xf32> to vector<8x1x1xf32>
    %644 = vector.broadcast %643 : vector<8x1x1xf32> to vector<8x8x1xf32>
    %645 = arith.cmpf oge, %641, %644 : vector<8x8x1xf32>
    %646 = arith.andi %645, %639 : vector<8x8x1xi1>
    %cst_105 = arith.constant 8.000000e+00 : f32
    %647 = vector.broadcast %cst_105 : f32 to vector<8x8x1xf32>
    %648 = arith.select %646, %8, %647 : vector<8x8x1xi1>, vector<8x8x1xf32>
    %cst_106 = arith.constant dense<0x7F800000> : vector<8x1xf32>
    %649 = vector.multi_reduction <minimumf>, %648, %cst_106 [1] : vector<8x8x1xf32> to vector<8x1xf32>
    %650 = vector.shape_cast %649 : vector<8x1xf32> to vector<8x1x1xf32>
    %651 = vector.broadcast %650 : vector<8x1x1xf32> to vector<8x8x1xf32>
    %652 = arith.cmpf oeq, %8, %651 : vector<8x8x1xf32>
    %653 = arith.extui %652 : vector<8x8x1xi1> to vector<8x8x1xi32>
    %654 = arith.sitofp %653 : vector<8x8x1xi32> to vector<8x8x1xf32>
    %655 = vector.broadcast %650 : vector<8x1x1xf32> to vector<8x8x1xf32>
    %656 = arith.cmpf olt, %8, %655 : vector<8x8x1xf32>
    %657 = arith.extui %656 : vector<8x8x1xi1> to vector<8x8x1xi32>
    %658 = arith.sitofp %657 : vector<8x8x1xi32> to vector<8x8x1xf32>
    %659 = vector.broadcast %650 : vector<8x1x1xf32> to vector<8x8x1xf32>
    %660 = arith.cmpf ogt, %8, %659 : vector<8x8x1xf32>
    %661 = arith.extui %660 : vector<8x8x1xi1> to vector<8x8x1xi32>
    %662 = arith.sitofp %661 : vector<8x8x1xi32> to vector<8x8x1xf32>
    %663 = vector.broadcast %654 : vector<8x8x1xf32> to vector<8x8x32xf32>
    %664 = arith.mulf %663, %628 : vector<8x8x32xf32>
    %665 = vector.broadcast %658 : vector<8x8x1xf32> to vector<8x8x32xf32>
    %666 = arith.mulf %665, %574 : vector<8x8x32xf32>
    %667 = arith.addf %664, %666 : vector<8x8x32xf32>
    %668 = vector.broadcast %662 : vector<8x8x1xf32> to vector<8x8x32xf32>
    %669 = arith.mulf %668, %583 : vector<8x8x32xf32>
    %670 = arith.addf %667, %669 : vector<8x8x32xf32>
    %671 = vector.broadcast %654 : vector<8x8x1xf32> to vector<8x8x32xf32>
    %672 = arith.mulf %671, %621 : vector<8x8x32xf32>
    %673 = vector.broadcast %658 : vector<8x8x1xf32> to vector<8x8x32xf32>
    %674 = arith.mulf %673, %581 : vector<8x8x32xf32>
    %675 = arith.addf %672, %674 : vector<8x8x32xf32>
    %676 = vector.broadcast %662 : vector<8x8x1xf32> to vector<8x8x32xf32>
    %677 = arith.mulf %676, %585 : vector<8x8x32xf32>
    %678 = arith.addf %675, %677 : vector<8x8x32xf32>
    %679 = vector.extract_strided_slice %1 {offsets = [0, 6, 0], sizes = [8, 1, 1], strides = [1, 1, 1]} : vector<8x8x1xf32> to vector<8x1x1xf32>
    %680 = vector.broadcast %679 : vector<8x1x1xf32> to vector<8x8x32xf32>
    %681 = arith.mulf %680, %670 : vector<8x8x32xf32>
    %cst_107 = arith.constant 1.000000e+00 : f32
    %682 = vector.broadcast %cst_107 : f32 to vector<8x1x1xf32>
    %683 = arith.subf %682, %679 : vector<8x1x1xf32>
    %684 = vector.broadcast %683 : vector<8x1x1xf32> to vector<8x8x32xf32>
    %685 = arith.mulf %684, %574 : vector<8x8x32xf32>
    %686 = arith.addf %681, %685 : vector<8x8x32xf32>
    %687 = vector.broadcast %679 : vector<8x1x1xf32> to vector<8x8x32xf32>
    %688 = arith.mulf %687, %678 : vector<8x8x32xf32>
    %cst_108 = arith.constant 1.000000e+00 : f32
    %689 = vector.broadcast %cst_108 : f32 to vector<8x1x1xf32>
    %690 = arith.subf %689, %679 : vector<8x1x1xf32>
    %691 = vector.broadcast %690 : vector<8x1x1xf32> to vector<8x8x32xf32>
    %692 = arith.mulf %691, %581 : vector<8x8x32xf32>
    %693 = arith.addf %688, %692 : vector<8x8x32xf32>
    %694 = vector.extract_strided_slice %686 {offsets = [0, 1, 0], sizes = [8, 7, 32], strides = [1, 1, 1]} : vector<8x8x32xf32> to vector<8x7x32xf32>
    %695 = tpu.concatenate %694, %13 in 1 : vector<8x7x32xf32>, vector<8x1x32xf32> -> vector<8x8x32xf32>
    %696 = vector.extract_strided_slice %693 {offsets = [0, 1, 0], sizes = [8, 7, 32], strides = [1, 1, 1]} : vector<8x8x32xf32> to vector<8x7x32xf32>
    %697 = tpu.concatenate %696, %13 in 1 : vector<8x7x32xf32>, vector<8x1x32xf32> -> vector<8x8x32xf32>
    %698 = tpu.concatenate %686, %695 in 2 : vector<8x8x32xf32>, vector<8x8x32xf32> -> vector<8x8x64xf32>
    %699 = vector.shape_cast %698 : vector<8x8x64xf32> to vector<64x64xf32>
    %cst_109 = arith.constant dense<0.000000e+00> : vector<64x160xf32>
    %700 = tpu.matmul %699, %4, %cst_109 {dimension_numbers = #tpu.dot_dimension_numbers<[1], [0], [0], [1], [0, 0, 1, 1], [], []>} : vector<64x64xf32>, vector<64x160xf32>, vector<64x160xf32> -> vector<64x160xf32>
    %701 = vector.broadcast %5 : vector<1x160xf32> to vector<64x160xf32>
    %702 = arith.addf %700, %701 : vector<64x160xf32>
    %703 = vector.shape_cast %702 : vector<64x160xf32> to vector<8x8x160xf32>
    %704 = vector.extract_strided_slice %703 {offsets = [0, 0, 0], sizes = [8, 8, 32], strides = [1, 1, 1]} : vector<8x8x160xf32> to vector<8x8x32xf32>
    %705 = vector.extract_strided_slice %703 {offsets = [0, 0, 32], sizes = [8, 8, 32], strides = [1, 1, 1]} : vector<8x8x160xf32> to vector<8x8x32xf32>
    %706 = vector.extract_strided_slice %703 {offsets = [0, 0, 64], sizes = [8, 8, 32], strides = [1, 1, 1]} : vector<8x8x160xf32> to vector<8x8x32xf32>
    %707 = vector.extract_strided_slice %703 {offsets = [0, 0, 96], sizes = [8, 8, 32], strides = [1, 1, 1]} : vector<8x8x160xf32> to vector<8x8x32xf32>
    %708 = vector.extract_strided_slice %703 {offsets = [0, 0, 128], sizes = [8, 8, 32], strides = [1, 1, 1]} : vector<8x8x160xf32> to vector<8x8x32xf32>
    %cst_110 = arith.constant 1.000000e+00 : f32
    %709 = vector.broadcast %cst_110 : f32 to vector<8x8x32xf32>
    %710 = arith.addf %705, %709 : vector<8x8x32xf32>
    %711 = arith.negf %710 : vector<8x8x32xf32>
    %712 = math.exp %711 : vector<8x8x32xf32>
    %cst_111 = arith.constant 1.000000e+00 : f32
    %713 = vector.broadcast %cst_111 : f32 to vector<8x8x32xf32>
    %714 = arith.addf %713, %712 : vector<8x8x32xf32>
    %715 = arith.divf %713, %714 : vector<8x8x32xf32>
    %716 = arith.mulf %693, %715 : vector<8x8x32xf32>
    %cst_112 = arith.constant 1.000000e+00 : f32
    %717 = vector.broadcast %cst_112 : f32 to vector<8x8x32xf32>
    %718 = arith.addf %706, %717 : vector<8x8x32xf32>
    %719 = arith.negf %718 : vector<8x8x32xf32>
    %720 = math.exp %719 : vector<8x8x32xf32>
    %cst_113 = arith.constant 1.000000e+00 : f32
    %721 = vector.broadcast %cst_113 : f32 to vector<8x8x32xf32>
    %722 = arith.addf %721, %720 : vector<8x8x32xf32>
    %723 = arith.divf %721, %722 : vector<8x8x32xf32>
    %724 = arith.mulf %697, %723 : vector<8x8x32xf32>
    %725 = arith.addf %716, %724 : vector<8x8x32xf32>
    %726 = math.tanh %707 : vector<8x8x32xf32>
    %727 = arith.negf %704 : vector<8x8x32xf32>
    %728 = math.exp %727 : vector<8x8x32xf32>
    %cst_114 = arith.constant 1.000000e+00 : f32
    %729 = vector.broadcast %cst_114 : f32 to vector<8x8x32xf32>
    %730 = arith.addf %729, %728 : vector<8x8x32xf32>
    %731 = arith.divf %729, %730 : vector<8x8x32xf32>
    %732 = arith.mulf %726, %731 : vector<8x8x32xf32>
    %733 = arith.addf %725, %732 : vector<8x8x32xf32>
    %734 = arith.negf %708 : vector<8x8x32xf32>
    %735 = math.exp %734 : vector<8x8x32xf32>
    %cst_115 = arith.constant 1.000000e+00 : f32
    %736 = vector.broadcast %cst_115 : f32 to vector<8x8x32xf32>
    %737 = arith.addf %736, %735 : vector<8x8x32xf32>
    %738 = arith.divf %736, %737 : vector<8x8x32xf32>
    %739 = math.tanh %733 : vector<8x8x32xf32>
    %740 = arith.mulf %738, %739 : vector<8x8x32xf32>
    %741 = vector.extract_strided_slice %1 {offsets = [0, 7, 0], sizes = [8, 1, 1], strides = [1, 1, 1]} : vector<8x8x1xf32> to vector<8x1x1xf32>
    %742 = vector.broadcast %741 : vector<8x1x1xf32> to vector<8x8x32xf32>
    %743 = arith.mulf %742, %740 : vector<8x8x32xf32>
    %cst_116 = arith.constant 1.000000e+00 : f32
    %744 = vector.broadcast %cst_116 : f32 to vector<8x1x1xf32>
    %745 = arith.subf %744, %741 : vector<8x1x1xf32>
    %746 = vector.broadcast %745 : vector<8x1x1xf32> to vector<8x8x32xf32>
    %747 = arith.mulf %746, %686 : vector<8x8x32xf32>
    %748 = arith.addf %743, %747 : vector<8x8x32xf32>
    %749 = vector.extract_strided_slice %748 {offsets = [0, 0, 0], sizes = [8, 1, 32], strides = [1, 1, 1]} : vector<8x8x32xf32> to vector<8x1x32xf32>
    %750 = vector.shape_cast %749 : vector<8x1x32xf32> to vector<8x32xf32>
    %c0_117 = arith.constant 0 : index
    %c0_118 = arith.constant 0 : index
    %751 = vector.load %arg9[%c0_117, %c0_118] : memref<8x32xf32, #tpu.memory_space<vmem>>, vector<8x32xf32>
    tpu.vector_store %arg9[%c0_117, %c0_118], %750 {strides = array<i32>} : memref<8x32xf32, #tpu.memory_space<vmem>>, vector<8x32xf32>,
    return
  }
  func.func @transform_0(%arg0: i32) -> (i32, i32, i32) {
    %c0_i32 = arith.constant 0 : i32
    %c0_i32_0 = arith.constant 0 : i32
    %c0_i32_1 = arith.constant 0 : i32
    return %arg0, %c0_i32, %c0_i32_0 : i32, i32, i32
  }
  func.func @transform_1(%arg0: i32) -> (i32, i32, i32) {
    %c0_i32 = arith.constant 0 : i32
    %c0_i32_0 = arith.constant 0 : i32
    %c0_i32_1 = arith.constant 0 : i32
    return %arg0, %c0_i32, %c0_i32_0 : i32, i32, i32
  }
  func.func @transform_2(%arg0: i32) -> (i32, i32) {
    %c0_i32 = arith.constant 0 : i32
    %c0_i32_0 = arith.constant 0 : i32
    %c0_i32_1 = arith.constant 0 : i32
    return %c0_i32, %c0_i32_0 : i32, i32
  }
  func.func @transform_3(%arg0: i32) -> (i32, i32) {
    %c0_i32 = arith.constant 0 : i32
    %c0_i32_0 = arith.constant 0 : i32
    %c0_i32_1 = arith.constant 0 : i32
    return %c0_i32, %c0_i32_0 : i32, i32
  }
  func.func @transform_4(%arg0: i32) -> (i32, i32) {
    %c0_i32 = arith.constant 0 : i32
    %c0_i32_0 = arith.constant 0 : i32
    %c0_i32_1 = arith.constant 0 : i32
    return %c0_i32, %c0_i32_0 : i32, i32
  }
  func.func @transform_5(%arg0: i32) -> (i32, i32) {
    %c0_i32 = arith.constant 0 : i32
    %c0_i32_0 = arith.constant 0 : i32
    %c0_i32_1 = arith.constant 0 : i32
    return %c0_i32, %c0_i32_0 : i32, i32
  }
  func.func @transform_6(%arg0: i32) -> (i32, i32) {
    %c0_i32 = arith.constant 0 : i32
    %c0_i32_0 = arith.constant 0 : i32
    %c0_i32_1 = arith.constant 0 : i32
    return %c0_i32, %c0_i32_0 : i32, i32
  }
  func.func @transform_7(%arg0: i32) -> (i32, i32) {
    %c0_i32 = arith.constant 0 : i32
    %c0_i32_0 = arith.constant 0 : i32
    %c0_i32_1 = arith.constant 0 : i32
    return %c0_i32, %c0_i32_0 : i32, i32
  }
  func.func @transform_8(%arg0: i32) -> (i32, i32) {
    %c0_i32 = arith.constant 0 : i32
    %c0_i32_0 = arith.constant 0 : i32
    return %arg0, %c0_i32 : i32, i32
  }
}

</mosaic_0001>

<bundles_post_ra>
// kernel: gumbel_tree_lstm_forward.1
= control target key start
LH: loop header
LB: loop body
LE: loop exit
PB: predicated region body
PF: predicated region fallthrough
CT: control target
= control target key end

     0   :  { %s15417_s0 = inlined_call_operand.vmem [shape: f32[16,8,32], index: 0, kind: input, shape index: {}]   ;;  %s15418_s1 = inlined_call_operand.vmem [shape: f32[16,8,1], index: 1, kind: input, shape index: {}]   ;;  %s15419_s2 = inlined_call_operand.hbm [shape: f32[32,64], index: 2, kind: input, shape index: {}]   ;;  %s15420_s3 = inlined_call_operand.vmem [shape: f32[1,64], index: 3, kind: input, shape index: {}]   ;;  %s15421_s4 = inlined_call_operand.hbm [shape: f32[64,160], index: 4, kind: input, shape index: {}]   ;;  %s15422_s5 = inlined_call_operand.vmem [shape: f32[1,160], index: 5, kind: input, shape index: {}]   ;;  %s15423_s6 = inlined_call_operand.vmem [shape: f32[1,32], index: 6, kind: input, shape index: {}]   ;;  %s15424_s7 = inlined_call_operand.<no memory space> [shape: f32[1,1], index: 7, kind: input, shape index: {}]   ;;  %s15425_s8 = inlined_call_operand.hbm [shape: f32[16,32], index: 8, kind: output, shape index: {}]  }
   0x1   :  { %v13_v0 = vstv %s15424_s7 }
   0x2   :  { %14 = vst [vmem:[#allocation2] sm:$0x1] %v13_v0 }
   0x3   :  { %15 = vsyncpa [#allocation4], 0 }
   0x4   :  { %16 = vsyncpa [#allocation7], 0 }
   0x5   :  { %17 = vsyncpa [#allocation5], 0 }
   0x6   :  { %19 = vsyncpa [#allocation5 + $0x1], 0  ;;  %s10734_s29 = smov 0   ;;  %s10736_s30 = smov 0  }
   0x7   :  { %s10738_s9 = smov 0   ;;  %s10740_s10 = smov 0  }
   0x8 LB: > { %s10755_s7 = sadd.s32 4294967295, %s10672_s10   ;;  %s8411_s11 = sadd.s32 4294967294, %s10672_s10   ;;  %s10672_s10 = sphi %s10740_s10, %s16074_s10   ;;  %s10668_s9 = sphi %s10738_s9, %s16073_s9   ;;  %s10664_s30 = sphi %s10736_s30, %s16072_s30   ;;  %s10660_s29 = sphi %s10734_s29, %s16071_s29  }
   0x9   : > { %s10759_s12 = sadd.s32 1, %s10672_s10   ;;  %s210_s13 = sadd.s32 1, %s10668_s9 }
   0xa   : > { %s207_s14 = ssub.s32 %s10672_s10, %s10759_s12  ;;  %p220_p0 = scmp.ne.s32.totalorder %s10668_s9, %s10664_s30 }
   0xb   : > { %p208_p1 = scmp.eq.s32.totalorder %s207_s14, 0  ;;  %p221_p2 = scmp.eq.s32.totalorder %s10755_s7, 1 }
   0xc   : > { %p226_p3 = scmp.ne.s32.totalorder %s10664_s30, %s10660_s29  ;;  %p227_p4 = scmp.eq.s32.totalorder %s8411_s11, 1 }
   0xd   : > { %s10770_s15 = scalar_select %p208_p1, %s10668_s9, %s210_s13  }
   0xe   : > { %p10772_p5 = por %p221_p2, %p220_p0  ;;  %p10776_p6 = por %p227_p4, %p226_p3 }
   0xf   : > { %15655 = sst [smem:[#allocation12_spill]] %s10770_s15  ;;  %p8412_p7 = scmp.ge.s32.totalorder %s10672_s10, 1 }
  0x10   : > { %s15656_s16 = scalar_select %p10772_p5, 1, 0 }
  0x11   : > { %s15657_s17 = scalar_select %p10776_p6, 1, 0 }
  0x12   : > { %p234_p8 = scmp.lt.s32.totalorder %s10672_s10, 3  ;;  %p15426_p9 = scmp.eq.s32.totalorder %s10755_s7, 0 }
  0x13   : > { %s10674_s19 = smov [#allocation3]   ;;  %s10675_s22 = smov [#allocation6]  }
  0x14   : > { %p10783_p10 = pnand %p8412_p7, %p234_p8  ;;  %s246_s20 = sshll.u32 %s10674_s19, 4  ;;  %s247_s20 = int_to_ptr.vmem [resolvable:$true] %s246_s20 }
  0x15   : > { %s262_s23 = sshll.u32 %s10675_s22, 4  ;;  %s10546_s26 = scalar_lea.hbm %s15419_s2, 512  ;;  %s10795_s23 = int_to_ptr.vmem [resolvable:$true] %s262_s23 }
  0x16   : > { %s15658_s18 = scalar_select %p10783_p10, 1, 0 }
  0x17   : > { %p9201_p11 = pneg %p10783_p10  ;;  %p10547_p13 = scmp.ne.s32.totalorder %s15419_s2, %s10546_s26 }
  0x18   : > { %p10553_p3 = scmp.lt.u32.totalorder %s10546_s26, %s15419_s2 }
  0x19   : > { %p10791_p12 = pnand %p15426_p9, %p9201_p11 }
  0x1b   : > { %p10548_p0 = pneg %p10791_p12 }
  0x1d   : > { %p10549_p1 = pnand %p10548_p0, %p10547_p13 }
  0x1f   : > { %p10550_p2 = pneg %p10549_p1 }
  0x21   : > { %p10555_p4 = pnand %p10553_p3, %p10550_p2 }
  0x23   : > { %10558 = shalt.err (!%p10555_p4)
}
  0x24   : > { %s10559_s14 = scalar_lea.vmem %s247_s20, 512  ;;  %p10567_p9 = scmp.lt.s32.totalorder %s247_s20, %s247_s20 }
  0x25   : > { %p10560_p7 = scmp.ne.s32.totalorder %s247_s20, %s10559_s14  ;;  %p10568_p6 = scmp.lt.s32.totalorder %s10559_s14, %s10559_s14 }
  0x27   : > { %p10562_p8 = pnand %p10560_p7, %p10548_p0  ;;  %p10569_p5 = por %p10568_p6, %p10567_p9 }
  0x29   : > { %p10563_p11 = pneg %p10562_p8 }
  0x2b   : > { %p10570_p10 = pnand %p10569_p5, %p10563_p11 }
  0x2d   : > { %10573 = shalt.err (!%p10570_p10)
}
  0x2e   : > { %s10676_s19 = smov 128   ;;  %s10677_s22 = smov 8  }
  0x2f   : > { %9204 = dma.hbm_to_vmem [thread:$0]  (!%p10791_p12), %s15419_s2, 512, %s247_s20, [#allocation4], %s10676_s19, %s10676_s19, %s10677_s22  }
  0x30   : > { %s10574_s28 = scalar_lea.hbm %s15421_s4, 2048 }
  0x31   : > { %p10575_p13 = scmp.ne.s32.totalorder %s15421_s4, %s10574_s28  ;;  %p10581_p9 = scmp.lt.u32.totalorder %s10574_s28, %s15421_s4 }
  0x33   : > { %p10577_p5 = pnand %p10575_p13, %p10548_p0 }
  0x35   : > { %p10578_p6 = pneg %p10577_p5 }
  0x37   : > { %p10583_p10 = pnand %p10581_p9, %p10578_p6 }
  0x39   : > { %10586 = shalt.err (!%p10583_p10)
}
  0x3a   : > { %s10587_s20 = scalar_lea.vmem %s10795_s23, 2048  ;;  %p10595_p4 = scmp.lt.s32.totalorder %s10795_s23, %s10795_s23 }
  0x3b   : > { %p10588_p1 = scmp.ne.s32.totalorder %s10795_s23, %s10587_s20  ;;  %p10596_p7 = scmp.lt.s32.totalorder %s10587_s20, %s10587_s20 }
  0x3d   : > { %p10590_p2 = pnand %p10588_p1, %p10548_p0  ;;  %p10597_p8 = por %p10596_p7, %p10595_p4 }
  0x3f   : > { %p10591_p3 = pneg %p10590_p2 }
  0x41   : > { %p10598_p11 = pnand %p10597_p8, %p10591_p3 }
  0x43   : > { %10601 = shalt.err (!%p10598_p11)
}
  0x44   : > { %s10678_s15 = smov 256   ;;  %s10679_s19 = smov 16  }
  0x45   : > { %9207 = dma.hbm_to_vmem [thread:$0]  (!%p10791_p12), %s15421_s4, 2048, %s10795_s23, [#allocation7], %s10678_s15, %s10678_s15, %s10679_s19  }
  0x46   : > { %p15660_p13 = scmp.ne.s32.totalorder %s15658_s18, 0 }
  0x48   : > { %305 = sbr.rel (%p15660_p13) target bundleno = 7421 (0x1cfd), region = 52 }
  0x4f   : > { %p15661_p0 = scmp.eq.s32.totalorder %s10755_s7, 0 }
  0x51   : > { %10647 = dma.done.wait (%p15661_p0), [#allocation4], 512   ;;  %p15662_p5 = pmov %p15661_p0 }
  0x52   : > { %p15663_p6 = pmov %p15661_p0 }
  0x53   : > { %10649 = vsyncadd (%p15662_p5), [#allocation4], 4294966784 }
  0x54   : > { %10651 = dma.done.wait (%p15663_p6), [#allocation7], 2048   ;;  %p15664_p9 = pmov %p15661_p0 }
  0x55   : > { %s8420_s21 = sshll.u32 %s10755_s7, 3  ;;  %vm415_vm0 = vcmask 261120   ;;  %v376_v1 = vld [vmem:[#allocation3] sm:$0xff]  ;;  %v377_v2 = vld [vmem:[#allocation3 + $0x8] sm:$0xff]  ;;  %v378_v3 = vld [vmem:[#allocation3 + $0x10] sm:$0xff]  ;;  %vm569_vm1 = vcmask 1046528  }
  0x56   : > { %10653 = vsyncadd (%p15664_p9), [#allocation7], 4294965248  ;;  %p349_p10 = scmp.lt.s32.totalorder %s8420_s21, 15  ;;  %v8839_v4 = vpack.c.bf16 %v377_v2, %v376_v1  ;;  %v379_v5 = vld [vmem:[#allocation3 + $0x18] sm:$0xff]  ;;  %v382_v47 = vld [vmem:[#allocation6 + $0x8] sm:$0xff]  ;;  %s15653_s20 = smov 32  }
  0x57   : > { %v8843_v7 = vpack.c.bf16 %v379_v5, %v378_v3  ;;  %v384_v48 = vld [vmem:[#allocation6 + $0x18] sm:$0xff]  ;;  %v381_v49 = vld [vmem:[#allocation6] sm:$0xff]  ;;  %v383_v51 = vld [vmem:[#allocation6 + $0x10] sm:$0xff]  ;;  %vm629_vm2 = vcmask 523264   ;;  %s15651_s22 = smov 96   ;;  %s15649_s24 = smov 64  }
  0x58   : > { %s16076_s21 = smov (!%p349_p10, %s8420_s21), 15  ;;  %8840 = vmatprep.subr.bf16.mxu0 %v8839_v4  ;;  %v10961_v50 = vpack.c.bf16 %v384_v48, %v382_v47  ;;  %v386_v52 = vld [vmem:[#allocation6 + $0x28] sm:$0xff]  ;;  %v388_v53 = vld [vmem:[#allocation6 + $0x38] sm:$0xff]  ;;  %v10963_v54 = vpack.c.bf16 %v383_v51, %v381_v49  ;;  %v385_v56 = vld [vmem:[#allocation6 + $0x20] sm:$0xff]  ;;  %vm1205_vm4 = vcmask 7168   ;;  %p16068_p1 = scmp.ne.s32.totalorder %s15656_s16, 0 }
  0x59   : > { %s8421_s23 = sshll.u32 %s16076_s21, 3  ;;  %8842 = vmatpush3.bf16.msra.mxu0 %v8839_v4  ;;  %v10965_v55 = vpack.c.bf16 %v388_v53, %v386_v52  ;;  %v387_v57 = vld [vmem:[#allocation6 + $0x30] sm:$0xff]  ;;  %v390_v58 = vld [vmem:[#allocation6 + $0x48] sm:$0xff]  ;;  %v392_v59 = vld [vmem:[#allocation6 + $0x58] sm:$0xff] }
  0x5a   : > { %s10858_s26 = scalar_lea.vmem %s15417_s0, %s8421_s23  ;;  %s10863_s11 = scalar_lea.vmem %s15418_s1, %s8421_s23  ;;  %8844 = vmatprep.subr.bf16.mxu0 %v8843_v7  ;;  %15676 = vst [vmem:[#allocation24_spill] sm:$0xff] %v10961_v50  ;;  %15677 = vst [vmem:[#allocation25_spill] sm:$0xff] %v10963_v54  ;;  %8848 = vmatprep.subr.bf16.mxu1 %v10961_v50  ;;  %v10970_v60 = vpack.c.bf16 %v387_v57, %v385_v56  ;;  %v10974_v61 = vpack.c.bf16 %v392_v59, %v390_v58  ;;  %v389_v62 = vld [vmem:[#allocation6 + $0x40] sm:$0xff]  ;;  %v391_v63 = vld [vmem:[#allocation6 + $0x50] sm:$0xff] }
  0x5b   : > { %v360_v6 = vld [vmem:[%s10858_s26] sm:$0xff]  ;;  %v10871_v9 = vld [vmem:[%s10863_s11 + $0x8] sm:$0xff]  ;;  %v10874_v10 = vld [vmem:[%s10863_s11 + $0x10] sm:$0xff]  ;;  %15678 = vst [vmem:[#allocation26_spill] sm:$0xff] %v10965_v55  ;;  %8850 = vmatpush1.bf16.msra.mxu1 %v10963_v54  ;;  %v10978_v2 = vpack.c.bf16 %v391_v63, %v389_v62 }
  0x5c   : > { %8827 = vmatprep.mubr.msk.f32.mxu0 %vm415_vm0, %v360_v6  ;;  %v10868_v8 = vld [vmem:[%s10863_s11] sm:$0xff]  ;;  %v15437_v12 = vrot.slane %v10871_v9, 1  ;;  %v15436_v13 = vrot.slane %v10874_v10, 1  ;;  %v10880_v14 = vld [vmem:[%s10863_s11 + $0x18] sm:$0xff]  ;;  %v10886_v16 = vld [vmem:[%s10863_s11 + $0x28] sm:$0xff]  ;;  %v10917_v28 = vsub.f32 1.0, %v10871_v9  ;;  %8852 = vmatprep.subr.bf16.mxu1 %v10965_v55 }
  0x5d   : > { %v15438_v11 = vrot.slane %v10868_v8, 1  ;;  %v10883_v15 = vld [vmem:[%s10863_s11 + $0x20] sm:$0xff]  ;;  %15665 = vst [vmem:[#allocation13_spill] sm:$0xff] %v10886_v16  ;;  %v15435_v17 = vrot.slane %v10880_v14, 1  ;;  %v10890_v18 = vld [vmem:[%s10863_s11 + $0x30] sm:$0xff]  ;;  %v10896_v20 = vld [vmem:[%s10863_s11 + $0x38] sm:$0xff]  ;;  %8846 = vmatpush3.bf16.msra.mxu0 %v8843_v7 }
  0x5e   : > { %15666 = vst [vmem:[#allocation14_spill] sm:$0xff] %v10890_v18  ;;  %v15434_v19 = vrot.slane %v10883_v15, 1  ;;  %15667 = vst [vmem:[#allocation15_spill] sm:$0xff] %v10896_v20  ;;  %v10899_v21 = vsub.f32 1.0, %v10868_v8  ;;  %v361_v22 = vld [vmem:[%s10858_s26 + $0x8] sm:$0xff]  ;;  %v15433_v23 = vrot.slane %v10886_v16, 1  ;;  %8864 = vmatprep.subr.bf16.mxu0 %v10961_v50 }
  0x5f   : > { %8967 = vpush %v15438_v11  ;;  %v362_v24 = vld [vmem:[%s10858_s26 + $0x10] sm:$0xff]  ;;  %v15432_v25 = vrot.slane %v10890_v18, 1  ;;  %v15431_v26 = vrot.slane %v10896_v20, 1  ;;  %15669 = vst [vmem:[#allocation17_spill] sm:$0xff] %v10917_v28  ;;  %v10920_v29 = vsub.f32 1.0, %v10874_v10  ;;  %v10923_v30 = vsub.f32 1.0, %v10880_v14  ;;  %8854 = vmatpush1.bf16.msra.mxu1 %v10970_v60 }
  0x60   : > { %15668 = vst [vmem:[#allocation16_spill] sm:$0xff] %v10899_v21  ;;  %8969 = vpush %v15437_v12  ;;  %8828 = vmatmul.mubr.msk.f32.vlgmr.msra.gmra.mrb[0].mxu0 %vm415_vm0, %v361_v22  ;;  %v1646_v27 = vrot.slane %v10899_v21, 1  ;;  %v363_v31 = vld [vmem:[%s10858_s26 + $0x18] sm:$0xff]  ;;  %v10930_v32 = vsub.f32 1.0, %v10883_v15  ;;  %v10933_v33 = vsub.f32 1.0, %v10886_v16  ;;  %v364_v34 = vld [vmem:[%s10858_s26 + $0x20] sm:$0xff]  ;;  %8856 = vmatprep.subr.bf16.mxu1 %v10974_v61 }
  0x61   : > { %8971 = vpush %v15436_v13  ;;  %15670 = vst [vmem:[#allocation18_spill] sm:$0xff] %v10920_v29  ;;  %8830 = vmatprep.mubr.msk.f32.mxu0 %vm415_vm0, %v362_v24  ;;  %v1647_v35 = vrot.slane %v10917_v28, 1  ;;  %v1648_v36 = vrot.slane %v10920_v29, 1  ;;  %v10941_v37 = vsub.f32 1.0, %v10890_v18  ;;  %v1649_v38 = vrot.slane %v10923_v30, 1  ;;  %v365_v41 = vld [vmem:[%s10858_s26 + $0x28] sm:$0xff]  ;;  %8866 = vmatpush1.bf16.msra.mxu0 %v10963_v54 }
  0x62   : > { %8973 = vpush %v15435_v17  ;;  %15671 = vst [vmem:[#allocation19_spill] sm:$0xff] %v10923_v30  ;;  %v10947_v39 = vsub.f32 1.0, %v10896_v20  ;;  %v1650_v40 = vrot.slane %v10930_v32, 1  ;;  %v1651_v42 = vrot.slane %v10933_v33, 1  ;;  %v366_v43 = vld [vmem:[%s10858_s26 + $0x30] sm:$0xff]  ;;  %v367_v46 = vld [vmem:[%s10858_s26 + $0x38] sm:$0xff]  ;;  %8868 = vmatprep.subr.bf16.mxu0 %v10965_v55 }
  0x63   : > { %8975 = vpush %v15434_v19  ;;  %15672 = vst [vmem:[#allocation20_spill] sm:$0xff] %v10930_v32  ;;  %v1652_v44 = vrot.slane %v10941_v37, 1  ;;  %v394_v0 = vld [vmem:[#allocation6 + $0x68] sm:$0xff]  ;;  %v396_v1 = vld [vmem:[#allocation6 + $0x78] sm:$0xff]  ;;  %8858 = vmatpush1.bf16.msra.mxu1 %v10978_v2  ;;  %v15429_v7 = vmov 0.0  }
  0x64   : > { %8977 = vpush %v15433_v23  ;;  %15673 = vst [vmem:[#allocation21_spill] sm:$0xff] %v10933_v33  ;;  %8831 = vmatmul.mubr.msk.f32.gmra.mrb[2].mxu0 %vm415_vm0, %v363_v31  ;;  %v1653_v45 = vrot.slane %v10947_v39, 1  ;;  %v10982_v3 = vpack.c.bf16 %v396_v1, %v394_v0  ;;  %v393_v4 = vld [vmem:[#allocation6 + $0x60] sm:$0xff]  ;;  %v395_v5 = vld [vmem:[#allocation6 + $0x70] sm:$0xff]  ;;  %718 = vmatprep.mubr.f32.mxu1 %v15429_v7 }
  0x65   : > { %8979 = vpush %v15432_v25  ;;  %15674 = vst [vmem:[#allocation22_spill] sm:$0xff] %v10941_v37  ;;  %8833 = vmatprep.mubr.msk.f32.mxu0 %vm415_vm0, %v364_v34  ;;  %8870 = vmatpush1.bf16.msra.mxu0 %v10970_v60  ;;  %v10986_v6 = vpack.c.bf16 %v395_v5, %v393_v4  ;;  %v8425_v22 = vld [vmem:[%s15420_s3] ss:$0 sm:$0xff] }
  0x66   : > { %8981 = vpush %v15431_v26  ;;  %15675 = vst [vmem:[#allocation23_spill] sm:$0xff] %v10947_v39  ;;  %8872 = vmatprep.subr.bf16.mxu0 %v10974_v61  ;;  %8860 = vmatprep.subr.bf16.mxu1 %v10982_v3 }
  0x67   : > { %8983 = vpush %v1646_v27  ;;  %15679 = vst [vmem:[#allocation27_spill] sm:$0xff] %v10970_v60  ;;  %8862 = vmatpush1.bf16.msra.mxu1 %v10986_v6 }
  0x68   : > { %8985 = vpush %v1647_v35  ;;  %8834 = vmatmul.mubr.msk.f32.gmra.mrb[4].mxu0 %vm415_vm0, %v365_v41  ;;  %15680 = vst [vmem:[#allocation28_spill] sm:$0xff] %v10974_v61  ;;  %8880 = vmatprep.subr.bf16.mxu1 %v10961_v50 }
  0x69   : > { %8987 = vpush %v1648_v36  ;;  %8836 = vmatprep.mubr.msk.f32.mxu0 %vm415_vm0, %v366_v43  ;;  %15681 = vst [vmem:[#allocation29_spill] sm:$0xff] %v10978_v2  ;;  %8874 = vmatpush1.bf16.msra.mxu0 %v10978_v2 }
  0x6a   : > { %8989 = vpush %v1649_v38  ;;  %15682 = vst [vmem:[#allocation30_spill] sm:$0xff] %v10982_v3  ;;  %8876 = vmatprep.subr.bf16.mxu0 %v10982_v3 }
  0x6b   : > { %8991 = vpush %v1650_v40  ;;  %15683 = vst [vmem:[#allocation31_spill] sm:$0xff] %v10986_v6 }
  0x6c   : > { %8993 = vpush %v1651_v42  ;;  %8837 = vmatmul.mubr.msk.f32.gmra.mrb[6].mxu0 %vm415_vm0, %v367_v46 }
  0x6d   : > { %8995 = vpush %v1652_v44  ;;  %8878 = vmatpush1.bf16.msra.mxu0 %v10986_v6  ;;  %1902 = vmatprep.mubr.f32.mxu0 %v15429_v7 }
  0x6e   : > { %8997 = vpush %v1653_v45  ;;  %8896 = vmatprep.subr.bf16.mxu0 %v10961_v50 }
  0x90   : > { %s11549_s25 = spop %8967 }
  0x91   : > { %s11551_s18 = spop %8969 }
  0x92   : > { %s11553_s26 = spop %8971 }
  0x93   : > { %s11555_s27 = spop %8973 }
  0x94   : > { %s11557_s28 = spop %8975 }
  0x95   : > { %s11559_s13 = spop %8977 }
  0x96   : > { %s11561_s14 = spop %8979 }
  0x97   : > { %s11563_s15 = spop %8981 }
  0x98   : > { %s8984_s19 = spop %8983 }
  0x99   : > { %s8986_s21 = spop %8985 }
  0x9a   : > { %s8988_s23 = spop %8987 }
 0x133   : > { %v8829_v24 = vpop.f32.mrb[0].mxu0 }
 0x134   : > { %v506_v27 = vpop.f32.mrb[1].mxu0  ;;  %v11000_v31 = vadd.f32 %v8829_v24, %v8425_v22 }
 0x135   : > { %v11002_v34 = vadd.f32 %v8425_v22, %v506_v27 }
 0x136   : > { %v554_v43 = vrot.slane %v11000_v31, 1 }
 0x137   : > { %v8832_v35 = vpop.f32.mrb[2].mxu0  ;;  %v553_v36 = vrot.slane %v11002_v34, 1 }
 0x138   : > { %v11005_v38 = vadd.f32 %v8832_v35, %v8425_v22  ;;  %v516_v40 = vpop.f32.mrb[3].mxu0  ;;  %v11025_v52 = vsel %vm569_vm1, %v554_v43, 0.0 }
 0x139   : > { %v11007_v41 = vadd.f32 %v8425_v22, %v516_v40  ;;  %v11010_v42 = vsel %vm569_vm1, %v553_v36, 0.0 }
 0x13a   : > { %586 = vrot.lane.b32.xlu0 %v11010_v42, %s15653_s20  ;;  %v556_v46 = vrot.slane %v11005_v38, 1 }
 0x13b   : > { %v8835_v44 = vpop.f32.mrb[4].mxu0  ;;  %v555_v45 = vrot.slane %v11007_v41, 1 }
 0x13c   : > { %v11017_v47 = vadd.f32 %v8835_v44, %v8425_v22  ;;  %v526_v48 = vpop.f32.mrb[5].mxu0  ;;  %v11032_v56 = vsel %vm569_vm1, %v556_v46, 0.0 }
 0x13d   : > { %v11019_v49 = vadd.f32 %v8425_v22, %v526_v48  ;;  %v11022_v51 = vsel %vm569_vm1, %v555_v45, 0.0 }
 0x13e   : > { %590 = vrot.lane.b32.xlu1 %v11022_v51, %s15653_s20  ;;  %588 = vrot.lane.b32.xlu0 %v11025_v52, %s15653_s20  ;;  %v558_v58 = vrot.slane %v11017_v47, 1 }
 0x13f   : > { %v8838_v53 = vpop.f32.mrb[6].mxu0  ;;  %v557_v57 = vrot.slane %v11019_v49, 1 }
 0x140   : > { %v11036_v59 = vadd.f32 %v8838_v53, %v8425_v22  ;;  %v536_v62 = vpop.f32.mrb[7].mxu0  ;;  %v11048_v1 = vsel %vm569_vm1, %v558_v58, 0.0 }
 0x141   : > { %v11038_v63 = vadd.f32 %v8425_v22, %v536_v62  ;;  %v11041_v0 = vsel %vm569_vm1, %v557_v57, 0.0 }
 0x142   : > { %592 = vrot.lane.b32.xlu1 %v11032_v56, %s15653_s20  ;;  %594 = vrot.lane.b32.xlu0 %v11041_v0, %s15653_s20  ;;  %v560_v5 = vrot.slane %v11036_v59, 1 }
 0x143   : > { %v559_v4 = vrot.slane %v11038_v63, 1 }
 0x144   : > { %v11060_v22 = vsel %vm569_vm1, %v560_v5, 0.0 }
 0x145   : > { %v11053_v24 = vsel %vm569_vm1, %v559_v4, 0.0 }
 0x146   : > { %596 = vrot.lane.b32.xlu1 %v11048_v1, %s15653_s20  ;;  %598 = vrot.lane.b32.xlu0 %v11053_v24, %s15653_s20 }
 0x14a   : > { %600 = vrot.lane.b32.xlu1 %v11060_v22, %s15653_s20 }
 0x1ac   : > { %v587_v27 = vpop.permute.xlu0 %586 }
 0x1ad   : > { %v610_v35 = vsel %vm415_vm0, %v11002_v34, %v587_v27 }
 0x1ae   : > { %8434 = vmatmul.mubr.msk.f32.vlgmr.msra.gmra.mrb[0].mxu1 %vm629_vm2, %v610_v35  ;;  %v399_v35 = vlaneseq }
 0x1af   : > { %724 = vmatprep.mubr.f32.mxu1 %v15429_v7  ;;  %8882 = vmatpush1.bf16.msra.mxu1 %v10963_v54 }
 0x1b0   : > { %v591_v36 = vpop.permute.xlu1 %590  ;;  %v589_v40 = vpop.permute.xlu0 %588  ;;  %8884 = vmatprep.subr.bf16.mxu1 %v10965_v55 }
 0x1b1   : > { %v611_v43 = vsel %vm415_vm0, %v11000_v31, %v589_v40  ;;  %v612_v44 = vsel %vm415_vm0, %v11007_v41, %v591_v36  ;;  %v11104_v36 = vshrl.u32 %v399_v35, 7 }
 0x1b2   : > { %8435 = vmatmul.mubr.msk.f32.gmra.mrb[2].mxu1 %vm629_vm2, %v611_v43  ;;  %v11110_v43 = vld [vmem:[%s15422_s5] sm:$0x3] }
 0x1b3   : > { %730 = vmatprep.mubr.f32.mxu1 %v15429_v7  ;;  %8886 = vmatpush1.bf16.msra.mxu1 %v10970_v60  ;;  %v621_v40 = vsub.s32 0, %v11104_v36 }
 0x1b4   : > { %8888 = vmatprep.subr.bf16.mxu1 %v10974_v61  ;;  %v593_v45 = vpop.permute.xlu1 %592  ;;  %v595_v48 = vpop.permute.xlu0 %594 }
 0x1b5   : > { %v613_v46 = vsel %vm415_vm0, %v11005_v38, %v593_v45  ;;  %v614_v53 = vsel %vm415_vm0, %v11019_v49, %v595_v48 }
 0x1b6   : > { %8436 = vmatmul.mubr.msk.f32.gmra.mrb[4].mxu1 %vm629_vm2, %v612_v44  ;;  %v11113_v44 = vrot.slane %v11110_v43, %v621_v40 }
 0x1b7   : > { %736 = vmatprep.mubr.f32.mxu1 %v15429_v7  ;;  %8890 = vmatpush1.bf16.msra.mxu1 %v10978_v2 }
 0x1b8   : > { %8892 = vmatprep.subr.bf16.mxu1 %v10982_v3  ;;  %v597_v57 = vpop.permute.xlu1 %596  ;;  %v599_v62 = vpop.permute.xlu0 %598  ;;  %15684 = vst [vmem:[#allocation32_spill] sm:$0xff] %v11113_v44 }
 0x1b9   : > { %v615_v58 = vsel %vm415_vm0, %v11017_v47, %v597_v57  ;;  %v616_v4 = vsel %vm415_vm0, %v11038_v63, %v599_v62 }
 0x1ba   : > { %8437 = vmatmul.mubr.msk.f32.gmra.mrb[6].mxu1 %vm629_vm2, %v613_v46 }
 0x1bb   : > { %742 = vmatprep.mubr.f32.mxu1 %v15429_v7  ;;  %8894 = vmatpush1.bf16.msra.mxu1 %v10986_v6 }
 0x1bc   : > { %8912 = vmatprep.subr.bf16.mxu1 %v10961_v50  ;;  %v601_v5 = vpop.permute.xlu1 %600 }
 0x1bd   : > { %v617_v27 = vsel %vm415_vm0, %v11036_v59, %v601_v5 }
 0x1be   : > { %8438 = vmatmul.mubr.msk.f32.gmra.mrb[8].mxu1 %vm629_vm2, %v614_v53 }
 0x1bf   : > { %748 = vmatprep.mubr.f32.mxu1 %v15429_v7 }
 0x1c2   : > { %8439 = vmatmul.mubr.msk.f32.gmra.mrb[10].mxu1 %vm629_vm2, %v615_v58 }
 0x1c3   : > { %754 = vmatprep.mubr.f32.mxu1 %v15429_v7 }
 0x1c6   : > { %8440 = vmatmul.mubr.msk.f32.gmra.mrb[12].mxu1 %vm629_vm2, %v616_v4 }
 0x1c7   : > { %760 = vmatprep.mubr.f32.mxu1 %v15429_v7 }
 0x1ca   : > { %8441 = vmatmul.mubr.msk.f32.gmra.mrb[14].mxu1 %vm629_vm2, %v617_v27 }
 0x1cb   : > { %3080 = vmatprep.mubr.f32.mxu1 %v15429_v7 }
 0x281   : > { %v720_v45 = vpop.f32.mrb[0].mxu1 }
 0x282   : > { %v11116_v46 = vadd.f32 %v720_v45, %v11113_v44  ;;  %v11118_v48 = vpop.f32.mrb[1].mxu1 }
 0x284   : > { %v8450_v53 = vmul.f32 -1.442695, %v11116_v46 }
 0x285   : > { %v726_v57 = vpop.f32.mrb[2].mxu1 }
 0x286   : > { %9592 = vpow2.f32 %v8450_v53  ;;  %v11122_v58 = vadd.f32 %v726_v57, %v11113_v44  ;;  %v11124_v62 = vpop.f32.mrb[3].mxu1 }
 0x288   : > { %v8451_v4 = vmul.f32 -1.442695, %v11122_v58 }
 0x289   : > { %v732_v5 = vpop.f32.mrb[4].mxu1 }
 0x28a   : > { %9594 = vpow2.f32 %v8451_v4  ;;  %v11128_v27 = vadd.f32 %v732_v5, %v11113_v44  ;;  %v11130_v35 = vpop.f32.mrb[5].mxu1 }
 0x28c   : > { %v8452_v40 = vmul.f32 -1.442695, %v11128_v27 }
 0x28d   : > { %v738_v45 = vpop.f32.mrb[6].mxu1 }
 0x28e   : > { %9596 = vpow2.f32 %v8452_v40  ;;  %v11134_v53 = vadd.f32 %v738_v45, %v11113_v44  ;;  %v11136_v57 = vpop.f32.mrb[7].mxu1 }
 0x290   : > { %v9593_v7 = vpop.eup %9592  ;;  %v8453_v26 = vmul.f32 -1.442695, %v11134_v53 }
 0x291   : > { %v911_v25 = vadd.f32 1.0, %v9593_v7  ;;  %v744_v23 = vpop.f32.mrb[8].mxu1 }
 0x292   : > { %9598 = vpow2.f32 %v8453_v26  ;;  %v11139_v4 = vpop.f32.mrb[9].mxu1  ;;  %v11144_v12 = vadd.f32 %v744_v23, %v11113_v44 }
 0x293   : > { %9600 = vrcp.f32 %v911_v25 }
 0x294   : > { %v9595_v5 = vpop.eup %9594  ;;  %v8454_v25 = vmul.f32 -1.442695, %v11144_v12 }
 0x295   : > { %v912_v19 = vadd.f32 1.0, %v9595_v5  ;;  %v750_v17 = vpop.f32.mrb[10].mxu1 }
 0x296   : > { %v11141_v13 = vpop.f32.mrb[11].mxu1  ;;  %v11150_v5 = vadd.f32 %v750_v17, %v11113_v44 }
 0x297   : > { %9602 = vrcp.f32 %v912_v19 }
 0x298   : > { %v9597_v40 = vpop.eup %9596 }
 0x299   : > { %v913_v45 = vadd.f32 1.0, %v9597_v40  ;;  %v756_v11 = vpop.f32.mrb[12].mxu1  ;;  %v8455_v40 = vmul.f32 -1.442695, %v11150_v5 }
 0x29a   : > { %v11146_v50 = vpop.f32.mrb[13].mxu1 }
 0x29b   : > { %9604 = vrcp.f32 %v913_v45  ;;  %v767_v45 = vadd.f32 1.0, %v11116_v46 }
 0x29c   : > { %v9599_v7 = vpop.eup %9598 }
 0x29d   : > { %v9601_v26 = vpop.eup %9600  ;;  %v914_v6 = vadd.f32 1.0, %v9599_v7  ;;  %v762_v3 = vpop.f32.mrb[14].mxu1  ;;  %v11159_v7 = vadd.f32 %v756_v11, %v11113_v44  ;;  %v8442_v17 = vmul.f32 -1.442695, %v767_v45 }
 0x29e   : > { %943 = vrot.lane.b32.xlu0 %v9601_v26, %s15651_s22  ;;  %v11153_v19 = vpop.f32.mrb[15].mxu1  ;;  %v11166_v60 = vadd.f32 %v762_v3, %v11113_v44 }
 0x29f   : > { %9606 = vrcp.f32 %v914_v6  ;;  %v8456_v26 = vmul.f32 -1.442695, %v11159_v7  ;;  %v768_v6 = vadd.f32 1.0, %v11122_v58 }
 0x2a0   : > { %9608 = vpow2.f32 %v8454_v25  ;;  %v8457_v45 = vmul.f32 -1.442695, %v11166_v60 }
 0x2a1   : > { %v9603_v23 = vpop.eup %9602  ;;  %9610 = vpow2.f32 %v8455_v40  ;;  %v8443_v11 = vmul.f32 -1.442695, %v768_v6  ;;  %v771_v6 = vadd.f32 1.0, %v11144_v12 }
 0x2a2   : > { %945 = vrot.lane.b32.xlu1 %v9603_v23, %s15651_s22  ;;  %9612 = vpow2.f32 %v8442_v17 }
 0x2a3   : > { %9614 = vpow2.f32 %v8456_v26 }
 0x2a5   : > { %v9605_v2 = vpop.eup %9604 }
 0x2a6   : > { %947 = vrot.lane.b32.xlu0 %v9605_v2, %s15651_s22  ;;  %v769_v2 = vadd.f32 1.0, %v11128_v27 }
 0x2a8   : > { %v8444_v54 = vmul.f32 -1.442695, %v769_v2 }
 0x2a9   : > { %v9607_v61 = vpop.eup %9606 }
 0x2aa   : > { %949 = vrot.lane.b32.xlu1 %v9607_v61, %s15651_s22  ;;  %v9609_v25 = vpop.eup %9608  ;;  %v770_v61 = vadd.f32 1.0, %v11134_v53 }
 0x2ab   : > { %v915_v23 = vadd.f32 1.0, %v9609_v25  ;;  %v9611_v40 = vpop.eup %9610 }
 0x2ac   : > { %v916_v55 = vadd.f32 1.0, %v9611_v40  ;;  %v9613_v17 = vpop.eup %9612  ;;  %v8445_v3 = vmul.f32 -1.442695, %v770_v61  ;;  %v773_v61 = vadd.f32 1.0, %v11159_v7 }
 0x2ad   : > { %9616 = vrcp.f32 %v915_v23  ;;  %v9615_v25 = vpop.eup %9614  ;;  %v799_v23 = vadd.f32 1.0, %v9613_v17 }
 0x2ae   : > { %9618 = vpow2.f32 %v8443_v11  ;;  %v917_v26 = vadd.f32 1.0, %v9615_v25  ;;  %v8446_v11 = vmul.f32 -1.442695, %v771_v6 }
 0x2af   : > { %9620 = vrcp.f32 %v916_v55  ;;  %v772_v55 = vadd.f32 1.0, %v11150_v5 }
 0x2b0   : > { %9622 = vpow2.f32 %v8457_v45 }
 0x2b1   : > { %9624 = vpow2.f32 %v8444_v54  ;;  %v8447_v54 = vmul.f32 -1.442695, %v772_v55 }
 0x2b2   : > { %9626 = vrcp.f32 %v917_v26 }
 0x2b3   : > { %9628 = vpow2.f32 %v8445_v3  ;;  %v774_v3 = vadd.f32 1.0, %v11166_v60 }
 0x2b4   : > { %9630 = vrcp.f32 %v799_v23 }
 0x2b5   : > { %9632 = vpow2.f32 %v8446_v11  ;;  %v8449_v11 = vmul.f32 -1.442695, %v774_v3 }
 0x2b7   : > { %v9617_v20 = vpop.eup %9616 }
 0x2b8   : > { %951 = vrot.lane.b32.xlu0 %v9617_v20, %s15651_s22  ;;  %v9619_v44 = vpop.eup %9618  ;;  %v8448_v20 = vmul.f32 -1.442695, %v773_v61 }
 0x2b9   : > { %v9621_v40 = vpop.eup %9620  ;;  %v800_v25 = vadd.f32 1.0, %v9619_v44 }
 0x2ba   : > { %v9623_v2 = vpop.eup %9622  ;;  %953 = vrot.lane.b32.xlu1 %v9621_v40, %s15651_s22 }
 0x2bb   : > { %v918_v45 = vadd.f32 1.0, %v9623_v2  ;;  %v9625_v17 = vpop.eup %9624 }
 0x2bc   : > { %v9627_v26 = vpop.eup %9626  ;;  %v801_v6 = vadd.f32 1.0, %v9625_v17 }
 0x2bd   : > { %9634 = vrcp.f32 %v918_v45  ;;  %955 = vrot.lane.b32.xlu0 %v9627_v26, %s15651_s22  ;;  %v9629_v23 = vpop.eup %9628 }
 0x2be   : > { %9636 = vpow2.f32 %v8447_v54  ;;  %v11178_v18 = vpop.eup %9630  ;;  %v802_v44 = vadd.f32 1.0, %v9629_v23 }
 0x2bf   : > { %9638 = vrcp.f32 %v800_v25  ;;  %v9633_v55 = vpop.eup %9632 }
 0x2c0   : > { %9640 = vpow2.f32 %v8448_v20  ;;  %v803_v2 = vadd.f32 1.0, %v9633_v55 }
 0x2c1   : > { %839 = vrot.lane.b32.xlu0 %v11178_v18, %s15651_s22  ;;  %9642 = vrcp.f32 %v801_v6 }
 0x2c2   : > { %9644 = vpow2.f32 %v8449_v11 }
 0x2c3   : > { %9646 = vrcp.f32 %v802_v44 }
 0x2c4   : > { %9648 = vrcp.f32 %v803_v2 }
 0x2c7   : > { %v9635_v40 = vpop.eup %9634 }
 0x2c8   : > { %957 = vrot.lane.b32.xlu1 %v9635_v40, %s15651_s22  ;;  %v9637_v45 = vpop.eup %9636 }
 0x2c9   : > { %v11183_v54 = vpop.eup %9638  ;;  %v804_v61 = vadd.f32 1.0, %v9637_v45 }
 0x2ca   : > { %v9641_v25 = vpop.eup %9640 }
 0x2cb   : > { %v11187_v17 = vpop.eup %9642  ;;  %9650 = vrcp.f32 %v804_v61  ;;  %v805_v26 = vadd.f32 1.0, %v9641_v25 }
 0x2cc   : > { %841 = vrot.lane.b32.xlu1 %v11183_v54, %s15651_s22  ;;  %v9645_v20 = vpop.eup %9644 }
 0x2cd   : > { %v11191_v3 = vpop.eup %9646  ;;  %9652 = vrcp.f32 %v805_v26  ;;  %v806_v6 = vadd.f32 1.0, %v9645_v20 }
 0x2ce   : > { %v11195_v23 = vpop.eup %9648 }
 0x2cf   : > { %9654 = vrcp.f32 %v806_v6 }
 0x2d0   : > { %843 = vrot.lane.b32.xlu1 %v11187_v17, %s15651_s22  ;;  %9656 = vtanh.f32 %v11116_v46 }
 0x2d1   : > { %9658 = vtanh.f32 %v11122_v58 }
 0x2d2   : > { %9660 = vtanh.f32 %v11128_v27 }
 0x2d3   : > { %9662 = vtanh.f32 %v11134_v53 }
 0x2d4   : > { %845 = vrot.lane.b32.xlu1 %v11191_v3, %s15651_s22  ;;  %9664 = vtanh.f32 %v11144_v12 }
 0x2d5   : > { %v11199_v11 = vpop.eup %9650  ;;  %9666 = vtanh.f32 %v11150_v5 }
 0x2d6   : > { %9668 = vtanh.f32 %v11159_v7 }
 0x2d7   : > { %v11203_v44 = vpop.eup %9652  ;;  %9670 = vtanh.f32 %v11166_v60 }
 0x2d8   : > { %847 = vrot.lane.b32.xlu1 %v11195_v23, %s15651_s22 }
 0x2d9   : > { %v11207_v55 = vpop.eup %9654 }
 0x2da   : > { %v9657_v40 = vpop.eup %9656 }
 0x2db   : > { %v9659_v61 = vpop.eup %9658 }
 0x2dc   : > { %849 = vrot.lane.b32.xlu1 %v11199_v11, %s15651_s22  ;;  %v9661_v20 = vpop.eup %9660 }
 0x2dd   : > { %v9663_v58 = vpop.eup %9662 }
 0x2de   : > { %v9665_v53 = vpop.eup %9664 }
 0x2e0   : > { %851 = vrot.lane.b32.xlu1 %v11203_v44, %s15651_s22 }
 0x2e4   : > { %853 = vrot.lane.b32.xlu1 %v11207_v55, %s15651_s22 }
 0x310   : > { %v944_v2 = vpop.permute.xlu0 %943 }
 0x311   : > { %v967_v45 = vmul.f32 %v9657_v40, %v944_v2 }
 0x313   : > { %983 = vrot.lane.b32.xlu0 %v967_v45, %s15649_s24  ;;  %v9667_v45 = vpop.eup %9666 }
 0x314   : > { %v946_v25 = vpop.permute.xlu1 %945 }
 0x315   : > { %v968_v26 = vmul.f32 %v9659_v61, %v946_v25 }
 0x317   : > { %985 = vrot.lane.b32.xlu0 %v968_v26, %s15649_s24  ;;  %v9669_v26 = vpop.eup %9668 }
 0x318   : > { %v948_v6 = vpop.permute.xlu0 %947  ;;  %v9671_v12 = vpop.eup %9670 }
 0x319   : > { %v969_v46 = vmul.f32 %v9661_v20, %v948_v6 }
 0x31b   : > { %987 = vrot.lane.b32.xlu0 %v969_v46, %s15649_s24 }
 0x31c   : > { %v950_v27 = vpop.permute.xlu1 %949 }
 0x31d   : > { %v970_v16 = vmul.f32 %v9663_v58, %v950_v27  ;;  %v823_v27 = vmul.f32 %v11178_v18, %v11002_v34  ;;  %v825_v18 = vmul.f32 %v11187_v17, %v11007_v41 }
 0x31f   : > { %989 = vrot.lane.b32.xlu0 %v970_v16, %s15649_s24 }
 0x32a   : > { %v952_v40 = vpop.permute.xlu0 %951 }
 0x32b   : > { %v971_v2 = vmul.f32 %v9665_v53, %v952_v40 }
 0x32c   : > { %v954_v61 = vpop.permute.xlu1 %953 }
 0x32d   : > { %991 = vrot.lane.b32.xlu0 %v971_v2, %s15649_s24  ;;  %v972_v25 = vmul.f32 %v9667_v45, %v954_v61  ;;  %v824_v61 = vmul.f32 %v11183_v54, %v11000_v31  ;;  %v826_v54 = vmul.f32 %v11191_v3, %v11005_v38 }
 0x32f   : > { %v956_v16 = vpop.permute.xlu0 %955 }
 0x330   : > { %v973_v20 = vmul.f32 %v9669_v26, %v956_v16 }
 0x331   : > { %993 = vrot.lane.b32.xlu0 %v972_v25, %s15649_s24 }
 0x333   : > { %v840_v7 = vpop.permute.xlu0 %839 }
 0x334   : > { %v863_v58 = vmul.f32 %v840_v7, %v11010_v42 }
 0x335   : > { %995 = vrot.lane.b32.xlu0 %v973_v20, %s15649_s24 }
 0x336   : > { %v871_v40 = vadd.f32 %v863_v58, %v823_v27 }
 0x33a   : > { %v958_v5 = vpop.permute.xlu1 %957 }
 0x33b   : > { %v974_v6 = vmul.f32 %v9671_v12, %v958_v5 }
 0x33d   : > { %997 = vrot.lane.b32.xlu1 %v974_v6, %s15649_s24 }
 0x33e   : > { %v842_v46 = vpop.permute.xlu1 %841 }
 0x33f   : > { %v864_v60 = vmul.f32 %v842_v46, %v11025_v52 }
 0x341   : > { %v872_v26 = vadd.f32 %v864_v60, %v824_v61 }
 0x342   : > { %v844_v53 = vpop.permute.xlu1 %843 }
 0x343   : > { %v865_v25 = vmul.f32 %v844_v53, %v11022_v51 }
 0x345   : > { %v873_v6 = vadd.f32 %v865_v25, %v825_v18  ;;  %v827_v25 = vmul.f32 %v11195_v23, %v11019_v49 }
 0x346   : > { %v846_v16 = vpop.permute.xlu1 %845 }
 0x347   : > { %v866_v5 = vmul.f32 %v846_v16, %v11032_v56 }
 0x349   : > { %v874_v58 = vadd.f32 %v866_v5, %v826_v54 }
 0x385   : > { %v984_v2 = vpop.permute.xlu0 %983 }
 0x386   : > { %v11231_v45 = vadd.f32 %v984_v2, %v871_v40  ;;  %v848_v40 = vpop.permute.xlu1 %847 }
 0x387   : > { %v867_v61 = vmul.f32 %v848_v40, %v11041_v0 }
 0x388   : > { %9672 = vtanh.f32 %v11231_v45 }
 0x389   : > { %v986_v20 = vpop.permute.xlu0 %985  ;;  %v875_v16 = vadd.f32 %v867_v61, %v827_v25  ;;  %v830_v25 = vmul.f32 %v11207_v55, %v11036_v59 }
 0x38a   : > { %v11237_v12 = vadd.f32 %v986_v20, %v872_v26  ;;  %v850_v3 = vpop.permute.xlu1 %849 }
 0x38b   : > { %v868_v20 = vmul.f32 %v850_v3, %v11048_v1 }
 0x38c   : > { %9674 = vtanh.f32 %v11237_v12 }
 0x38d   : > { %v988_v7 = vpop.permute.xlu0 %987 }
 0x38e   : > { %v11243_v46 = vadd.f32 %v988_v7, %v873_v6  ;;  %v828_v6 = vmul.f32 %v11199_v11, %v11017_v47  ;;  %v852_v7 = vpop.permute.xlu1 %851 }
 0x390   : > { %9676 = vtanh.f32 %v11243_v46  ;;  %v876_v54 = vadd.f32 %v868_v20, %v828_v6 }
 0x391   : > { %v990_v27 = vpop.permute.xlu0 %989 }
 0x392   : > { %v9673_v53 = vpop.eup %9672  ;;  %v11248_v60 = vadd.f32 %v990_v27, %v874_v58  ;;  %v869_v27 = vmul.f32 %v852_v7, %v11053_v24  ;;  %v854_v40 = vpop.permute.xlu1 %853  ;;  %v625_v7 = vsub.s32 1, %v11104_v36 }
 0x393   : > { %1079 = vrot.lane.b32.xlu0 %v9673_v53, %s15651_s22  ;;  %v829_v53 = vmul.f32 %v11203_v44, %v11038_v63  ;;  %v870_v3 = vmul.f32 %v854_v40, %v11060_v22 }
 0x394   : > { %9678 = vtanh.f32 %v11248_v60 }
 0x396   : > { %v9675_v17 = vpop.eup %9674 }
 0x397   : > { %1081 = vrot.lane.b32.xlu1 %v9675_v17, %s15651_s22  ;;  %v877_v17 = vadd.f32 %v869_v27, %v829_v53 }
 0x39a   : > { %v9677_v2 = vpop.eup %9676 }
 0x39b   : > { %1083 = vrot.lane.b32.xlu0 %v9677_v2, %s15651_s22 }
 0x39e   : > { %v9679_v26 = vpop.eup %9678 }
 0x39f   : > { %1085 = vrot.lane.b32.xlu1 %v9679_v26, %s15651_s22  ;;  %v992_v18 = vpop.permute.xlu0 %991 }
 0x3a0   : > { %v11259_v5 = vadd.f32 %v992_v18, %v875_v16  ;;  %v878_v16 = vadd.f32 %v870_v3, %v830_v25 }
 0x3a2   : > { %9680 = vtanh.f32 %v11259_v5 }
 0x3a3   : > { %v994_v58 = vpop.permute.xlu0 %993 }
 0x3a4   : > { %v11265_v23 = vadd.f32 %v994_v58, %v876_v54  ;;  %v11285_v54 = vrot.slane %v11110_v43, %v625_v7 }
 0x3a6   : > { %9682 = vtanh.f32 %v11265_v23  ;;  %15685 = vst [vmem:[#allocation33_spill] sm:$0xff] %v11285_v54  ;;  %v723_v55 = vadd.f32 %v11118_v48, %v11285_v54  ;;  %v729_v27 = vadd.f32 %v11124_v62, %v11285_v54  ;;  %v747_v62 = vadd.f32 %v11139_v4, %v11285_v54 }
 0x3a7   : > { %v996_v2 = vpop.permute.xlu0 %995  ;;  %v759_v4 = vadd.f32 %v11146_v50, %v11285_v54 }
 0x3a8   : > { %v11270_v61 = vadd.f32 %v996_v2, %v877_v17  ;;  %v8458_v58 = vmul.f32 -1.442695, %v723_v55  ;;  %v8459_v53 = vmul.f32 -1.442695, %v729_v27  ;;  %v735_v17 = vadd.f32 %v11130_v35, %v11285_v54  ;;  %v11302_v55 = vld [vmem:[%s15423_s6] ss:$0 sm:$0xff] }
 0x3a9   : > { %v741_v2 = vadd.f32 %v11136_v57, %v11285_v54 }
 0x3aa   : > { %9684 = vtanh.f32 %v11270_v61  ;;  %v8460_v40 = vmul.f32 -1.442695, %v735_v17 }
 0x3ab   : > { %v8461_v43 = vmul.f32 -1.442695, %v741_v2 }
 0x3ac   : > { %v9681_v11 = vpop.eup %9680 }
 0x3ad   : > { %1087 = vrot.lane.b32.xlu0 %v9681_v11, %s15651_s22 }
 0x3af   : > { %v998_v20 = vpop.permute.xlu1 %997 }
 0x3b0   : > { %v9683_v26 = vpop.eup %9682  ;;  %v11278_v44 = vadd.f32 %v998_v20, %v878_v16  ;;  %v8462_v20 = vmul.f32 -1.442695, %v747_v62  ;;  %v765_v62 = vadd.f32 %v11153_v19, %v11285_v54 }
 0x3b1   : > { %1089 = vrot.lane.b32.xlu1 %v9683_v26, %s15651_s22 }
 0x3b2   : > { %9686 = vtanh.f32 %v11278_v44 }
 0x3b3   : > { %9688 = vpow2.f32 %v8458_v58 }
 0x3b4   : > { %v9685_v18 = vpop.eup %9684  ;;  %9690 = vpow2.f32 %v8459_v53 }
 0x3b5   : > { %1091 = vrot.lane.b32.xlu0 %v9685_v18, %s15651_s22  ;;  %9692 = vpow2.f32 %v8460_v40  ;;  %v753_v18 = vadd.f32 %v11141_v13, %v11285_v54 }
 0x3b6   : > { %9694 = vpow2.f32 %v8461_v43  ;;  %v8464_v43 = vmul.f32 -1.442695, %v759_v4 }
 0x3b7   : > { %v8463_v58 = vmul.f32 -1.442695, %v753_v18 }
 0x3bc   : > { %v9687_v6 = vpop.eup %9686 }
 0x3bd   : > { %1093 = vrot.lane.b32.xlu1 %v9687_v6, %s15651_s22  ;;  %v9689_v11 = vpop.eup %9688 }
 0x3be   : > { %v1039_v3 = vadd.f32 1.0, %v9689_v11  ;;  %v9691_v48 = vpop.eup %9690 }
 0x3bf   : > { %v1040_v25 = vadd.f32 1.0, %v9691_v48  ;;  %v9693_v26 = vpop.eup %9692 }
 0x3c0   : > { %9696 = vrcp.f32 %v1039_v3  ;;  %v1041_v16 = vadd.f32 1.0, %v9693_v26  ;;  %v9695_v35 = vpop.eup %9694 }
 0x3c1   : > { %9698 = vrcp.f32 %v1040_v25  ;;  %v1042_v57 = vadd.f32 1.0, %v9695_v35 }
 0x3c2   : > { %9700 = vrcp.f32 %v1041_v16 }
 0x3c3   : > { %9702 = vpow2.f32 %v8462_v20 }
 0x3c4   : > { %9704 = vrcp.f32 %v1042_v57 }
 0x3c5   : > { %9706 = vpow2.f32 %v8463_v58  ;;  %v8465_v58 = vmul.f32 -1.442695, %v765_v62 }
 0x3c6   : > { %9708 = vpow2.f32 %v8464_v43 }
 0x3ca   : > { %v9697_v6 = vpop.eup %9696 }
 0x3cb   : > { %v9699_v53 = vpop.eup %9698 }
 0x3cc   : > { %v9701_v3 = vpop.eup %9700 }
 0x3cd   : > { %v9703_v26 = vpop.eup %9702 }
 0x3ce   : > { %v9705_v35 = vpop.eup %9704  ;;  %v1043_v18 = vadd.f32 1.0, %v9703_v26 }
 0x3d0   : > { %9710 = vrcp.f32 %v1043_v18 }
 0x3d1   : > { %9712 = vpow2.f32 %v8465_v58 }
 0x405   : > { %v1080_v7 = vpop.permute.xlu0 %1079 }
 0x406   : > { %v11304_v27 = vmul.f32 %v9697_v6, %v1080_v7  ;;  %v9707_v7 = vpop.eup %9706 }
 0x407   : > { %v1044_v19 = vadd.f32 1.0, %v9707_v7 }
 0x408   : > { %v1111_v13 = vmul.f32 %v11302_v55, %v11304_v27 }
 0x409   : > { %v1082_v17 = vpop.permute.xlu1 %1081  ;;  %9714 = vrcp.f32 %v1044_v19 }
 0x40a   : > { %v11310_v40 = vmul.f32 %v9699_v53, %v1082_v17  ;;  %v1119_v2 = vsel %vm415_vm0, %v1111_v13, 0.0  ;;  %v9709_v53 = vpop.eup %9708 }
 0x40b   : > { %1120 = vadd.xlane.f32.xlu0 %v1119_v2  ;;  %v1045_v17 = vadd.f32 1.0, %v9709_v53  ;;  %v9711_v2 = vpop.eup %9710 }
 0x40c   : > { %v1112_v11 = vmul.f32 %v11302_v55, %v11310_v40 }
 0x40d   : > { %v1084_v48 = vpop.permute.xlu0 %1083  ;;  %9716 = vrcp.f32 %v1045_v17 }
 0x40e   : > { %v11315_v25 = vmul.f32 %v9701_v3, %v1084_v48  ;;  %v1122_v50 = vsel %vm415_vm0, %v1112_v11, 0.0  ;;  %v9713_v3 = vpop.eup %9712 }
 0x40f   : > { %1123 = vadd.xlane.f32.xlu1 %v1122_v50  ;;  %v1046_v26 = vadd.f32 1.0, %v9713_v3  ;;  %v10684_v3 = vmov 0  }
 0x410   : > { %v1113_v16 = vmul.f32 %v11302_v55, %v11315_v25  ;;  %9260 = vset.pattern.permute.xlu1 %v10684_v3  ;;  %9266 = vset.pattern.permute.xlu0 %v10684_v3  ;;  %v2816_v3 = vrot.slane %v10899_v21, 2 }
 0x411   : > { %v1086_v20 = vpop.permute.xlu1 %1085  ;;  %9718 = vrcp.f32 %v1046_v26  ;;  %v11353_v26 = vld [vmem:[%s10863_s11 + $0x8] sm:$0xff] }
 0x412   : > { %v11322_v57 = vmul.f32 %v9705_v35, %v1086_v20  ;;  %v1125_v6 = vsel %vm415_vm0, %v1113_v16, 0.0  ;;  %15687 = vst [vmem:[#allocation35_spill] sm:$0xff] %v11353_v26 }
 0x413   : > { %1126 = vadd.xlane.f32.xlu0 %v1125_v6  ;;  %v9715_v50 = vpop.eup %9714 }
 0x414   : > { %v1114_v4 = vmul.f32 %v11302_v55, %v11322_v57 }
 0x416   : > { %v1128_v13 = vsel %vm415_vm0, %v1114_v4, 0.0 }
 0x417   : > { %1129 = vadd.xlane.f32.xlu0 %v1128_v13  ;;  %v9717_v6 = vpop.eup %9716 }
 0x41b   : > { %v9719_v19 = vpop.eup %9718 }
 0x41f   : > { %v1088_v43 = vpop.permute.xlu0 %1087 }
 0x420   : > { %v11328_v11 = vmul.f32 %v9711_v2, %v1088_v43 }
 0x422   : > { %v1115_v48 = vmul.f32 %v11302_v55, %v11328_v11 }
 0x423   : > { %v1090_v62 = vpop.permute.xlu1 %1089 }
 0x424   : > { %v1131_v16 = vsel %vm415_vm0, %v1115_v48, 0.0  ;;  %v11333_v35 = vmul.f32 %v9715_v50, %v1090_v62  ;;  %v11349_v48 = vld [vmem:[%s10863_s11] sm:$0xff]  ;;  %v15461_v62 = vrot.slane %v11353_v26, 2 }
 0x425   : > { %1132 = vadd.xlane.f32.xlu1 %v1131_v16  ;;  %15686 = vst [vmem:[#allocation34_spill] sm:$0xff] %v11349_v48  ;;  %v15464_v50 = vrot.slane %v11349_v48, 2  ;;  %v11357_v16 = vld [vmem:[%s10863_s11 + $0x10] sm:$0xff] }
 0x426   : > { %v1116_v20 = vmul.f32 %v11302_v55, %v11333_v35  ;;  %15688 = vst [vmem:[#allocation36_spill] sm:$0xff] %v11357_v16 }
 0x427   : > { %v1092_v7 = vpop.permute.xlu0 %1091  ;;  %8999 = vpush %v15464_v50  ;;  %v2821_v50 = vrot.slane %v10933_v33, 2 }
 0x428   : > { %v1134_v18 = vsel %vm415_vm0, %v1116_v20, 0.0  ;;  %v11338_v58 = vmul.f32 %v9717_v6, %v1092_v7  ;;  %v11361_v20 = vld [vmem:[%s10863_s11 + $0x18] sm:$0xff]  ;;  %v11367_v6 = vld [vmem:[%s10863_s11 + $0x20] sm:$0xff]  ;;  %9001 = vpush %v15461_v62  ;;  %v2818_v62 = vrot.slane %v10920_v29, 2 }
 0x429   : > { %1135 = vadd.xlane.f32.xlu0 %v1134_v18  ;;  %15689 = vst [vmem:[#allocation37_spill] sm:$0xff] %v11361_v20  ;;  %v15462_v18 = vrot.slane %v11361_v20, 2  ;;  %15690 = vst [vmem:[#allocation38_spill] sm:$0xff] %v11367_v6  ;;  %v15463_v7 = vrot.slane %v11367_v6, 2 }
 0x42a   : > { %v1117_v4 = vmul.f32 %v11302_v55, %v11338_v58 }
 0x42c   : > { %v1137_v13 = vsel %vm415_vm0, %v1117_v4, 0.0  ;;  %v11373_v4 = vld [vmem:[%s10863_s11 + $0x28] sm:$0xff] }
 0x42d   : > { %1138 = vadd.xlane.f32.xlu1 %v1137_v13  ;;  %15691 = vst [vmem:[#allocation39_spill] sm:$0xff] %v11373_v4  ;;  %v15465_v13 = vrot.slane %v11373_v4, 2 }
 0x42f   : > { %v1094_v53 = vpop.permute.xlu1 %1093 }
 0x430   : > { %v11343_v17 = vmul.f32 %v9719_v19, %v1094_v53  ;;  %v11379_v19 = vld [vmem:[%s10863_s11 + $0x30] sm:$0xff] }
 0x431   : > { %15692 = vst [vmem:[#allocation40_spill] sm:$0xff] %v11379_v19  ;;  %v15468_v53 = vrot.slane %v11379_v19, 2  ;;  %v2823_v19 = vrot.slane %v10947_v39, 2 }
 0x432   : > { %v1118_v2 = vmul.f32 %v11302_v55, %v11343_v17  ;;  %v15460_v55 = vrot.slane %v11357_v16, 2 }
 0x434   : > { %v1140_v43 = vsel %vm415_vm0, %v1118_v2, 0.0  ;;  %9003 = vpush %v15460_v55  ;;  %v11385_v2 = vld [vmem:[%s10863_s11 + $0x38] sm:$0xff]  ;;  %v2817_v55 = vrot.slane %v10917_v28, 2 }
 0x435   : > { %1141 = vadd.xlane.f32.xlu0 %v1140_v43  ;;  %9005 = vpush %v15462_v18  ;;  %15693 = vst [vmem:[#allocation41_spill] sm:$0xff] %v11385_v2  ;;  %v15467_v43 = vrot.slane %v11385_v2, 2  ;;  %v2819_v18 = vrot.slane %v10923_v30, 2  ;;  %v15695_v2 = vrot.slane %v10871_v9, 1 }
 0x436   : > { %9007 = vpush %v15463_v7  ;;  %v2820_v7 = vrot.slane %v10930_v32, 2 }
 0x437   : > { %9009 = vpush %v15465_v13  ;;  %v2822_v13 = vrot.slane %v10941_v37, 2 }
 0x438   : > { %9011 = vpush %v15468_v53 }
 0x439   : > { %9013 = vpush %v15467_v43  ;;  %v15694_v43 = vrot.slane %v10868_v8, 1  ;;  %v15696_v8 = vrot.slane %v10874_v10, 1 }
 0x43a   : > { %9015 = vpush %v2816_v3  ;;  %v11407_v3 = vld [vmem:[#allocation2] ss:$0 sm:$0xff] }
 0x43b   : > { %9017 = vpush %v2817_v55  ;;  %v1181_v53 = vsel %vm569_vm1, %v15694_v43, 0.0 }
 0x43c   : > { %9019 = vpush %v2818_v62  ;;  %vm1189_vm3 = vcmp.gt.f32.partialorder %v1181_v53, 0.0  ;;  %v1182_v62 = vsel %vm569_vm1, %v15695_v2, 0.0 }
 0x43d   : > { %9021 = vpush %v2819_v18  ;;  %vm1190_vm5 = vcmp.gt.f32.partialorder %v1182_v62, 0.0  ;;  %v15701_v62 = vld [vmem:[#allocation14_spill] sm:$0xff] }
 0x43e   : > { %9023 = vpush %v2820_v7 }
 0x43f   : > { %9025 = vpush %v2821_v50 }
 0x440   : > { %9027 = vpush %v2822_v13 }
 0x441   : > { %9029 = vpush %v2823_v19  ;;  %v1183_v19 = vsel %vm569_vm1, %v15696_v8, 0.0 }
 0x442   : > { %vm1191_vm6 = vcmp.gt.f32.partialorder %v1183_v19, 0.0 }
 0x498   : > { %v1121_v55 = vpop.xlane.xlu0 %1120 }
 0x499   : > { %v1149_v18 = vadd.f32 %v11407_v3, %v1121_v55 }
 0x49b   : > { %v1197_v7 = vsel %vm1189_vm3, %v1149_v18, -1e+30  ;;  %v15697_v18 = vrot.slane %v10880_v14, 1  ;;  %v11429_v14 = vcvt.s32.f32 %v11104_v36 }
 0x49c   : > { %v1206_v50 = vsel %vm1205_vm4, %v1197_v7, -inf  ;;  %v1124_v13 = vpop.xlane.xlu1 %1123 }
 0x49d   : > { %v1207_v43 = vrot.slane %v1206_v50, 4  ;;  %v1150_v4 = vadd.f32 %v11407_v3, %v1124_v13  ;;  %v1184_v20 = vsel %vm569_vm1, %v15697_v18, 0.0 }
 0x49e   : > { %vm1192_vm7 = vcmp.gt.f32.partialorder %v1184_v20, 0.0 }
 0x49f   : > { %v1208_v6 = vmax.f32 %v1206_v50, %v1207_v43  ;;  %v1198_v9 = vsel %vm1190_vm5, %v1150_v4, -1e+30 }
 0x4a0   : > { %v1213_v2 = vsel %vm1205_vm4, %v1198_v9, -inf  ;;  %v1127_v55 = vpop.xlane.xlu0 %1126 }
 0x4a1   : > { %v1209_v16 = vrot.slane %v1208_v6, 2  ;;  %v1214_v26 = vrot.slane %v1213_v2, 4  ;;  %v1151_v10 = vadd.f32 %v11407_v3, %v1127_v55 }
 0x4a3   : > { %v1210_v48 = vmax.f32 %v1208_v6, %v1209_v16  ;;  %v1215_v8 = vmax.f32 %v1213_v2, %v1214_v26  ;;  %v1199_v39 = vsel %vm1191_vm6, %v1151_v10, -1e+30 }
 0x4a4   : > { %v1220_v50 = vsel %vm1205_vm4, %v1199_v39, -inf  ;;  %v1130_v4 = vpop.xlane.xlu0 %1129 }
 0x4a5   : > { %v1211_v13 = vrot.slane %v1210_v48, 1  ;;  %v1216_v43 = vrot.slane %v1215_v8, 2  ;;  %v1221_v37 = vrot.slane %v1220_v50, 4  ;;  %v1152_v33 = vadd.f32 %v11407_v3, %v1130_v4 }
 0x4a7   : > { %v1212_v18 = vmax.f32 %v1210_v48, %v1211_v13  ;;  %v1217_v32 = vmax.f32 %v1215_v8, %v1216_v43  ;;  %v1222_v30 = vmax.f32 %v1220_v50, %v1221_v37  ;;  %v1200_v16 = vsel %vm1192_vm7, %v1152_v33, -1e+30 }
 0x4a8   : > { %v1227_v26 = vsel %vm1205_vm4, %v1200_v16, -inf  ;;  %v15698_v33 = vrot.slane %v10883_v15, 1 }
 0x4a9   : > { %vm1262_vm8 = vcmp.ge.f32.partialorder %v1197_v7, %v1212_v18  ;;  %v1218_v6 = vrot.slane %v1217_v32, 1  ;;  %v1223_v2 = vrot.slane %v1222_v30, 2  ;;  %v1228_v55 = vrot.slane %v1227_v26, 4 }
 0x4aa   : > { %vm1270_vm9 = vmand %vm1262_vm8, %vm1189_vm3  ;;  %v11439_v7 = vsel %vm569_vm1, %v15698_v33, 0.0 }
 0x4ab   : > { %v1278_v10 = vsel %vm1270_vm9, %v11429_v14, 8.0  ;;  %v1219_v29 = vmax.f32 %v1217_v32, %v1218_v6  ;;  %v1224_v4 = vmax.f32 %v1222_v30, %v1223_v2  ;;  %v1229_v28 = vmax.f32 %v1227_v26, %v1228_v55 }
 0x4ac   : > { %v1286_v36 = vsel %vm1205_vm4, %v1278_v10, inf  ;;  %vm1193_vm13 = vcmp.gt.f32.partialorder %v11439_v7, 0.0  ;;  %v15702_v6 = vrot.slane %v15701_v62, 1 }
 0x4ad   : > { %v1287_v48 = vrot.slane %v1286_v36, 4  ;;  %vm1263_vm10 = vcmp.ge.f32.partialorder %v1198_v9, %v1219_v29  ;;  %v1225_v37 = vrot.slane %v1224_v4, 1  ;;  %v1230_v8 = vrot.slane %v1229_v28, 2  ;;  %v15699_v9 = vld [vmem:[#allocation13_spill] sm:$0xff] }
 0x4ae   : > { %vm1271_vm11 = vmand %vm1263_vm10, %vm1190_vm5  ;;  %v15700_v15 = vrot.slane %v15699_v9, 1  ;;  %v11453_v2 = vsel %vm569_vm1, %v15702_v6, 0.0 }
 0x4af   : > { %v1288_v53 = vmin.f32 %v1286_v36, %v1287_v48  ;;  %v1279_v50 = vsel %vm1271_vm11, %v11429_v14, 8.0  ;;  %v1226_v13 = vmax.f32 %v1224_v4, %v1225_v37  ;;  %v1231_v32 = vmax.f32 %v1229_v28, %v1230_v8 }
 0x4b0   : > { %v1293_v30 = vsel %vm1205_vm4, %v1279_v50, inf  ;;  %v11448_v26 = vsel %vm569_vm1, %v15700_v15, 0.0  ;;  %vm1195_vm5 = vcmp.gt.f32.partialorder %v11453_v2, 0.0 }
 0x4b1   : > { %v1289_v43 = vrot.slane %v1288_v53, 2  ;;  %v1294_v18 = vrot.slane %v1293_v30, 4  ;;  %vm1264_vm12 = vcmp.ge.f32.partialorder %v1199_v39, %v1226_v13  ;;  %v1232_v29 = vrot.slane %v1231_v32, 1 }
 0x4b2   : > { %vm1272_vm14 = vmand %vm1264_vm12, %vm1191_vm6  ;;  %v1133_v4 = vpop.xlane.xlu1 %1132  ;;  %vm1194_vm3 = vcmp.gt.f32.partialorder %v11448_v26, 0.0 }
 0x4b3   : > { %v1290_v28 = vmin.f32 %v1288_v53, %v1289_v43  ;;  %v1295_v55 = vmin.f32 %v1293_v30, %v1294_v18  ;;  %v1280_v10 = vsel %vm1272_vm14, %v11429_v14, 8.0  ;;  %v1233_v39 = vmax.f32 %v1231_v32, %v1232_v29  ;;  %v15703_v30 = vld [vmem:[#allocation15_spill] sm:$0xff] }
 0x4b4   : > { %v1300_v36 = vsel %vm1205_vm4, %v1280_v10, inf  ;;  %v1153_v48 = vadd.f32 %v11407_v3, %v1133_v4  ;;  %v15704_v43 = vrot.slane %v15703_v30, 1 }
 0x4b5   : > { %v1296_v37 = vrot.slane %v1295_v55, 2  ;;  %v1301_v8 = vrot.slane %v1300_v36, 4  ;;  %vm1265_vm15 = vcmp.ge.f32.partialorder %v1200_v16, %v1233_v39  ;;  %v1291_v33 = vrot.slane %v1290_v28, 1 }
 0x4b6   : > { %vm1273_vm6 = vmand %vm1265_vm15, %vm1192_vm7  ;;  %v1201_v19 = vsel %vm1193_vm13, %v1153_v48, -1e+30  ;;  %v11469_v16 = vsel %vm569_vm1, %v15704_v43, 0.0  ;;  %v1136_v9 = vpop.xlane.xlu0 %1135  ;;  %v15705_v48 = vmov 0.0  }
 0x4b7   : > { %v1297_v53 = vmin.f32 %v1295_v55, %v1296_v37  ;;  %v1302_v50 = vmin.f32 %v1300_v36, %v1301_v8  ;;  %v1281_v13 = vsel %vm1273_vm6, %v11429_v14, 8.0  ;;  %v1234_v32 = vsel %vm1205_vm4, %v1201_v19, -inf }
 0x4b8   : > { %v1307_v18 = vsel %vm1205_vm4, %v1281_v13, inf  ;;  %v1235_v29 = vrot.slane %v1234_v32, 4  ;;  %v1292_v20 = vmin.f32 %v1290_v28, %v1291_v33  ;;  %v1154_v6 = vadd.f32 %v11407_v3, %v1136_v9 }
 0x4b9   : > { %v1303_v15 = vrot.slane %v1302_v50, 2  ;;  %v1308_v62 = vrot.slane %v1307_v18, 4  ;;  %v1298_v55 = vrot.slane %v1297_v53, 1  ;;  %vm1196_vm14 = vcmp.gt.f32.partialorder %v11469_v16, 0.0 }
 0x4ba   : > { %v1236_v10 = vmax.f32 %v1234_v32, %v1235_v29  ;;  %vm1342_vm7 = vcmp.eq.f32.partialorder %v11429_v14, %v1292_v20  ;;  %vm1366_vm8 = vcmp.lt.f32.partialorder %v11429_v14, %v1292_v20  ;;  %vm1390_vm9 = vcmp.gt.f32.partialorder %v11429_v14, %v1292_v20  ;;  %v1139_v20 = vpop.xlane.xlu1 %1138 }
 0x4bb   : > { %v1304_v39 = vmin.f32 %v1302_v50, %v1303_v15  ;;  %v1309_v4 = vmin.f32 %v1307_v18, %v1308_v62  ;;  %v1202_v36 = vsel %vm1194_vm3, %v1154_v6, -1e+30  ;;  %v8467_v37 = vsel %vm1342_vm7, 1.0, %v15705_v48 }
 0x4bc   : > { %v1237_v28 = vrot.slane %v1236_v10, 2  ;;  %v1241_v8 = vsel %vm1205_vm4, %v1202_v36, -inf  ;;  %v8475_v33 = vsel %vm1366_vm8, 1.0, %v15705_v48  ;;  %v1299_v13 = vmin.f32 %v1297_v53, %v1298_v55 }
 0x4bd   : > { %v1310_v32 = vrot.slane %v1309_v4, 2  ;;  %v1242_v30 = vrot.slane %v1241_v8, 4  ;;  %v9261_v43 = vpack.i.bf16 %v8475_v33, %v8467_v37  ;;  %v8483_v29 = vsel %vm1390_vm9, 1.0, %v15705_v48 }
 0x4be   : > { %v1238_v9 = vmax.f32 %v1236_v10, %v1237_v28  ;;  %vm1343_vm10 = vcmp.eq.f32.partialorder %v11429_v14, %v1299_v13  ;;  %vm1367_vm11 = vcmp.lt.f32.partialorder %v11429_v14, %v1299_v13  ;;  %vm1391_vm12 = vcmp.gt.f32.partialorder %v11429_v14, %v1299_v13 }
 0x4bf   : > { %v1311_v50 = vmin.f32 %v1309_v4, %v1310_v32  ;;  %v1243_v18 = vmax.f32 %v1241_v8, %v1242_v30  ;;  %v1155_v15 = vadd.f32 %v11407_v3, %v1139_v20  ;;  %9262 = vperm.xlu1 %9260, %v9261_v43   ;;  %v8468_v53 = vsel %vm1343_vm10, 1.0, %v15705_v48 }
 0x4c0   : > { %v1239_v62 = vrot.slane %v1238_v9, 1  ;;  %v9267_v6 = vpack.i.bf16 %v8468_v53, %v8483_v29  ;;  %v8476_v55 = vsel %vm1367_vm11, 1.0, %v15705_v48  ;;  %v8484_v10 = vsel %vm1391_vm12, 1.0, %v15705_v48 }
 0x4c1   : > { %v1244_v37 = vrot.slane %v1243_v18, 2  ;;  %v1203_v28 = vsel %vm1195_vm5, %v1155_v15, -1e+30  ;;  %v9272_v33 = vpack.i.bf16 %v8484_v10, %v8476_v55  ;;  %v1305_v21 = vrot.slane %v1304_v39, 1 }
 0x4c2   : > { %v1240_v13 = vmax.f32 %v1238_v9, %v1239_v62  ;;  %v1248_v4 = vsel %vm1205_vm4, %v1203_v28, -inf  ;;  %9268 = vperm.xlu0 %9266, %v9267_v6   ;;  %v1312_v8 = vrot.slane %v1311_v50, 1  ;;  %v1142_v53 = vpop.xlane.xlu0 %1141 }
 0x4c3   : > { %v1245_v32 = vmax.f32 %v1243_v18, %v1244_v37  ;;  %v1249_v30 = vrot.slane %v1248_v4, 4  ;;  %9273 = vperm.xlu1 %9260, %v9272_v33   ;;  %v1306_v43 = vmin.f32 %v1304_v39, %v1305_v21 }
 0x4c4   : > { %vm1266_vm15 = vcmp.ge.f32.partialorder %v1201_v19, %v1240_v13  ;;  %v1313_v29 = vmin.f32 %v1311_v50, %v1312_v8  ;;  %v1156_v50 = vadd.f32 %v11407_v3, %v1142_v53 }
 0x4c5   : > { %vm1274_vm6 = vmand %vm1266_vm15, %vm1193_vm13  ;;  %v1246_v20 = vrot.slane %v1245_v32, 1  ;;  %v1250_v15 = vmax.f32 %v1248_v4, %v1249_v30  ;;  %vm1344_vm7 = vcmp.eq.f32.partialorder %v11429_v14, %v1306_v43  ;;  %vm1368_vm8 = vcmp.lt.f32.partialorder %v11429_v14, %v1306_v43 }
 0x4c6   : > { %v1282_v9 = vsel %vm1274_vm6, %v11429_v14, 8.0  ;;  %v8469_v18 = vsel %vm1344_vm7, 1.0, %v15705_v48  ;;  %v8477_v21 = vsel %vm1368_vm8, 1.0, %v15705_v48  ;;  %vm1345_vm9 = vcmp.eq.f32.partialorder %v11429_v14, %v1313_v29 }
 0x4c7   : > { %v1314_v19 = vsel %vm1205_vm4, %v1282_v9, inf  ;;  %v1247_v39 = vmax.f32 %v1245_v32, %v1246_v20  ;;  %v1251_v7 = vrot.slane %v1250_v15, 2  ;;  %v9277_v6 = vpack.i.bf16 %v8477_v21, %v8469_v18 }
 0x4c8   : > { %v1315_v62 = vrot.slane %v1314_v19, 4  ;;  %v8470_v55 = vsel %vm1345_vm9, 1.0, %v15705_v48  ;;  %vm1392_vm13 = vcmp.gt.f32.partialorder %v11429_v14, %v1306_v43  ;;  %v1204_v37 = vsel %vm1196_vm14, %v1156_v50, -1e+30 }
 0x4c9   : > { %vm1267_vm10 = vcmp.ge.f32.partialorder %v1202_v36, %v1247_v39  ;;  %v1252_v10 = vmax.f32 %v1250_v15, %v1251_v7  ;;  %v8485_v33 = vsel %vm1392_vm13, 1.0, %v15705_v48  ;;  %v1255_v4 = vsel %vm1205_vm4, %v1204_v37, -inf  ;;  %9278 = vperm.xlu1 %9260, %v9277_v6  }
 0x4ca   : > { %v1316_v13 = vmin.f32 %v1314_v19, %v1315_v62  ;;  %vm1275_vm11 = vmand %vm1267_vm10, %vm1194_vm3  ;;  %v9282_v3 = vpack.i.bf16 %v8470_v55, %v8485_v33  ;;  %vm1369_vm12 = vcmp.lt.f32.partialorder %v11429_v14, %v1313_v29  ;;  %v1256_v36 = vrot.slane %v1255_v4, 4 }
 0x4cb   : > { %v1283_v8 = vsel %vm1275_vm11, %v11429_v14, 8.0  ;;  %v1253_v32 = vrot.slane %v1252_v10, 1  ;;  %v8478_v20 = vsel %vm1369_vm12, 1.0, %v15705_v48  ;;  %vm1393_vm15 = vcmp.gt.f32.partialorder %v11429_v14, %v1313_v29 }
 0x4cc   : > { %v1317_v30 = vrot.slane %v1316_v13, 2  ;;  %v1321_v43 = vsel %vm1205_vm4, %v1283_v8, inf  ;;  %v1257_v9 = vmax.f32 %v1255_v4, %v1256_v36  ;;  %v8486_v53 = vsel %vm1393_vm15, 1.0, %v15705_v48 }
 0x4cd   : > { %v1322_v15 = vrot.slane %v1321_v43, 4  ;;  %v1254_v26 = vmax.f32 %v1252_v10, %v1253_v32  ;;  %9283 = vperm.xlu1 %9260, %v9282_v3   ;;  %v9287_v39 = vpack.i.bf16 %v8486_v53, %v8478_v20 }
 0x4ce   : > { %v1318_v18 = vmin.f32 %v1316_v13, %v1317_v30  ;;  %v1258_v19 = vrot.slane %v1257_v9, 2 }
 0x4cf   : > { %v1323_v21 = vmin.f32 %v1321_v43, %v1322_v15  ;;  %vm1268_vm3 = vcmp.ge.f32.partialorder %v1203_v28, %v1254_v26 }
 0x4d0   : > { %vm1276_vm6 = vmand %vm1268_vm3, %vm1195_vm5  ;;  %v1319_v7 = vrot.slane %v1318_v18, 1  ;;  %v1259_v6 = vmax.f32 %v1257_v9, %v1258_v19 }
 0x4d1   : > { %v1324_v50 = vrot.slane %v1323_v21, 2  ;;  %v1284_v62 = vsel %vm1276_vm6, %v11429_v14, 8.0  ;;  %9288 = vperm.xlu1 %9260, %v9287_v39  }
 0x4d2   : > { %v1328_v29 = vsel %vm1205_vm4, %v1284_v62, inf  ;;  %v1320_v55 = vmin.f32 %v1318_v18, %v1319_v7  ;;  %v1260_v13 = vrot.slane %v1259_v6, 1 }
 0x4d3   : > { %v1325_v10 = vmin.f32 %v1323_v21, %v1324_v50  ;;  %v1329_v33 = vrot.slane %v1328_v29, 4 }
 0x4d4   : > { %vm1346_vm7 = vcmp.eq.f32.partialorder %v11429_v14, %v1320_v55  ;;  %vm1370_vm8 = vcmp.lt.f32.partialorder %v11429_v14, %v1320_v55  ;;  %v1261_v2 = vmax.f32 %v1259_v6, %v1260_v13  ;;  %vm1394_vm13 = vcmp.gt.f32.partialorder %v11429_v14, %v1320_v55 }
 0x4d5   : > { %v1330_v28 = vmin.f32 %v1328_v29, %v1329_v33  ;;  %v8471_v4 = vsel %vm1346_vm7, 1.0, %v15705_v48  ;;  %v8479_v3 = vsel %vm1370_vm8, 1.0, %v15705_v48  ;;  %v1326_v32 = vrot.slane %v1325_v10, 1 }
 0x4d6   : > { %v9292_v8 = vpack.i.bf16 %v8479_v3, %v8471_v4  ;;  %vm1269_vm5 = vcmp.ge.f32.partialorder %v1204_v37, %v1261_v2  ;;  %v8487_v16 = vsel %vm1394_vm13, 1.0, %v15705_v48 }
 0x4d7   : > { %v1331_v36 = vrot.slane %v1330_v28, 2  ;;  %vm1277_vm9 = vmand %vm1269_vm5, %vm1196_vm14  ;;  %v1327_v30 = vmin.f32 %v1325_v10, %v1326_v32  ;;  %vm2351_vm5 = vcmask 1045504  }
 0x4d8   : > { %9293 = vperm.xlu1 %9260, %v9292_v8   ;;  %v1285_v20 = vsel %vm1277_vm9, %v11429_v14, 8.0 }
 0x4d9   : > { %v1332_v43 = vmin.f32 %v1330_v28, %v1331_v36  ;;  %v1335_v15 = vsel %vm1205_vm4, %v1285_v20, inf  ;;  %vm1347_vm10 = vcmp.eq.f32.partialorder %v11429_v14, %v1327_v30  ;;  %vm1371_vm11 = vcmp.lt.f32.partialorder %v11429_v14, %v1327_v30 }
 0x4da   : > { %vm1395_vm12 = vcmp.gt.f32.partialorder %v11429_v14, %v1327_v30  ;;  %v1336_v26 = vrot.slane %v1335_v15, 4  ;;  %v8472_v37 = vsel %vm1347_vm10, 1.0, %v15705_v48  ;;  %v8480_v21 = vsel %vm1371_vm11, 1.0, %v15705_v48 }
 0x4db   : > { %v9297_v9 = vpack.i.bf16 %v8472_v37, %v8487_v16  ;;  %v1333_v53 = vrot.slane %v1332_v43, 1  ;;  %v8488_v19 = vsel %vm1395_vm12, 1.0, %v15705_v48 }
 0x4dc   : > { %v1337_v18 = vmin.f32 %v1335_v15, %v1336_v26  ;;  %v9302_v50 = vpack.i.bf16 %v8488_v19, %v8480_v21 }
 0x4dd   : > { %9298 = vperm.xlu1 %9260, %v9297_v9   ;;  %v1334_v39 = vmin.f32 %v1332_v43, %v1333_v53 }
 0x4de   : > { %v1338_v7 = vrot.slane %v1337_v18, 2 }
 0x4df   : > { %vm1348_vm14 = vcmp.eq.f32.partialorder %v11429_v14, %v1334_v39  ;;  %vm1372_vm15 = vcmp.lt.f32.partialorder %v11429_v14, %v1334_v39  ;;  %vm1396_vm3 = vcmp.gt.f32.partialorder %v11429_v14, %v1334_v39 }
 0x4e0   : > { %v1339_v62 = vmin.f32 %v1337_v18, %v1338_v7  ;;  %v8473_v6 = vsel %vm1348_vm14, 1.0, %v15705_v48  ;;  %v8481_v29 = vsel %vm1372_vm15, 1.0, %v15705_v48  ;;  %v8489_v28 = vsel %vm1396_vm3, 1.0, %v15705_v48 }
 0x4e1   : > { %9303 = vperm.xlu1 %9260, %v9302_v50   ;;  %v9307_v10 = vpack.i.bf16 %v8481_v29, %v8473_v6  ;;  %v1599_v50 = vstv %s11549_s25  ;;  %v1602_v29 = vstv %s11551_s18  ;;  %s8990_s25 = spop %8989 }
 0x4e2   : > { %v1340_v55 = vrot.slane %v1339_v62, 1  ;;  %s8992_s18 = spop %8991 }
 0x4e4   : > { %v1341_v33 = vmin.f32 %v1339_v62, %v1340_v55 }
 0x4e5   : > { %9308 = vperm.xlu1 %9260, %v9307_v10  }
 0x4e6   : > { %vm1349_vm6 = vcmp.eq.f32.partialorder %v11429_v14, %v1341_v33  ;;  %vm1373_vm7 = vcmp.lt.f32.partialorder %v11429_v14, %v1341_v33  ;;  %vm1397_vm8 = vcmp.gt.f32.partialorder %v11429_v14, %v1341_v33 }
 0x4e7   : > { %v8474_v13 = vsel %vm1349_vm6, 1.0, %v15705_v48  ;;  %v8482_v4 = vsel %vm1373_vm7, 1.0, %v15705_v48  ;;  %v8490_v3 = vsel %vm1397_vm8, 1.0, %v15705_v48 }
 0x4e8   : > { %v9312_v2 = vpack.i.bf16 %v8474_v13, %v8489_v28  ;;  %v1658_v28 = vstv %s8986_s21 }
 0x4e9   : > { %1499 = vperm.xlu1 %9260, %v8482_v4  }
 0x4ea   : > { %9313 = vperm.xlu0 %9266, %v9312_v2  }
 0x4ee   : > { %1555 = vperm.xlu0 %9266, %v8490_v3  }
 0x53e   : > { %v9263_v8 = vpop.permute.xlu1 %9262 }
 0x53f   : > { %v9265_v32 = vunpack.i.h.bf16 %v9263_v8  ;;  %v9264_v36 = vunpack.i.l.bf16 %v9263_v8 }
 0x541   : > { %v1502_v30 = vmul.f32 %v9265_v32, %v11002_v34  ;;  %v1454_v43 = vmul.f32 %v9264_v36, %v11304_v27  ;;  %v1574_v20 = vmul.f32 %v9264_v36, %v11231_v45  ;;  %v9269_v15 = vpop.permute.xlu0 %9268  ;;  %v1655_v27 = vstv %s8984_s19 }
 0x542   : > { %v9274_v26 = vpop.permute.xlu1 %9273  ;;  %v9271_v37 = vunpack.i.h.bf16 %v9269_v15  ;;  %v9270_v16 = vunpack.i.l.bf16 %v9269_v15  ;;  %v1678_v13 = vmul.f32 %v1655_v27, %v11002_v34 }
 0x543   : > { %v1582_v9 = vadd.f32 %v1574_v20, %v1502_v30  ;;  %v9276_v53 = vunpack.i.h.bf16 %v9274_v26  ;;  %v9275_v18 = vunpack.i.l.bf16 %v9274_v26  ;;  %v1510_v21 = vadd.f32 %v1502_v30, %v1454_v43 }
 0x544   : > { %v1455_v19 = vmul.f32 %v9271_v37, %v11310_v40  ;;  %v1575_v39 = vmul.f32 %v9271_v37, %v11237_v12  ;;  %v1558_v7 = vmul.f32 %v9270_v16, %v11010_v42  ;;  %v1679_v30 = vmul.f32 %v1658_v28, %v11000_v31 }
 0x545   : > { %v1503_v45 = vmul.f32 %v9275_v18, %v11000_v31  ;;  %v1559_v55 = vmul.f32 %v9276_v53, %v11025_v52 }
 0x546   : > { %v1566_v62 = vadd.f32 %v1558_v7, %v1510_v21  ;;  %v1590_v6 = vadd.f32 %v1582_v9, %v1558_v7 }
 0x547   : > { %v1511_v10 = vadd.f32 %v1503_v45, %v1455_v19  ;;  %v1583_v33 = vadd.f32 %v1575_v39, %v1503_v45 }
 0x548   : > { %v1622_v40 = vmul.f32 %v1599_v50, %v1566_v62  ;;  %v1694_v2 = vmul.f32 %v1599_v50, %v1590_v6  ;;  %v9279_v42 = vpop.permute.xlu1 %9278 }
 0x549   : > { %v1567_v12 = vadd.f32 %v1559_v55, %v1511_v10  ;;  %v1591_v4 = vadd.f32 %v1583_v33, %v1559_v55  ;;  %v9281_v3 = vunpack.i.h.bf16 %v9279_v42  ;;  %v9280_v8 = vunpack.i.l.bf16 %v9279_v42 }
 0x54a   : > { %v11576_v32 = vadd.f32 %v1678_v13, %v1622_v40  ;;  %v11578_v36 = vadd.f32 %v1694_v2, %v1678_v13 }
 0x54b   : > { %v1623_v43 = vmul.f32 %v1602_v29, %v1567_v12  ;;  %v1695_v52 = vmul.f32 %v1602_v29, %v1591_v4  ;;  %v1504_v20 = vmul.f32 %v9281_v3, %v11007_v41  ;;  %v1456_v34 = vmul.f32 %v9280_v8, %v11315_v25 }
 0x54c   : > { %v1576_v15 = vmul.f32 %v9280_v8, %v11243_v46  ;;  %v9284_v26 = vpop.permute.xlu1 %9283  ;;  %v1718_v9 = vrot.slane %v11576_v32, 1  ;;  %v1661_v25 = vstv %s8988_s23  ;;  %v1605_v29 = vstv %s11553_s26  ;;  %s8994_s26 = spop %8993 }
 0x54d   : > { %v11584_v37 = vadd.f32 %v1679_v30, %v1623_v43  ;;  %v11586_v16 = vadd.f32 %v1695_v52, %v1679_v30  ;;  %v9285_v18 = vunpack.i.l.bf16 %v9284_v26  ;;  %v9286_v31 = vunpack.i.h.bf16 %v9284_v26 }
 0x54e   : > { %v1584_v53 = vadd.f32 %v1576_v15, %v1504_v20  ;;  %v11590_v21 = vsel %vm569_vm1, %v1718_v9, 0.0  ;;  %v1512_v39 = vadd.f32 %v1504_v20, %v1456_v34  ;;  %v1680_v55 = vmul.f32 %v1661_v25, %v11007_v41 }
 0x54f   : > { %v1719_v19 = vrot.slane %v11584_v37, 1  ;;  %v1560_v46 = vmul.f32 %v9285_v18, %v11022_v51  ;;  %1782 = vrot.lane.b32.xlu1 %v11590_v21, %s15653_s20  ;;  %v1457_v10 = vmul.f32 %v9286_v31, %v11322_v57  ;;  %v1577_v51 = vmul.f32 %v9286_v31, %v11248_v60 }
 0x550   : > { %v9289_v7 = vpop.permute.xlu1 %9288  ;;  %v1664_v3 = vstv %s8990_s25  ;;  %v1608_v52 = vstv %s11555_s27  ;;  %s8996_s27 = spop %8995 }
 0x551   : > { %v11597_v50 = vsel %vm569_vm1, %v1719_v19, 0.0  ;;  %v1568_v27 = vadd.f32 %v1560_v46, %v1512_v39  ;;  %v1592_v45 = vadd.f32 %v1584_v53, %v1560_v46  ;;  %v9291_v62 = vunpack.i.h.bf16 %v9289_v7 }
 0x552   : > { %v9290_v6 = vunpack.i.l.bf16 %v9289_v7  ;;  %1784 = vrot.lane.b32.xlu0 %v11597_v50, %s15653_s20  ;;  %v1681_v20 = vmul.f32 %v1664_v3, %v11005_v38 }
 0x553   : > { %v1624_v33 = vmul.f32 %v1605_v29, %v1568_v27  ;;  %v1696_v13 = vmul.f32 %v1605_v29, %v1592_v45  ;;  %v1561_v40 = vmul.f32 %v9291_v62, %v11032_v56  ;;  %v1667_v27 = vstv %s8992_s18 }
 0x554   : > { %v1505_v28 = vmul.f32 %v9290_v6, %v11005_v38 }
 0x555   : > { %v11607_v4 = vadd.f32 %v1680_v55, %v1624_v33  ;;  %v11609_v42 = vadd.f32 %v1696_v13, %v1680_v55 }
 0x556   : > { %v1513_v2 = vadd.f32 %v1505_v28, %v1457_v10  ;;  %v1585_v12 = vadd.f32 %v1577_v51, %v1505_v28  ;;  %v1611_v10 = vstv %s11557_s28  ;;  %s8998_s28 = spop %8997 }
 0x557   : > { %v9294_v41 = vpop.permute.xlu1 %9293  ;;  %v1720_v60 = vrot.slane %v11607_v4, 1 }
 0x558   : > { %v1569_v8 = vadd.f32 %v1561_v40, %v1513_v2  ;;  %v1593_v57 = vadd.f32 %v1585_v12, %v1561_v40  ;;  %v9296_v30 = vunpack.i.h.bf16 %v9294_v41  ;;  %v9295_v43 = vunpack.i.l.bf16 %v9294_v41 }
 0x559   : > { %v11617_v9 = vsel %vm569_vm1, %v1720_v60, 0.0  ;;  %v1682_v40 = vmul.f32 %v1667_v27, %v11019_v49  ;;  %v1670_v2 = vstv %s8994_s26 }
 0x55a   : > { %v1625_v34 = vmul.f32 %v1608_v52, %v1569_v8  ;;  %v1697_v15 = vmul.f32 %v1608_v52, %v1593_v57  ;;  %v1506_v56 = vmul.f32 %v9296_v30, %v11019_v49  ;;  %v1578_v26 = vmul.f32 %v9295_v43, %v11259_v5  ;;  %1786 = vrot.lane.b32.xlu1 %v11617_v9, %s15653_s20 }
 0x55b   : > { %v1458_v53 = vmul.f32 %v9295_v43, %v11328_v11  ;;  %v1683_v49 = vmul.f32 %v1670_v2, %v11017_v47 }
 0x55c   : > { %v11622_v18 = vadd.f32 %v1681_v20, %v1625_v34  ;;  %v11624_v31 = vadd.f32 %v1697_v15, %v1681_v20  ;;  %v1586_v19 = vadd.f32 %v1578_v26, %v1506_v56  ;;  %v9299_v38 = vpop.permute.xlu1 %9298  ;;  %v1614_v34 = vstv %s11559_s13 }
 0x55d   : > { %v9300_v25 = vunpack.i.l.bf16 %v9299_v38  ;;  %v9301_v39 = vunpack.i.h.bf16 %v9299_v38  ;;  %v1514_v46 = vadd.f32 %v1506_v56, %v1458_v53 }
 0x55e   : > { %v1721_v5 = vrot.slane %v11622_v18, 1 }
 0x55f   : > { %v1562_v7 = vmul.f32 %v9300_v25, %v11041_v0  ;;  %v1459_v51 = vmul.f32 %v9301_v39, %v11333_v35  ;;  %v1579_v33 = vmul.f32 %v9301_v39, %v11265_v23 }
 0x560   : > { %v9304_v11 = vpop.permute.xlu1 %9303  ;;  %v11629_v45 = vsel %vm569_vm1, %v1721_v5, 0.0 }
 0x561   : > { %v1570_v62 = vadd.f32 %v1562_v7, %v1514_v46  ;;  %v1594_v6 = vadd.f32 %v1586_v19, %v1562_v7  ;;  %v9306_v29 = vunpack.i.h.bf16 %v9304_v11  ;;  %v9305_v55 = vunpack.i.l.bf16 %v9304_v11  ;;  %1788 = vrot.lane.b32.xlu0 %v11629_v45, %s15653_s20 }
 0x562   : > { %v1673_v11 = vstv %s8996_s27 }
 0x563   : > { %v1626_v13 = vmul.f32 %v1611_v10, %v1570_v62  ;;  %v1698_v0 = vmul.f32 %v1611_v10, %v1594_v6  ;;  %v1507_v28 = vmul.f32 %v9305_v55, %v11017_v47  ;;  %v1563_v12 = vmul.f32 %v9306_v29, %v11048_v1 }
 0x564   : > { %v9309_v3 = vpop.permute.xlu1 %9308 }
 0x565   : > { %v1515_v41 = vadd.f32 %v1507_v28, %v1459_v51  ;;  %v1587_v8 = vadd.f32 %v1579_v33, %v1507_v28  ;;  %v9311_v57 = vunpack.i.h.bf16 %v9309_v3  ;;  %v9310_v30 = vunpack.i.l.bf16 %v9309_v3 }
 0x566   : > { %v11639_v43 = vadd.f32 %v1682_v40, %v1626_v13  ;;  %v11641_v35 = vadd.f32 %v1698_v0, %v1682_v40  ;;  %v1617_v13 = vstv %s11561_s14  ;;  %v1676_v0 = vstv %s8998_s28 }
 0x567   : > { %v1571_v23 = vadd.f32 %v1563_v12, %v1515_v41  ;;  %v1595_v52 = vadd.f32 %v1587_v8, %v1563_v12  ;;  %v1508_v60 = vmul.f32 %v9311_v57, %v11038_v63  ;;  %v1460_v20 = vmul.f32 %v9310_v30, %v11338_v58 }
 0x568   : > { %v1580_v1 = vmul.f32 %v9310_v30, %v11270_v61  ;;  %v1500_v15 = vpop.permute.xlu1 %1499  ;;  %v1722_v56 = vrot.slane %v11639_v43, 1  ;;  %v1620_v12 = vstv %s11563_s15  ;;  %v1685_v41 = vmul.f32 %v1676_v0, %v11036_v59  ;;  %s12197_s15 = spop %8999 }
 0x569   : > { %v1627_v26 = vmul.f32 %v1614_v34, %v1571_v23  ;;  %v1699_v53 = vmul.f32 %v1614_v34, %v1595_v52  ;;  %v9314_v19 = vpop.permute.xlu0 %9313  ;;  %v1516_v38 = vadd.f32 %v1508_v60, %v1460_v20  ;;  %v1509_v25 = vmul.f32 %v1500_v15, %v11036_v59  ;;  %v15712_v15 = vld [vmem:[#allocation25_spill] sm:$0xff]  ;;  %s12199_s19 = spop %9001 }
 0x56a   : > { %v9316_v39 = vunpack.i.h.bf16 %v9314_v19  ;;  %v9315_v5 = vunpack.i.l.bf16 %v9314_v19  ;;  %v1588_v46 = vadd.f32 %v1580_v1, %v1508_v60  ;;  %v11651_v58 = vsel %vm569_vm1, %v1722_v56, 0.0  ;;  %v15713_v56 = vld [vmem:[#allocation26_spill] sm:$0xff]  ;;  %v15715_v19 = vld [vmem:[#allocation28_spill] sm:$0xff]  ;;  %s12201_s21 = spop %9003 }
 0x56b   : > { %1790 = vrot.lane.b32.xlu1 %v11651_v58, %s15653_s20  ;;  %v11655_v47 = vadd.f32 %v1683_v49, %v1627_v26  ;;  %v11657_v61 = vadd.f32 %v1699_v53, %v1683_v49  ;;  %v15714_v53 = vld [vmem:[#allocation27_spill] sm:$0xff]  ;;  %s12203_s23 = spop %9005 }
 0x56c   : > { %v1461_v7 = vmul.f32 %v9316_v39, %v11343_v17  ;;  %v1564_v27 = vmul.f32 %v9315_v5, %v11053_v24  ;;  %v1581_v62 = vmul.f32 %v9316_v39, %v11278_v44  ;;  %v1684_v24 = vmul.f32 %v1673_v11, %v11038_v63  ;;  %v15717_v39 = vld [vmem:[#allocation30_spill] sm:$0xff]  ;;  %s12205_s25 = spop %9007 }
 0x56d   : > { %v1556_v6 = vpop.permute.xlu0 %1555  ;;  %v1723_v29 = vrot.slane %v11655_v47, 1  ;;  %s12207_s18 = spop %9009 }
 0x56e   : > { %v1572_v55 = vadd.f32 %v1564_v27, %v1516_v38  ;;  %v1596_v10 = vadd.f32 %v1588_v46, %v1564_v27  ;;  %v1565_v51 = vmul.f32 %v1556_v6, %v11060_v22  ;;  %v1517_v33 = vadd.f32 %v1509_v25, %v1461_v7  ;;  %v15716_v38 = vld [vmem:[#allocation29_spill] sm:$0xff]  ;;  %v15718_v46 = vld [vmem:[#allocation31_spill] sm:$0xff]  ;;  %v15719_v7 = vld [vmem:[#allocation24_spill] sm:$0xff]  ;;  %s12209_s26 = spop %9011 }
 0x56f   : > { %v1589_v28 = vadd.f32 %v1581_v62, %v1509_v25  ;;  %v11666_v40 = vsel %vm569_vm1, %v1723_v29, 0.0  ;;  %s12211_s27 = spop %9013 }
 0x570   : > { %v1573_v17 = vadd.f32 %v1565_v51, %v1517_v33  ;;  %v1628_v2 = vmul.f32 %v1617_v13, %v1572_v55  ;;  %v1700_v44 = vmul.f32 %v1617_v13, %v1596_v10  ;;  %1792 = vrot.lane.b32.xlu0 %v11666_v40, %s15653_s20  ;;  %s9016_s28 = spop %9015 }
 0x571   : > { %v1597_v3 = vadd.f32 %v1589_v28, %v1565_v51  ;;  %v15720_v28 = vld [vmem:[#allocation32_spill] sm:$0xff]  ;;  %s9018_s13 = spop %9017 }
 0x572   : > { %v1629_v22 = vmul.f32 %v1620_v12, %v1573_v17  ;;  %v11673_v8 = vadd.f32 %v1684_v24, %v1628_v2  ;;  %v11675_v57 = vadd.f32 %v1700_v44, %v1684_v24  ;;  %s9020_s14 = spop %9019 }
 0x573   : > { %v1701_v30 = vmul.f32 %v1620_v12, %v1597_v3 }
 0x574   : > { %15706 = vst [vmem:[#allocation13_spill] sm:$0xff] %v11673_v8  ;;  %15707 = vst [vmem:[#allocation14_spill] sm:$0xff] %v11675_v57  ;;  %v11677_v23 = vadd.f32 %v1685_v41, %v1629_v22  ;;  %v1724_v63 = vrot.slane %v11673_v8, 1 }
 0x575   : > { %v11680_v52 = vadd.f32 %v1701_v30, %v1685_v41 }
 0x576   : > { %15708 = vst [vmem:[#allocation15_spill] sm:$0xff] %v11677_v23  ;;  %v11683_v60 = vsel %vm569_vm1, %v1724_v63, 0.0  ;;  %v1725_v20 = vrot.slane %v11677_v23, 1 }
 0x577   : > { %15709 = vst [vmem:[#allocation42_spill] sm:$0xff] %v11680_v52  ;;  %15710 = vst [vmem:[#allocation43_spill] sm:$0xff] %v11683_v60  ;;  %1794 = vrot.lane.b32.xlu1 %v11683_v60, %s15653_s20 }
 0x578   : > { %v11689_v59 = vsel %vm569_vm1, %v1725_v20, 0.0 }
 0x579   : > { %15711 = vst [vmem:[#allocation44_spill] sm:$0xff] %v11689_v59  ;;  %1796 = vrot.lane.b32.xlu0 %v11689_v59, %s15653_s20 }
 0x5c1   : > { %v1783_v34 = vpop.permute.xlu1 %1782 }
 0x5c2   : > { %v1806_v49 = vsel %vm415_vm0, %v11576_v32, %v1783_v34 }
 0x5c3   : > { %8491 = vmatmul.mubr.msk.f32.vlgmr.msra.gmra.mrb[8].mxu0 %vm629_vm2, %v1806_v49 }
 0x5c4   : > { %v1785_v1 = vpop.permute.xlu0 %1784  ;;  %1908 = vmatprep.mubr.f32.mxu0 %v15705_v48  ;;  %8898 = vmatpush1.bf16.msra.mxu0 %v15712_v15 }
 0x5c5   : > { %8900 = vmatprep.subr.bf16.mxu0 %v15713_v56  ;;  %v1807_v26 = vsel %vm415_vm0, %v11584_v37, %v1785_v1 }
 0x5c7   : > { %8492 = vmatmul.mubr.msk.f32.gmra.mrb[10].mxu0 %vm629_vm2, %v1807_v26 }
 0x5c8   : > { %1914 = vmatprep.mubr.f32.mxu0 %v15705_v48  ;;  %8902 = vmatpush1.bf16.msra.mxu0 %v15714_v53 }
 0x5c9   : > { %8904 = vmatprep.subr.bf16.mxu0 %v15715_v19 }
 0x5cc   : > { %8906 = vmatpush1.bf16.msra.mxu0 %v15716_v38  ;;  %v1787_v25 = vpop.permute.xlu1 %1786 }
 0x5cd   : > { %8908 = vmatprep.subr.bf16.mxu0 %v15717_v39  ;;  %v1808_v5 = vsel %vm415_vm0, %v11607_v4, %v1787_v25 }
 0x5ce   : > { %8493 = vmatmul.mubr.msk.f32.gmra.mrb[12].mxu0 %vm629_vm2, %v1808_v5 }
 0x5cf   : > { %1920 = vmatprep.mubr.f32.mxu0 %v15705_v48 }
 0x5d0   : > { %8910 = vmatpush1.bf16.msra.mxu0 %v15718_v46 }
 0x5d1   : > { %8928 = vmatprep.subr.bf16.mxu0 %v15719_v7 }
 0x5d3   : > { %v1789_v27 = vpop.permute.xlu0 %1788 }
 0x5d4   : > { %v1809_v11 = vsel %vm415_vm0, %v11622_v18, %v1789_v27 }
 0x5d5   : > { %8494 = vmatmul.mubr.msk.f32.gmra.mrb[14].mxu0 %vm629_vm2, %v1809_v11 }
 0x5d6   : > { %1926 = vmatprep.mubr.f32.mxu0 %v15705_v48 }
 0x5dd   : > { %v1791_v62 = vpop.permute.xlu1 %1790 }
 0x5de   : > { %v1810_v6 = vsel %vm415_vm0, %v11639_v43, %v1791_v62 }
 0x5df   : > { %8495 = vmatmul.mubr.msk.f32.gmra.mrb[16].mxu0 %vm629_vm2, %v1810_v6 }
 0x5e0   : > { %1932 = vmatprep.mubr.f32.mxu0 %v15705_v48 }
 0x5e2   : > { %v1793_v29 = vpop.permute.xlu0 %1792 }
 0x5e3   : > { %v1811_v55 = vsel %vm415_vm0, %v11655_v47, %v1793_v29 }
 0x5e4   : > { %8496 = vmatmul.mubr.msk.f32.gmra.mrb[18].mxu0 %vm629_vm2, %v1811_v55 }
 0x5e5   : > { %1938 = vmatprep.mubr.f32.mxu0 %v15705_v48 }
 0x5e9   : > { %v1795_v10 = vpop.permute.xlu1 %1794 }
 0x5ea   : > { %v1812_v51 = vsel %vm415_vm0, %v11673_v8, %v1795_v10 }
 0x5eb   : > { %v1797_v33 = vpop.permute.xlu0 %1796  ;;  %8497 = vmatmul.mubr.msk.f32.gmra.mrb[20].mxu0 %vm629_vm2, %v1812_v51 }
 0x5ec   : > { %1944 = vmatprep.mubr.f32.mxu0 %v15705_v48  ;;  %v1813_v13 = vsel %vm415_vm0, %v11677_v23, %v1797_v33 }
 0x5ef   : > { %8498 = vmatmul.mubr.msk.f32.gmra.mrb[22].mxu0 %vm629_vm2, %v1813_v13 }
 0x5f0   : > { %4258 = vmatprep.mubr.f32.mxu0 %v15705_v48 }
 0x696   : > { %v1904_v0 = vpop.f32.mrb[8].mxu0 }
 0x697   : > { %v11734_v24 = vadd.f32 %v1904_v0, %v15720_v28  ;;  %v11736_v17 = vpop.f32.mrb[9].mxu0 }
 0x699   : > { %v8507_v2 = vmul.f32 -1.442695, %v11734_v24 }
 0x69a   : > { %v1910_v44 = vpop.f32.mrb[10].mxu0 }
 0x69b   : > { %9720 = vpow2.f32 %v8507_v2  ;;  %v11740_v12 = vadd.f32 %v1910_v44, %v15720_v28  ;;  %v11742_v3 = vpop.f32.mrb[11].mxu0 }
 0x69d   : > { %v8508_v41 = vmul.f32 -1.442695, %v11740_v12 }
 0x69f   : > { %9722 = vpow2.f32 %v8508_v41 }
 0x6a1   : > { %v1916_v22 = vpop.f32.mrb[12].mxu0 }
 0x6a2   : > { %v11746_v30 = vadd.f32 %v1916_v22, %v15720_v28  ;;  %v11748_v63 = vpop.f32.mrb[13].mxu0 }
 0x6a4   : > { %v8509_v34 = vmul.f32 -1.442695, %v11746_v30 }
 0x6a5   : > { %v9721_v20 = vpop.eup %9720 }
 0x6a6   : > { %v2095_v49 = vadd.f32 1.0, %v9721_v20  ;;  %9724 = vpow2.f32 %v8509_v34 }
 0x6a8   : > { %9726 = vrcp.f32 %v2095_v49  ;;  %v1922_v1 = vpop.f32.mrb[14].mxu0 }
 0x6a9   : > { %v9723_v26 = vpop.eup %9722  ;;  %v11751_v25 = vpop.f32.mrb[15].mxu0  ;;  %v11754_v27 = vadd.f32 %v1922_v1, %v15720_v28  ;;  %v1951_v1 = vadd.f32 1.0, %v11734_v24 }
 0x6aa   : > { %v2096_v5 = vadd.f32 1.0, %v9723_v26 }
 0x6ab   : > { %v8510_v11 = vmul.f32 -1.442695, %v11754_v27 }
 0x6ac   : > { %9728 = vrcp.f32 %v2096_v5 }
 0x6ad   : > { %9730 = vpow2.f32 %v8510_v11 }
 0x6b0   : > { %v9725_v62 = vpop.eup %9724 }
 0x6b1   : > { %v2097_v29 = vadd.f32 1.0, %v9725_v62 }
 0x6b2   : > { %v9727_v6 = vpop.eup %9726  ;;  %v1928_v55 = vpop.f32.mrb[16].mxu0 }
 0x6b3   : > { %v11758_v10 = vadd.f32 %v1928_v55, %v15720_v28  ;;  %v11760_v51 = vpop.f32.mrb[17].mxu0  ;;  %2127 = vrot.lane.b32.xlu1 %v9727_v6, %s15651_s22  ;;  %9732 = vrcp.f32 %v2097_v29  ;;  %v8499_v29 = vmul.f32 -1.442695, %v1951_v1  ;;  %v1954_v1 = vadd.f32 1.0, %v11754_v27 }
 0x6b5   : > { %v8511_v33 = vmul.f32 -1.442695, %v11758_v10 }
 0x6b6   : > { %v9729_v13 = vpop.eup %9728 }
 0x6b7   : > { %9734 = vpow2.f32 %v8511_v33  ;;  %v1934_v0 = vpop.f32.mrb[18].mxu0  ;;  %2129 = vrot.lane.b32.xlu0 %v9729_v13, %s15651_s22  ;;  %v9731_v41 = vpop.eup %9730  ;;  %v1952_v33 = vadd.f32 1.0, %v11740_v12 }
 0x6b8   : > { %v11765_v2 = vpop.f32.mrb[19].mxu0  ;;  %v11768_v44 = vadd.f32 %v1934_v0, %v15720_v28  ;;  %v2098_v22 = vadd.f32 1.0, %v9731_v41 }
 0x6b9   : > { %v8500_v41 = vmul.f32 -1.442695, %v1952_v33  ;;  %v1955_v33 = vadd.f32 1.0, %v11758_v10 }
 0x6ba   : > { %v8512_v20 = vmul.f32 -1.442695, %v11768_v44  ;;  %9736 = vrcp.f32 %v2098_v22 }
 0x6bc   : > { %9738 = vpow2.f32 %v8512_v20 }
 0x6bd   : > { %v9733_v34 = vpop.eup %9732 }
 0x6be   : > { %v1940_v49 = vpop.f32.mrb[20].mxu0  ;;  %2131 = vrot.lane.b32.xlu1 %v9733_v34, %s15651_s22  ;;  %v1953_v34 = vadd.f32 1.0, %v11746_v30 }
 0x6bf   : > { %v11772_v26 = vpop.f32.mrb[21].mxu0  ;;  %v11776_v5 = vadd.f32 %v1940_v49, %v15720_v28 }
 0x6c1   : > { %v9735_v11 = vpop.eup %9734  ;;  %v8513_v13 = vmul.f32 -1.442695, %v11776_v5 }
 0x6c2   : > { %v2099_v62 = vadd.f32 1.0, %v9735_v11  ;;  %v1946_v6 = vpop.f32.mrb[22].mxu0 }
 0x6c3   : > { %v11778_v55 = vpop.f32.mrb[23].mxu0  ;;  %v11783_v0 = vadd.f32 %v1946_v6, %v15720_v28  ;;  %v8502_v6 = vmul.f32 -1.442695, %v1954_v1  ;;  %v1957_v1 = vadd.f32 1.0, %v11776_v5 }
 0x6c4   : > { %9740 = vrcp.f32 %v2099_v62  ;;  %v9737_v22 = vpop.eup %9736  ;;  %v8501_v62 = vmul.f32 -1.442695, %v1953_v34 }
 0x6c5   : > { %9742 = vpow2.f32 %v8499_v29  ;;  %v8514_v20 = vmul.f32 -1.442695, %v11783_v0  ;;  %2133 = vrot.lane.b32.xlu0 %v9737_v22, %s15651_s22  ;;  %v8503_v22 = vmul.f32 -1.442695, %v1955_v33 }
 0x6c6   : > { %9744 = vpow2.f32 %v8513_v13  ;;  %v9739_v49 = vpop.eup %9738 }
 0x6c7   : > { %9746 = vpow2.f32 %v8500_v41  ;;  %v2100_v11 = vadd.f32 1.0, %v9739_v49  ;;  %v1956_v41 = vadd.f32 1.0, %v11768_v44 }
 0x6c8   : > { %9748 = vpow2.f32 %v8514_v20 }
 0x6c9   : > { %9750 = vrcp.f32 %v2100_v11 }
 0x6ca   : > { %9752 = vpow2.f32 %v8501_v62 }
 0x6cb   : > { %9754 = vpow2.f32 %v8502_v6  ;;  %v8505_v6 = vmul.f32 -1.442695, %v1957_v1 }
 0x6ce   : > { %v9741_v7 = vpop.eup %9740 }
 0x6cf   : > { %2135 = vrot.lane.b32.xlu1 %v9741_v7, %s15651_s22  ;;  %v9743_v29 = vpop.eup %9742  ;;  %v8504_v7 = vmul.f32 -1.442695, %v1956_v41 }
 0x6d0   : > { %v9745_v13 = vpop.eup %9744  ;;  %v1983_v46 = vadd.f32 1.0, %v9743_v29  ;;  %v1958_v29 = vadd.f32 1.0, %v11783_v0 }
 0x6d1   : > { %v2101_v28 = vadd.f32 1.0, %v9745_v13  ;;  %v9747_v49 = vpop.eup %9746 }
 0x6d2   : > { %v9749_v34 = vpop.eup %9748  ;;  %v1984_v62 = vadd.f32 1.0, %v9747_v49 }
 0x6d3   : > { %9756 = vrcp.f32 %v2101_v28  ;;  %v9751_v20 = vpop.eup %9750  ;;  %v2102_v11 = vadd.f32 1.0, %v9749_v34 }
 0x6d4   : > { %9758 = vrcp.f32 %v1983_v46  ;;  %2137 = vrot.lane.b32.xlu0 %v9751_v20, %s15651_s22  ;;  %v9753_v13 = vpop.eup %9752  ;;  %v8506_v46 = vmul.f32 -1.442695, %v1958_v29 }
 0x6d5   : > { %9760 = vpow2.f32 %v8503_v22  ;;  %v9755_v33 = vpop.eup %9754  ;;  %v1985_v28 = vadd.f32 1.0, %v9753_v13 }
 0x6d6   : > { %9762 = vrcp.f32 %v2102_v11  ;;  %v1986_v41 = vadd.f32 1.0, %v9755_v33 }
 0x6d7   : > { %9764 = vpow2.f32 %v8504_v7 }
 0x6d8   : > { %9766 = vrcp.f32 %v1984_v62 }
 0x6d9   : > { %9768 = vpow2.f32 %v8505_v6 }
 0x6da   : > { %9770 = vrcp.f32 %v1985_v28 }
 0x6db   : > { %9772 = vpow2.f32 %v8506_v46 }
 0x6dc   : > { %9774 = vrcp.f32 %v1986_v41 }
 0x6dd   : > { %v9757_v39 = vpop.eup %9756 }
 0x6de   : > { %2139 = vrot.lane.b32.xlu1 %v9757_v39, %s15651_s22  ;;  %v11796_v22 = vpop.eup %9758 }
 0x6df   : > { %v9761_v34 = vpop.eup %9760 }
 0x6e0   : > { %v9763_v49 = vpop.eup %9762  ;;  %v1987_v20 = vadd.f32 1.0, %v9761_v34 }
 0x6e1   : > { %2141 = vrot.lane.b32.xlu0 %v9763_v49, %s15651_s22  ;;  %v9765_v11 = vpop.eup %9764 }
 0x6e2   : > { %2023 = vrot.lane.b32.xlu1 %v11796_v22, %s15651_s22  ;;  %v11801_v7 = vpop.eup %9766  ;;  %9776 = vrcp.f32 %v1987_v20  ;;  %v1988_v39 = vadd.f32 1.0, %v9765_v11 }
 0x6e3   : > { %v9769_v1 = vpop.eup %9768 }
 0x6e4   : > { %v11805_v62 = vpop.eup %9770  ;;  %9778 = vrcp.f32 %v1988_v39  ;;  %v1989_v13 = vadd.f32 1.0, %v9769_v1 }
 0x6e5   : > { %2025 = vrot.lane.b32.xlu0 %v11801_v7, %s15651_s22  ;;  %v9773_v6 = vpop.eup %9772 }
 0x6e6   : > { %v11809_v29 = vpop.eup %9774  ;;  %9780 = vrcp.f32 %v1989_v13  ;;  %v1990_v33 = vadd.f32 1.0, %v9773_v6 }
 0x6e8   : > { %9782 = vrcp.f32 %v1990_v33 }
 0x6e9   : > { %2027 = vrot.lane.b32.xlu0 %v11805_v62, %s15651_s22  ;;  %9784 = vtanh.f32 %v11734_v24 }
 0x6ea   : > { %9786 = vtanh.f32 %v11740_v12 }
 0x6eb   : > { %9788 = vtanh.f32 %v11746_v30 }
 0x6ec   : > { %v11813_v28 = vpop.eup %9776  ;;  %9790 = vtanh.f32 %v11754_v27 }
 0x6ed   : > { %2029 = vrot.lane.b32.xlu0 %v11809_v29, %s15651_s22  ;;  %9792 = vtanh.f32 %v11758_v10 }
 0x6ee   : > { %v11817_v46 = vpop.eup %9778  ;;  %9794 = vtanh.f32 %v11768_v44 }
 0x6ef   : > { %9796 = vtanh.f32 %v11776_v5 }
 0x6f0   : > { %v11821_v41 = vpop.eup %9780  ;;  %9798 = vtanh.f32 %v11783_v0  ;;  %v1751_v0 = vrot.slane %v11586_v16, 1 }
 0x6f1   : > { %2031 = vrot.lane.b32.xlu0 %v11813_v28, %s15651_s22 }
 0x6f2   : > { %v11825_v34 = vpop.eup %9782 }
 0x6f3   : > { %v9785_v49 = vpop.eup %9784 }
 0x6f4   : > { %v9787_v39 = vpop.eup %9786 }
 0x6f5   : > { %2033 = vrot.lane.b32.xlu0 %v11817_v46, %s15651_s22  ;;  %v9789_v6 = vpop.eup %9788 }
 0x6f6   : > { %v9791_v24 = vpop.eup %9790 }
 0x6f7   : > { %v9793_v30 = vpop.eup %9792 }
 0x6f8   : > { %v9795_v27 = vpop.eup %9794 }
 0x6f9   : > { %2035 = vrot.lane.b32.xlu0 %v11821_v41, %s15651_s22 }
 0x6fd   : > { %2037 = vrot.lane.b32.xlu0 %v11825_v34, %s15651_s22 }
 0x725   : > { %v2128_v20 = vpop.permute.xlu1 %2127 }
 0x726   : > { %v2151_v11 = vmul.f32 %v9785_v49, %v2128_v20 }
 0x728   : > { %2167 = vrot.lane.b32.xlu1 %v2151_v11, %s15649_s24 }
 0x729   : > { %v2130_v1 = vpop.permute.xlu0 %2129 }
 0x72a   : > { %v2152_v13 = vmul.f32 %v9787_v39, %v2130_v1 }
 0x72c   : > { %2169 = vrot.lane.b32.xlu1 %v2152_v13, %s15649_s24 }
 0x730   : > { %v2132_v33 = vpop.permute.xlu1 %2131 }
 0x731   : > { %v2153_v38 = vmul.f32 %v9789_v6, %v2132_v33 }
 0x733   : > { %2171 = vrot.lane.b32.xlu1 %v2153_v38, %s15649_s24  ;;  %v9797_v38 = vpop.eup %9796 }
 0x734   : > { %v9799_v6 = vpop.eup %9798 }
 0x737   : > { %v2134_v12 = vpop.permute.xlu0 %2133 }
 0x738   : > { %v2154_v49 = vmul.f32 %v9791_v24, %v2134_v12  ;;  %v1750_v24 = vrot.slane %v11578_v36, 1 }
 0x73a   : > { %2173 = vrot.lane.b32.xlu1 %v2154_v49, %s15649_s24  ;;  %v11847_v12 = vsel %vm569_vm1, %v1750_v24, 0.0 }
 0x741   : > { %v2136_v20 = vpop.permute.xlu1 %2135 }
 0x742   : > { %v2155_v11 = vmul.f32 %v9793_v30, %v2136_v20  ;;  %v2007_v20 = vmul.f32 %v11796_v22, %v11578_v36 }
 0x744   : > { %2175 = vrot.lane.b32.xlu1 %v2155_v11, %s15649_s24  ;;  %v11854_v11 = vsel %vm569_vm1, %v1751_v0, 0.0  ;;  %v2009_v0 = vmul.f32 %v11805_v62, %v11609_v42  ;;  %v1754_v62 = vrot.slane %v11641_v35, 1 }
 0x746   : > { %v2138_v39 = vpop.permute.xlu0 %2137 }
 0x747   : > { %v2156_v1 = vmul.f32 %v9795_v27, %v2138_v39 }
 0x749   : > { %2177 = vrot.lane.b32.xlu1 %v2156_v1, %s15649_s24 }
 0x750   : > { %v2140_v10 = vpop.permute.xlu1 %2139 }
 0x751   : > { %v2157_v13 = vmul.f32 %v9797_v38, %v2140_v10  ;;  %v2008_v10 = vmul.f32 %v11801_v7, %v11586_v16 }
 0x753   : > { %2179 = vrot.lane.b32.xlu1 %v2157_v13, %s15649_s24  ;;  %v2142_v44 = vpop.permute.xlu0 %2141  ;;  %v1752_v13 = vrot.slane %v11609_v42, 1 }
 0x754   : > { %v2158_v33 = vmul.f32 %v9799_v6, %v2142_v44  ;;  %v2024_v5 = vpop.permute.xlu1 %2023 }
 0x755   : > { %v2047_v49 = vmul.f32 %v2024_v5, %v11847_v12  ;;  %v11866_v24 = vsel %vm569_vm1, %v1752_v13, 0.0 }
 0x756   : > { %2181 = vrot.lane.b32.xlu0 %v2158_v33, %s15649_s24 }
 0x757   : > { %v2026_v30 = vpop.permute.xlu0 %2025  ;;  %v2055_v39 = vadd.f32 %v2047_v49, %v2007_v20  ;;  %v1753_v20 = vrot.slane %v11624_v31, 1 }
 0x758   : > { %v2048_v27 = vmul.f32 %v2026_v30, %v11854_v11 }
 0x75a   : > { %v2056_v6 = vadd.f32 %v2048_v27, %v2008_v10  ;;  %v11878_v10 = vsel %vm569_vm1, %v1753_v20, 0.0  ;;  %v2011_v20 = vmul.f32 %v11813_v28, %v11641_v35  ;;  %v1756_v28 = vrot.slane %v11675_v57, 1 }
 0x75b   : > { %v2028_v44 = vpop.permute.xlu0 %2027 }
 0x75c   : > { %v2049_v5 = vmul.f32 %v2028_v44, %v11866_v24  ;;  %v2010_v44 = vmul.f32 %v11809_v29, %v11624_v31  ;;  %v1755_v29 = vrot.slane %v11657_v61, 1 }
 0x75e   : > { %v2057_v7 = vadd.f32 %v2049_v5, %v2009_v0 }
 0x79a   : > { %v2168_v1 = vpop.permute.xlu1 %2167 }
 0x79b   : > { %v11857_v38 = vadd.f32 %v2168_v1, %v2055_v39  ;;  %v2030_v39 = vpop.permute.xlu0 %2029 }
 0x79c   : > { %v2050_v13 = vmul.f32 %v2030_v39, %v11878_v10 }
 0x79d   : > { %9800 = vtanh.f32 %v11857_v38 }
 0x79e   : > { %v2170_v33 = vpop.permute.xlu1 %2169  ;;  %v2058_v5 = vadd.f32 %v2050_v13, %v2010_v44 }
 0x79f   : > { %v11863_v22 = vadd.f32 %v2170_v33, %v2056_v6  ;;  %v2032_v6 = vpop.permute.xlu0 %2031  ;;  %v11886_v33 = vsel %vm569_vm1, %v1754_v62, 0.0 }
 0x7a0   : > { %v2051_v0 = vmul.f32 %v2032_v6, %v11886_v33  ;;  %v11900_v6 = vsel %vm569_vm1, %v1755_v29, 0.0 }
 0x7a1   : > { %9802 = vtanh.f32 %v11863_v22  ;;  %15721 = vst [vmem:[#allocation45_spill] sm:$0xff] %v11900_v6 }
 0x7a2   : > { %v2059_v39 = vadd.f32 %v2051_v0, %v2011_v20 }
 0x7a3   : > { %v2034_v13 = vpop.permute.xlu0 %2033 }
 0x7a4   : > { %v2052_v44 = vmul.f32 %v2034_v13, %v11900_v6  ;;  %v1757_v13 = vrot.slane %v11680_v52, 1 }
 0x7a5   : > { %v2172_v49 = vpop.permute.xlu1 %2171 }
 0x7a6   : > { %v11873_v27 = vadd.f32 %v2172_v49, %v2057_v7 }
 0x7a7   : > { %v9801_v30 = vpop.eup %9800  ;;  %v2036_v0 = vpop.permute.xlu0 %2035 }
 0x7a8   : > { %2263 = vrot.lane.b32.xlu1 %v9801_v30, %s15651_s22  ;;  %9804 = vtanh.f32 %v11873_v27 }
 0x7ab   : > { %v9803_v1 = vpop.eup %9802  ;;  %v2038_v53 = vpop.permute.xlu0 %2037 }
 0x7ac   : > { %2265 = vrot.lane.b32.xlu0 %v9803_v1, %s15651_s22  ;;  %v2174_v7 = vpop.permute.xlu1 %2173 }
 0x7ad   : > { %v11889_v49 = vadd.f32 %v2174_v7, %v2058_v5  ;;  %v2012_v5 = vmul.f32 %v11817_v46, %v11657_v61  ;;  %v2013_v46 = vmul.f32 %v11821_v41, %v11675_v57 }
 0x7af   : > { %9806 = vtanh.f32 %v11889_v49 }
 0x7b2   : > { %v9805_v30 = vpop.eup %9804 }
 0x7b3   : > { %2267 = vrot.lane.b32.xlu1 %v9805_v30, %s15651_s22  ;;  %v2060_v30 = vadd.f32 %v2052_v44, %v2012_v5  ;;  %v11919_v44 = vsel %vm569_vm1, %v1757_v13, 0.0  ;;  %v1913_v13 = vadd.f32 %v11742_v3, %v11285_v54  ;;  %v1931_v3 = vadd.f32 %v11760_v51, %v11285_v54 }
 0x7b4   : > { %15723 = vst [vmem:[#allocation47_spill] sm:$0xff] %v11919_v44  ;;  %v2054_v5 = vmul.f32 %v2038_v53, %v11919_v44  ;;  %v15740_v44 = vld [vmem:[#allocation18_spill] sm:$0xff] }
 0x7b6   : > { %v2176_v1 = vpop.permute.xlu1 %2175 }
 0x7b7   : > { %v11896_v62 = vadd.f32 %v2176_v1, %v2059_v39  ;;  %v11908_v39 = vsel %vm569_vm1, %v1756_v28, 0.0 }
 0x7b8   : > { %15722 = vst [vmem:[#allocation46_spill] sm:$0xff] %v11908_v39  ;;  %v2053_v29 = vmul.f32 %v2036_v0, %v11908_v39  ;;  %v2014_v0 = vmul.f32 %v11825_v34, %v11680_v52  ;;  %v1907_v34 = vadd.f32 %v11736_v17, %v11285_v54 }
 0x7b9   : > { %9808 = vtanh.f32 %v11896_v62  ;;  %v9807_v7 = vpop.eup %9806 }
 0x7ba   : > { %2269 = vrot.lane.b32.xlu0 %v9807_v7, %s15651_s22  ;;  %v2061_v28 = vadd.f32 %v2053_v29, %v2013_v46  ;;  %v8515_v29 = vmul.f32 -1.442695, %v1907_v34 }
 0x7bb   : > { %v2178_v20 = vpop.permute.xlu1 %2177 }
 0x7bc   : > { %v11910_v1 = vadd.f32 %v2178_v20, %v2060_v30  ;;  %v2062_v20 = vadd.f32 %v2054_v5, %v2014_v0  ;;  %v1925_v0 = vadd.f32 %v11751_v25, %v11285_v54  ;;  %v1937_v25 = vadd.f32 %v11765_v2, %v11285_v54 }
 0x7be   : > { %9810 = vtanh.f32 %v11910_v1 }
 0x7c3   : > { %v9809_v19 = vpop.eup %9808 }
 0x7c4   : > { %2271 = vrot.lane.b32.xlu1 %v9809_v19, %s15651_s22 }
 0x7c5   : > { %v2180_v7 = vpop.permute.xlu1 %2179 }
 0x7c6   : > { %v11922_v30 = vadd.f32 %v2180_v7, %v2061_v28 }
 0x7c8   : > { %15724 = vst [vmem:[#allocation48_spill] sm:$0xff] %v11922_v30  ;;  %9812 = vtanh.f32 %v11922_v30  ;;  %v2182_v56 = vpop.permute.xlu0 %2181  ;;  %v9811_v15 = vpop.eup %9810 }
 0x7c9   : > { %v11927_v41 = vadd.f32 %v2182_v56, %v2062_v20  ;;  %2273 = vrot.lane.b32.xlu0 %v9811_v15, %s15651_s22  ;;  %v8516_v56 = vmul.f32 -1.442695, %v1913_v13  ;;  %v1919_v15 = vadd.f32 %v11748_v63, %v11285_v54  ;;  %v8518_v20 = vmul.f32 -1.442695, %v1925_v0 }
 0x7ca   : > { %v8520_v0 = vmul.f32 -1.442695, %v1937_v25  ;;  %v1949_v25 = vadd.f32 %v11778_v55, %v11285_v54 }
 0x7cb   : > { %15725 = vst [vmem:[#allocation49_spill] sm:$0xff] %v11927_v41  ;;  %9814 = vtanh.f32 %v11927_v41  ;;  %v8517_v46 = vmul.f32 -1.442695, %v1919_v15 }
 0x7cc   : > { %9816 = vpow2.f32 %v8515_v29 }
 0x7cd   : > { %9818 = vpow2.f32 %v8516_v56  ;;  %v11950_v56 = vld [vmem:[%s15423_s6] ss:$0 sm:$0xff] }
 0x7ce   : > { %9820 = vpow2.f32 %v8517_v46 }
 0x7d2   : > { %v9813_v19 = vpop.eup %9812 }
 0x7d3   : > { %2275 = vrot.lane.b32.xlu1 %v9813_v19, %s15651_s22 }
 0x7d5   : > { %v9815_v53 = vpop.eup %9814 }
 0x7d6   : > { %2277 = vrot.lane.b32.xlu0 %v9815_v53, %s15651_s22  ;;  %v9817_v28 = vpop.eup %9816  ;;  %v8519_v53 = vmul.f32 -1.442695, %v1931_v3 }
 0x7d7   : > { %v2223_v5 = vadd.f32 1.0, %v9817_v28  ;;  %v9819_v7 = vpop.eup %9818 }
 0x7d8   : > { %v2224_v17 = vadd.f32 1.0, %v9819_v7  ;;  %v9821_v19 = vpop.eup %9820 }
 0x7d9   : > { %9822 = vrcp.f32 %v2223_v5  ;;  %v2225_v34 = vadd.f32 1.0, %v9821_v19  ;;  %v1943_v19 = vadd.f32 %v11772_v26, %v11285_v54  ;;  %v8522_v26 = vmul.f32 -1.442695, %v1949_v25 }
 0x7da   : > { %9824 = vrcp.f32 %v2224_v17 }
 0x7db   : > { %9826 = vpow2.f32 %v8518_v20 }
 0x7dc   : > { %9828 = vpow2.f32 %v8519_v53 }
 0x7dd   : > { %9830 = vrcp.f32 %v2225_v34 }
 0x7de   : > { %9832 = vpow2.f32 %v8520_v0 }
 0x7e3   : > { %v9823_v63 = vpop.eup %9822 }
 0x7e4   : > { %v9825_v15 = vpop.eup %9824 }
 0x7e5   : > { %v9827_v7 = vpop.eup %9826 }
 0x7e6   : > { %v2226_v17 = vadd.f32 1.0, %v9827_v7  ;;  %v9829_v3 = vpop.eup %9828 }
 0x7e7   : > { %v9831_v53 = vpop.eup %9830 }
 0x7e8   : > { %9834 = vrcp.f32 %v2226_v17 }
 0x81a   : > { %v2264_v29 = vpop.permute.xlu1 %2263 }
 0x81b   : > { %v11943_v13 = vmul.f32 %v9823_v63, %v2264_v29  ;;  %v2227_v63 = vadd.f32 1.0, %v9829_v3 }
 0x81d   : > { %v2295_v51 = vmul.f32 %v11950_v56, %v11943_v13  ;;  %9836 = vrcp.f32 %v2227_v63 }
 0x81e   : > { %v2266_v46 = vpop.permute.xlu0 %2265 }
 0x81f   : > { %v11954_v28 = vmul.f32 %v9825_v15, %v2266_v46  ;;  %v2303_v5 = vsel %vm415_vm0, %v2295_v51, 0.0  ;;  %v8521_v51 = vmul.f32 -1.442695, %v1943_v19 }
 0x820   : > { %2304 = vadd.xlane.f32.xlu1 %v2303_v5  ;;  %v9833_v5 = vpop.eup %9832 }
 0x821   : > { %v2296_v2 = vmul.f32 %v11950_v56, %v11954_v28  ;;  %9838 = vpow2.f32 %v8521_v51  ;;  %v9835_v7 = vpop.eup %9834 }
 0x822   : > { %9840 = vpow2.f32 %v8522_v26 }
 0x823   : > { %v2306_v20 = vsel %vm415_vm0, %v2296_v2, 0.0  ;;  %v2228_v2 = vadd.f32 1.0, %v9833_v5 }
 0x824   : > { %2307 = vadd.xlane.f32.xlu0 %v2306_v20 }
 0x825   : > { %v2268_v34 = vpop.permute.xlu1 %2267  ;;  %9842 = vrcp.f32 %v2228_v2 }
 0x826   : > { %v11962_v29 = vmul.f32 %v9831_v53, %v2268_v34 }
 0x827   : > { %v9837_v55 = vpop.eup %9836 }
 0x828   : > { %v2297_v15 = vmul.f32 %v11950_v56, %v11962_v29 }
 0x82a   : > { %v2309_v46 = vsel %vm415_vm0, %v2297_v15, 0.0 }
 0x82b   : > { %2310 = vadd.xlane.f32.xlu0 %v2309_v46  ;;  %v9839_v3 = vpop.eup %9838 }
 0x82c   : > { %v2270_v0 = vpop.permute.xlu0 %2269  ;;  %v2229_v63 = vadd.f32 1.0, %v9839_v3  ;;  %v9841_v25 = vpop.eup %9840 }
 0x82d   : > { %v11969_v17 = vmul.f32 %v9835_v7, %v2270_v0  ;;  %v2230_v46 = vadd.f32 1.0, %v9841_v25 }
 0x82e   : > { %9844 = vrcp.f32 %v2229_v63 }
 0x82f   : > { %v2298_v20 = vmul.f32 %v11950_v56, %v11969_v17  ;;  %v9843_v26 = vpop.eup %9842  ;;  %9846 = vrcp.f32 %v2230_v46 }
 0x831   : > { %v2312_v19 = vsel %vm415_vm0, %v2298_v20, 0.0 }
 0x832   : > { %2313 = vadd.xlane.f32.xlu1 %v2312_v19 }
 0x836   : > { %v2272_v53 = vpop.permute.xlu1 %2271 }
 0x837   : > { %v11974_v34 = vmul.f32 %v9837_v55, %v2272_v53 }
 0x838   : > { %v9845_v20 = vpop.eup %9844 }
 0x839   : > { %v2299_v51 = vmul.f32 %v11950_v56, %v11974_v34  ;;  %v9847_v53 = vpop.eup %9846 }
 0x83b   : > { %v2315_v15 = vsel %vm415_vm0, %v2299_v51, 0.0  ;;  %v2274_v5 = vpop.permute.xlu0 %2273 }
 0x83c   : > { %2316 = vadd.xlane.f32.xlu0 %v2315_v15  ;;  %v11979_v7 = vmul.f32 %v9843_v26, %v2274_v5  ;;  %v11995_v26 = vld [vmem:[%s10863_s11] sm:$0xff] }
 0x83d   : > { %15728 = vst [vmem:[#allocation52_spill] sm:$0xff] %v11995_v26  ;;  %v15493_v5 = vrot.slane %v11995_v26, 3  ;;  %v12031_v26 = vld [vmem:[%s10863_s11 + $0x38] sm:$0xff] }
 0x83e   : > { %v2300_v0 = vmul.f32 %v11950_v56, %v11979_v7  ;;  %15736 = vst [vmem:[#allocation59_spill] sm:$0xff] %v12031_v26 }
 0x83f   : > { %9031 = vpush %v15493_v5 }
 0x840   : > { %v2318_v2 = vsel %vm415_vm0, %v2300_v0, 0.0  ;;  %v11999_v0 = vld [vmem:[%s10863_s11 + $0x8] sm:$0xff] }
 0x841   : > { %2319 = vadd.xlane.f32.xlu1 %v2318_v2  ;;  %15729 = vst [vmem:[#allocation53_spill] sm:$0xff] %v11999_v0  ;;  %v15495_v2 = vrot.slane %v11999_v0, 3  ;;  %v15738_v0 = vld [vmem:[#allocation16_spill] sm:$0xff] }
 0x842   : > { %v3994_v54 = vrot.slane %v15738_v0, 3  ;;  %v15743_v0 = vld [vmem:[#allocation21_spill] sm:$0xff] }
 0x843   : > { %9033 = vpush %v15495_v2  ;;  %v3999_v52 = vrot.slane %v15743_v0, 3  ;;  %v12056_v0 = vld [vmem:[#allocation2] ss:$0 sm:$0xff] }
 0x845   : > { %v2276_v55 = vpop.permute.xlu1 %2275 }
 0x846   : > { %v11984_v3 = vmul.f32 %v9845_v20, %v2276_v55  ;;  %v12003_v20 = vld [vmem:[%s10863_s11 + $0x10] sm:$0xff] }
 0x847   : > { %15730 = vst [vmem:[#allocation54_spill] sm:$0xff] %v12003_v20  ;;  %v15499_v55 = vrot.slane %v12003_v20, 3 }
 0x848   : > { %15726 = vst [vmem:[#allocation50_spill] sm:$0xff] %v11984_v3  ;;  %v2301_v19 = vmul.f32 %v11950_v56, %v11984_v3  ;;  %v2278_v63 = vpop.permute.xlu0 %2277 }
 0x849   : > { %v11989_v25 = vmul.f32 %v9847_v53, %v2278_v63  ;;  %v12013_v53 = vld [vmem:[%s10863_s11 + $0x20] sm:$0xff]  ;;  %9035 = vpush %v15499_v55  ;;  %v15510_v63 = vrot.slane %v12031_v26, 3  ;;  %v15739_v55 = vld [vmem:[#allocation17_spill] sm:$0xff] }
 0x84a   : > { %v2321_v51 = vsel %vm415_vm0, %v2301_v19, 0.0  ;;  %v12007_v19 = vld [vmem:[%s10863_s11 + $0x18] sm:$0xff]  ;;  %15732 = vst [vmem:[#allocation56_spill] sm:$0xff] %v12013_v53  ;;  %v15737_v2 = vrot.slane %v12013_v53, 3  ;;  %v3995_v20 = vrot.slane %v15739_v55, 3  ;;  %v15742_v53 = vld [vmem:[#allocation20_spill] sm:$0xff] }
 0x84b   : > { %15727 = vst [vmem:[#allocation51_spill] sm:$0xff] %v11989_v25  ;;  %2322 = vadd.xlane.f32.xlu0 %v2321_v51  ;;  %v2302_v15 = vmul.f32 %v11950_v56, %v11989_v25  ;;  %15731 = vst [vmem:[#allocation55_spill] sm:$0xff] %v12007_v19  ;;  %v12019_v51 = vld [vmem:[%s10863_s11 + $0x28] sm:$0xff]  ;;  %v15735_v5 = vrot.slane %v12007_v19, 3  ;;  %v3996_v19 = vrot.slane %v15740_v44, 3 }
 0x84c   : > { %15733 = vst [vmem:[#allocation57_spill] sm:$0xff] %v12019_v51  ;;  %v15745_v55 = vld [vmem:[#allocation23_spill] sm:$0xff] }
 0x84d   : > { %v2324_v46 = vsel %vm415_vm0, %v2302_v15, 0.0  ;;  %v15507_v15 = vrot.slane %v12019_v51, 3  ;;  %9037 = vpush %v15735_v5  ;;  %v15741_v5 = vld [vmem:[#allocation19_spill] sm:$0xff] }
 0x84e   : > { %2325 = vadd.xlane.f32.xlu1 %v2324_v46  ;;  %v12025_v46 = vld [vmem:[%s10863_s11 + $0x30] sm:$0xff]  ;;  %9039 = vpush %v15737_v2  ;;  %v3997_v59 = vrot.slane %v15741_v5, 3  ;;  %v3998_v2 = vrot.slane %v15742_v53, 3 }
 0x84f   : > { %15734 = vst [vmem:[#allocation58_spill] sm:$0xff] %v12025_v46  ;;  %v15511_v56 = vrot.slane %v12025_v46, 3  ;;  %9041 = vpush %v15507_v15  ;;  %v15744_v15 = vld [vmem:[#allocation22_spill] sm:$0xff]  ;;  %v4001_v46 = vrot.slane %v15745_v55, 3 }
 0x850   : > { %v4000_v51 = vrot.slane %v15744_v15, 3  ;;  %v15750_v15 = vld [vmem:[#allocation36_spill] sm:$0xff] }
 0x851   : > { %9043 = vpush %v15511_v56 }
 0x852   : > { %9045 = vpush %v15510_v63  ;;  %v15746_v63 = vld [vmem:[#allocation34_spill] sm:$0xff] }
 0x853   : > { %9047 = vpush %v3994_v54  ;;  %v15747_v56 = vrot.slane %v15746_v63, 2 }
 0x854   : > { %9049 = vpush %v3995_v20  ;;  %v15748_v20 = vld [vmem:[#allocation35_spill] sm:$0xff] }
 0x855   : > { %9051 = vpush %v3996_v19  ;;  %v2352_v54 = vsel %vm2351_vm5, %v15747_v56, 0.0  ;;  %v15749_v53 = vrot.slane %v15748_v20, 2 }
 0x856   : > { %9053 = vpush %v3997_v59  ;;  %vm2360_vm9 = vcmp.gt.f32.partialorder %v2352_v54, 0.0 }
 0x857   : > { %9055 = vpush %v3998_v2  ;;  %v2353_v19 = vsel %vm2351_vm5, %v15749_v53, 0.0  ;;  %v15751_v53 = vrot.slane %v15750_v15, 2 }
 0x858   : > { %9057 = vpush %v3999_v52  ;;  %vm2361_vm13 = vcmp.gt.f32.partialorder %v2353_v19, 0.0 }
 0x859   : > { %9059 = vpush %v4000_v51  ;;  %v2354_v5 = vsel %vm2351_vm5, %v15751_v53, 0.0  ;;  %v15752_v53 = vld [vmem:[#allocation37_spill] sm:$0xff] }
 0x85a   : > { %9061 = vpush %v4001_v46  ;;  %vm2362_vm10 = vcmp.gt.f32.partialorder %v2354_v5, 0.0 }
 0x8ad   : > { %v2305_v26 = vpop.xlane.xlu1 %2304 }
 0x8ae   : > { %v2327_v59 = vadd.f32 %v12056_v0, %v2305_v26 }
 0x8b0   : > { %v2368_v2 = vsel %vm2360_vm9, %v2327_v59, -1e+30 }
 0x8b1   : > { %v2376_v52 = vsel %vm1205_vm4, %v2368_v2, -inf  ;;  %v2308_v51 = vpop.xlane.xlu0 %2307 }
 0x8b2   : > { %v2377_v46 = vrot.slane %v2376_v52, 4  ;;  %v2328_v63 = vadd.f32 %v12056_v0, %v2308_v51 }
 0x8b4   : > { %v2378_v56 = vmax.f32 %v2376_v52, %v2377_v46  ;;  %v2369_v55 = vsel %vm2361_vm13, %v2328_v63, -1e+30 }
 0x8b5   : > { %v2383_v20 = vsel %vm1205_vm4, %v2369_v55, -inf }
 0x8b6   : > { %v2379_v44 = vrot.slane %v2378_v56, 2  ;;  %v2384_v26 = vrot.slane %v2383_v20, 4 }
 0x8b8   : > { %v2380_v39 = vmax.f32 %v2378_v56, %v2379_v44  ;;  %v2385_v59 = vmax.f32 %v2383_v20, %v2384_v26  ;;  %v2311_v60 = vpop.xlane.xlu0 %2310  ;;  %v15753_v26 = vrot.slane %v15752_v53, 2 }
 0x8b9   : > { %v2329_v23 = vadd.f32 %v12056_v0, %v2311_v60 }
 0x8ba   : > { %v2381_v41 = vrot.slane %v2380_v39, 1  ;;  %v2386_v25 = vrot.slane %v2385_v59, 2  ;;  %v12075_v3 = vsel %vm2351_vm5, %v15753_v26, 0.0 }
 0x8bb   : > { %v2370_v46 = vsel %vm2362_vm10, %v2329_v23, -1e+30  ;;  %vm2363_vm3 = vcmp.gt.f32.partialorder %v12075_v3, 0.0 }
 0x8bc   : > { %v2382_v51 = vmax.f32 %v2380_v39, %v2381_v41  ;;  %v2387_v52 = vmax.f32 %v2385_v59, %v2386_v25  ;;  %v2390_v63 = vsel %vm1205_vm4, %v2370_v46, -inf }
 0x8bd   : > { %v2391_v30 = vrot.slane %v2390_v63, 4 }
 0x8be   : > { %vm2432_vm11 = vcmp.ge.f32.partialorder %v2368_v2, %v2382_v51  ;;  %v2388_v15 = vrot.slane %v2387_v52, 1  ;;  %v15754_v51 = vld [vmem:[#allocation38_spill] sm:$0xff] }
 0x8bf   : > { %vm2440_vm12 = vmand %vm2432_vm11, %vm2360_vm9  ;;  %v2392_v20 = vmax.f32 %v2390_v63, %v2391_v30  ;;  %v2314_v2 = vpop.xlane.xlu1 %2313 }
 0x8c0   : > { %v2448_v44 = vsel %vm2440_vm12, %v11429_v14, 8.0  ;;  %v2389_v56 = vmax.f32 %v2387_v52, %v2388_v15  ;;  %v2330_v59 = vadd.f32 %v12056_v0, %v2314_v2  ;;  %v15755_v52 = vrot.slane %v15754_v51, 2 }
 0x8c1   : > { %v2456_v60 = vsel %vm1205_vm4, %v2448_v44, inf  ;;  %v2393_v23 = vrot.slane %v2392_v20, 2 }
 0x8c2   : > { %v2457_v39 = vrot.slane %v2456_v60, 4  ;;  %vm2433_vm14 = vcmp.ge.f32.partialorder %v2369_v55, %v2389_v56  ;;  %v12086_v63 = vsel %vm2351_vm5, %v15755_v52, 0.0  ;;  %v2371_v44 = vsel %vm2363_vm3, %v2330_v59, -1e+30 }
 0x8c3   : > { %vm2441_vm15 = vmand %vm2433_vm14, %vm2361_vm13  ;;  %v2394_v54 = vmax.f32 %v2392_v20, %v2393_v23  ;;  %v2397_v20 = vsel %vm1205_vm4, %v2371_v44, -inf  ;;  %vm2364_vm6 = vcmp.gt.f32.partialorder %v12086_v63, 0.0 }
 0x8c4   : > { %v2458_v41 = vmin.f32 %v2456_v60, %v2457_v39  ;;  %v2449_v25 = vsel %vm2441_vm15, %v11429_v14, 8.0  ;;  %v2398_v60 = vrot.slane %v2397_v20, 4 }
 0x8c5   : > { %v2463_v30 = vsel %vm1205_vm4, %v2449_v25, inf  ;;  %v2395_v19 = vrot.slane %v2394_v54, 1 }
 0x8c6   : > { %v2459_v55 = vrot.slane %v2458_v41, 2  ;;  %v2464_v15 = vrot.slane %v2463_v30, 4  ;;  %v2399_v51 = vmax.f32 %v2397_v20, %v2398_v60 }
 0x8c7   : > { %v2396_v26 = vmax.f32 %v2394_v54, %v2395_v19 }
 0x8c8   : > { %v2460_v56 = vmin.f32 %v2458_v41, %v2459_v55  ;;  %v2465_v53 = vmin.f32 %v2463_v30, %v2464_v15  ;;  %v15756_v30 = vld [vmem:[#allocation39_spill] sm:$0xff] }
 0x8c9   : > { %v2317_v39 = vpop.xlane.xlu0 %2316  ;;  %vm2434_vm7 = vcmp.ge.f32.partialorder %v2370_v46, %v2396_v26  ;;  %v15757_v59 = vrot.slane %v15756_v30, 2  ;;  %v2400_v46 = vrot.slane %v2399_v51, 2 }
 0x8ca   : > { %v2461_v23 = vrot.slane %v2460_v56, 1  ;;  %v2466_v25 = vrot.slane %v2465_v53, 2  ;;  %v2331_v2 = vadd.f32 %v12056_v0, %v2317_v39  ;;  %vm2442_vm8 = vmand %vm2434_vm7, %vm2362_vm10 }
 0x8cb   : > { %v2450_v41 = vsel %vm2442_vm8, %v11429_v14, 8.0  ;;  %v12100_v55 = vsel %vm2351_vm5, %v15757_v59, 0.0 }
 0x8cc   : > { %v2462_v52 = vmin.f32 %v2460_v56, %v2461_v23  ;;  %v2467_v57 = vmin.f32 %v2465_v53, %v2466_v25  ;;  %v2372_v54 = vsel %vm2364_vm6, %v2331_v2, -1e+30  ;;  %v2470_v15 = vsel %vm1205_vm4, %v2450_v41, inf }
 0x8cd   : > { %v2404_v19 = vsel %vm1205_vm4, %v2372_v54, -inf  ;;  %v2471_v26 = vrot.slane %v2470_v15, 4  ;;  %v2401_v56 = vmax.f32 %v2399_v51, %v2400_v46  ;;  %vm2365_vm11 = vcmp.gt.f32.partialorder %v12100_v55, 0.0 }
 0x8ce   : > { %v2468_v5 = vrot.slane %v2467_v57, 1  ;;  %v2405_v20 = vrot.slane %v2404_v19, 4  ;;  %vm2512_vm9 = vcmp.eq.f32.partialorder %v11429_v14, %v2462_v52  ;;  %vm2536_vm13 = vcmp.lt.f32.partialorder %v11429_v14, %v2462_v52  ;;  %v2320_v46 = vpop.xlane.xlu1 %2319 }
 0x8cf   : > { %v8523_v53 = vsel %vm2512_vm9, 1.0, %v15705_v48  ;;  %vm2560_vm10 = vcmp.gt.f32.partialorder %v11429_v14, %v2462_v52  ;;  %v2472_v39 = vmin.f32 %v2470_v15, %v2471_v26  ;;  %v8531_v25 = vsel %vm2536_vm13, 1.0, %v15705_v48 }
 0x8d0   : > { %v2469_v60 = vmin.f32 %v2467_v57, %v2468_v5  ;;  %v2406_v23 = vmax.f32 %v2404_v19, %v2405_v20  ;;  %v2402_v2 = vrot.slane %v2401_v56, 1  ;;  %v9317_v41 = vpack.i.bf16 %v8531_v25, %v8523_v53  ;;  %v15758_v53 = vld [vmem:[#allocation40_spill] sm:$0xff] }
 0x8d1   : > { %v8539_v30 = vsel %vm2560_vm10, 1.0, %v15705_v48  ;;  %v2473_v59 = vrot.slane %v2472_v39, 2  ;;  %v2332_v5 = vadd.f32 %v12056_v0, %v2320_v46  ;;  %v15759_v25 = vrot.slane %v15758_v53, 2 }
 0x8d2   : > { %v2407_v8 = vrot.slane %v2406_v23, 2  ;;  %vm2513_vm12 = vcmp.eq.f32.partialorder %v11429_v14, %v2469_v60  ;;  %vm2537_vm14 = vcmp.lt.f32.partialorder %v11429_v14, %v2469_v60  ;;  %v2403_v51 = vmax.f32 %v2401_v56, %v2402_v2  ;;  %9318 = vperm.xlu0 %9266, %v9317_v41  }
 0x8d3   : > { %v8524_v57 = vsel %vm2513_vm12, 1.0, %v15705_v48  ;;  %v8532_v52 = vsel %vm2537_vm14, 1.0, %v15705_v48  ;;  %vm2561_vm15 = vcmp.gt.f32.partialorder %v11429_v14, %v2469_v60  ;;  %v2474_v15 = vmin.f32 %v2472_v39, %v2473_v59 }
 0x8d4   : > { %v2408_v19 = vmax.f32 %v2406_v23, %v2407_v8  ;;  %v9322_v26 = vpack.i.bf16 %v8524_v57, %v8539_v30  ;;  %vm2435_vm7 = vcmp.ge.f32.partialorder %v2371_v44, %v2403_v51  ;;  %v8540_v20 = vsel %vm2561_vm15, 1.0, %v15705_v48 }
 0x8d5   : > { %v12121_v56 = vsel %vm2351_vm5, %v15759_v25, 0.0  ;;  %v2475_v2 = vrot.slane %v2474_v15, 1  ;;  %vm2443_vm8 = vmand %vm2435_vm7, %vm2363_vm3  ;;  %v2373_v60 = vsel %vm2365_vm11, %v2332_v5, -1e+30  ;;  %v9327_v39 = vpack.i.bf16 %v8540_v20, %v8532_v52 }
 0x8d6   : > { %v2409_v41 = vrot.slane %v2408_v19, 1  ;;  %9323 = vperm.xlu1 %9260, %v9322_v26   ;;  %v2451_v8 = vsel %vm2443_vm8, %v11429_v14, 8.0  ;;  %v2411_v44 = vsel %vm1205_vm4, %v2373_v60, -inf  ;;  %vm2366_vm9 = vcmp.gt.f32.partialorder %v12121_v56, 0.0  ;;  %v15760_v26 = vld [vmem:[#allocation41_spill] sm:$0xff] }
 0x8d7   : > { %v2476_v23 = vmin.f32 %v2474_v15, %v2475_v2  ;;  %v2477_v30 = vsel %vm1205_vm4, %v2451_v8, inf  ;;  %v2412_v51 = vrot.slane %v2411_v44, 4  ;;  %v15761_v20 = vrot.slane %v15760_v26, 2 }
 0x8d8   : > { %v2410_v59 = vmax.f32 %v2408_v19, %v2409_v41  ;;  %v2478_v46 = vrot.slane %v2477_v30, 4  ;;  %v2323_v57 = vpop.xlane.xlu0 %2322 }
 0x8d9   : > { %v2413_v3 = vmax.f32 %v2411_v44, %v2412_v51  ;;  %vm2514_vm3 = vcmp.eq.f32.partialorder %v11429_v14, %v2476_v23  ;;  %vm2538_vm10 = vcmp.lt.f32.partialorder %v11429_v14, %v2476_v23  ;;  %v2333_v52 = vadd.f32 %v12056_v0, %v2323_v57 }
 0x8da   : > { %vm2436_vm13 = vcmp.ge.f32.partialorder %v2372_v54, %v2410_v59  ;;  %9328 = vperm.xlu1 %9260, %v9327_v39   ;;  %v2479_v5 = vmin.f32 %v2477_v30, %v2478_v46  ;;  %v8525_v15 = vsel %vm2514_vm3, 1.0, %v15705_v48  ;;  %v8533_v19 = vsel %vm2538_vm10, 1.0, %v15705_v48 }
 0x8db   : > { %vm2444_vm12 = vmand %vm2436_vm13, %vm2364_vm6  ;;  %v12141_v54 = vsel %vm2351_vm5, %v15761_v20, 0.0  ;;  %v2414_v25 = vrot.slane %v2413_v3, 2  ;;  %v9332_v2 = vpack.i.bf16 %v8533_v19, %v8525_v15  ;;  %v2374_v63 = vsel %vm2366_vm9, %v2333_v52, -1e+30  ;;  %v2326_v46 = vpop.xlane.xlu1 %2325 }
 0x8dc   : > { %v2452_v53 = vsel %vm2444_vm12, %v11429_v14, 8.0  ;;  %v2480_v41 = vrot.slane %v2479_v5, 2  ;;  %v2418_v30 = vsel %vm1205_vm4, %v2374_v63, -inf  ;;  %vm2367_vm6 = vcmp.gt.f32.partialorder %v12141_v54, 0.0 }
 0x8dd   : > { %v2484_v8 = vsel %vm1205_vm4, %v2452_v53, inf  ;;  %v2415_v39 = vmax.f32 %v2413_v3, %v2414_v25  ;;  %9333 = vperm.xlu0 %9266, %v9332_v2   ;;  %v2419_v51 = vrot.slane %v2418_v30, 4  ;;  %v2334_v15 = vadd.f32 %v12056_v0, %v2326_v46 }
 0x8de   : > { %v2485_v44 = vrot.slane %v2484_v8, 4  ;;  %v2481_v59 = vmin.f32 %v2479_v5, %v2480_v41  ;;  %vm2562_vm5 = vcmp.gt.f32.partialorder %v11429_v14, %v2476_v23 }
 0x8df   : > { %v2416_v26 = vrot.slane %v2415_v39, 1  ;;  %v2420_v20 = vmax.f32 %v2418_v30, %v2419_v51  ;;  %v2375_v3 = vsel %vm2367_vm6, %v2334_v15, -1e+30 }
 0x8e0   : > { %v2486_v57 = vmin.f32 %v2484_v8, %v2485_v44  ;;  %v2482_v19 = vrot.slane %v2481_v59, 1  ;;  %v2425_v6 = vsel %vm1205_vm4, %v2375_v3, -inf  ;;  %v8541_v8 = vsel %vm2562_vm5, 1.0, %v15705_v48 }
 0x8e1   : > { %v2417_v52 = vmax.f32 %v2415_v39, %v2416_v26  ;;  %v2421_v2 = vrot.slane %v2420_v20, 2  ;;  %v2426_v41 = vrot.slane %v2425_v6, 4 }
 0x8e2   : > { %v2487_v53 = vrot.slane %v2486_v57, 2  ;;  %v2483_v25 = vmin.f32 %v2481_v59, %v2482_v19 }
 0x8e3   : > { %vm2437_vm14 = vcmp.ge.f32.partialorder %v2373_v60, %v2417_v52  ;;  %v2422_v0 = vmax.f32 %v2420_v20, %v2421_v2  ;;  %v2427_v39 = vmax.f32 %v2425_v6, %v2426_v41 }
 0x8e4   : > { %v2488_v5 = vmin.f32 %v2486_v57, %v2487_v53  ;;  %vm2445_vm15 = vmand %vm2437_vm14, %vm2365_vm11  ;;  %vm2539_vm7 = vcmp.lt.f32.partialorder %v11429_v14, %v2483_v25  ;;  %vm2563_vm8 = vcmp.gt.f32.partialorder %v11429_v14, %v2483_v25  ;;  %vm2515_vm13 = vcmp.eq.f32.partialorder %v11429_v14, %v2483_v25 }
 0x8e5   : > { %v2453_v44 = vsel %vm2445_vm15, %v11429_v14, 8.0  ;;  %v8534_v30 = vsel %vm2539_vm7, 1.0, %v15705_v48  ;;  %v2423_v59 = vrot.slane %v2422_v0, 1  ;;  %v8542_v51 = vsel %vm2563_vm8, 1.0, %v15705_v48 }
 0x8e6   : > { %v2489_v23 = vrot.slane %v2488_v5, 1  ;;  %v2491_v60 = vsel %vm1205_vm4, %v2453_v44, inf  ;;  %v8526_v55 = vsel %vm2515_vm13, 1.0, %v15705_v48  ;;  %v2428_v26 = vrot.slane %v2427_v39, 2 }
 0x8e7   : > { %v2492_v57 = vrot.slane %v2491_v60, 4  ;;  %v9342_v15 = vpack.i.bf16 %v8542_v51, %v8534_v30  ;;  %v2424_v19 = vmax.f32 %v2422_v0, %v2423_v59  ;;  %v9337_v20 = vpack.i.bf16 %v8526_v55, %v8541_v8 }
 0x8e8   : > { %v2490_v46 = vmin.f32 %v2488_v5, %v2489_v23  ;;  %v2429_v52 = vmax.f32 %v2427_v39, %v2428_v26 }
 0x8e9   : > { %v2493_v53 = vmin.f32 %v2491_v60, %v2492_v57  ;;  %9343 = vperm.xlu0 %9266, %v9342_v15   ;;  %vm2438_vm10 = vcmp.ge.f32.partialorder %v2374_v63, %v2424_v19  ;;  %9338 = vperm.xlu1 %9260, %v9337_v20  }
 0x8ea   : > { %vm2516_vm11 = vcmp.eq.f32.partialorder %v11429_v14, %v2490_v46  ;;  %vm2540_vm3 = vcmp.lt.f32.partialorder %v11429_v14, %v2490_v46  ;;  %vm2446_vm12 = vmand %vm2438_vm10, %vm2366_vm9  ;;  %v2430_v5 = vrot.slane %v2429_v52, 1  ;;  %vm2564_vm14 = vcmp.gt.f32.partialorder %v11429_v14, %v2490_v46 }
 0x8eb   : > { %v8527_v6 = vsel %vm2516_vm11, 1.0, %v15705_v48  ;;  %v8535_v25 = vsel %vm2540_vm3, 1.0, %v15705_v48  ;;  %v2494_v2 = vrot.slane %v2493_v53, 2  ;;  %v2454_v8 = vsel %vm2446_vm12, %v11429_v14, 8.0 }
 0x8ec   : > { %v9347_v41 = vpack.i.bf16 %v8535_v25, %v8527_v6  ;;  %v2498_v23 = vsel %vm1205_vm4, %v2454_v8, inf  ;;  %v2431_v44 = vmax.f32 %v2429_v52, %v2430_v5  ;;  %v8543_v55 = vsel %vm2564_vm14, 1.0, %v15705_v48 }
 0x8ed   : > { %v2495_v0 = vmin.f32 %v2493_v53, %v2494_v2  ;;  %v2499_v39 = vrot.slane %v2498_v23, 4  ;;  %vm3529_vm14 = vcmask 1044480  }
 0x8ee   : > { %9348 = vperm.xlu1 %9260, %v9347_v41   ;;  %vm2439_vm5 = vcmp.ge.f32.partialorder %v2375_v3, %v2431_v44 }
 0x8ef   : > { %v2496_v63 = vrot.slane %v2495_v0, 1  ;;  %v2500_v30 = vmin.f32 %v2498_v23, %v2499_v39  ;;  %vm2447_vm15 = vmand %vm2439_vm5, %vm2367_vm6  ;;  %vm4707_vm5 = vcmask 1043456  }
 0x8f0   : > { %v2455_v60 = vsel %vm2447_vm15, %v11429_v14, 8.0 }
 0x8f1   : > { %v2497_v56 = vmin.f32 %v2495_v0, %v2496_v63  ;;  %v2501_v59 = vrot.slane %v2500_v30, 2  ;;  %v2505_v51 = vsel %vm1205_vm4, %v2455_v60, inf }
 0x8f2   : > { %v2506_v57 = vrot.slane %v2505_v51, 4 }
 0x8f3   : > { %vm2541_vm9 = vcmp.lt.f32.partialorder %v11429_v14, %v2497_v56  ;;  %vm2565_vm7 = vcmp.gt.f32.partialorder %v11429_v14, %v2497_v56  ;;  %vm2517_vm8 = vcmp.eq.f32.partialorder %v11429_v14, %v2497_v56  ;;  %v2502_v3 = vmin.f32 %v2500_v30, %v2501_v59 }
 0x8f4   : > { %v8536_v46 = vsel %vm2541_vm9, 1.0, %v15705_v48  ;;  %v8544_v54 = vsel %vm2565_vm7, 1.0, %v15705_v48  ;;  %v8528_v26 = vsel %vm2517_vm8, 1.0, %v15705_v48  ;;  %v2507_v15 = vmin.f32 %v2505_v51, %v2506_v57 }
 0x8f5   : > { %v9357_v19 = vpack.i.bf16 %v8544_v54, %v8536_v46  ;;  %v9352_v20 = vpack.i.bf16 %v8528_v26, %v8543_v55  ;;  %v2503_v53 = vrot.slane %v2502_v3, 1 }
 0x8f6   : > { %v2508_v52 = vrot.slane %v2507_v15, 2 }
 0x8f7   : > { %9358 = vperm.xlu1 %9260, %v9357_v19   ;;  %9353 = vperm.xlu0 %9266, %v9352_v20   ;;  %v2504_v6 = vmin.f32 %v2502_v3, %v2503_v53  ;;  %v2785_v53 = vstv %s12197_s15  ;;  %s9022_s15 = spop %9021 }
 0x8f8   : > { %v2509_v25 = vmin.f32 %v2507_v15, %v2508_v52  ;;  %v2825_v52 = vstv %s9016_s28 }
 0x8f9   : > { %vm2518_vm6 = vcmp.eq.f32.partialorder %v11429_v14, %v2504_v6  ;;  %vm2542_vm13 = vcmp.lt.f32.partialorder %v11429_v14, %v2504_v6  ;;  %vm2566_vm11 = vcmp.gt.f32.partialorder %v11429_v14, %v2504_v6 }
 0x8fa   : > { %v8529_v2 = vsel %vm2518_vm6, 1.0, %v15705_v48  ;;  %v8537_v5 = vsel %vm2542_vm13, 1.0, %v15705_v48  ;;  %v2510_v41 = vrot.slane %v2509_v25, 1  ;;  %v8545_v44 = vsel %vm2566_vm11, 1.0, %v15705_v48 }
 0x8fb   : > { %v9362_v8 = vpack.i.bf16 %v8537_v5, %v8529_v2 }
 0x8fc   : > { %v2511_v0 = vmin.f32 %v2509_v25, %v2510_v41 }
 0x8fd   : > { %9363 = vperm.xlu0 %9266, %v9362_v8  }
 0x8fe   : > { %vm2543_vm3 = vcmp.lt.f32.partialorder %v11429_v14, %v2511_v0  ;;  %vm2519_vm10 = vcmp.eq.f32.partialorder %v11429_v14, %v2511_v0  ;;  %vm2567_vm12 = vcmp.gt.f32.partialorder %v11429_v14, %v2511_v0 }
 0x8ff   : > { %v8530_v23 = vsel %vm2519_vm10, 1.0, %v15705_v48  ;;  %v8538_v39 = vsel %vm2543_vm3, 1.0, %v15705_v48  ;;  %v8546_v30 = vsel %vm2567_vm12, 1.0, %v15705_v48 }
 0x900   : > { %v9367_v63 = vpack.i.bf16 %v8530_v23, %v8545_v44 }
 0x901   : > { %2669 = vperm.xlu0 %9266, %v8538_v39  }
 0x902   : > { %9368 = vperm.xlu1 %9260, %v9367_v63  }
 0x906   : > { %2725 = vperm.xlu1 %9260, %v8546_v30  }
 0x951   : > { %v9319_v56 = vpop.permute.xlu0 %9318 }
 0x952   : > { %v9321_v60 = vunpack.i.h.bf16 %v9319_v56  ;;  %v9320_v59 = vunpack.i.l.bf16 %v9319_v56 }
 0x954   : > { %v2672_v51 = vmul.f32 %v9321_v60, %v11576_v32  ;;  %v2752_v55 = vmul.f32 %v9321_v60, %v11578_v36  ;;  %v2624_v57 = vmul.f32 %v9320_v59, %v11943_v13  ;;  %v2744_v3 = vmul.f32 %v9320_v59, %v11857_v38 }
 0x955   : > { %v9324_v46 = vpop.permute.xlu1 %9323  ;;  %v2848_v13 = vmul.f32 %v2825_v52, %v11576_v32  ;;  %v2872_v38 = vmul.f32 %v2825_v52, %v11578_v36 }
 0x956   : > { %v9325_v54 = vunpack.i.l.bf16 %v9324_v46  ;;  %v2760_v26 = vadd.f32 %v2752_v55, %v2744_v3  ;;  %v2680_v15 = vadd.f32 %v2672_v51, %v2624_v57  ;;  %v9326_v6 = vunpack.i.h.bf16 %v9324_v46 }
 0x957   : > { %v2828_v55 = vstv %s9018_s13 }
 0x958   : > { %v2728_v19 = vmul.f32 %v9325_v54, %v11590_v21  ;;  %v2768_v20 = vmul.f32 %v9325_v54, %v11847_v12  ;;  %v2625_v44 = vmul.f32 %v9326_v6, %v11954_v28  ;;  %v2745_v21 = vmul.f32 %v9326_v6, %v11863_v22 }
 0x959   : > { %v9329_v25 = vpop.permute.xlu1 %9328  ;;  %v2788_v54 = vstv %s12199_s19  ;;  %s9024_s19 = spop %9023 }
 0x95a   : > { %v2736_v2 = vadd.f32 %v2728_v19, %v2680_v15  ;;  %v2776_v5 = vadd.f32 %v2768_v20, %v2760_v26  ;;  %v9330_v41 = vunpack.i.l.bf16 %v9329_v25  ;;  %v9331_v8 = vunpack.i.h.bf16 %v9329_v25 }
 0x95b   : > { %v2849_v19 = vmul.f32 %v2828_v55, %v11584_v37  ;;  %v2873_v20 = vmul.f32 %v2828_v55, %v11586_v16 }
 0x95c   : > { %v2808_v0 = vmul.f32 %v2785_v53, %v2736_v2  ;;  %v2864_v23 = vmul.f32 %v2785_v53, %v2776_v5  ;;  %v9334_v12 = vpop.permute.xlu0 %9333  ;;  %v2673_v39 = vmul.f32 %v9330_v41, %v11584_v37  ;;  %v2753_v63 = vmul.f32 %v9330_v41, %v11586_v16 }
 0x95d   : > { %v9336_v30 = vunpack.i.h.bf16 %v9334_v12  ;;  %v9335_v56 = vunpack.i.l.bf16 %v9334_v12  ;;  %v2729_v36 = vmul.f32 %v9331_v8, %v11597_v50  ;;  %v2769_v59 = vmul.f32 %v9331_v8, %v11854_v11 }
 0x95e   : > { %v12226_v60 = vadd.f32 %v2848_v13, %v2808_v0  ;;  %v12228_v32 = vadd.f32 %v2872_v38, %v2864_v23  ;;  %v2681_v51 = vadd.f32 %v2673_v39, %v2625_v44  ;;  %v2761_v28 = vadd.f32 %v2753_v63, %v2745_v21 }
 0x95f   : > { %v2754_v22 = vmul.f32 %v9336_v30, %v11609_v42  ;;  %v2746_v57 = vmul.f32 %v9335_v56, %v11873_v27  ;;  %v2674_v25 = vmul.f32 %v9336_v30, %v11607_v4  ;;  %v2626_v37 = vmul.f32 %v9335_v56, %v11962_v29 }
 0x960   : > { %v2737_v3 = vadd.f32 %v2729_v36, %v2681_v51  ;;  %v2777_v46 = vadd.f32 %v2769_v59, %v2761_v28  ;;  %v2896_v15 = vrot.slane %v12226_v60, 1  ;;  %v2791_v13 = vstv %s12201_s21  ;;  %s12283_s21 = spop %9025 }
 0x961   : > { %v2762_v26 = vadd.f32 %v2754_v22, %v2746_v57  ;;  %v2831_v23 = vstv %s9020_s14  ;;  %v2682_v44 = vadd.f32 %v2674_v25, %v2626_v37  ;;  %v2794_v56 = vstv %s12203_s23  ;;  %s12314_s23 = spop %9027 }
 0x962   : > { %v2809_v50 = vmul.f32 %v2788_v54, %v2737_v3  ;;  %v2865_v11 = vmul.f32 %v2788_v54, %v2777_v46  ;;  %v12239_v53 = vsel %vm569_vm1, %v2896_v15, 0.0  ;;  %v2834_v36 = vstv %s9022_s15 }
 0x963   : > { %2960 = vrot.lane.b32.xlu0 %v12239_v53, %s15653_s20  ;;  %v2850_v46 = vmul.f32 %v2831_v23, %v11607_v4 }
 0x964   : > { %v12243_v27 = vadd.f32 %v2849_v19, %v2809_v50  ;;  %v12245_v52 = vadd.f32 %v2873_v20, %v2865_v11  ;;  %v2851_v20 = vmul.f32 %v2834_v36, %v11622_v18 }
 0x966   : > { %v2897_v6 = vrot.slane %v12243_v27, 1 }
 0x968   : > { %v9344_v16 = vpop.permute.xlu0 %9343  ;;  %v12251_v2 = vsel %vm569_vm1, %v2897_v6, 0.0  ;;  %v9339_v8 = vpop.permute.xlu1 %9338 }
 0x969   : > { %v9346_v5 = vunpack.i.h.bf16 %v9344_v16  ;;  %v9345_v41 = vunpack.i.l.bf16 %v9344_v16  ;;  %2962 = vrot.lane.b32.xlu1 %v12251_v2, %s15653_s20  ;;  %v9341_v38 = vunpack.i.h.bf16 %v9339_v8  ;;  %v9340_v0 = vunpack.i.l.bf16 %v9339_v8 }
 0x96b   : > { %v2675_v29 = vmul.f32 %v9345_v41, %v11622_v18  ;;  %v2755_v21 = vmul.f32 %v9345_v41, %v11624_v31  ;;  %v2627_v12 = vmul.f32 %v9341_v38, %v11969_v17  ;;  %v2747_v39 = vmul.f32 %v9341_v38, %v11889_v49 }
 0x96c   : > { %v2730_v63 = vmul.f32 %v9340_v0, %v11617_v9  ;;  %v2770_v30 = vmul.f32 %v9340_v0, %v11866_v24  ;;  %v2731_v59 = vmul.f32 %v9346_v5, %v11629_v45  ;;  %v2771_v51 = vmul.f32 %v9346_v5, %v11878_v10 }
 0x96d   : > { %v9349_v28 = vpop.permute.xlu1 %9348  ;;  %v2683_v55 = vadd.f32 %v2675_v29, %v2627_v12  ;;  %v2763_v22 = vadd.f32 %v2755_v21, %v2747_v39  ;;  %v2874_v17 = vmul.f32 %v2831_v23, %v11609_v42  ;;  %v2875_v45 = vmul.f32 %v2834_v36, %v11624_v31 }
 0x96e   : > { %v2738_v57 = vadd.f32 %v2730_v63, %v2682_v44  ;;  %v2778_v3 = vadd.f32 %v2770_v30, %v2762_v26  ;;  %v9351_v49 = vunpack.i.h.bf16 %v9349_v28  ;;  %v9350_v54 = vunpack.i.l.bf16 %v9349_v28  ;;  %v15762_v28 = vld [vmem:[#allocation45_spill] sm:$0xff] }
 0x96f   : > { %v2739_v9 = vadd.f32 %v2731_v59, %v2683_v55  ;;  %v2779_v15 = vadd.f32 %v2771_v51, %v2763_v22  ;;  %v2797_v63 = vstv %s12205_s25  ;;  %v2837_v30 = vstv %s9024_s19  ;;  %s9030_s25 = spop %9029 }
 0x970   : > { %v2810_v24 = vmul.f32 %v2791_v13, %v2738_v57  ;;  %v2866_v19 = vmul.f32 %v2791_v13, %v2778_v3  ;;  %v2756_v10 = vmul.f32 %v9351_v49, %v11641_v35  ;;  %v2748_v50 = vmul.f32 %v9350_v54, %v11896_v62 }
 0x971   : > { %v2811_v4 = vmul.f32 %v2794_v56, %v2739_v9  ;;  %v2867_v42 = vmul.f32 %v2794_v56, %v2779_v15  ;;  %v2676_v25 = vmul.f32 %v9351_v49, %v11639_v43  ;;  %v2628_v37 = vmul.f32 %v9350_v54, %v11974_v34 }
 0x972   : > { %v12271_v11 = vadd.f32 %v2850_v46, %v2810_v24  ;;  %v12273_v26 = vadd.f32 %v2874_v17, %v2866_v19  ;;  %v2764_v6 = vadd.f32 %v2756_v10, %v2748_v50  ;;  %v2800_v59 = vstv %s12207_s18  ;;  %v15763_v10 = vld [vmem:[#allocation13_spill] sm:$0xff] }
 0x973   : > { %v12277_v16 = vadd.f32 %v2851_v20, %v2811_v4  ;;  %v12279_v18 = vadd.f32 %v2875_v45, %v2867_v42  ;;  %v2684_v34 = vadd.f32 %v2676_v25, %v2628_v37  ;;  %v2852_v57 = vmul.f32 %v2837_v30, %v11639_v43  ;;  %v15764_v4 = vld [vmem:[#allocation14_spill] sm:$0xff]  ;;  %v15766_v37 = vld [vmem:[#allocation48_spill] sm:$0xff] }
 0x974   : > { %v2898_v31 = vrot.slane %v12271_v11, 1  ;;  %v2876_v3 = vmul.f32 %v2837_v30, %v11641_v35  ;;  %v15770_v30 = vld [vmem:[#allocation49_spill] sm:$0xff] }
 0x975   : > { %v2899_v62 = vrot.slane %v12277_v16, 1 }
 0x976   : > { %v9354_v5 = vpop.permute.xlu0 %9353  ;;  %v9359_v41 = vpop.permute.xlu1 %9358  ;;  %v12286_v23 = vsel %vm569_vm1, %v2898_v31, 0.0 }
 0x977   : > { %v9356_v8 = vunpack.i.h.bf16 %v9354_v5  ;;  %v9355_v13 = vunpack.i.l.bf16 %v9354_v5  ;;  %v9360_v38 = vunpack.i.l.bf16 %v9359_v41  ;;  %v9361_v0 = vunpack.i.h.bf16 %v9359_v41  ;;  %2964 = vrot.lane.b32.xlu0 %v12286_v23, %s15653_s20 }
 0x978   : > { %v12289_v44 = vsel %vm569_vm1, %v2899_v62, 0.0  ;;  %v2843_v62 = vstv %s12314_s23 }
 0x979   : > { %v2629_v29 = vmul.f32 %v9356_v8, %v11979_v7  ;;  %v2749_v21 = vmul.f32 %v9356_v8, %v11910_v1  ;;  %v2732_v12 = vmul.f32 %v9355_v13, %v11651_v58  ;;  %v2772_v39 = vmul.f32 %v9355_v13, %v11886_v33  ;;  %2966 = vrot.lane.b32.xlu1 %v12289_v44, %s15653_s20 }
 0x97a   : > { %v2677_v56 = vmul.f32 %v9360_v38, %v11655_v47  ;;  %v2757_v36 = vmul.f32 %v9360_v38, %v11657_v61  ;;  %v2840_v7 = vstv %s12283_s21  ;;  %v2733_v58 = vmul.f32 %v9361_v0, %v11666_v40 }
 0x97b   : > { %v2740_v51 = vadd.f32 %v2732_v12, %v2684_v34  ;;  %v2780_v1 = vadd.f32 %v2772_v39, %v2764_v6  ;;  %v2773_v33 = vmul.f32 %v9361_v0, %v15762_v28  ;;  %v2853_v19 = vmul.f32 %v2840_v7, %v11655_v47  ;;  %v15765_v6 = vld [vmem:[#allocation50_spill] sm:$0xff]  ;;  %v15768_v0 = vld [vmem:[#allocation15_spill] sm:$0xff] }
 0x97c   : > { %v2685_v55 = vadd.f32 %v2677_v56, %v2629_v29  ;;  %v2765_v22 = vadd.f32 %v2757_v36, %v2749_v21  ;;  %v9364_v49 = vpop.permute.xlu0 %9363  ;;  %v2877_v20 = vmul.f32 %v2840_v7, %v11657_v61  ;;  %v15769_v39 = vld [vmem:[#allocation51_spill] sm:$0xff]  ;;  %v15772_v7 = vld [vmem:[#allocation46_spill] sm:$0xff] }
 0x97d   : > { %v2812_v46 = vmul.f32 %v2797_v63, %v2740_v51  ;;  %v2868_v17 = vmul.f32 %v2797_v63, %v2780_v1  ;;  %v9366_v15 = vunpack.i.h.bf16 %v9364_v49  ;;  %v9365_v24 = vunpack.i.l.bf16 %v9364_v49  ;;  %v15771_v36 = vld [vmem:[#allocation43_spill] sm:$0xff] }
 0x97e   : > { %v2741_v54 = vadd.f32 %v2733_v58, %v2685_v55  ;;  %v2781_v9 = vadd.f32 %v2773_v33, %v2765_v22  ;;  %v2803_v1 = vstv %s12209_s26  ;;  %v15773_v58 = vld [vmem:[#allocation42_spill] sm:$0xff] }
 0x97f   : > { %v12310_v40 = vadd.f32 %v2852_v57, %v2812_v46  ;;  %v12312_v45 = vadd.f32 %v2876_v3, %v2868_v17  ;;  %v2678_v50 = vmul.f32 %v9366_v15, %v15763_v10  ;;  %v2758_v42 = vmul.f32 %v9366_v15, %v15764_v4  ;;  %v15775_v17 = vld [vmem:[#allocation44_spill] sm:$0xff] }
 0x980   : > { %v2813_v43 = vmul.f32 %v2800_v59, %v2741_v54  ;;  %v2869_v35 = vmul.f32 %v2800_v59, %v2781_v9  ;;  %v2630_v25 = vmul.f32 %v9365_v24, %v15765_v6  ;;  %v2750_v31 = vmul.f32 %v9365_v24, %v15766_v37  ;;  %v2670_v47 = vpop.permute.xlu0 %2669  ;;  %v15776_v24 = vld [vmem:[#allocation47_spill] sm:$0xff] }
 0x981   : > { %v9369_v5 = vpop.permute.xlu1 %9368  ;;  %v2679_v29 = vmul.f32 %v2670_v47, %v15768_v0  ;;  %v2900_v21 = vrot.slane %v12310_v40, 1  ;;  %v2759_v28 = vmul.f32 %v2670_v47, %v15773_v58  ;;  %v2854_v54 = vmul.f32 %v2843_v62, %v15763_v10 }
 0x982   : > { %v12320_v61 = vadd.f32 %v2853_v19, %v2813_v43  ;;  %v12322_v41 = vadd.f32 %v2877_v20, %v2869_v35  ;;  %v2766_v8 = vadd.f32 %v2758_v42, %v2750_v31  ;;  %v9371_v13 = vunpack.i.h.bf16 %v9369_v5 }
 0x983   : > { %v9370_v38 = vunpack.i.l.bf16 %v9369_v5  ;;  %v2686_v34 = vadd.f32 %v2678_v50, %v2630_v25  ;;  %v12335_v55 = vsel %vm569_vm1, %v2900_v21, 0.0  ;;  %v2846_v9 = vstv %s9030_s25  ;;  %v15783_v21 = vld [vmem:[#allocation25_spill] sm:$0xff] }
 0x984   : > { %15767 = vst [vmem:[#allocation34_spill] sm:$0xff] %v12322_v41  ;;  %v2901_v12 = vrot.slane %v12320_v61, 1  ;;  %v2631_v63 = vmul.f32 %v9371_v13, %v15769_v39  ;;  %v2751_v56 = vmul.f32 %v9371_v13, %v15770_v30  ;;  %2968 = vrot.lane.b32.xlu0 %v12335_v55, %s15653_s20  ;;  %v2878_v20 = vmul.f32 %v2843_v62, %v15764_v4  ;;  %v15785_v30 = vld [vmem:[#allocation27_spill] sm:$0xff] }
 0x985   : > { %v2734_v59 = vmul.f32 %v9370_v38, %v15771_v36  ;;  %v2774_v51 = vmul.f32 %v9370_v38, %v15772_v7  ;;  %v2726_v33 = vpop.permute.xlu1 %2725  ;;  %v2806_v42 = vstv %s12211_s27  ;;  %v2855_v25 = vmul.f32 %v2846_v9, %v15768_v0  ;;  %v15787_v36 = vld [vmem:[#allocation29_spill] sm:$0xff]  ;;  %v15789_v7 = vld [vmem:[#allocation31_spill] sm:$0xff]  ;;  %s12877_s27 = spop %9031 }
 0x986   : > { %v12338_v22 = vsel %vm569_vm1, %v2901_v12, 0.0  ;;  %v2687_v46 = vadd.f32 %v2679_v29, %v2631_v63  ;;  %v2735_v49 = vmul.f32 %v2726_v33, %v15775_v17  ;;  %v2767_v15 = vadd.f32 %v2759_v28, %v2751_v56  ;;  %v15784_v12 = vld [vmem:[#allocation26_spill] sm:$0xff]  ;;  %v15786_v56 = vld [vmem:[#allocation28_spill] sm:$0xff]  ;;  %s12879_s28 = spop %9033 }
 0x987   : > { %15774 = vst [vmem:[#allocation35_spill] sm:$0xff] %v12338_v22  ;;  %v2742_v57 = vadd.f32 %v2734_v59, %v2686_v34  ;;  %v2782_v3 = vadd.f32 %v2774_v51, %v2766_v8  ;;  %v2775_v19 = vmul.f32 %v2726_v33, %v15776_v24  ;;  %2970 = vrot.lane.b32.xlu1 %v12338_v22, %s15653_s20  ;;  %v15788_v59 = vld [vmem:[#allocation30_spill] sm:$0xff]  ;;  %v15790_v51 = vld [vmem:[#allocation24_spill] sm:$0xff]  ;;  %s12881_s13 = spop %9035 }
 0x988   : > { %v2743_v50 = vadd.f32 %v2735_v49, %v2687_v46  ;;  %v2879_v47 = vmul.f32 %v2846_v9, %v15773_v58  ;;  %s12883_s14 = spop %9037 }
 0x989   : > { %v2814_v43 = vmul.f32 %v2803_v1, %v2742_v57  ;;  %v2870_v35 = vmul.f32 %v2803_v1, %v2782_v3  ;;  %v2783_v6 = vadd.f32 %v2775_v19, %v2767_v15  ;;  %v15791_v19 = vld [vmem:[#allocation32_spill] sm:$0xff]  ;;  %s12885_s15 = spop %9039 }
 0x98a   : > { %v2815_v37 = vmul.f32 %v2806_v42, %v2743_v50  ;;  %s12887_s19 = spop %9041 }
 0x98b   : > { %v12350_v31 = vadd.f32 %v2854_v54, %v2814_v43  ;;  %v12352_v10 = vadd.f32 %v2878_v20, %v2870_v35  ;;  %v2871_v5 = vmul.f32 %v2806_v42, %v2783_v6  ;;  %s12889_s21 = spop %9043 }
 0x98c   : > { %v12355_v8 = vadd.f32 %v2855_v25, %v2815_v37  ;;  %s12895_s23 = spop %9045 }
 0x98d   : > { %15777 = vst [vmem:[#allocation36_spill] sm:$0xff] %v12350_v31  ;;  %15778 = vst [vmem:[#allocation37_spill] sm:$0xff] %v12352_v10  ;;  %v2902_v13 = vrot.slane %v12350_v31, 1  ;;  %v12358_v4 = vadd.f32 %v2879_v47, %v2871_v5  ;;  %s9048_s25 = spop %9047 }
 0x98e   : > { %15779 = vst [vmem:[#allocation38_spill] sm:$0xff] %v12355_v8  ;;  %v2903_v38 = vrot.slane %v12355_v8, 1  ;;  %s9050_s18 = spop %9049 }
 0x98f   : > { %15780 = vst [vmem:[#allocation39_spill] sm:$0xff] %v12358_v4  ;;  %v12361_v62 = vsel %vm569_vm1, %v2902_v13, 0.0  ;;  %s9052_s26 = spop %9051 }
 0x990   : > { %15781 = vst [vmem:[#allocation40_spill] sm:$0xff] %v12361_v62  ;;  %2972 = vrot.lane.b32.xlu0 %v12361_v62, %s15653_s20  ;;  %v12367_v34 = vsel %vm569_vm1, %v2903_v38, 0.0 }
 0x991   : > { %15782 = vst [vmem:[#allocation41_spill] sm:$0xff] %v12367_v34  ;;  %2974 = vrot.lane.b32.xlu1 %v12367_v34, %s15653_s20 }
 0x9d5   : > { %v2961_v0 = vpop.permute.xlu0 %2960 }
 0x9d6   : > { %v2984_v29 = vsel %vm415_vm0, %v12226_v60, %v2961_v0 }
 0x9d7   : > { %8547 = vmatmul.mubr.msk.f32.vlgmr.msra.gmra.mrb[16].mxu1 %vm629_vm2, %v2984_v29 }
 0x9d8   : > { %3086 = vmatprep.mubr.f32.mxu1 %v15705_v48  ;;  %8914 = vmatpush1.bf16.msra.mxu1 %v15783_v21 }
 0x9d9   : > { %8916 = vmatprep.subr.bf16.mxu1 %v15784_v12 }
 0x9db   : > { %v2963_v39 = vpop.permute.xlu1 %2962 }
 0x9dc   : > { %v2985_v63 = vsel %vm415_vm0, %v12243_v27, %v2963_v39  ;;  %8918 = vmatpush1.bf16.msra.mxu1 %v15785_v30 }
 0x9dd   : > { %8548 = vmatmul.mubr.msk.f32.gmra.mrb[18].mxu1 %vm629_vm2, %v2985_v63  ;;  %8920 = vmatprep.subr.bf16.mxu1 %v15786_v56 }
 0x9de   : > { %3092 = vmatprep.mubr.f32.mxu1 %v15705_v48 }
 0x9e0   : > { %8922 = vmatpush1.bf16.msra.mxu1 %v15787_v36 }
 0x9e1   : > { %8924 = vmatprep.subr.bf16.mxu1 %v15788_v59 }
 0x9e4   : > { %8926 = vmatpush1.bf16.msra.mxu1 %v15789_v7 }
 0x9e5   : > { %8959 = vmatprep.subr.bf16.mxu1 %v15790_v51 }
 0x9e9   : > { %v2965_v1 = vpop.permute.xlu0 %2964 }
 0x9ea   : > { %v2986_v58 = vsel %vm415_vm0, %v12271_v11, %v2965_v1 }
 0x9eb   : > { %v2967_v28 = vpop.permute.xlu1 %2966  ;;  %8549 = vmatmul.mubr.msk.f32.gmra.mrb[20].mxu1 %vm629_vm2, %v2986_v58 }
 0x9ec   : > { %3098 = vmatprep.mubr.f32.mxu1 %v15705_v48  ;;  %v2987_v33 = vsel %vm415_vm0, %v12277_v16, %v2967_v28 }
 0x9ef   : > { %8550 = vmatmul.mubr.msk.f32.gmra.mrb[22].mxu1 %vm629_vm2, %v2987_v33 }
 0x9f0   : > { %3104 = vmatprep.mubr.f32.mxu1 %v15705_v48 }
 0x9f6   : > { %v2969_v57 = vpop.permute.xlu0 %2968 }
 0x9f7   : > { %v2988_v3 = vsel %vm415_vm0, %v12310_v40, %v2969_v57 }
 0x9f8   : > { %8551 = vmatmul.mubr.msk.f32.gmra.mrb[24].mxu1 %vm629_vm2, %v2988_v3 }
 0x9f9   : > { %v2971_v46 = vpop.permute.xlu1 %2970  ;;  %3110 = vmatprep.mubr.f32.mxu1 %v15705_v48 }
 0x9fa   : > { %v2989_v17 = vsel %vm415_vm0, %v12320_v61, %v2971_v46 }
 0x9fc   : > { %8552 = vmatmul.mubr.msk.f32.gmra.mrb[26].mxu1 %vm629_vm2, %v2989_v17 }
 0x9fd   : > { %3116 = vmatprep.mubr.f32.mxu1 %v15705_v48 }
 0xa02   : > { %v2973_v49 = vpop.permute.xlu0 %2972 }
 0xa03   : > { %v2990_v54 = vsel %vm415_vm0, %v12350_v31, %v2973_v49  ;;  %v2975_v9 = vpop.permute.xlu1 %2974 }
 0xa04   : > { %8553 = vmatmul.mubr.msk.f32.gmra.mrb[28].mxu1 %vm629_vm2, %v2990_v54  ;;  %v2991_v15 = vsel %vm415_vm0, %v12355_v8, %v2975_v9 }
 0xa05   : > { %3122 = vmatprep.mubr.f32.mxu1 %v15705_v48 }
 0xa08   : > { %8554 = vmatmul.mubr.msk.f32.gmra.mrb[30].mxu1 %vm629_vm2, %v2991_v15 }
 0xa09   : > { %5436 = vmatprep.mubr.f32.mxu1 %v15705_v48 }
 0xaaa   : > { %v3082_v24 = vpop.f32.mrb[16].mxu1 }
 0xaab   : > { %v12412_v20 = vadd.f32 %v3082_v24, %v15791_v19  ;;  %v12414_v43 = vpop.f32.mrb[17].mxu1 }
 0xaad   : > { %v8563_v35 = vmul.f32 -1.442695, %v12412_v20 }
 0xaaf   : > { %9848 = vpow2.f32 %v8563_v35 }
 0xab0   : > { %v3088_v50 = vpop.f32.mrb[18].mxu1 }
 0xab1   : > { %v12418_v42 = vadd.f32 %v3088_v50, %v15791_v19  ;;  %v12420_v6 = vpop.f32.mrb[19].mxu1 }
 0xab3   : > { %v8564_v25 = vmul.f32 -1.442695, %v12418_v42 }
 0xab5   : > { %9850 = vpow2.f32 %v8564_v25 }
 0xab9   : > { %v9849_v37 = vpop.eup %9848 }
 0xaba   : > { %v3273_v47 = vadd.f32 1.0, %v9849_v37 }
 0xabc   : > { %9852 = vrcp.f32 %v3273_v47 }
 0xabe   : > { %v3094_v38 = vpop.f32.mrb[20].mxu1 }
 0xabf   : > { %v9851_v5 = vpop.eup %9850  ;;  %v12424_v0 = vadd.f32 %v3094_v38, %v15791_v19  ;;  %v12426_v29 = vpop.f32.mrb[21].mxu1 }
 0xac0   : > { %v3274_v13 = vadd.f32 1.0, %v9851_v5  ;;  %v3129_v5 = vadd.f32 1.0, %v12412_v20 }
 0xac1   : > { %v8565_v39 = vmul.f32 -1.442695, %v12424_v0 }
 0xac2   : > { %9854 = vrcp.f32 %v3274_v13  ;;  %v3100_v63 = vpop.f32.mrb[22].mxu1 }
 0xac3   : > { %v12430_v1 = vadd.f32 %v3100_v63, %v15791_v19  ;;  %v12432_v58 = vpop.f32.mrb[23].mxu1  ;;  %9856 = vpow2.f32 %v8565_v39 }
 0xac5   : > { %v8566_v33 = vmul.f32 -1.442695, %v12430_v1 }
 0xac6   : > { %v9853_v28 = vpop.eup %9852 }
 0xac7   : > { %3305 = vrot.lane.b32.xlu0 %v9853_v28, %s15651_s22  ;;  %9858 = vpow2.f32 %v8566_v33  ;;  %v8555_v33 = vmul.f32 -1.442695, %v3129_v5 }
 0xacb   : > { %v3106_v3 = vpop.f32.mrb[24].mxu1 }
 0xacc   : > { %v9855_v57 = vpop.eup %9854  ;;  %v12437_v46 = vpop.f32.mrb[25].mxu1  ;;  %v12440_v54 = vadd.f32 %v3106_v3, %v15791_v19 }
 0xacd   : > { %3307 = vrot.lane.b32.xlu1 %v9855_v57, %s15651_s22  ;;  %v9857_v17 = vpop.eup %9856 }
 0xace   : > { %v3275_v49 = vadd.f32 1.0, %v9857_v17  ;;  %v8567_v50 = vmul.f32 -1.442695, %v12440_v54  ;;  %v3130_v17 = vadd.f32 1.0, %v12418_v42 }
 0xacf   : > { %v3112_v9 = vpop.f32.mrb[26].mxu1 }
 0xad0   : > { %9860 = vrcp.f32 %v3275_v49  ;;  %v12442_v15 = vpop.f32.mrb[27].mxu1  ;;  %v12446_v25 = vadd.f32 %v3112_v9, %v15791_v19 }
 0xad1   : > { %v9859_v24 = vpop.eup %9858 }
 0xad2   : > { %v3276_v35 = vadd.f32 1.0, %v9859_v24  ;;  %v8568_v13 = vmul.f32 -1.442695, %v12446_v25  ;;  %v8556_v24 = vmul.f32 -1.442695, %v3130_v17  ;;  %v3133_v17 = vadd.f32 1.0, %v12440_v54 }
 0xad4   : > { %9862 = vrcp.f32 %v3276_v35 }
 0xad5   : > { %9864 = vpow2.f32 %v8567_v50  ;;  %v3131_v50 = vadd.f32 1.0, %v12424_v0 }
 0xad6   : > { %9866 = vpow2.f32 %v8568_v13 }
 0xad7   : > { %v3118_v37 = vpop.f32.mrb[28].mxu1  ;;  %9868 = vpow2.f32 %v8555_v33  ;;  %v3132_v33 = vadd.f32 1.0, %v12430_v1 }
 0xad8   : > { %v12448_v47 = vpop.f32.mrb[29].mxu1  ;;  %v12453_v38 = vadd.f32 %v3118_v37, %v15791_v19 }
 0xada   : > { %v9861_v28 = vpop.eup %9860  ;;  %v8569_v57 = vmul.f32 -1.442695, %v12453_v38 }
 0xadb   : > { %v3124_v39 = vpop.f32.mrb[30].mxu1  ;;  %3309 = vrot.lane.b32.xlu0 %v9861_v28, %s15651_s22  ;;  %v8557_v28 = vmul.f32 -1.442695, %v3131_v50 }
 0xadc   : > { %v12455_v63 = vpop.f32.mrb[31].mxu1  ;;  %9870 = vpow2.f32 %v8569_v57  ;;  %v12461_v49 = vadd.f32 %v3124_v39, %v15791_v19 }
 0xade   : > { %v9863_v3 = vpop.eup %9862  ;;  %v8570_v37 = vmul.f32 -1.442695, %v12461_v49 }
 0xadf   : > { %3311 = vrot.lane.b32.xlu1 %v9863_v3, %s15651_s22  ;;  %v9865_v9 = vpop.eup %9864  ;;  %v8558_v3 = vmul.f32 -1.442695, %v3132_v33 }
 0xae0   : > { %v3277_v35 = vadd.f32 1.0, %v9865_v9  ;;  %v9867_v5 = vpop.eup %9866 }
 0xae1   : > { %v3278_v13 = vadd.f32 1.0, %v9867_v5  ;;  %v9869_v57 = vpop.eup %9868 }
 0xae2   : > { %9872 = vrcp.f32 %v3277_v35  ;;  %v3161_v9 = vadd.f32 1.0, %v9869_v57  ;;  %v8559_v35 = vmul.f32 -1.442695, %v3133_v17  ;;  %v3136_v17 = vadd.f32 1.0, %v12461_v49 }
 0xae3   : > { %9874 = vpow2.f32 %v8556_v24  ;;  %v3134_v24 = vadd.f32 1.0, %v12446_v25 }
 0xae4   : > { %9876 = vpow2.f32 %v8570_v37 }
 0xae5   : > { %9878 = vrcp.f32 %v3278_v13 }
 0xae6   : > { %v9871_v39 = vpop.eup %9870  ;;  %9880 = vpow2.f32 %v8557_v28  ;;  %v3135_v28 = vadd.f32 1.0, %v12453_v38 }
 0xae7   : > { %v3279_v19 = vadd.f32 1.0, %v9871_v39  ;;  %v8560_v39 = vmul.f32 -1.442695, %v3134_v24 }
 0xae9   : > { %9882 = vrcp.f32 %v3279_v19 }
 0xaea   : > { %9884 = vpow2.f32 %v8558_v3  ;;  %v8561_v3 = vmul.f32 -1.442695, %v3135_v28 }
 0xaeb   : > { %9886 = vrcp.f32 %v3161_v9 }
 0xaec   : > { %v9873_v51 = vpop.eup %9872  ;;  %9888 = vpow2.f32 %v8559_v35  ;;  %v8562_v35 = vmul.f32 -1.442695, %v3136_v17 }
 0xaed   : > { %3313 = vrot.lane.b32.xlu0 %v9873_v51, %s15651_s22  ;;  %v9875_v50 = vpop.eup %9874 }
 0xaee   : > { %v9877_v37 = vpop.eup %9876  ;;  %v3162_v33 = vadd.f32 1.0, %v9875_v50 }
 0xaef   : > { %v9879_v5 = vpop.eup %9878  ;;  %v3280_v13 = vadd.f32 1.0, %v9877_v37 }
 0xaf0   : > { %3315 = vrot.lane.b32.xlu1 %v9879_v5, %s15651_s22  ;;  %v9881_v19 = vpop.eup %9880 }
 0xaf1   : > { %9890 = vrcp.f32 %v3280_v13  ;;  %v3163_v51 = vadd.f32 1.0, %v9881_v19 }
 0xaf2   : > { %9892 = vpow2.f32 %v8560_v39 }
 0xaf3   : > { %v9883_v57 = vpop.eup %9882  ;;  %9894 = vrcp.f32 %v3162_v33 }
 0xaf4   : > { %3317 = vrot.lane.b32.xlu0 %v9883_v57, %s15651_s22  ;;  %v9885_v9 = vpop.eup %9884  ;;  %9896 = vpow2.f32 %v8561_v3 }
 0xaf5   : > { %v12474_v37 = vpop.eup %9886  ;;  %9898 = vrcp.f32 %v3163_v51  ;;  %v3164_v24 = vadd.f32 1.0, %v9885_v9 }
 0xaf6   : > { %v9889_v50 = vpop.eup %9888  ;;  %9900 = vpow2.f32 %v8562_v35 }
 0xaf7   : > { %9902 = vrcp.f32 %v3164_v24  ;;  %v3165_v13 = vadd.f32 1.0, %v9889_v50 }
 0xaf8   : > { %3201 = vrot.lane.b32.xlu0 %v12474_v37, %s15651_s22 }
 0xaf9   : > { %9904 = vrcp.f32 %v3165_v13 }
 0xafb   : > { %v9891_v5 = vpop.eup %9890 }
 0xafc   : > { %3319 = vrot.lane.b32.xlu1 %v9891_v5, %s15651_s22  ;;  %v9893_v39 = vpop.eup %9892 }
 0xafd   : > { %v12479_v28 = vpop.eup %9894  ;;  %v3166_v33 = vadd.f32 1.0, %v9893_v39 }
 0xafe   : > { %v9897_v19 = vpop.eup %9896 }
 0xaff   : > { %v12483_v57 = vpop.eup %9898  ;;  %9906 = vrcp.f32 %v3166_v33  ;;  %v3167_v3 = vadd.f32 1.0, %v9897_v19 }
 0xb00   : > { %3203 = vrot.lane.b32.xlu1 %v12479_v28, %s15651_s22  ;;  %v9901_v17 = vpop.eup %9900 }
 0xb01   : > { %v12487_v51 = vpop.eup %9902  ;;  %9908 = vrcp.f32 %v3167_v3  ;;  %v3168_v9 = vadd.f32 1.0, %v9901_v17 }
 0xb03   : > { %v12491_v35 = vpop.eup %9904  ;;  %9910 = vrcp.f32 %v3168_v9 }
 0xb04   : > { %3205 = vrot.lane.b32.xlu1 %v12483_v57, %s15651_s22  ;;  %9912 = vtanh.f32 %v12412_v20 }
 0xb05   : > { %9914 = vtanh.f32 %v12418_v42 }
 0xb06   : > { %9916 = vtanh.f32 %v12424_v0 }
 0xb07   : > { %9918 = vtanh.f32 %v12430_v1 }
 0xb08   : > { %3207 = vrot.lane.b32.xlu1 %v12487_v51, %s15651_s22  ;;  %9920 = vtanh.f32 %v12440_v54 }
 0xb09   : > { %v12495_v24 = vpop.eup %9906  ;;  %9922 = vtanh.f32 %v12446_v25 }
 0xb0a   : > { %9924 = vtanh.f32 %v12453_v38 }
 0xb0b   : > { %v12499_v50 = vpop.eup %9908  ;;  %9926 = vtanh.f32 %v12461_v49 }
 0xb0c   : > { %3209 = vrot.lane.b32.xlu1 %v12491_v35, %s15651_s22 }
 0xb0d   : > { %v12503_v5 = vpop.eup %9910 }
 0xb0e   : > { %v9913_v13 = vpop.eup %9912 }
 0xb0f   : > { %v9915_v19 = vpop.eup %9914 }
 0xb10   : > { %3211 = vrot.lane.b32.xlu1 %v12495_v24, %s15651_s22  ;;  %v9917_v9 = vpop.eup %9916 }
 0xb11   : > { %v9919_v20 = vpop.eup %9918 }
 0xb14   : > { %3213 = vrot.lane.b32.xlu1 %v12499_v50, %s15651_s22 }
 0xb18   : > { %3215 = vrot.lane.b32.xlu1 %v12503_v5, %s15651_s22 }
 0xb39   : > { %v3306_v39 = vpop.permute.xlu0 %3305 }
 0xb3a   : > { %v3329_v33 = vmul.f32 %v9913_v13, %v3306_v39  ;;  %v9921_v13 = vpop.eup %9920 }
 0xb3b   : > { %v9923_v1 = vpop.eup %9922 }
 0xb3c   : > { %3345 = vrot.lane.b32.xlu0 %v3329_v33, %s15649_s24 }
 0xb3f   : > { %v3308_v3 = vpop.permute.xlu1 %3307 }
 0xb40   : > { %v3330_v17 = vmul.f32 %v9915_v19, %v3308_v3  ;;  %v2928_v3 = vrot.slane %v12228_v32, 1 }
 0xb42   : > { %3347 = vrot.lane.b32.xlu0 %v3330_v17, %s15649_s24 }
 0xb4d   : > { %v3310_v7 = vpop.permute.xlu0 %3309 }
 0xb4e   : > { %v3331_v59 = vmul.f32 %v9917_v9, %v3310_v7  ;;  %v12525_v9 = vsel %vm569_vm1, %v2928_v3, 0.0 }
 0xb50   : > { %3349 = vrot.lane.b32.xlu0 %v3331_v59, %s15649_s24  ;;  %v9925_v59 = vpop.eup %9924 }
 0xb51   : > { %v3312_v42 = vpop.permute.xlu1 %3311  ;;  %v9927_v54 = vpop.eup %9926 }
 0xb52   : > { %v3332_v36 = vmul.f32 %v9919_v20, %v3312_v42  ;;  %v2929_v20 = vrot.slane %v12245_v52, 1 }
 0xb54   : > { %3351 = vrot.lane.b32.xlu0 %v3332_v36, %s15649_s24 }
 0xb5f   : > { %v3314_v0 = vpop.permute.xlu0 %3313 }
 0xb60   : > { %v3333_v39 = vmul.f32 %v9921_v13, %v3314_v0  ;;  %v3185_v13 = vmul.f32 %v12474_v37, %v12228_v32  ;;  %v12532_v0 = vsel %vm569_vm1, %v2929_v20, 0.0  ;;  %v2930_v37 = vrot.slane %v12273_v26, 1 }
 0xb62   : > { %3353 = vrot.lane.b32.xlu0 %v3333_v39, %s15649_s24  ;;  %v3316_v7 = vpop.permute.xlu1 %3315  ;;  %v12546_v3 = vsel %vm569_vm1, %v2930_v37, 0.0 }
 0xb63   : > { %v3334_v33 = vmul.f32 %v9923_v1, %v3316_v7 }
 0xb66   : > { %3355 = vrot.lane.b32.xlu0 %v3334_v33, %s15649_s24  ;;  %v3318_v36 = vpop.permute.xlu0 %3317 }
 0xb67   : > { %v3335_v19 = vmul.f32 %v9925_v59, %v3318_v36  ;;  %v3186_v59 = vmul.f32 %v12479_v28, %v12245_v52 }
 0xb6a   : > { %3357 = vrot.lane.b32.xlu0 %v3335_v19, %s15649_s24  ;;  %v3202_v17 = vpop.permute.xlu0 %3201 }
 0xb6b   : > { %v3225_v49 = vmul.f32 %v3202_v17, %v12525_v9  ;;  %v2931_v17 = vrot.slane %v12279_v18, 1 }
 0xb6d   : > { %v3233_v39 = vadd.f32 %v3225_v49, %v3185_v13  ;;  %v12554_v13 = vsel %vm569_vm1, %v2931_v17, 0.0 }
 0xb6e   : > { %v3320_v25 = vpop.permute.xlu1 %3319 }
 0xb6f   : > { %v3336_v38 = vmul.f32 %v9927_v54, %v3320_v25 }
 0xb71   : > { %3359 = vrot.lane.b32.xlu1 %v3336_v38, %s15649_s24 }
 0xb72   : > { %v3204_v42 = vpop.permute.xlu1 %3203 }
 0xb73   : > { %v3226_v1 = vmul.f32 %v3204_v42, %v12532_v0  ;;  %v3187_v42 = vmul.f32 %v12483_v57, %v12273_v26 }
 0xb75   : > { %v3234_v36 = vadd.f32 %v3226_v1, %v3186_v59 }
 0xb76   : > { %v3206_v25 = vpop.permute.xlu1 %3205 }
 0xb77   : > { %v3227_v28 = vmul.f32 %v3206_v25, %v12546_v3 }
 0xb79   : > { %v3235_v1 = vadd.f32 %v3227_v28, %v3187_v42 }
 0xb7a   : > { %v3208_v20 = vpop.permute.xlu1 %3207 }
 0xb7e   : > { %v3210_v57 = vpop.permute.xlu1 %3209 }
 0xbae   : > { %v3346_v7 = vpop.permute.xlu0 %3345 }
 0xbaf   : > { %v12535_v33 = vadd.f32 %v3346_v7, %v3233_v39  ;;  %v3228_v39 = vmul.f32 %v3208_v20, %v12554_v13  ;;  %v3212_v20 = vpop.permute.xlu1 %3211 }
 0xbb1   : > { %9928 = vtanh.f32 %v12535_v33 }
 0xbb4   : > { %v3348_v19 = vpop.permute.xlu0 %3347 }
 0xbb5   : > { %v12540_v54 = vadd.f32 %v3348_v19, %v3234_v36  ;;  %v3188_v36 = vmul.f32 %v12487_v51, %v12279_v18 }
 0xbb7   : > { %9930 = vtanh.f32 %v12540_v54  ;;  %v3236_v19 = vadd.f32 %v3228_v39, %v3188_v36  ;;  %v3189_v39 = vmul.f32 %v12491_v35, %v12312_v45 }
 0xbbb   : > { %v9929_v38 = vpop.eup %9928 }
 0xbbc   : > { %3441 = vrot.lane.b32.xlu0 %v9929_v38, %s15651_s22  ;;  %v2932_v38 = vrot.slane %v12312_v45, 1 }
 0xbbe   : > { %v12567_v28 = vsel %vm569_vm1, %v2932_v38, 0.0 }
 0xbbf   : > { %v3229_v51 = vmul.f32 %v3210_v57, %v12567_v28  ;;  %v3190_v57 = vmul.f32 %v12495_v24, %v12322_v41 }
 0xbc1   : > { %v9931_v49 = vpop.eup %9930 }
 0xbc2   : > { %3443 = vrot.lane.b32.xlu1 %v9931_v49, %s15651_s22  ;;  %v3350_v7 = vpop.permute.xlu0 %3349  ;;  %v2933_v49 = vrot.slane %v12322_v41, 1 }
 0xbc3   : > { %v12557_v59 = vadd.f32 %v3350_v7, %v3235_v1  ;;  %v2934_v7 = vrot.slane %v12352_v10, 1 }
 0xbc4   : > { %v12575_v1 = vsel %vm569_vm1, %v2933_v49, 0.0 }
 0xbc5   : > { %9932 = vtanh.f32 %v12557_v59  ;;  %15792 = vst [vmem:[#allocation45_spill] sm:$0xff] %v12575_v1  ;;  %v3230_v36 = vmul.f32 %v3212_v20, %v12575_v1  ;;  %v3191_v20 = vmul.f32 %v12499_v50, %v12352_v10  ;;  %v3192_v50 = vmul.f32 %v12503_v5, %v12358_v4 }
 0xbc6   : > { %v3352_v37 = vpop.permute.xlu0 %3351 }
 0xbc7   : > { %v12562_v25 = vadd.f32 %v3352_v37, %v3236_v19  ;;  %v3237_v19 = vadd.f32 %v3229_v51, %v3189_v39  ;;  %v3214_v37 = vpop.permute.xlu1 %3213  ;;  %v3238_v49 = vadd.f32 %v3230_v36, %v3190_v57  ;;  %v2935_v51 = vrot.slane %v12358_v4, 1 }
 0xbc9   : > { %9934 = vtanh.f32 %v12562_v25 }
 0xbcb   : > { %v3216_v24 = vpop.permute.xlu1 %3215 }
 0xbcf   : > { %v9933_v17 = vpop.eup %9932 }
 0xbd0   : > { %3445 = vrot.lane.b32.xlu0 %v9933_v17, %s15651_s22  ;;  %v12585_v17 = vsel %vm569_vm1, %v2934_v7, 0.0 }
 0xbd1   : > { %15793 = vst [vmem:[#allocation13_spill] sm:$0xff] %v12585_v17  ;;  %v3231_v35 = vmul.f32 %v3214_v37, %v12585_v17  ;;  %v12598_v37 = vsel %vm569_vm1, %v2935_v51, 0.0 }
 0xbd2   : > { %15795 = vst [vmem:[#allocation50_spill] sm:$0xff] %v12598_v37  ;;  %v3232_v36 = vmul.f32 %v3216_v24, %v12598_v37  ;;  %v15814_v37 = vld [vmem:[#allocation18_spill] sm:$0xff] }
 0xbd3   : > { %v9935_v42 = vpop.eup %9934  ;;  %v3239_v39 = vadd.f32 %v3231_v35, %v3191_v20  ;;  %v5174_v34 = vrot.slane %v15814_v37, 4 }
 0xbd4   : > { %3447 = vrot.lane.b32.xlu1 %v9935_v42, %s15651_s22  ;;  %v3354_v38 = vpop.permute.xlu0 %3353 }
 0xbd5   : > { %v12580_v56 = vadd.f32 %v3354_v38, %v3237_v19  ;;  %v3240_v38 = vadd.f32 %v3232_v36, %v3192_v50 }
 0xbd7   : > { %9936 = vtanh.f32 %v12580_v56 }
 0xbd8   : > { %v3356_v30 = vpop.permute.xlu0 %3355 }
 0xbd9   : > { %v12589_v42 = vadd.f32 %v3356_v30, %v3238_v49 }
 0xbdb   : > { %9938 = vtanh.f32 %v12589_v42 }
 0xbdc   : > { %v3358_v19 = vpop.permute.xlu0 %3357 }
 0xbdd   : > { %v12595_v7 = vadd.f32 %v3358_v19, %v3239_v39  ;;  %v15797_v39 = vld [vmem:[#allocation33_spill] sm:$0xff] }
 0xbde   : > { %v3085_v5 = vadd.f32 %v12414_v43, %v15797_v39  ;;  %v3091_v19 = vadd.f32 %v12420_v6, %v15797_v39 }
 0xbdf   : > { %15794 = vst [vmem:[#allocation14_spill] sm:$0xff] %v12595_v7  ;;  %9940 = vtanh.f32 %v12595_v7 }
 0xbe0   : > { %v8571_v24 = vmul.f32 -1.442695, %v3085_v5  ;;  %v8572_v36 = vmul.f32 -1.442695, %v3091_v19  ;;  %v12624_v19 = vld [vmem:[%s15423_s6] ss:$0 sm:$0xff] }
 0xbe1   : > { %v9937_v30 = vpop.eup %9936 }
 0xbe2   : > { %3449 = vrot.lane.b32.xlu0 %v9937_v30, %s15651_s22 }
 0xbe3   : > { %v3360_v57 = vpop.permute.xlu1 %3359 }
 0xbe4   : > { %v12605_v49 = vadd.f32 %v3360_v57, %v3240_v38  ;;  %v3097_v57 = vadd.f32 %v12426_v29, %v15797_v39 }
 0xbe5   : > { %v9939_v35 = vpop.eup %9938 }
 0xbe6   : > { %15796 = vst [vmem:[#allocation48_spill] sm:$0xff] %v12605_v49  ;;  %3451 = vrot.lane.b32.xlu1 %v9939_v35, %s15651_s22  ;;  %9942 = vtanh.f32 %v12605_v49 }
 0xbe7   : > { %9944 = vpow2.f32 %v8571_v24 }
 0xbe8   : > { %9946 = vpow2.f32 %v8572_v36 }
 0xbe9   : > { %v9941_v20 = vpop.eup %9940 }
 0xbea   : > { %3453 = vrot.lane.b32.xlu0 %v9941_v20, %s15651_s22  ;;  %v8573_v20 = vmul.f32 -1.442695, %v3097_v57  ;;  %v3109_v57 = vadd.f32 %v12437_v46, %v15797_v39 }
 0xbf0   : > { %v9943_v51 = vpop.eup %9942 }
 0xbf1   : > { %3455 = vrot.lane.b32.xlu1 %v9943_v51, %s15651_s22  ;;  %v9945_v30 = vpop.eup %9944  ;;  %v3103_v51 = vadd.f32 %v12432_v58, %v15797_v39 }
 0xbf2   : > { %v3401_v50 = vadd.f32 1.0, %v9945_v30  ;;  %v9947_v38 = vpop.eup %9946 }
 0xbf3   : > { %v3402_v35 = vadd.f32 1.0, %v9947_v38  ;;  %v8574_v43 = vmul.f32 -1.442695, %v3103_v51 }
 0xbf4   : > { %9948 = vrcp.f32 %v3401_v50 }
 0xbf5   : > { %9950 = vrcp.f32 %v3402_v35 }
 0xbf6   : > { %9952 = vpow2.f32 %v8573_v20 }
 0xbf7   : > { %9954 = vpow2.f32 %v8574_v43 }
 0xbfe   : > { %v9949_v6 = vpop.eup %9948 }
 0xbff   : > { %v9951_v36 = vpop.eup %9950 }
 0xc00   : > { %v9953_v30 = vpop.eup %9952 }
 0xc01   : > { %v3403_v35 = vadd.f32 1.0, %v9953_v30  ;;  %v9955_v51 = vpop.eup %9954 }
 0xc03   : > { %9956 = vrcp.f32 %v3403_v35 }
 0xc0d   : > { %v9957_v30 = vpop.eup %9956 }
 0xc2e   : > { %v3442_v5 = vpop.permute.xlu0 %3441 }
 0xc2f   : > { %v12619_v24 = vmul.f32 %v9949_v6, %v3442_v5  ;;  %v8575_v6 = vmul.f32 -1.442695, %v3109_v57  ;;  %v3115_v5 = vadd.f32 %v12442_v15, %v15797_v39  ;;  %v3127_v57 = vadd.f32 %v12455_v63, %v15797_v39 }
 0xc31   : > { %v3473_v29 = vmul.f32 %v12624_v19, %v12619_v24  ;;  %9958 = vpow2.f32 %v8575_v6  ;;  %v8578_v6 = vmul.f32 -1.442695, %v3127_v57 }
 0xc33   : > { %v3481_v58 = vsel %vm415_vm0, %v3473_v29, 0.0  ;;  %v3404_v29 = vadd.f32 1.0, %v9955_v51 }
 0xc34   : > { %v3444_v50 = vpop.permute.xlu1 %3443  ;;  %3482 = vadd.xlane.f32.xlu0 %v3481_v58 }
 0xc35   : > { %v12629_v38 = vmul.f32 %v9951_v36, %v3444_v50  ;;  %v8576_v36 = vmul.f32 -1.442695, %v3115_v5  ;;  %v3121_v50 = vadd.f32 %v12448_v47, %v15797_v39  ;;  %9960 = vrcp.f32 %v3404_v29 }
 0xc37   : > { %v3474_v20 = vmul.f32 %v12624_v19, %v12629_v38  ;;  %9962 = vpow2.f32 %v8576_v36  ;;  %v8577_v46 = vmul.f32 -1.442695, %v3121_v50 }
 0xc39   : > { %v3484_v43 = vsel %vm415_vm0, %v3474_v20, 0.0  ;;  %9964 = vpow2.f32 %v8577_v46 }
 0xc3a   : > { %3485 = vadd.xlane.f32.xlu1 %v3484_v43  ;;  %9966 = vpow2.f32 %v8578_v6 }
 0xc3b   : > { %v9959_v15 = vpop.eup %9958 }
 0xc3c   : > { %v3405_v29 = vadd.f32 1.0, %v9959_v15 }
 0xc3e   : > { %9968 = vrcp.f32 %v3405_v29 }
 0xc3f   : > { %v9961_v51 = vpop.eup %9960 }
 0xc41   : > { %v9963_v36 = vpop.eup %9962 }
 0xc42   : > { %v3446_v58 = vpop.permute.xlu0 %3445  ;;  %v3406_v46 = vadd.f32 1.0, %v9963_v36 }
 0xc43   : > { %v12642_v20 = vmul.f32 %v9957_v30, %v3446_v58  ;;  %v9965_v30 = vpop.eup %9964 }
 0xc44   : > { %9970 = vrcp.f32 %v3406_v46  ;;  %v3407_v58 = vadd.f32 1.0, %v9965_v30  ;;  %v9967_v57 = vpop.eup %9966 }
 0xc45   : > { %v3475_v35 = vmul.f32 %v12624_v19, %v12642_v20  ;;  %v3408_v15 = vadd.f32 1.0, %v9967_v57 }
 0xc46   : > { %v3448_v43 = vpop.permute.xlu1 %3447  ;;  %9972 = vrcp.f32 %v3407_v58 }
 0xc47   : > { %v12646_v5 = vmul.f32 %v9961_v51, %v3448_v43  ;;  %v3487_v47 = vsel %vm415_vm0, %v3475_v35, 0.0  ;;  %9974 = vrcp.f32 %v3408_v15 }
 0xc48   : > { %3488 = vadd.xlane.f32.xlu0 %v3487_v47  ;;  %v9969_v51 = vpop.eup %9968 }
 0xc49   : > { %v3476_v50 = vmul.f32 %v12624_v19, %v12646_v5 }
 0xc4b   : > { %v3490_v63 = vsel %vm415_vm0, %v3476_v50, 0.0 }
 0xc4c   : > { %3491 = vadd.xlane.f32.xlu0 %v3490_v63 }
 0xc4e   : > { %v9971_v39 = vpop.eup %9970 }
 0xc50   : > { %v9973_v50 = vpop.eup %9972 }
 0xc51   : > { %v9975_v57 = vpop.eup %9974 }
 0xc54   : > { %v3450_v43 = vpop.permute.xlu0 %3449 }
 0xc55   : > { %v12652_v35 = vmul.f32 %v9969_v51, %v3450_v43 }
 0xc57   : > { %v3477_v47 = vmul.f32 %v12624_v19, %v12652_v35 }
 0xc58   : > { %v3452_v6 = vpop.permute.xlu1 %3451 }
 0xc59   : > { %v12656_v12 = vmul.f32 %v9971_v39, %v3452_v6  ;;  %v3493_v29 = vsel %vm415_vm0, %v3477_v47, 0.0  ;;  %v12673_v6 = vld [vmem:[%s10863_s11] sm:$0xff] }
 0xc5a   : > { %3494 = vadd.xlane.f32.xlu1 %v3493_v29  ;;  %15800 = vst [vmem:[#allocation49_spill] sm:$0xff] %v12673_v6  ;;  %v15528_v29 = vrot.slane %v12673_v6, 4 }
 0xc5b   : > { %v3478_v36 = vmul.f32 %v12624_v19, %v12656_v12 }
 0xc5c   : > { %v3454_v63 = vpop.permute.xlu0 %3453  ;;  %9063 = vpush %v15528_v29 }
 0xc5d   : > { %v12661_v46 = vmul.f32 %v9973_v50, %v3454_v63  ;;  %v3496_v30 = vsel %vm415_vm0, %v3478_v36, 0.0  ;;  %v12677_v36 = vld [vmem:[%s10863_s11 + $0x8] sm:$0xff]  ;;  %v12681_v63 = vld [vmem:[%s10863_s11 + $0x10] sm:$0xff] }
 0xc5e   : > { %3497 = vadd.xlane.f32.xlu0 %v3496_v30  ;;  %15801 = vst [vmem:[#allocation43_spill] sm:$0xff] %v12677_v36  ;;  %v15530_v50 = vrot.slane %v12677_v36, 4  ;;  %15802 = vst [vmem:[#allocation46_spill] sm:$0xff] %v12681_v63  ;;  %v15806_v21 = vrot.slane %v12681_v63, 4  ;;  %v15813_v63 = vld [vmem:[#allocation17_spill] sm:$0xff] }
 0xc5f   : > { %15798 = vst [vmem:[#allocation15_spill] sm:$0xff] %v12661_v46  ;;  %v3479_v39 = vmul.f32 %v12624_v19, %v12661_v46 }
 0xc60   : > { %9065 = vpush %v15530_v50 }
 0xc61   : > { %v3499_v58 = vsel %vm415_vm0, %v3479_v39, 0.0  ;;  %v12685_v39 = vld [vmem:[%s10863_s11 + $0x18] sm:$0xff]  ;;  %9067 = vpush %v15806_v21  ;;  %v5173_v21 = vrot.slane %v15813_v63, 4 }
 0xc62   : > { %3500 = vadd.xlane.f32.xlu1 %v3499_v58  ;;  %15803 = vst [vmem:[#allocation42_spill] sm:$0xff] %v12685_v39  ;;  %v12691_v58 = vld [vmem:[%s10863_s11 + $0x20] sm:$0xff]  ;;  %v15808_v6 = vrot.slane %v12685_v39, 4 }
 0xc63   : > { %v3456_v51 = vpop.permute.xlu1 %3455  ;;  %15804 = vst [vmem:[#allocation44_spill] sm:$0xff] %v12691_v58  ;;  %v15810_v50 = vrot.slane %v12691_v58, 4 }
 0xc64   : > { %v12667_v43 = vmul.f32 %v9975_v57, %v3456_v51  ;;  %v12697_v51 = vld [vmem:[%s10863_s11 + $0x28] sm:$0xff]  ;;  %9069 = vpush %v15808_v6 }
 0xc65   : > { %15805 = vst [vmem:[#allocation47_spill] sm:$0xff] %v12697_v51  ;;  %9071 = vpush %v15810_v50  ;;  %v15815_v6 = vld [vmem:[#allocation19_spill] sm:$0xff]  ;;  %v15817_v50 = vld [vmem:[#allocation21_spill] sm:$0xff] }
 0xc66   : > { %15799 = vst [vmem:[#allocation51_spill] sm:$0xff] %v12667_v43  ;;  %v3480_v15 = vmul.f32 %v12624_v19, %v12667_v43  ;;  %v12704_v19 = vld [vmem:[%s10863_s11 + $0x30] sm:$0xff]  ;;  %v5175_v39 = vrot.slane %v15815_v6, 4  ;;  %v5177_v58 = vrot.slane %v15817_v50, 4  ;;  %v15824_v43 = vld [vmem:[#allocation54_spill] sm:$0xff] }
 0xc67   : > { %15807 = vst [vmem:[#allocation60_spill] sm:$0xff] %v12704_v19  ;;  %v15541_v29 = vrot.slane %v12704_v19, 4  ;;  %v15822_v50 = vld [vmem:[#allocation53_spill] sm:$0xff]  ;;  %v15825_v8 = vrot.slane %v15824_v43, 3 }
 0xc68   : > { %v3502_v47 = vsel %vm415_vm0, %v3480_v15, 0.0  ;;  %v15811_v15 = vld [vmem:[#allocation16_spill] sm:$0xff] }
 0xc69   : > { %3503 = vadd.xlane.f32.xlu0 %v3502_v47  ;;  %v10513_v47 = vld [vmem:[%s10863_s11 + $0x38] sm:$0xff]  ;;  %v5172_v36 = vrot.slane %v15811_v15, 4 }
 0xc6a   : > { %v4698_v30 = vrot.slane %v10513_v47, 4  ;;  %v15812_v47 = vrot.slane %v12697_v51, 4  ;;  %v15818_v15 = vld [vmem:[#allocation22_spill] sm:$0xff] }
 0xc6b   : > { %v5178_v51 = vrot.slane %v15818_v15, 4  ;;  %v15823_v15 = vrot.slane %v15822_v50, 3 }
 0xc6c   : > { %v12710_v57 = vsel %vm4707_vm5, %v4698_v30, 0.0  ;;  %9073 = vpush %v15812_v47  ;;  %v15819_v47 = vld [vmem:[#allocation23_spill] sm:$0xff] }
 0xc6d   : > { %15809 = vst [vmem:[#allocation61_spill] sm:$0xff] %v12710_v57  ;;  %9075 = vpush %v15541_v29  ;;  %v15816_v57 = vld [vmem:[#allocation20_spill] sm:$0xff]  ;;  %v5179_v63 = vrot.slane %v15819_v47, 4 }
 0xc6e   : > { %9077 = vpush %v4698_v30  ;;  %v5176_v4 = vrot.slane %v15816_v57, 4  ;;  %v15820_v30 = vld [vmem:[#allocation52_spill] sm:$0xff] }
 0xc6f   : > { %9079 = vpush %v5172_v36  ;;  %v15821_v29 = vrot.slane %v15820_v30, 3 }
 0xc70   : > { %9081 = vpush %v5173_v21  ;;  %v12729_v21 = vld [vmem:[#allocation2] ss:$0 sm:$0xff] }
 0xc71   : > { %9083 = vpush %v5174_v34  ;;  %v3530_v36 = vsel %vm3529_vm14, %v15821_v29, 0.0 }
 0xc72   : > { %9085 = vpush %v5175_v39  ;;  %vm3538_vm15 = vcmp.gt.f32.partialorder %v3530_v36, 0.0  ;;  %v3531_v39 = vsel %vm3529_vm14, %v15823_v15, 0.0 }
 0xc73   : > { %9087 = vpush %v5176_v4  ;;  %vm3539_vm9 = vcmp.gt.f32.partialorder %v3531_v39, 0.0 }
 0xc74   : > { %9089 = vpush %v5177_v58 }
 0xc75   : > { %9091 = vpush %v5178_v51 }
 0xc76   : > { %9093 = vpush %v5179_v63 }
 0xcc1   : > { %v3483_v19 = vpop.xlane.xlu0 %3482 }
 0xcc2   : > { %v3505_v34 = vadd.f32 %v12729_v21, %v3483_v19 }
 0xcc4   : > { %v3546_v4 = vsel %vm3538_vm15, %v3505_v34, -1e+30 }
 0xcc5   : > { %v3554_v58 = vsel %vm1205_vm4, %v3546_v4, -inf }
 0xcc6   : > { %v3555_v63 = vrot.slane %v3554_v58, 4 }
 0xcc7   : > { %v3486_v51 = vpop.xlane.xlu1 %3485 }
 0xcc8   : > { %v3506_v30 = vadd.f32 %v12729_v21, %v3486_v51  ;;  %v3556_v29 = vmax.f32 %v3554_v58, %v3555_v63  ;;  %v3532_v58 = vsel %vm3529_vm14, %v15825_v8, 0.0 }
 0xcc9   : > { %vm3540_vm6 = vcmp.gt.f32.partialorder %v3532_v58, 0.0 }
 0xcca   : > { %v3547_v47 = vsel %vm3539_vm9, %v3506_v30, -1e+30  ;;  %v3557_v57 = vrot.slane %v3556_v29, 2 }
 0xccb   : > { %v3561_v6 = vsel %vm1205_vm4, %v3547_v47, -inf }
 0xccc   : > { %v3562_v19 = vrot.slane %v3561_v6, 4  ;;  %v3558_v37 = vmax.f32 %v3556_v29, %v3557_v57 }
 0xcce   : > { %v3563_v50 = vmax.f32 %v3561_v6, %v3562_v19  ;;  %v3559_v17 = vrot.slane %v3558_v37, 1  ;;  %v15826_v6 = vld [vmem:[#allocation55_spill] sm:$0xff] }
 0xcd0   : > { %v3564_v15 = vrot.slane %v3563_v50, 2  ;;  %v3560_v62 = vmax.f32 %v3558_v37, %v3559_v17  ;;  %v15827_v17 = vrot.slane %v15826_v6, 3 }
 0xcd2   : > { %v3565_v34 = vmax.f32 %v3563_v50, %v3564_v15  ;;  %vm3610_vm7 = vcmp.ge.f32.partialorder %v3546_v4, %v3560_v62  ;;  %v12749_v62 = vsel %vm3529_vm14, %v15827_v17, 0.0 }
 0xcd3   : > { %vm3618_vm8 = vmand %vm3610_vm7, %vm3538_vm15  ;;  %vm3541_vm3 = vcmp.gt.f32.partialorder %v12749_v62, 0.0 }
 0xcd4   : > { %v3566_v49 = vrot.slane %v3565_v34, 1  ;;  %v3626_v63 = vsel %vm3618_vm8, %v11429_v14, 8.0 }
 0xcd5   : > { %v3634_v51 = vsel %vm1205_vm4, %v3626_v63, inf  ;;  %v3489_v57 = vpop.xlane.xlu0 %3488 }
 0xcd6   : > { %v3567_v30 = vmax.f32 %v3565_v34, %v3566_v49  ;;  %v3635_v46 = vrot.slane %v3634_v51, 4  ;;  %v3507_v43 = vadd.f32 %v12729_v21, %v3489_v57 }
 0xcd8   : > { %vm3611_vm13 = vcmp.ge.f32.partialorder %v3547_v47, %v3567_v30  ;;  %v3636_v37 = vmin.f32 %v3634_v51, %v3635_v46  ;;  %v3548_v49 = vsel %vm3540_vm6, %v3507_v43, -1e+30 }
 0xcd9   : > { %vm3619_vm11 = vmand %vm3611_vm13, %vm3539_vm9  ;;  %v3568_v29 = vsel %vm1205_vm4, %v3548_v49, -inf  ;;  %v3492_v19 = vpop.xlane.xlu0 %3491 }
 0xcda   : > { %v3627_v8 = vsel %vm3619_vm11, %v11429_v14, 8.0  ;;  %v3637_v36 = vrot.slane %v3636_v37, 2  ;;  %v3569_v15 = vrot.slane %v3568_v29, 4  ;;  %v3508_v46 = vadd.f32 %v12729_v21, %v3492_v19 }
 0xcdb   : > { %v3641_v4 = vsel %vm1205_vm4, %v3627_v8, inf }
 0xcdc   : > { %v3642_v47 = vrot.slane %v3641_v4, 4  ;;  %v3638_v50 = vmin.f32 %v3636_v37, %v3637_v36  ;;  %v3570_v63 = vmax.f32 %v3568_v29, %v3569_v15  ;;  %v3549_v51 = vsel %vm3541_vm3, %v3508_v46, -1e+30  ;;  %v15828_v15 = vld [vmem:[#allocation56_spill] sm:$0xff] }
 0xcdd   : > { %v3575_v57 = vsel %vm1205_vm4, %v3549_v51, -inf  ;;  %v15829_v46 = vrot.slane %v15828_v15, 3 }
 0xcde   : > { %v3643_v39 = vmin.f32 %v3641_v4, %v3642_v47  ;;  %v3639_v34 = vrot.slane %v3638_v50, 1  ;;  %v3571_v17 = vrot.slane %v3570_v63, 2  ;;  %v3576_v43 = vrot.slane %v3575_v57, 4 }
 0xce0   : > { %v3644_v30 = vrot.slane %v3643_v39, 2  ;;  %v3640_v6 = vmin.f32 %v3638_v50, %v3639_v34  ;;  %v3572_v31 = vmax.f32 %v3570_v63, %v3571_v17  ;;  %v3577_v7 = vmax.f32 %v3575_v57, %v3576_v43 }
 0xce2   : > { %v3645_v8 = vmin.f32 %v3643_v39, %v3644_v30  ;;  %vm3690_vm10 = vcmp.eq.f32.partialorder %v11429_v14, %v3640_v6  ;;  %vm3714_vm12 = vcmp.lt.f32.partialorder %v11429_v14, %v3640_v6  ;;  %v3573_v47 = vrot.slane %v3572_v31, 1 }
 0xce3   : > { %v8579_v36 = vsel %vm3690_vm10, 1.0, %v15705_v48  ;;  %v8587_v4 = vsel %vm3714_vm12, 1.0, %v15705_v48  ;;  %v3578_v29 = vrot.slane %v3577_v7, 2  ;;  %vm3738_vm15 = vcmp.gt.f32.partialorder %v11429_v14, %v3640_v6 }
 0xce4   : > { %v3646_v37 = vrot.slane %v3645_v8, 1  ;;  %v9372_v19 = vpack.i.bf16 %v8587_v4, %v8579_v36  ;;  %v12770_v39 = vsel %vm3529_vm14, %v15829_v46, 0.0  ;;  %v3574_v34 = vmax.f32 %v3572_v31, %v3573_v47 }
 0xce5   : > { %v3579_v63 = vmax.f32 %v3577_v7, %v3578_v29  ;;  %v8595_v30 = vsel %vm3738_vm15, 1.0, %v15705_v48  ;;  %vm3542_vm10 = vcmp.gt.f32.partialorder %v12770_v39, 0.0 }
 0xce6   : > { %v3647_v50 = vmin.f32 %v3645_v8, %v3646_v37  ;;  %9373 = vperm.xlu1 %9260, %v9372_v19   ;;  %vm3612_vm13 = vcmp.ge.f32.partialorder %v3548_v49, %v3574_v34  ;;  %v15830_v49 = vld [vmem:[#allocation57_spill] sm:$0xff]  ;;  %v15832_v34 = vld [vmem:[#allocation58_spill] sm:$0xff] }
 0xce7   : > { %v3580_v57 = vrot.slane %v3579_v63, 1  ;;  %vm3620_vm11 = vmand %vm3612_vm13, %vm3540_vm6  ;;  %v3495_v4 = vpop.xlane.xlu1 %3494  ;;  %v15831_v47 = vrot.slane %v15830_v49, 3 }
 0xce8   : > { %vm3691_vm9 = vcmp.eq.f32.partialorder %v11429_v14, %v3647_v50  ;;  %vm3715_vm7 = vcmp.lt.f32.partialorder %v11429_v14, %v3647_v50  ;;  %vm3739_vm8 = vcmp.gt.f32.partialorder %v11429_v14, %v3647_v50  ;;  %v3628_v7 = vsel %vm3620_vm11, %v11429_v14, 8.0 }
 0xce9   : > { %v8580_v6 = vsel %vm3691_vm9, 1.0, %v15705_v48  ;;  %v8588_v17 = vsel %vm3715_vm7, 1.0, %v15705_v48  ;;  %v8596_v31 = vsel %vm3739_vm8, 1.0, %v15705_v48  ;;  %v3581_v8 = vmax.f32 %v3579_v63, %v3580_v57 }
 0xcea   : > { %v9377_v43 = vpack.i.bf16 %v8580_v6, %v8595_v30  ;;  %v9382_v37 = vpack.i.bf16 %v8596_v31, %v8588_v17  ;;  %v3648_v36 = vsel %vm1205_vm4, %v3628_v7, inf  ;;  %v12786_v29 = vsel %vm3529_vm14, %v15831_v47, 0.0 }
 0xceb   : > { %v3649_v58 = vrot.slane %v3648_v36, 4  ;;  %vm3613_vm6 = vcmp.ge.f32.partialorder %v3549_v51, %v3581_v8  ;;  %v3509_v19 = vadd.f32 %v12729_v21, %v3495_v4  ;;  %vm3543_vm15 = vcmp.gt.f32.partialorder %v12786_v29, 0.0  ;;  %v3498_v6 = vpop.xlane.xlu0 %3497 }
 0xcec   : > { %9378 = vperm.xlu0 %9266, %v9377_v43   ;;  %9383 = vperm.xlu1 %9260, %v9382_v37   ;;  %vm3621_vm12 = vmand %vm3613_vm6, %vm3541_vm3  ;;  %v15833_v63 = vrot.slane %v15832_v34, 3  ;;  %v3510_v31 = vadd.f32 %v12729_v21, %v3498_v6 }
 0xced   : > { %v3650_v50 = vmin.f32 %v3648_v36, %v3649_v58  ;;  %v3629_v15 = vsel %vm3621_vm12, %v11429_v14, 8.0  ;;  %v3550_v46 = vsel %vm3542_vm10, %v3509_v19, -1e+30 }
 0xcee   : > { %v12798_v30 = vsel %vm3529_vm14, %v15833_v63, 0.0  ;;  %v3655_v51 = vsel %vm1205_vm4, %v3629_v15, inf  ;;  %v3582_v57 = vsel %vm1205_vm4, %v3550_v46, -inf  ;;  %v3551_v36 = vsel %vm3543_vm15, %v3510_v31, -1e+30 }
 0xcef   : > { %v3651_v62 = vrot.slane %v3650_v50, 2  ;;  %v3656_v17 = vrot.slane %v3655_v51, 4  ;;  %v3583_v43 = vrot.slane %v3582_v57, 4  ;;  %vm3544_vm3 = vcmp.gt.f32.partialorder %v12798_v30, 0.0  ;;  %v3501_v49 = vpop.xlane.xlu1 %3500 }
 0xcf0   : > { %v3589_v4 = vsel %vm1205_vm4, %v3551_v36, -inf  ;;  %v3511_v34 = vadd.f32 %v12729_v21, %v3501_v49 }
 0xcf1   : > { %v3652_v7 = vmin.f32 %v3650_v50, %v3651_v62  ;;  %v3657_v8 = vmin.f32 %v3655_v51, %v3656_v17  ;;  %v3584_v37 = vmax.f32 %v3582_v57, %v3583_v43  ;;  %v3590_v15 = vrot.slane %v3589_v4, 4  ;;  %v15834_v51 = vld [vmem:[#allocation59_spill] sm:$0xff] }
 0xcf2   : > { %v15835_v57 = vrot.slane %v15834_v51, 3  ;;  %v3552_v17 = vsel %vm3544_vm3, %v3511_v34, -1e+30 }
 0xcf3   : > { %v3653_v47 = vrot.slane %v3652_v7, 1  ;;  %v3658_v58 = vrot.slane %v3657_v8, 2  ;;  %v3585_v19 = vrot.slane %v3584_v37, 2  ;;  %v3591_v50 = vmax.f32 %v3589_v4, %v3590_v15 }
 0xcf4   : > { %v12811_v62 = vsel %vm3529_vm14, %v15835_v57, 0.0  ;;  %v3596_v22 = vsel %vm1205_vm4, %v3552_v17, -inf }
 0xcf5   : > { %v3654_v63 = vmin.f32 %v3652_v7, %v3653_v47  ;;  %v3659_v10 = vmin.f32 %v3657_v8, %v3658_v58  ;;  %v3586_v6 = vmax.f32 %v3584_v37, %v3585_v19  ;;  %v3592_v1 = vrot.slane %v3591_v50, 2 }
 0xcf6   : > { %v3597_v41 = vrot.slane %v3596_v22, 4  ;;  %vm3545_vm14 = vcmp.gt.f32.partialorder %v12811_v62, 0.0  ;;  %v3504_v47 = vpop.xlane.xlu0 %3503 }
 0xcf7   : > { %v3660_v43 = vrot.slane %v3659_v10, 1  ;;  %v3587_v31 = vrot.slane %v3586_v6, 1  ;;  %vm3692_vm9 = vcmp.eq.f32.partialorder %v11429_v14, %v3654_v63  ;;  %vm3716_vm7 = vcmp.lt.f32.partialorder %v11429_v14, %v3654_v63 }
 0xcf8   : > { %v3593_v37 = vmax.f32 %v3591_v50, %v3592_v1  ;;  %v8581_v4 = vsel %vm3692_vm9, 1.0, %v15705_v48  ;;  %v3598_v49 = vmax.f32 %v3596_v22, %v3597_v41  ;;  %v8589_v58 = vsel %vm3716_vm7, 1.0, %v15705_v48 }
 0xcf9   : > { %v3661_v7 = vmin.f32 %v3659_v10, %v3660_v43  ;;  %v3588_v8 = vmax.f32 %v3586_v6, %v3587_v31  ;;  %vm3740_vm8 = vcmp.gt.f32.partialorder %v11429_v14, %v3654_v63  ;;  %v3512_v15 = vadd.f32 %v12729_v21, %v3504_v47 }
 0xcfa   : > { %v3594_v19 = vrot.slane %v3593_v37, 1  ;;  %v9387_v34 = vpack.i.bf16 %v8589_v58, %v8581_v4  ;;  %v3599_v10 = vrot.slane %v3598_v49, 2 }
 0xcfb   : > { %vm3614_vm13 = vcmp.ge.f32.partialorder %v3550_v46, %v3588_v8  ;;  %vm3717_vm6 = vcmp.lt.f32.partialorder %v11429_v14, %v3661_v7  ;;  %vm3741_vm12 = vcmp.gt.f32.partialorder %v11429_v14, %v3661_v7  ;;  %vm3693_vm9 = vcmp.eq.f32.partialorder %v11429_v14, %v3661_v7 }
 0xcfc   : > { %vm3622_vm11 = vmand %vm3614_vm13, %vm3542_vm10  ;;  %v3595_v22 = vmax.f32 %v3593_v37, %v3594_v19  ;;  %v3553_v1 = vsel %vm3545_vm14, %v3512_v15, -1e+30  ;;  %9388 = vperm.xlu1 %9260, %v9387_v34   ;;  %v8590_v21 = vsel %vm3717_vm6, 1.0, %v15705_v48  ;;  %v3600_v39 = vmax.f32 %v3598_v49, %v3599_v10 }
 0xcfd   : > { %v3630_v41 = vsel %vm3622_vm11, %v11429_v14, 8.0  ;;  %v3603_v6 = vsel %vm1205_vm4, %v3553_v1, -inf  ;;  %v8598_v50 = vsel %vm3741_vm12, 1.0, %v15705_v48  ;;  %v8582_v8 = vsel %vm3693_vm9, 1.0, %v15705_v48 }
 0xcfe   : > { %v3662_v46 = vsel %vm1205_vm4, %v3630_v41, inf  ;;  %vm3615_vm10 = vcmp.ge.f32.partialorder %v3551_v36, %v3595_v22  ;;  %v3604_v57 = vrot.slane %v3603_v6, 4  ;;  %v9397_v43 = vpack.i.bf16 %v8598_v50, %v8590_v21 }
 0xcff   : > { %v3663_v51 = vrot.slane %v3662_v46, 4  ;;  %vm3623_vm7 = vmand %vm3615_vm10, %vm3543_vm15  ;;  %v3601_v31 = vrot.slane %v3600_v39, 1  ;;  %v8597_v37 = vsel %vm3740_vm8, 1.0, %v15705_v48 }
 0xd00   : > { %v3631_v49 = vsel %vm3623_vm7, %v11429_v14, 8.0  ;;  %v3605_v47 = vmax.f32 %v3603_v6, %v3604_v57  ;;  %9398 = vperm.xlu1 %9260, %v9397_v43   ;;  %v9392_v36 = vpack.i.bf16 %v8582_v8, %v8597_v37 }
 0xd01   : > { %v3664_v4 = vmin.f32 %v3662_v46, %v3663_v51  ;;  %v3669_v58 = vsel %vm1205_vm4, %v3631_v49, inf  ;;  %v3602_v19 = vmax.f32 %v3600_v39, %v3601_v31 }
 0xd02   : > { %v3670_v15 = vrot.slane %v3669_v58, 4  ;;  %v3606_v34 = vrot.slane %v3605_v47, 2  ;;  %9393 = vperm.xlu0 %9266, %v9392_v36  }
 0xd03   : > { %v3665_v29 = vrot.slane %v3664_v4, 2  ;;  %vm3616_vm15 = vcmp.ge.f32.partialorder %v3552_v17, %v3602_v19 }
 0xd04   : > { %v3671_v10 = vmin.f32 %v3669_v58, %v3670_v15  ;;  %vm3624_vm13 = vmand %vm3616_vm15, %vm3544_vm3  ;;  %v3607_v63 = vmax.f32 %v3605_v47, %v3606_v34 }
 0xd05   : > { %v3666_v7 = vmin.f32 %v3664_v4, %v3665_v29  ;;  %v3632_v41 = vsel %vm3624_vm13, %v11429_v14, 8.0 }
 0xd06   : > { %v3672_v21 = vrot.slane %v3671_v10, 2  ;;  %v3676_v46 = vsel %vm1205_vm4, %v3632_v41, inf  ;;  %v3608_v6 = vrot.slane %v3607_v63, 1 }
 0xd07   : > { %v3667_v22 = vrot.slane %v3666_v7, 1  ;;  %v3677_v50 = vrot.slane %v3676_v46, 4 }
 0xd08   : > { %v3673_v51 = vmin.f32 %v3671_v10, %v3672_v21  ;;  %v3609_v57 = vmax.f32 %v3607_v63, %v3608_v6 }
 0xd09   : > { %v3668_v39 = vmin.f32 %v3666_v7, %v3667_v22  ;;  %v3678_v43 = vmin.f32 %v3676_v46, %v3677_v50 }
 0xd0a   : > { %v3674_v31 = vrot.slane %v3673_v51, 1  ;;  %vm3617_vm8 = vcmp.ge.f32.partialorder %v3553_v1, %v3609_v57 }
 0xd0b   : > { %vm3694_vm11 = vcmp.eq.f32.partialorder %v11429_v14, %v3668_v39  ;;  %vm3718_vm6 = vcmp.lt.f32.partialorder %v11429_v14, %v3668_v39  ;;  %v3679_v30 = vrot.slane %v3678_v43, 2  ;;  %vm3625_vm3 = vmand %vm3617_vm8, %vm3545_vm14  ;;  %vm3742_vm12 = vcmp.gt.f32.partialorder %v11429_v14, %v3668_v39 }
 0xd0c   : > { %v8583_v17 = vsel %vm3694_vm11, 1.0, %v15705_v48  ;;  %v8591_v8 = vsel %vm3718_vm6, 1.0, %v15705_v48  ;;  %v3675_v37 = vmin.f32 %v3673_v51, %v3674_v31  ;;  %v3633_v4 = vsel %vm3625_vm3, %v11429_v14, 8.0 }
 0xd0d   : > { %v9402_v49 = vpack.i.bf16 %v8591_v8, %v8583_v17  ;;  %v3680_v47 = vmin.f32 %v3678_v43, %v3679_v30  ;;  %v3683_v1 = vsel %vm1205_vm4, %v3633_v4, inf  ;;  %v8599_v36 = vsel %vm3742_vm12, 1.0, %v15705_v48 }
 0xd0e   : > { %v3684_v58 = vrot.slane %v3683_v1, 4  ;;  %vm3719_vm9 = vcmp.lt.f32.partialorder %v11429_v14, %v3675_v37  ;;  %vm3743_vm14 = vcmp.gt.f32.partialorder %v11429_v14, %v3675_v37  ;;  %vm3695_vm10 = vcmp.eq.f32.partialorder %v11429_v14, %v3675_v37 }
 0xd0f   : > { %9403 = vperm.xlu0 %9266, %v9402_v49   ;;  %v3681_v62 = vrot.slane %v3680_v47, 1  ;;  %v8592_v19 = vsel %vm3719_vm9, 1.0, %v15705_v48  ;;  %v8600_v29 = vsel %vm3743_vm14, 1.0, %v15705_v48  ;;  %v8584_v15 = vsel %vm3695_vm10, 1.0, %v15705_v48 }
 0xd10   : > { %v3685_v34 = vmin.f32 %v3683_v1, %v3684_v58  ;;  %v9412_v7 = vpack.i.bf16 %v8600_v29, %v8592_v19  ;;  %v9407_v10 = vpack.i.bf16 %v8584_v15, %v8599_v36  ;;  %vm5885_vm3 = vcmask 1042432  }
 0xd11   : > { %v3682_v63 = vmin.f32 %v3680_v47, %v3681_v62 }
 0xd12   : > { %v3686_v41 = vrot.slane %v3685_v34, 2  ;;  %9408 = vperm.xlu1 %9260, %v9407_v10  }
 0xd13   : > { %9413 = vperm.xlu0 %9266, %v9412_v7   ;;  %vm3696_vm7 = vcmp.eq.f32.partialorder %v11429_v14, %v3682_v63  ;;  %vm3720_vm15 = vcmp.lt.f32.partialorder %v11429_v14, %v3682_v63  ;;  %vm3744_vm13 = vcmp.gt.f32.partialorder %v11429_v14, %v3682_v63 }
 0xd14   : > { %v3687_v22 = vmin.f32 %v3685_v34, %v3686_v41  ;;  %v8585_v21 = vsel %vm3696_vm7, 1.0, %v15705_v48  ;;  %v8593_v46 = vsel %vm3720_vm15, 1.0, %v15705_v48  ;;  %v8601_v43 = vsel %vm3744_vm13, 1.0, %v15705_v48 }
 0xd15   : > { %v9417_v6 = vpack.i.bf16 %v8593_v46, %v8585_v21  ;;  %v3963_v41 = vstv %s12877_s27  ;;  %s9054_s27 = spop %9053 }
 0xd16   : > { %v3688_v50 = vrot.slane %v3687_v22, 1 }
 0xd17   : > { %9418 = vperm.xlu1 %9260, %v9417_v6   ;;  %v3966_v6 = vstv %s12879_s28  ;;  %s12963_s28 = spop %9055 }
 0xd18   : > { %v3689_v39 = vmin.f32 %v3687_v22, %v3688_v50  ;;  %v4003_v22 = vstv %s9048_s25  ;;  %v4006_v50 = vstv %s9050_s18 }
 0xd1a   : > { %vm3721_vm8 = vcmp.lt.f32.partialorder %v11429_v14, %v3689_v39  ;;  %vm3697_vm11 = vcmp.eq.f32.partialorder %v11429_v14, %v3689_v39  ;;  %vm3745_vm6 = vcmp.gt.f32.partialorder %v11429_v14, %v3689_v39 }
 0xd1b   : > { %v8594_v51 = vsel %vm3721_vm8, 1.0, %v15705_v48  ;;  %v8586_v57 = vsel %vm3697_vm11, 1.0, %v15705_v48  ;;  %v8602_v30 = vsel %vm3745_vm6, 1.0, %v15705_v48 }
 0xd1c   : > { %3847 = vperm.xlu1 %9260, %v8594_v51   ;;  %v9422_v31 = vpack.i.bf16 %v8586_v57, %v8601_v43 }
 0xd1e   : > { %9423 = vperm.xlu0 %9266, %v9422_v31  }
 0xd22   : > { %3903 = vperm.xlu0 %9266, %v8602_v30  }
 0xd65   : > { %v9374_v17 = vpop.permute.xlu1 %9373 }
 0xd66   : > { %v9376_v8 = vunpack.i.h.bf16 %v9374_v17  ;;  %v9375_v37 = vunpack.i.l.bf16 %v9374_v17 }
 0xd68   : > { %v3850_v4 = vmul.f32 %v9376_v8, %v12226_v60  ;;  %v3930_v49 = vmul.f32 %v9376_v8, %v12228_v32  ;;  %v3802_v47 = vmul.f32 %v9375_v37, %v12619_v24  ;;  %v3922_v1 = vmul.f32 %v9375_v37, %v12535_v33 }
 0xd6a   : > { %v3938_v36 = vadd.f32 %v3930_v49, %v3922_v1  ;;  %v3858_v15 = vadd.f32 %v3850_v4, %v3802_v47  ;;  %v4027_v49 = vmul.f32 %v4006_v50, %v12243_v27 }
 0xd6b   : > { %v9379_v58 = vpop.permute.xlu0 %9378  ;;  %v9384_v62 = vpop.permute.xlu1 %9383 }
 0xd6c   : > { %v9381_v19 = vunpack.i.h.bf16 %v9379_v58  ;;  %v9380_v29 = vunpack.i.l.bf16 %v9379_v58  ;;  %v9386_v34 = vunpack.i.h.bf16 %v9384_v62  ;;  %v9385_v7 = vunpack.i.l.bf16 %v9384_v62 }
 0xd6e   : > { %v3803_v10 = vmul.f32 %v9381_v19, %v12629_v38  ;;  %v3923_v24 = vmul.f32 %v9381_v19, %v12540_v54  ;;  %v3906_v33 = vmul.f32 %v9380_v29, %v12239_v53  ;;  %v3946_v63 = vmul.f32 %v9380_v29, %v12525_v9 }
 0xd6f   : > { %v3851_v21 = vmul.f32 %v9385_v7, %v12243_v27  ;;  %v3931_v46 = vmul.f32 %v9385_v7, %v12245_v52  ;;  %v3907_v57 = vmul.f32 %v9386_v34, %v12251_v2  ;;  %v3947_v38 = vmul.f32 %v9386_v34, %v12532_v0 }
 0xd70   : > { %v3914_v39 = vadd.f32 %v3906_v33, %v3858_v15  ;;  %v3954_v51 = vadd.f32 %v3946_v63, %v3938_v36  ;;  %v4026_v53 = vmul.f32 %v4003_v22, %v12226_v60  ;;  %v4050_v9 = vmul.f32 %v4003_v22, %v12228_v32 }
 0xd71   : > { %v3859_v43 = vadd.f32 %v3851_v21, %v3803_v10  ;;  %v3939_v54 = vadd.f32 %v3931_v46, %v3923_v24  ;;  %v4051_v2 = vmul.f32 %v4006_v50, %v12245_v52  ;;  %v4009_v50 = vstv %s9052_s26 }
 0xd72   : > { %v3986_v31 = vmul.f32 %v3963_v41, %v3914_v39  ;;  %v4042_v30 = vmul.f32 %v3963_v41, %v3954_v51 }
 0xd73   : > { %v3915_v17 = vadd.f32 %v3907_v57, %v3859_v43  ;;  %v3955_v8 = vadd.f32 %v3947_v38, %v3939_v54  ;;  %v4012_v38 = vstv %s9054_s27 }
 0xd74   : > { %v12909_v37 = vadd.f32 %v4026_v53, %v3986_v31  ;;  %v12911_v4 = vadd.f32 %v4050_v9, %v4042_v30 }
 0xd75   : > { %v3987_v47 = vmul.f32 %v3966_v6, %v3915_v17  ;;  %v4043_v0 = vmul.f32 %v3966_v6, %v3955_v8  ;;  %v3969_v17 = vstv %s12881_s13  ;;  %v4028_v8 = vmul.f32 %v4009_v50, %v12271_v11  ;;  %s12972_s13 = spop %9057 }
 0xd76   : > { %v4074_v1 = vrot.slane %v12909_v37, 1 }
 0xd77   : > { %v12916_v36 = vadd.f32 %v4027_v49, %v3987_v47  ;;  %v12918_v60 = vadd.f32 %v4051_v2, %v4043_v0  ;;  %v3972_v47 = vstv %s12883_s14  ;;  %s13001_s14 = spop %9059 }
 0xd78   : > { %v12921_v32 = vsel %vm569_vm1, %v4074_v1, 0.0 }
 0xd79   : > { %4138 = vrot.lane.b32.xlu1 %v12921_v32, %s15653_s20  ;;  %v4075_v58 = vrot.slane %v12916_v36, 1 }
 0xd7b   : > { %v12927_v27 = vsel %vm569_vm1, %v4075_v58, 0.0  ;;  %v9389_v52 = vpop.permute.xlu1 %9388 }
 0xd7c   : > { %4140 = vrot.lane.b32.xlu0 %v12927_v27, %s15653_s20  ;;  %v9391_v62 = vunpack.i.h.bf16 %v9389_v52  ;;  %v9390_v19 = vunpack.i.l.bf16 %v9389_v52 }
 0xd7e   : > { %v3932_v29 = vmul.f32 %v9391_v62, %v12273_v26  ;;  %v3924_v15 = vmul.f32 %v9390_v19, %v12557_v59  ;;  %v3852_v7 = vmul.f32 %v9391_v62, %v12271_v11  ;;  %v3804_v10 = vmul.f32 %v9390_v19, %v12642_v20 }
 0xd7f   : > { %v9399_v34 = vpop.permute.xlu1 %9398 }
 0xd80   : > { %v3940_v24 = vadd.f32 %v3932_v29, %v3924_v15  ;;  %v9400_v33 = vunpack.i.l.bf16 %v9399_v34  ;;  %v9401_v41 = vunpack.i.h.bf16 %v9399_v34  ;;  %v3860_v59 = vadd.f32 %v3852_v7, %v3804_v10 }
 0xd81   : > { %v9394_v63 = vpop.permute.xlu0 %9393 }
 0xd82   : > { %v3853_v22 = vmul.f32 %v9400_v33, %v12277_v16  ;;  %v3933_v21 = vmul.f32 %v9400_v33, %v12279_v18  ;;  %v9396_v46 = vunpack.i.h.bf16 %v9394_v63  ;;  %v9395_v6 = vunpack.i.l.bf16 %v9394_v63 }
 0xd83   : > { %v3909_v43 = vmul.f32 %v9401_v41, %v12289_v44  ;;  %v3949_v54 = vmul.f32 %v9401_v41, %v12554_v13  ;;  %v4053_v44 = vmul.f32 %v4012_v38, %v12279_v18  ;;  %v3975_v41 = vstv %s12885_s15  ;;  %s9062_s15 = spop %9061 }
 0xd84   : > { %v3805_v39 = vmul.f32 %v9396_v46, %v12646_v5  ;;  %v3925_v51 = vmul.f32 %v9396_v46, %v12562_v25  ;;  %v3908_v20 = vmul.f32 %v9395_v6, %v12286_v23  ;;  %v3948_v57 = vmul.f32 %v9395_v6, %v12546_v3 }
 0xd85   : > { %v4052_v5 = vmul.f32 %v4009_v50, %v12273_v26  ;;  %v4029_v3 = vmul.f32 %v4012_v38, %v12277_v16  ;;  %v4018_v38 = vstv %s12972_s13 }
 0xd86   : > { %v3861_v53 = vadd.f32 %v3853_v22, %v3805_v39  ;;  %v3941_v9 = vadd.f32 %v3933_v21, %v3925_v51  ;;  %v3916_v31 = vadd.f32 %v3908_v20, %v3860_v59  ;;  %v3956_v30 = vadd.f32 %v3948_v57, %v3940_v24 }
 0xd87   : > { %v4015_v57 = vstv %s12963_s28 }
 0xd88   : > { %v3917_v25 = vadd.f32 %v3909_v43, %v3861_v53  ;;  %v3957_v49 = vadd.f32 %v3949_v54, %v3941_v9  ;;  %v3988_v23 = vmul.f32 %v3969_v17, %v3916_v31  ;;  %v4044_v2 = vmul.f32 %v3969_v17, %v3956_v30  ;;  %v15836_v54 = vld [vmem:[#allocation34_spill] sm:$0xff]  ;;  %v15837_v30 = vld [vmem:[#allocation35_spill] sm:$0xff] }
 0xd8a   : > { %v12949_v0 = vadd.f32 %v4028_v8, %v3988_v23  ;;  %v12951_v13 = vadd.f32 %v4052_v5, %v4044_v2  ;;  %v3989_v1 = vmul.f32 %v3972_v47, %v3917_v25  ;;  %v4045_v58 = vmul.f32 %v3972_v47, %v3957_v49  ;;  %v15838_v8 = vld [vmem:[#allocation45_spill] sm:$0xff] }
 0xd8c   : > { %v12953_v11 = vadd.f32 %v4029_v3, %v3989_v1  ;;  %v12955_v26 = vadd.f32 %v4053_v44, %v4045_v58  ;;  %v4076_v29 = vrot.slane %v12949_v0, 1  ;;  %v4031_v3 = vmul.f32 %v4018_v38, %v12320_v61  ;;  %v15839_v58 = vld [vmem:[#allocation37_spill] sm:$0xff] }
 0xd8e   : > { %v9404_v52 = vpop.permute.xlu0 %9403  ;;  %v4077_v16 = vrot.slane %v12953_v11, 1  ;;  %v12966_v33 = vsel %vm569_vm1, %v4076_v29, 0.0 }
 0xd8f   : > { %v9406_v62 = vunpack.i.h.bf16 %v9404_v52  ;;  %v9405_v19 = vunpack.i.l.bf16 %v9404_v52  ;;  %4142 = vrot.lane.b32.xlu1 %v12966_v33, %s15653_s20 }
 0xd90   : > { %v12969_v63 = vsel %vm569_vm1, %v4077_v16, 0.0 }
 0xd91   : > { %v3854_v18 = vmul.f32 %v9406_v62, %v12310_v40  ;;  %v3934_v15 = vmul.f32 %v9406_v62, %v12312_v45  ;;  %v3806_v34 = vmul.f32 %v9405_v19, %v12652_v35  ;;  %v3926_v7 = vmul.f32 %v9405_v19, %v12580_v56  ;;  %v9409_v10 = vpop.permute.xlu1 %9408  ;;  %4144 = vrot.lane.b32.xlu0 %v12969_v63, %s15653_s20  ;;  %v15840_v19 = vld [vmem:[#allocation14_spill] sm:$0xff] }
 0xd92   : > { %v9414_v24 = vpop.permute.xlu0 %9413  ;;  %v9411_v21 = vunpack.i.h.bf16 %v9409_v10  ;;  %v9410_v35 = vunpack.i.l.bf16 %v9409_v10  ;;  %v3978_v56 = vstv %s12887_s19  ;;  %v4055_v62 = vmul.f32 %v4018_v38, %v15836_v54  ;;  %v15845_v38 = vld [vmem:[#allocation48_spill] sm:$0xff] }
 0xd93   : > { %v3942_v22 = vadd.f32 %v3934_v15, %v3926_v7  ;;  %v3862_v46 = vadd.f32 %v3854_v18, %v3806_v34  ;;  %v9416_v6 = vunpack.i.h.bf16 %v9414_v24  ;;  %v9415_v50 = vunpack.i.l.bf16 %v9414_v24  ;;  %v15841_v34 = vld [vmem:[#allocation36_spill] sm:$0xff]  ;;  %v15842_v7 = vld [vmem:[#allocation15_spill] sm:$0xff] }
 0xd94   : > { %v3807_v59 = vmul.f32 %v9411_v21, %v12656_v12  ;;  %v3927_v39 = vmul.f32 %v9411_v21, %v12589_v42  ;;  %v3910_v51 = vmul.f32 %v9410_v35, %v12335_v55  ;;  %v3950_v20 = vmul.f32 %v9410_v35, %v12567_v28 }
 0xd95   : > { %v3855_v43 = vmul.f32 %v9415_v50, %v12320_v61  ;;  %v3935_v53 = vmul.f32 %v9415_v50, %v15836_v54  ;;  %v3911_v17 = vmul.f32 %v9416_v6, %v15837_v30  ;;  %v3951_v5 = vmul.f32 %v9416_v6, %v15838_v8  ;;  %v15846_v54 = vld [vmem:[#allocation40_spill] sm:$0xff] }
 0xd96   : > { %v3918_v9 = vadd.f32 %v3910_v51, %v3862_v46  ;;  %v3958_v31 = vadd.f32 %v3950_v20, %v3942_v22  ;;  %v9419_v25 = vpop.permute.xlu1 %9418  ;;  %v4030_v55 = vmul.f32 %v4015_v57, %v12310_v40  ;;  %v4054_v28 = vmul.f32 %v4015_v57, %v12312_v45  ;;  %v15844_v20 = vld [vmem:[#allocation51_spill] sm:$0xff] }
 0xd97   : > { %v3863_v12 = vadd.f32 %v3855_v43, %v3807_v59  ;;  %v3943_v49 = vadd.f32 %v3935_v53, %v3927_v39  ;;  %v9421_v42 = vunpack.i.h.bf16 %v9419_v25  ;;  %v9420_v23 = vunpack.i.l.bf16 %v9419_v25  ;;  %v15843_v59 = vld [vmem:[#allocation38_spill] sm:$0xff] }
 0xd98   : > { %v3990_v2 = vmul.f32 %v3975_v41, %v3918_v9  ;;  %v4046_v47 = vmul.f32 %v3975_v41, %v3958_v31  ;;  %v15847_v9 = vld [vmem:[#allocation13_spill] sm:$0xff]  ;;  %v3981_v30 = vstv %s12889_s21 }
 0xd99   : > { %v3919_v44 = vadd.f32 %v3911_v17, %v3863_v12  ;;  %v3959_v1 = vadd.f32 %v3951_v5, %v3943_v49  ;;  %v3936_v52 = vmul.f32 %v9421_v42, %v15839_v58  ;;  %v3928_v29 = vmul.f32 %v9420_v23, %v15840_v19  ;;  %v15848_v17 = vld [vmem:[#allocation39_spill] sm:$0xff] }
 0xd9a   : > { %v12995_v16 = vadd.f32 %v4030_v55, %v3990_v2  ;;  %v12997_v18 = vadd.f32 %v4054_v28, %v4046_v47  ;;  %v3856_v45 = vmul.f32 %v9421_v42, %v15841_v34  ;;  %v3808_v10 = vmul.f32 %v9420_v23, %v15842_v7  ;;  %v15849_v55 = vld [vmem:[#allocation41_spill] sm:$0xff] }
 0xd9b   : > { %v3991_v15 = vmul.f32 %v3978_v56, %v3919_v44  ;;  %v4047_v40 = vmul.f32 %v3978_v56, %v3959_v1  ;;  %v3944_v61 = vadd.f32 %v3936_v52, %v3928_v29  ;;  %v3848_v24 = vpop.permute.xlu1 %3847  ;;  %v4021_v56 = vstv %s13001_s14  ;;  %v15850_v44 = vld [vmem:[#allocation50_spill] sm:$0xff] }
 0xd9c   : > { %v4078_v6 = vrot.slane %v12995_v16, 1  ;;  %v3864_v50 = vadd.f32 %v3856_v45, %v3808_v10  ;;  %v3857_v39 = vmul.f32 %v3848_v24, %v15843_v59  ;;  %v3937_v8 = vmul.f32 %v3848_v24, %v15848_v17 }
 0xd9d   : > { %v9424_v41 = vpop.permute.xlu0 %9423  ;;  %v13003_v22 = vadd.f32 %v4031_v3, %v3991_v15  ;;  %v13005_v21 = vadd.f32 %v4055_v62, %v4047_v40  ;;  %v4032_v2 = vmul.f32 %v4021_v56, %v15841_v34  ;;  %v4024_v47 = vstv %s9062_s15 }
 0xd9e   : > { %v9426_v35 = vunpack.i.h.bf16 %v9424_v41  ;;  %v9425_v46 = vunpack.i.l.bf16 %v9424_v41  ;;  %v13018_v25 = vsel %vm569_vm1, %v4078_v6, 0.0  ;;  %v4056_v52 = vmul.f32 %v4021_v56, %v15839_v58 }
 0xd9f   : > { %v4079_v51 = vrot.slane %v13003_v22, 1  ;;  %4146 = vrot.lane.b32.xlu1 %v13018_v25, %s15653_s20  ;;  %v3984_v15 = vstv %s12895_s23  ;;  %v4033_v45 = vmul.f32 %v4024_v47, %v15843_v59  ;;  %s13548_s23 = spop %9063 }
 0xda0   : > { %v3809_v57 = vmul.f32 %v9426_v35, %v15844_v20  ;;  %v3929_v43 = vmul.f32 %v9426_v35, %v15845_v38  ;;  %v3912_v53 = vmul.f32 %v9425_v46, %v15846_v54  ;;  %v3952_v31 = vmul.f32 %v9425_v46, %v15847_v9  ;;  %v15858_v20 = vld [vmem:[#allocation26_spill] sm:$0xff]  ;;  %v15859_v38 = vld [vmem:[#allocation27_spill] sm:$0xff]  ;;  %v15861_v54 = vld [vmem:[#allocation29_spill] sm:$0xff]  ;;  %s13550_s25 = spop %9065 }
 0xda1   : > { %v3904_v5 = vpop.permute.xlu0 %3903  ;;  %v13021_v12 = vsel %vm569_vm1, %v4079_v51, 0.0  ;;  %v15857_v51 = vld [vmem:[#allocation25_spill] sm:$0xff]  ;;  %v15863_v9 = vld [vmem:[#allocation31_spill] sm:$0xff]  ;;  %s13552_s18 = spop %9067 }
 0xda2   : > { %v3920_v49 = vadd.f32 %v3912_v53, %v3864_v50  ;;  %v3960_v42 = vadd.f32 %v3952_v31, %v3944_v61  ;;  %v3865_v23 = vadd.f32 %v3857_v39, %v3809_v57  ;;  %v3913_v28 = vmul.f32 %v3904_v5, %v15849_v55  ;;  %4148 = vrot.lane.b32.xlu0 %v13021_v12, %s15653_s20  ;;  %v15862_v53 = vld [vmem:[#allocation30_spill] sm:$0xff]  ;;  %v15864_v31 = vld [vmem:[#allocation24_spill] sm:$0xff]  ;;  %s13554_s26 = spop %9069 }
 0xda3   : > { %v3945_v3 = vadd.f32 %v3937_v8, %v3929_v43  ;;  %v3953_v1 = vmul.f32 %v3904_v5, %v15850_v44  ;;  %v4057_v61 = vmul.f32 %v4024_v47, %v15848_v17  ;;  %v15860_v43 = vld [vmem:[#allocation28_spill] sm:$0xff]  ;;  %s13556_s27 = spop %9071 }
 0xda4   : > { %v3992_v62 = vmul.f32 %v3981_v30, %v3920_v49  ;;  %v4048_v19 = vmul.f32 %v3981_v30, %v3960_v42  ;;  %v3921_v29 = vadd.f32 %v3913_v28, %v3865_v23  ;;  %s13558_s28 = spop %9073 }
 0xda5   : > { %v3961_v40 = vadd.f32 %v3953_v1, %v3945_v3  ;;  %v15865_v1 = vld [vmem:[#allocation32_spill] sm:$0xff]  ;;  %s13560_s13 = spop %9075 }
 0xda6   : > { %v3993_v7 = vmul.f32 %v3984_v15, %v3921_v29  ;;  %v13033_v10 = vadd.f32 %v4032_v2, %v3992_v62  ;;  %v13035_v34 = vadd.f32 %v4056_v52, %v4048_v19  ;;  %s13562_s14 = spop %9077 }
 0xda7   : > { %v4049_v24 = vmul.f32 %v3984_v15, %v3961_v40  ;;  %s9080_s15 = spop %9079 }
 0xda8   : > { %15851 = vst [vmem:[#allocation52_spill] sm:$0xff] %v13033_v10  ;;  %15852 = vst [vmem:[#allocation53_spill] sm:$0xff] %v13035_v34  ;;  %v13038_v41 = vadd.f32 %v4033_v45, %v3993_v7  ;;  %v4080_v35 = vrot.slane %v13033_v10, 1  ;;  %s9082_s19 = spop %9081 }
 0xda9   : > { %v13041_v58 = vadd.f32 %v4057_v61, %v4049_v24  ;;  %s9084_s21 = spop %9083 }
 0xdaa   : > { %15853 = vst [vmem:[#allocation54_spill] sm:$0xff] %v13038_v41  ;;  %v13044_v46 = vsel %vm569_vm1, %v4080_v35, 0.0  ;;  %v4081_v6 = vrot.slane %v13038_v41, 1 }
 0xdab   : > { %15854 = vst [vmem:[#allocation55_spill] sm:$0xff] %v13041_v58  ;;  %15855 = vst [vmem:[#allocation56_spill] sm:$0xff] %v13044_v46  ;;  %4150 = vrot.lane.b32.xlu1 %v13044_v46, %s15653_s20 }
 0xdac   : > { %v13050_v56 = vsel %vm569_vm1, %v4081_v6, 0.0 }
 0xdad   : > { %15856 = vst [vmem:[#allocation57_spill] sm:$0xff] %v13050_v56  ;;  %4152 = vrot.lane.b32.xlu0 %v13050_v56, %s15653_s20 }
 0xdeb   : > { %v4139_v50 = vpop.permute.xlu1 %4138 }
 0xdec   : > { %v4162_v59 = vsel %vm415_vm0, %v12909_v37, %v4139_v50 }
 0xded   : > { %8603 = vmatmul.mubr.msk.f32.vlgmr.msra.gmra.mrb[24].mxu0 %vm629_vm2, %v4162_v59 }
 0xdee   : > { %v4141_v39 = vpop.permute.xlu0 %4140  ;;  %4264 = vmatprep.mubr.f32.mxu0 %v15705_v48  ;;  %8930 = vmatpush1.bf16.msra.mxu0 %v15857_v51 }
 0xdef   : > { %8932 = vmatprep.subr.bf16.mxu0 %v15858_v20  ;;  %v4163_v57 = vsel %vm415_vm0, %v12916_v36, %v4141_v39 }
 0xdf1   : > { %8604 = vmatmul.mubr.msk.f32.gmra.mrb[26].mxu0 %vm629_vm2, %v4163_v57 }
 0xdf2   : > { %4270 = vmatprep.mubr.f32.mxu0 %v15705_v48  ;;  %8934 = vmatpush1.bf16.msra.mxu0 %v15859_v38 }
 0xdf3   : > { %8936 = vmatprep.subr.bf16.mxu0 %v15860_v43 }
 0xdf6   : > { %8938 = vmatpush1.bf16.msra.mxu0 %v15861_v54 }
 0xdf7   : > { %8940 = vmatprep.subr.bf16.mxu0 %v15862_v53 }
 0xdfa   : > { %8942 = vmatpush1.bf16.msra.mxu0 %v15863_v9 }
 0xdfb   : > { %8944 = vmatprep.subr.bf16.mxu0 %v15864_v31 }
 0xe01   : > { %v4143_v30 = vpop.permute.xlu1 %4142 }
 0xe02   : > { %v4164_v17 = vsel %vm415_vm0, %v12949_v0, %v4143_v30 }
 0xe03   : > { %v4145_v8 = vpop.permute.xlu0 %4144  ;;  %8605 = vmatmul.mubr.msk.f32.gmra.mrb[28].mxu0 %vm629_vm2, %v4164_v17 }
 0xe04   : > { %4276 = vmatprep.mubr.f32.mxu0 %v15705_v48  ;;  %v4165_v5 = vsel %vm415_vm0, %v12953_v11, %v4145_v8 }
 0xe07   : > { %8606 = vmatmul.mubr.msk.f32.gmra.mrb[30].mxu0 %vm629_vm2, %v4165_v5 }
 0xe08   : > { %4282 = vmatprep.mubr.f32.mxu0 %v15705_v48 }
 0xe11   : > { %v4147_v49 = vpop.permute.xlu1 %4146 }
 0xe12   : > { %v4166_v42 = vsel %vm415_vm0, %v12995_v16, %v4147_v49 }
 0xe13   : > { %8607 = vmatmul.mubr.msk.f32.gmra.mrb[32].mxu0 %vm629_vm2, %v4166_v42 }
 0xe14   : > { %v4149_v23 = vpop.permute.xlu0 %4148  ;;  %4288 = vmatprep.mubr.f32.mxu0 %v15705_v48 }
 0xe15   : > { %v4167_v55 = vsel %vm415_vm0, %v13003_v22, %v4149_v23 }
 0xe17   : > { %8608 = vmatmul.mubr.msk.f32.gmra.mrb[34].mxu0 %vm629_vm2, %v4167_v55 }
 0xe18   : > { %4294 = vmatprep.mubr.f32.mxu0 %v15705_v48 }
 0xe1d   : > { %v4151_v28 = vpop.permute.xlu1 %4150 }
 0xe1e   : > { %v4168_v2 = vsel %vm415_vm0, %v13033_v10, %v4151_v28  ;;  %v15902_v10 = vld [vmem:[#allocation44_spill] sm:$0xff] }
 0xe1f   : > { %v4153_v47 = vpop.permute.xlu0 %4152  ;;  %8609 = vmatmul.mubr.msk.f32.gmra.mrb[36].mxu0 %vm629_vm2, %v4168_v2 }
 0xe20   : > { %4300 = vmatprep.mubr.f32.mxu0 %v15705_v48  ;;  %v4169_v3 = vsel %vm415_vm0, %v13038_v41, %v4153_v47 }
 0xe23   : > { %8610 = vmatmul.mubr.msk.f32.gmra.mrb[38].mxu0 %vm629_vm2, %v4169_v3 }
 0xe24   : > { %6614 = vmatprep.mubr.f32.mxu0 %v15705_v48 }
 0xec0   : > { %v4260_v44 = vpop.f32.mrb[24].mxu0 }
 0xec1   : > { %v13095_v52 = vadd.f32 %v4260_v44, %v15865_v1  ;;  %v13097_v62 = vpop.f32.mrb[25].mxu0 }
 0xec3   : > { %v8619_v19 = vmul.f32 -1.442695, %v13095_v52 }
 0xec4   : > { %v4266_v29 = vpop.f32.mrb[26].mxu0 }
 0xec5   : > { %9976 = vpow2.f32 %v8619_v19  ;;  %v13101_v15 = vadd.f32 %v4266_v29, %v15865_v1  ;;  %v13103_v40 = vpop.f32.mrb[27].mxu0 }
 0xec7   : > { %v8620_v45 = vmul.f32 -1.442695, %v13101_v15 }
 0xec9   : > { %9978 = vpow2.f32 %v8620_v45  ;;  %v4307_v45 = vadd.f32 1.0, %v13095_v52 }
 0xecf   : > { %v9977_v7 = vpop.eup %9976 }
 0xed0   : > { %v4451_v61 = vadd.f32 1.0, %v9977_v7 }
 0xed2   : > { %9980 = vrcp.f32 %v4451_v61 }
 0xed3   : > { %v9979_v24 = vpop.eup %9978 }
 0xed4   : > { %v4452_v35 = vadd.f32 1.0, %v9979_v24 }
 0xed6   : > { %9982 = vrcp.f32 %v4452_v35  ;;  %v4272_v50 = vpop.f32.mrb[28].mxu0 }
 0xed7   : > { %v13107_v59 = vadd.f32 %v4272_v50, %v15865_v1  ;;  %v13109_v39 = vpop.f32.mrb[29].mxu0  ;;  %v8611_v50 = vmul.f32 -1.442695, %v4307_v45 }
 0xed9   : > { %v8621_v57 = vmul.f32 -1.442695, %v13107_v59 }
 0xeda   : > { %v4278_v30 = vpop.f32.mrb[30].mxu0 }
 0xedb   : > { %9984 = vpow2.f32 %v8621_v57  ;;  %v13114_v17 = vadd.f32 %v4278_v30, %v15865_v1  ;;  %v13116_v8 = vpop.f32.mrb[31].mxu0 }
 0xedc   : > { %v9981_v6 = vpop.eup %9980 }
 0xedd   : > { %4483 = vrot.lane.b32.xlu1 %v9981_v6, %s15651_s22  ;;  %v8622_v5 = vmul.f32 -1.442695, %v13114_v17 }
 0xedf   : > { %9986 = vpow2.f32 %v8622_v5 }
 0xee0   : > { %v9983_v31 = vpop.eup %9982 }
 0xee1   : > { %4485 = vrot.lane.b32.xlu0 %v9983_v31, %s15651_s22 }
 0xee5   : > { %v9985_v49 = vpop.eup %9984 }
 0xee6   : > { %v4453_v42 = vadd.f32 1.0, %v9985_v49  ;;  %v4284_v23 = vpop.f32.mrb[32].mxu0  ;;  %v4308_v49 = vadd.f32 1.0, %v13101_v15 }
 0xee7   : > { %v13120_v55 = vpop.f32.mrb[33].mxu0  ;;  %v13123_v28 = vadd.f32 %v4284_v23, %v15865_v1 }
 0xee8   : > { %9988 = vrcp.f32 %v4453_v42 }
 0xee9   : > { %v9987_v2 = vpop.eup %9986  ;;  %v8623_v19 = vmul.f32 -1.442695, %v13123_v28 }
 0xeea   : > { %v4454_v47 = vadd.f32 1.0, %v9987_v2  ;;  %v4290_v3 = vpop.f32.mrb[34].mxu0  ;;  %v8612_v2 = vmul.f32 -1.442695, %v4308_v49  ;;  %v4311_v49 = vadd.f32 1.0, %v13123_v28 }
 0xeeb   : > { %v13125_v44 = vpop.f32.mrb[35].mxu0  ;;  %v13129_v29 = vadd.f32 %v4290_v3, %v15865_v1  ;;  %v4309_v3 = vadd.f32 1.0, %v13107_v59 }
 0xeec   : > { %9990 = vrcp.f32 %v4454_v47 }
 0xeed   : > { %9992 = vpow2.f32 %v8623_v19  ;;  %v8624_v61 = vmul.f32 -1.442695, %v13129_v29 }
 0xeef   : > { %9994 = vpow2.f32 %v8624_v61  ;;  %v8613_v61 = vmul.f32 -1.442695, %v4309_v3 }
 0xef0   : > { %9996 = vpow2.f32 %v8611_v50 }
 0xef2   : > { %v4296_v7 = vpop.f32.mrb[36].mxu0  ;;  %v9989_v6 = vpop.eup %9988 }
 0xef3   : > { %v13134_v24 = vadd.f32 %v4296_v7, %v15865_v1  ;;  %v13136_v35 = vpop.f32.mrb[37].mxu0  ;;  %4487 = vrot.lane.b32.xlu1 %v9989_v6, %s15651_s22  ;;  %v4310_v6 = vadd.f32 1.0, %v13114_v17 }
 0xef5   : > { %v8625_v31 = vmul.f32 -1.442695, %v13134_v24 }
 0xef6   : > { %v4302_v57 = vpop.f32.mrb[38].mxu0  ;;  %v9991_v5 = vpop.eup %9990 }
 0xef7   : > { %v13140_v30 = vpop.f32.mrb[39].mxu0  ;;  %4489 = vrot.lane.b32.xlu0 %v9991_v5, %s15651_s22  ;;  %9998 = vpow2.f32 %v8625_v31  ;;  %v13145_v42 = vadd.f32 %v4302_v57, %v15865_v1  ;;  %v9993_v23 = vpop.eup %9992  ;;  %v8614_v5 = vmul.f32 -1.442695, %v4310_v6 }
 0xef8   : > { %v4455_v47 = vadd.f32 1.0, %v9993_v23 }
 0xef9   : > { %v8626_v19 = vmul.f32 -1.442695, %v13145_v42  ;;  %v9995_v45 = vpop.eup %9994 }
 0xefa   : > { %10000 = vrcp.f32 %v4455_v47  ;;  %v4456_v7 = vadd.f32 1.0, %v9995_v45  ;;  %v9997_v50 = vpop.eup %9996  ;;  %v8615_v47 = vmul.f32 -1.442695, %v4311_v49  ;;  %v4314_v49 = vadd.f32 1.0, %v13145_v42 }
 0xefb   : > { %10002 = vpow2.f32 %v8612_v2  ;;  %v4339_v23 = vadd.f32 1.0, %v9997_v50  ;;  %v4312_v2 = vadd.f32 1.0, %v13129_v29 }
 0xefc   : > { %10004 = vpow2.f32 %v8626_v19 }
 0xefd   : > { %10006 = vrcp.f32 %v4456_v7 }
 0xefe   : > { %10008 = vpow2.f32 %v8613_v61  ;;  %v4313_v61 = vadd.f32 1.0, %v13134_v24 }
 0xf01   : > { %v9999_v31 = vpop.eup %9998 }
 0xf02   : > { %v4457_v57 = vadd.f32 1.0, %v9999_v31  ;;  %v8616_v31 = vmul.f32 -1.442695, %v4312_v2 }
 0xf04   : > { %10010 = vrcp.f32 %v4457_v57  ;;  %v10001_v1 = vpop.eup %10000 }
 0xf05   : > { %10012 = vpow2.f32 %v8614_v5  ;;  %4491 = vrot.lane.b32.xlu1 %v10001_v1, %s15651_s22  ;;  %v10003_v3 = vpop.eup %10002  ;;  %v8617_v5 = vmul.f32 -1.442695, %v4313_v61 }
 0xf06   : > { %10014 = vrcp.f32 %v4339_v23  ;;  %v10005_v19 = vpop.eup %10004  ;;  %v4340_v6 = vadd.f32 1.0, %v10003_v3 }
 0xf07   : > { %v10007_v45 = vpop.eup %10006  ;;  %v4458_v7 = vadd.f32 1.0, %v10005_v19  ;;  %10016 = vpow2.f32 %v8615_v47  ;;  %v8618_v47 = vmul.f32 -1.442695, %v4314_v49 }
 0xf08   : > { %4493 = vrot.lane.b32.xlu0 %v10007_v45, %s15651_s22  ;;  %v10009_v50 = vpop.eup %10008 }
 0xf09   : > { %10018 = vrcp.f32 %v4458_v7  ;;  %v4341_v1 = vadd.f32 1.0, %v10009_v50 }
 0xf0a   : > { %10020 = vpow2.f32 %v8616_v31 }
 0xf0b   : > { %10022 = vrcp.f32 %v4340_v6 }
 0xf0c   : > { %10024 = vpow2.f32 %v8617_v5 }
 0xf0d   : > { %10026 = vrcp.f32 %v4341_v1 }
 0xf0e   : > { %v10011_v57 = vpop.eup %10010  ;;  %10028 = vpow2.f32 %v8618_v47 }
 0xf0f   : > { %4495 = vrot.lane.b32.xlu1 %v10011_v57, %s15651_s22  ;;  %v10013_v23 = vpop.eup %10012 }
 0xf10   : > { %v13157_v19 = vpop.eup %10014  ;;  %v4342_v2 = vadd.f32 1.0, %v10013_v23 }
 0xf11   : > { %v10017_v3 = vpop.eup %10016 }
 0xf12   : > { %10030 = vrcp.f32 %v4342_v2  ;;  %v4343_v7 = vadd.f32 1.0, %v10017_v3 }
 0xf13   : > { %4379 = vrot.lane.b32.xlu1 %v13157_v19, %s15651_s22  ;;  %v10019_v45 = vpop.eup %10018 }
 0xf14   : > { %4497 = vrot.lane.b32.xlu0 %v10019_v45, %s15651_s22  ;;  %v10021_v31 = vpop.eup %10020  ;;  %10032 = vrcp.f32 %v4343_v7 }
 0xf15   : > { %v13162_v61 = vpop.eup %10022  ;;  %v4344_v6 = vadd.f32 1.0, %v10021_v31 }
 0xf16   : > { %v10025_v50 = vpop.eup %10024 }
 0xf17   : > { %v13166_v57 = vpop.eup %10026  ;;  %10034 = vrcp.f32 %v4344_v6  ;;  %v4345_v5 = vadd.f32 1.0, %v10025_v50 }
 0xf18   : > { %4381 = vrot.lane.b32.xlu0 %v13162_v61, %s15651_s22  ;;  %v10029_v49 = vpop.eup %10028 }
 0xf19   : > { %10036 = vrcp.f32 %v4345_v5  ;;  %v4346_v23 = vadd.f32 1.0, %v10029_v49 }
 0xf1b   : > { %10038 = vrcp.f32 %v4346_v23 }
 0xf1c   : > { %4383 = vrot.lane.b32.xlu0 %v13166_v57, %s15651_s22  ;;  %v13170_v1 = vpop.eup %10030  ;;  %10040 = vtanh.f32 %v13095_v52 }
 0xf1d   : > { %10042 = vtanh.f32 %v13101_v15 }
 0xf1e   : > { %v13174_v47 = vpop.eup %10032  ;;  %10044 = vtanh.f32 %v13107_v59 }
 0xf1f   : > { %10046 = vtanh.f32 %v13114_v17 }
 0xf20   : > { %4385 = vrot.lane.b32.xlu0 %v13170_v1, %s15651_s22  ;;  %10048 = vtanh.f32 %v13123_v28 }
 0xf21   : > { %v13178_v2 = vpop.eup %10034  ;;  %10050 = vtanh.f32 %v13129_v29 }
 0xf22   : > { %10052 = vtanh.f32 %v13134_v24 }
 0xf23   : > { %v13182_v3 = vpop.eup %10036  ;;  %10054 = vtanh.f32 %v13145_v42  ;;  %v4107_v42 = vrot.slane %v12918_v60, 1 }
 0xf24   : > { %4387 = vrot.lane.b32.xlu0 %v13174_v47, %s15651_s22 }
 0xf25   : > { %v13186_v45 = vpop.eup %10038 }
 0xf26   : > { %v10041_v7 = vpop.eup %10040 }
 0xf27   : > { %v10043_v50 = vpop.eup %10042 }
 0xf28   : > { %4389 = vrot.lane.b32.xlu0 %v13178_v2, %s15651_s22  ;;  %v10045_v23 = vpop.eup %10044 }
 0xf29   : > { %v10047_v52 = vpop.eup %10046 }
 0xf2c   : > { %4391 = vrot.lane.b32.xlu0 %v13182_v3, %s15651_s22 }
 0xf30   : > { %4393 = vrot.lane.b32.xlu0 %v13186_v45, %s15651_s22 }
 0xf4f   : > { %v4484_v31 = vpop.permute.xlu1 %4483 }
 0xf50   : > { %v4507_v6 = vmul.f32 %v10041_v7, %v4484_v31  ;;  %v10049_v7 = vpop.eup %10048 }
 0xf51   : > { %v10051_v17 = vpop.eup %10050 }
 0xf52   : > { %4523 = vrot.lane.b32.xlu1 %v4507_v6, %s15649_s24 }
 0xf53   : > { %v4486_v5 = vpop.permute.xlu0 %4485 }
 0xf54   : > { %v4508_v49 = vmul.f32 %v10043_v50, %v4486_v5  ;;  %v4106_v5 = vrot.slane %v12911_v4, 1 }
 0xf56   : > { %4525 = vrot.lane.b32.xlu1 %v4508_v49, %s15649_s24 }
 0xf65   : > { %v4488_v9 = vpop.permute.xlu1 %4487 }
 0xf66   : > { %v4509_v53 = vmul.f32 %v10045_v23, %v4488_v9  ;;  %v13208_v23 = vsel %vm569_vm1, %v4106_v5, 0.0 }
 0xf68   : > { %4527 = vrot.lane.b32.xlu1 %v4509_v53, %s15649_s24  ;;  %v10053_v53 = vpop.eup %10052 }
 0xf69   : > { %v4490_v15 = vpop.permute.xlu0 %4489  ;;  %v10055_v28 = vpop.eup %10054 }
 0xf6a   : > { %v4510_v54 = vmul.f32 %v10047_v52, %v4490_v15 }
 0xf6c   : > { %4529 = vrot.lane.b32.xlu1 %v4510_v54, %s15649_s24 }
 0xf77   : > { %v4492_v59 = vpop.permute.xlu1 %4491 }
 0xf78   : > { %v4511_v31 = vmul.f32 %v10049_v7, %v4492_v59  ;;  %v4363_v7 = vmul.f32 %v13157_v19, %v12911_v4  ;;  %v13215_v59 = vsel %vm569_vm1, %v4107_v42, 0.0 }
 0xf7a   : > { %4531 = vrot.lane.b32.xlu1 %v4511_v31, %s15649_s24  ;;  %v4494_v9 = vpop.permute.xlu0 %4493 }
 0xf7b   : > { %v4512_v6 = vmul.f32 %v10051_v17, %v4494_v9 }
 0xf7e   : > { %4533 = vrot.lane.b32.xlu1 %v4512_v6, %s15649_s24 }
 0xf81   : > { %v4496_v54 = vpop.permute.xlu1 %4495 }
 0xf82   : > { %v4513_v50 = vmul.f32 %v10053_v53, %v4496_v54  ;;  %v4364_v53 = vmul.f32 %v13162_v61, %v12918_v60  ;;  %v4109_v61 = vrot.slane %v12955_v26, 1 }
 0xf84   : > { %4535 = vrot.lane.b32.xlu1 %v4513_v50, %s15649_s24 }
 0xf85   : > { %v4380_v49 = vpop.permute.xlu1 %4379 }
 0xf86   : > { %v4498_v29 = vpop.permute.xlu0 %4497  ;;  %v4403_v52 = vmul.f32 %v4380_v49, %v13208_v23 }
 0xf87   : > { %v4514_v24 = vmul.f32 %v10055_v28, %v4498_v29 }
 0xf88   : > { %v4411_v17 = vadd.f32 %v4403_v52, %v4363_v7  ;;  %v13237_v7 = vsel %vm569_vm1, %v4109_v61, 0.0 }
 0xf89   : > { %4537 = vrot.lane.b32.xlu0 %v4514_v24, %s15649_s24  ;;  %v4108_v24 = vrot.slane %v12951_v13, 1 }
 0xf8a   : > { %v4382_v15 = vpop.permute.xlu0 %4381 }
 0xf8b   : > { %v4404_v31 = vmul.f32 %v4382_v15, %v13215_v59  ;;  %v13230_v49 = vsel %vm569_vm1, %v4108_v24, 0.0  ;;  %v4365_v15 = vmul.f32 %v13166_v57, %v12951_v13  ;;  %v4110_v24 = vrot.slane %v12997_v18, 1 }
 0xf8d   : > { %v4412_v54 = vadd.f32 %v4404_v31, %v4364_v53  ;;  %v13251_v61 = vsel %vm569_vm1, %v4110_v24, 0.0 }
 0xf8e   : > { %v4384_v5 = vpop.permute.xlu0 %4383 }
 0xf8f   : > { %v4405_v42 = vmul.f32 %v4384_v5, %v13230_v49 }
 0xf92   : > { %v4386_v52 = vpop.permute.xlu0 %4385 }
 0xf93   : > { %v4406_v31 = vmul.f32 %v4386_v52, %v13237_v7 }
 0xf96   : > { %v4388_v57 = vpop.permute.xlu0 %4387 }
 0xf97   : > { %v4407_v52 = vmul.f32 %v4388_v57, %v13251_v61  ;;  %v4368_v57 = vmul.f32 %v13178_v2, %v13005_v21 }
 0xfc4   : > { %v4524_v9 = vpop.permute.xlu1 %4523 }
 0xfc5   : > { %v13218_v6 = vadd.f32 %v4524_v9, %v4411_v17  ;;  %v4413_v17 = vadd.f32 %v4405_v42, %v4365_v15  ;;  %v4111_v42 = vrot.slane %v13005_v21, 1 }
 0xfc7   : > { %10056 = vtanh.f32 %v13218_v6 }
 0xfc8   : > { %v4526_v50 = vpop.permute.xlu1 %4525 }
 0xfc9   : > { %v13223_v28 = vadd.f32 %v4526_v50, %v4412_v54  ;;  %v4366_v54 = vmul.f32 %v13170_v1, %v12955_v26  ;;  %v4390_v1 = vpop.permute.xlu0 %4389 }
 0xfcb   : > { %10058 = vtanh.f32 %v13223_v28  ;;  %v4414_v50 = vadd.f32 %v4406_v31, %v4366_v54  ;;  %v4367_v31 = vmul.f32 %v13174_v47, %v12997_v18 }
 0xfd1   : > { %v10057_v19 = vpop.eup %10056 }
 0xfd2   : > { %4619 = vrot.lane.b32.xlu1 %v10057_v19, %s15651_s22 }
 0xfd5   : > { %v10059_v29 = vpop.eup %10058 }
 0xfd6   : > { %4621 = vrot.lane.b32.xlu0 %v10059_v29, %s15651_s22 }
 0xfda   : > { %v4528_v9 = vpop.permute.xlu1 %4527 }
 0xfdb   : > { %v13240_v53 = vadd.f32 %v4528_v9, %v4413_v17  ;;  %v13259_v17 = vsel %vm569_vm1, %v4111_v42, 0.0  ;;  %v4112_v9 = vrot.slane %v13035_v34, 1 }
 0xfdc   : > { %15866 = vst [vmem:[#allocation58_spill] sm:$0xff] %v13259_v17  ;;  %v4408_v54 = vmul.f32 %v4390_v1, %v13259_v17  ;;  %v4369_v1 = vmul.f32 %v13182_v3, %v13035_v34  ;;  %v4370_v3 = vmul.f32 %v13186_v45, %v13041_v58 }
 0xfdd   : > { %10060 = vtanh.f32 %v13240_v53  ;;  %v13268_v43 = vsel %vm569_vm1, %v4112_v9, 0.0 }
 0xfde   : > { %v4530_v19 = vpop.permute.xlu1 %4529  ;;  %15867 = vst [vmem:[#allocation59_spill] sm:$0xff] %v13268_v43  ;;  %v4416_v42 = vadd.f32 %v4408_v54, %v4368_v57 }
 0xfdf   : > { %v13245_v29 = vadd.f32 %v4530_v19, %v4414_v50  ;;  %v4415_v50 = vadd.f32 %v4407_v52, %v4367_v31  ;;  %v4392_v19 = vpop.permute.xlu0 %4391  ;;  %v4113_v52 = vrot.slane %v13041_v58, 1 }
 0xfe0   : > { %v4409_v47 = vmul.f32 %v4392_v19, %v13268_v43 }
 0xfe1   : > { %10062 = vtanh.f32 %v13245_v29  ;;  %v13281_v19 = vsel %vm569_vm1, %v4113_v52, 0.0 }
 0xfe2   : > { %v4417_v31 = vadd.f32 %v4409_v47, %v4369_v1  ;;  %15869 = vst [vmem:[#allocation35_spill] sm:$0xff] %v13281_v19 }
 0xfe3   : > { %v4394_v2 = vpop.permute.xlu0 %4393 }
 0xfe4   : > { %v4410_v54 = vmul.f32 %v4394_v2, %v13281_v19  ;;  %v15888_v19 = vld [vmem:[#allocation18_spill] sm:$0xff] }
 0xfe5   : > { %v6352_v56 = vrot.slane %v15888_v19, 5 }
 0xfe6   : > { %v4418_v57 = vadd.f32 %v4410_v54, %v4370_v3 }
 0xfe7   : > { %v10061_v5 = vpop.eup %10060 }
 0xfe8   : > { %4623 = vrot.lane.b32.xlu1 %v10061_v5, %s15651_s22 }
 0xfeb   : > { %v10063_v15 = vpop.eup %10062 }
 0xfec   : > { %4625 = vrot.lane.b32.xlu0 %v10063_v15, %s15651_s22  ;;  %v4532_v24 = vpop.permute.xlu1 %4531 }
 0xfed   : > { %v13263_v5 = vadd.f32 %v4532_v24, %v4415_v50 }
 0xfef   : > { %10064 = vtanh.f32 %v13263_v5 }
 0xff0   : > { %v4534_v15 = vpop.permute.xlu1 %4533 }
 0xff1   : > { %v13272_v38 = vadd.f32 %v4534_v15, %v4416_v42 }
 0xff3   : > { %10066 = vtanh.f32 %v13272_v38 }
 0xff6   : > { %v4536_v50 = vpop.permute.xlu1 %4535 }
 0xff7   : > { %v13278_v9 = vadd.f32 %v4536_v50, %v4417_v31  ;;  %v15871_v31 = vld [vmem:[#allocation33_spill] sm:$0xff] }
 0xff8   : > { %v4263_v45 = vadd.f32 %v13097_v62, %v15871_v31  ;;  %v4269_v50 = vadd.f32 %v13103_v40, %v15871_v31 }
 0xff9   : > { %15868 = vst [vmem:[#allocation34_spill] sm:$0xff] %v13278_v9  ;;  %10068 = vtanh.f32 %v13278_v9  ;;  %v10065_v24 = vpop.eup %10064  ;;  %v15903_v9 = vrot.slane %v15902_v10, 4 }
 0xffa   : > { %4627 = vrot.lane.b32.xlu1 %v10065_v24, %s15651_s22  ;;  %v8627_v2 = vmul.f32 -1.442695, %v4263_v45  ;;  %v8628_v54 = vmul.f32 -1.442695, %v4269_v50 }
 0xffb   : > { %v4538_v42 = vpop.permute.xlu0 %4537 }
 0xffc   : > { %v13288_v15 = vadd.f32 %v4538_v42, %v4418_v57 }
 0xffd   : > { %v10067_v47 = vpop.eup %10066 }
 0xffe   : > { %15870 = vst [vmem:[#allocation45_spill] sm:$0xff] %v13288_v15  ;;  %4629 = vrot.lane.b32.xlu0 %v10067_v47, %s15651_s22  ;;  %10070 = vtanh.f32 %v13288_v15  ;;  %v4275_v47 = vadd.f32 %v13109_v39, %v15871_v31 }
 0xfff   : > { %10072 = vpow2.f32 %v8627_v2  ;;  %v13307_v2 = vld [vmem:[%s15423_s6] ss:$0 sm:$0xff] }
0x1000   : > { %10074 = vpow2.f32 %v8628_v54  ;;  %v8629_v62 = vmul.f32 -1.442695, %v4275_v47 }
0x1003   : > { %v10069_v1 = vpop.eup %10068 }
0x1004   : > { %4631 = vrot.lane.b32.xlu1 %v10069_v1, %s15651_s22  ;;  %v4281_v1 = vadd.f32 %v13116_v8, %v15871_v31 }
0x1006   : > { %v8630_v45 = vmul.f32 -1.442695, %v4281_v1  ;;  %v4287_v1 = vadd.f32 %v13120_v55, %v15871_v31  ;;  %v4305_v55 = vadd.f32 %v13140_v30, %v15871_v31 }
0x1008   : > { %v10071_v52 = vpop.eup %10070 }
0x1009   : > { %4633 = vrot.lane.b32.xlu0 %v10071_v52, %s15651_s22  ;;  %v10073_v24 = vpop.eup %10072 }
0x100a   : > { %v4579_v3 = vadd.f32 1.0, %v10073_v24  ;;  %v10075_v57 = vpop.eup %10074 }
0x100b   : > { %v4580_v42 = vadd.f32 1.0, %v10075_v57 }
0x100c   : > { %10076 = vrcp.f32 %v4579_v3 }
0x100d   : > { %10078 = vrcp.f32 %v4580_v42 }
0x100e   : > { %10080 = vpow2.f32 %v8629_v62 }
0x100f   : > { %10082 = vpow2.f32 %v8630_v45  ;;  %v4293_v45 = vadd.f32 %v13125_v44, %v15871_v31 }
0x1016   : > { %v10077_v52 = vpop.eup %10076 }
0x1017   : > { %v10079_v39 = vpop.eup %10078 }
0x1018   : > { %v10081_v57 = vpop.eup %10080 }
0x1019   : > { %v10083_v42 = vpop.eup %10082  ;;  %v4581_v47 = vadd.f32 1.0, %v10081_v57 }
0x101a   : > { %v4582_v62 = vadd.f32 1.0, %v10083_v42 }
0x101b   : > { %10084 = vrcp.f32 %v4581_v47 }
0x101c   : > { %10086 = vrcp.f32 %v4582_v62  ;;  %v8634_v62 = vmul.f32 -1.442695, %v4305_v55 }
0x1044   : > { %v4620_v20 = vpop.permute.xlu1 %4619 }
0x1045   : > { %v13302_v40 = vmul.f32 %v10077_v52, %v4620_v20  ;;  %v8631_v52 = vmul.f32 -1.442695, %v4287_v1 }
0x1047   : > { %v4651_v50 = vmul.f32 %v13307_v2, %v13302_v40  ;;  %10088 = vpow2.f32 %v8631_v52 }
0x1048   : > { %v4622_v54 = vpop.permute.xlu0 %4621 }
0x1049   : > { %v13311_v24 = vmul.f32 %v10079_v39, %v4622_v54  ;;  %v4659_v8 = vsel %vm415_vm0, %v4651_v50, 0.0  ;;  %v8632_v50 = vmul.f32 -1.442695, %v4293_v45  ;;  %v4299_v39 = vadd.f32 %v13136_v35, %v15871_v31 }
0x104a   : > { %4660 = vadd.xlane.f32.xlu1 %v4659_v8  ;;  %v10085_v8 = vpop.eup %10084 }
0x104b   : > { %v4652_v20 = vmul.f32 %v13307_v2, %v13311_v24  ;;  %10090 = vpow2.f32 %v8632_v50  ;;  %v8633_v54 = vmul.f32 -1.442695, %v4299_v39  ;;  %v10087_v57 = vpop.eup %10086 }
0x104d   : > { %v4662_v3 = vsel %vm415_vm0, %v4652_v20, 0.0  ;;  %10092 = vpow2.f32 %v8633_v54 }
0x104e   : > { %4663 = vadd.xlane.f32.xlu0 %v4662_v3  ;;  %10094 = vpow2.f32 %v8634_v62 }
0x1051   : > { %v10089_v42 = vpop.eup %10088 }
0x1052   : > { %v4583_v52 = vadd.f32 1.0, %v10089_v42 }
0x1054   : > { %10096 = vrcp.f32 %v4583_v52 }
0x1055   : > { %v10091_v50 = vpop.eup %10090 }
0x1056   : > { %v4584_v30 = vadd.f32 1.0, %v10091_v50 }
0x1057   : > { %v10093_v54 = vpop.eup %10092 }
0x1058   : > { %10098 = vrcp.f32 %v4584_v30 }
0x105a   : > { %v4624_v20 = vpop.permute.xlu1 %4623 }
0x105b   : > { %v13323_v3 = vmul.f32 %v10085_v8, %v4624_v20  ;;  %v4585_v8 = vadd.f32 1.0, %v10093_v54  ;;  %v10095_v20 = vpop.eup %10094 }
0x105c   : > { %v4586_v42 = vadd.f32 1.0, %v10095_v20 }
0x105d   : > { %v4653_v44 = vmul.f32 %v13307_v2, %v13323_v3  ;;  %10100 = vrcp.f32 %v4585_v8 }
0x105e   : > { %v4626_v47 = vpop.permute.xlu0 %4625  ;;  %10102 = vrcp.f32 %v4586_v42 }
0x105f   : > { %v13329_v1 = vmul.f32 %v10087_v57, %v4626_v47  ;;  %v4665_v35 = vsel %vm415_vm0, %v4653_v44, 0.0  ;;  %v10097_v57 = vpop.eup %10096 }
0x1060   : > { %4666 = vadd.xlane.f32.xlu0 %v4665_v35 }
0x1061   : > { %v4654_v45 = vmul.f32 %v13307_v2, %v13329_v1 }
0x1062   : > { %v10099_v35 = vpop.eup %10098 }
0x1063   : > { %v4668_v39 = vsel %vm415_vm0, %v4654_v45, 0.0 }
0x1064   : > { %4669 = vadd.xlane.f32.xlu1 %v4668_v39 }
0x1067   : > { %v10101_v50 = vpop.eup %10100 }
0x1068   : > { %v10103_v20 = vpop.eup %10102 }
0x106c   : > { %v4628_v44 = vpop.permute.xlu1 %4627 }
0x106d   : > { %v13335_v55 = vmul.f32 %v10097_v57, %v4628_v44 }
0x106f   : > { %v4655_v47 = vmul.f32 %v13307_v2, %v13335_v55 }
0x1070   : > { %v4630_v31 = vpop.permute.xlu0 %4629 }
0x1071   : > { %v13339_v45 = vmul.f32 %v10099_v35, %v4630_v31  ;;  %v4671_v62 = vsel %vm415_vm0, %v4655_v47, 0.0  ;;  %v13356_v35 = vld [vmem:[%s10863_s11] sm:$0xff] }
0x1072   : > { %4672 = vadd.xlane.f32.xlu0 %v4671_v62  ;;  %15874 = vst [vmem:[#allocation36_spill] sm:$0xff] %v13356_v35  ;;  %v15561_v62 = vrot.slane %v13356_v35, 5 }
0x1073   : > { %v4656_v52 = vmul.f32 %v13307_v2, %v13339_v45 }
0x1074   : > { %9095 = vpush %v15561_v62 }
0x1075   : > { %v4674_v54 = vsel %vm415_vm0, %v4656_v52, 0.0  ;;  %v13360_v52 = vld [vmem:[%s10863_s11 + $0x8] sm:$0xff] }
0x1076   : > { %v4632_v39 = vpop.permute.xlu1 %4631  ;;  %4675 = vadd.xlane.f32.xlu1 %v4674_v54  ;;  %15875 = vst [vmem:[#allocation15_spill] sm:$0xff] %v13360_v52 }
0x1077   : > { %v13344_v30 = vmul.f32 %v10101_v50, %v4632_v39  ;;  %v15563_v50 = vrot.slane %v13360_v52, 5  ;;  %v13364_v39 = vld [vmem:[%s10863_s11 + $0x10] sm:$0xff] }
0x1078   : > { %15876 = vst [vmem:[#allocation38_spill] sm:$0xff] %v13364_v39  ;;  %v15880_v51 = vrot.slane %v13364_v39, 5  ;;  %v15887_v39 = vld [vmem:[#allocation17_spill] sm:$0xff] }
0x1079   : > { %15872 = vst [vmem:[#allocation37_spill] sm:$0xff] %v13344_v30  ;;  %v4657_v31 = vmul.f32 %v13307_v2, %v13344_v30  ;;  %9097 = vpush %v15563_v50 }
0x107a   : > { %9099 = vpush %v15880_v51  ;;  %v6351_v51 = vrot.slane %v15887_v39, 5 }
0x107b   : > { %v4677_v8 = vsel %vm415_vm0, %v4657_v31, 0.0  ;;  %v4634_v57 = vpop.permute.xlu0 %4633  ;;  %v13368_v31 = vld [vmem:[%s10863_s11 + $0x18] sm:$0xff] }
0x107c   : > { %4678 = vadd.xlane.f32.xlu0 %v4677_v8  ;;  %v13350_v44 = vmul.f32 %v10103_v20, %v4634_v57  ;;  %15877 = vst [vmem:[#allocation51_spill] sm:$0xff] %v13368_v31  ;;  %v13374_v8 = vld [vmem:[%s10863_s11 + $0x20] sm:$0xff]  ;;  %v13380_v57 = vld [vmem:[%s10863_s11 + $0x28] sm:$0xff]  ;;  %v15882_v35 = vrot.slane %v13368_v31, 5 }
0x107d   : > { %15878 = vst [vmem:[#allocation48_spill] sm:$0xff] %v13374_v8  ;;  %15879 = vst [vmem:[#allocation40_spill] sm:$0xff] %v13380_v57  ;;  %v15884_v50 = vrot.slane %v13374_v8, 5 }
0x107e   : > { %15873 = vst [vmem:[#allocation14_spill] sm:$0xff] %v13350_v44  ;;  %v4658_v42 = vmul.f32 %v13307_v2, %v13350_v44  ;;  %v13387_v2 = vld [vmem:[%s10863_s11 + $0x30] sm:$0xff]  ;;  %9101 = vpush %v15882_v35  ;;  %v15889_v35 = vld [vmem:[#allocation19_spill] sm:$0xff] }
0x107f   : > { %15881 = vst [vmem:[#allocation13_spill] sm:$0xff] %v13387_v2  ;;  %v15574_v62 = vrot.slane %v13387_v2, 5  ;;  %9103 = vpush %v15884_v50  ;;  %v6353_v31 = vrot.slane %v15889_v35, 5  ;;  %v15891_v50 = vld [vmem:[#allocation21_spill] sm:$0xff] }
0x1080   : > { %v4680_v47 = vsel %vm415_vm0, %v4658_v42, 0.0  ;;  %v15885_v42 = vld [vmem:[#allocation16_spill] sm:$0xff]  ;;  %v6355_v8 = vrot.slane %v15891_v50, 5 }
0x1081   : > { %4681 = vadd.xlane.f32.xlu1 %v4680_v47  ;;  %v10523_v47 = vld [vmem:[%s10863_s11 + $0x38] sm:$0xff]  ;;  %v6350_v52 = vrot.slane %v15885_v42, 5 }
0x1082   : > { %v5876_v54 = vrot.slane %v10523_v47, 5  ;;  %v15886_v47 = vrot.slane %v13380_v57, 5  ;;  %v15892_v42 = vld [vmem:[#allocation22_spill] sm:$0xff] }
0x1083   : > { %v6356_v57 = vrot.slane %v15892_v42, 5 }
0x1084   : > { %v13393_v20 = vsel %vm5885_vm3, %v5876_v54, 0.0  ;;  %9105 = vpush %v15886_v47  ;;  %v15893_v47 = vld [vmem:[#allocation23_spill] sm:$0xff] }
0x1085   : > { %15883 = vst [vmem:[#allocation39_spill] sm:$0xff] %v13393_v20  ;;  %9107 = vpush %v15574_v62  ;;  %v15890_v20 = vld [vmem:[#allocation20_spill] sm:$0xff]  ;;  %v6357_v39 = vrot.slane %v15893_v47, 5  ;;  %v15894_v62 = vld [vmem:[#allocation49_spill] sm:$0xff] }
0x1086   : > { %9109 = vpush %v5876_v54  ;;  %v6354_v58 = vrot.slane %v15890_v20, 5  ;;  %v15895_v54 = vrot.slane %v15894_v62, 4  ;;  %v15896_v20 = vld [vmem:[#allocation43_spill] sm:$0xff] }
0x1087   : > { %9111 = vpush %v6350_v52 }
0x1088   : > { %9113 = vpush %v6351_v51  ;;  %v4708_v2 = vsel %vm4707_vm5, %v15895_v54, 0.0  ;;  %v15897_v51 = vrot.slane %v15896_v20, 4 }
0x1089   : > { %9115 = vpush %v6352_v56  ;;  %vm4716_vm12 = vcmp.gt.f32.partialorder %v4708_v2, 0.0  ;;  %v13415_v56 = vld [vmem:[#allocation2] ss:$0 sm:$0xff] }
0x108a   : > { %9117 = vpush %v6353_v31  ;;  %v4709_v50 = vsel %vm4707_vm5, %v15897_v51, 0.0 }
0x108b   : > { %9119 = vpush %v6354_v58  ;;  %vm4717_vm9 = vcmp.gt.f32.partialorder %v4709_v50, 0.0 }
0x108c   : > { %9121 = vpush %v6355_v8 }
0x108d   : > { %9123 = vpush %v6356_v57 }
0x108e   : > { %9125 = vpush %v6357_v39 }
0x10d7   : > { %v4661_v52 = vpop.xlane.xlu1 %4660 }
0x10d8   : > { %v4683_v31 = vadd.f32 %v13415_v56, %v4661_v52 }
0x10da   : > { %v4724_v47 = vsel %vm4716_vm12, %v4683_v31, -1e+30 }
0x10db   : > { %v4732_v58 = vsel %vm1205_vm4, %v4724_v47, -inf  ;;  %v4664_v39 = vpop.xlane.xlu0 %4663 }
0x10dc   : > { %v4733_v8 = vrot.slane %v4732_v58, 4  ;;  %v4684_v62 = vadd.f32 %v13415_v56, %v4664_v39 }
0x10de   : > { %v4734_v57 = vmax.f32 %v4732_v58, %v4733_v8  ;;  %v4725_v54 = vsel %vm4717_vm9, %v4684_v62, -1e+30 }
0x10df   : > { %v4739_v20 = vsel %vm1205_vm4, %v4725_v54, -inf }
0x10e0   : > { %v4735_v42 = vrot.slane %v4734_v57, 2  ;;  %v4740_v51 = vrot.slane %v4739_v20, 4 }
0x10e2   : > { %v4736_v35 = vmax.f32 %v4734_v57, %v4735_v42  ;;  %v4741_v19 = vmax.f32 %v4739_v20, %v4740_v51 }
0x10e4   : > { %v4737_v43 = vrot.slane %v4736_v35, 1  ;;  %v4742_v52 = vrot.slane %v4741_v19, 2 }
0x10e6   : > { %v4738_v46 = vmax.f32 %v4736_v35, %v4737_v43  ;;  %v4743_v31 = vmax.f32 %v4741_v19, %v4742_v52  ;;  %v15898_v43 = vld [vmem:[#allocation46_spill] sm:$0xff] }
0x10e7   : > { %v15899_v19 = vrot.slane %v15898_v43, 4 }
0x10e8   : > { %vm4788_vm14 = vcmp.ge.f32.partialorder %v4724_v47, %v4738_v46  ;;  %v4744_v15 = vrot.slane %v4743_v31, 1 }
0x10e9   : > { %vm4796_vm10 = vmand %vm4788_vm14, %vm4716_vm12  ;;  %v4710_v46 = vsel %vm4707_vm5, %v15899_v19, 0.0 }
0x10ea   : > { %v4804_v44 = vsel %vm4796_vm10, %v11429_v14, 8.0  ;;  %v4745_v39 = vmax.f32 %v4743_v31, %v4744_v15  ;;  %vm4718_vm13 = vcmp.gt.f32.partialorder %v4710_v46, 0.0 }
0x10eb   : > { %v4812_v58 = vsel %vm1205_vm4, %v4804_v44, inf  ;;  %v15900_v44 = vld [vmem:[#allocation42_spill] sm:$0xff] }
0x10ec   : > { %v4813_v8 = vrot.slane %v4812_v58, 4  ;;  %vm4789_vm7 = vcmp.ge.f32.partialorder %v4725_v54, %v4745_v39  ;;  %v15901_v51 = vrot.slane %v15900_v44, 4 }
0x10ed   : > { %vm4797_vm15 = vmand %vm4789_vm7, %vm4717_vm9  ;;  %v4667_v15 = vpop.xlane.xlu0 %4666 }
0x10ee   : > { %v4814_v62 = vmin.f32 %v4812_v58, %v4813_v8  ;;  %v4805_v42 = vsel %vm4797_vm15, %v11429_v14, 8.0  ;;  %v4711_v50 = vsel %vm4707_vm5, %v15901_v51, 0.0  ;;  %v4685_v31 = vadd.f32 %v13415_v56, %v4667_v15 }
0x10ef   : > { %v4819_v57 = vsel %vm1205_vm4, %v4805_v42, inf  ;;  %vm4719_vm8 = vcmp.gt.f32.partialorder %v4711_v50, 0.0 }
0x10f0   : > { %v4815_v2 = vrot.slane %v4814_v62, 2  ;;  %v4820_v35 = vrot.slane %v4819_v57, 4  ;;  %v4726_v8 = vsel %vm4718_vm13, %v4685_v31, -1e+30 }
0x10f1   : > { %v4746_v42 = vsel %vm1205_vm4, %v4726_v8, -inf  ;;  %v4670_v43 = vpop.xlane.xlu1 %4669 }
0x10f2   : > { %v4816_v47 = vmin.f32 %v4814_v62, %v4815_v2  ;;  %v4821_v20 = vmin.f32 %v4819_v57, %v4820_v35  ;;  %v4747_v57 = vrot.slane %v4746_v42, 4  ;;  %v4686_v19 = vadd.f32 %v13415_v56, %v4670_v43 }
0x10f4   : > { %v4817_v54 = vrot.slane %v4816_v47, 1  ;;  %v4822_v52 = vrot.slane %v4821_v20, 2 }
0x10f6   : > { %v4818_v39 = vmin.f32 %v4816_v47, %v4817_v54  ;;  %v4823_v58 = vmin.f32 %v4821_v20, %v4822_v52  ;;  %v4748_v47 = vmax.f32 %v4746_v42, %v4747_v57  ;;  %v4727_v20 = vsel %vm4719_vm8, %v4686_v19, -1e+30 }
0x10f7   : > { %v4753_v44 = vsel %vm1205_vm4, %v4727_v20, -inf }
0x10f8   : > { %v4824_v62 = vrot.slane %v4823_v58, 1  ;;  %vm4868_vm11 = vcmp.eq.f32.partialorder %v11429_v14, %v4818_v39  ;;  %vm4892_vm6 = vcmp.lt.f32.partialorder %v11429_v14, %v4818_v39  ;;  %vm4916_vm12 = vcmp.gt.f32.partialorder %v11429_v14, %v4818_v39 }
0x10f9   : > { %v8635_v2 = vsel %vm4868_vm11, 1.0, %v15705_v48  ;;  %v8643_v15 = vsel %vm4892_vm6, 1.0, %v15705_v48  ;;  %v4749_v54 = vrot.slane %v4748_v47, 2  ;;  %v4754_v52 = vrot.slane %v4753_v44, 4 }
0x10fa   : > { %v4825_v35 = vmin.f32 %v4823_v58, %v4824_v62  ;;  %v9427_v51 = vpack.i.bf16 %v8643_v15, %v8635_v2  ;;  %v8651_v39 = vsel %vm4916_vm12, 1.0, %v15705_v48 }
0x10fb   : > { %v4750_v58 = vmax.f32 %v4748_v47, %v4749_v54  ;;  %v4755_v42 = vmax.f32 %v4753_v44, %v4754_v52 }
0x10fc   : > { %vm4869_vm9 = vcmp.eq.f32.partialorder %v11429_v14, %v4825_v35  ;;  %vm4893_vm14 = vcmp.lt.f32.partialorder %v11429_v14, %v4825_v35  ;;  %9428 = vperm.xlu0 %9266, %v9427_v51   ;;  %vm4917_vm10 = vcmp.gt.f32.partialorder %v11429_v14, %v4825_v35  ;;  %v13456_v35 = vsel %vm4707_vm5, %v15903_v9, 0.0 }
0x10fd   : > { %v8636_v31 = vsel %vm4869_vm9, 1.0, %v15705_v48  ;;  %v8644_v62 = vsel %vm4893_vm14, 1.0, %v15705_v48  ;;  %v8652_v57 = vsel %vm4917_vm10, 1.0, %v15705_v48  ;;  %v4751_v19 = vrot.slane %v4750_v58, 1 }
0x10fe   : > { %v9432_v43 = vpack.i.bf16 %v8636_v31, %v8651_v39  ;;  %v4756_v2 = vrot.slane %v4755_v42, 2  ;;  %v9437_v30 = vpack.i.bf16 %v8652_v57, %v8644_v62  ;;  %vm4720_vm11 = vcmp.gt.f32.partialorder %v13456_v35, 0.0  ;;  %v15906_v57 = vld [vmem:[#allocation60_spill] sm:$0xff] }
0x10ff   : > { %v4752_v15 = vmax.f32 %v4750_v58, %v4751_v19  ;;  %v4673_v31 = vpop.xlane.xlu0 %4672  ;;  %v15907_v50 = vrot.slane %v15906_v57, 4 }
0x1100   : > { %9433 = vperm.xlu1 %9260, %v9432_v43   ;;  %v4757_v41 = vmax.f32 %v4755_v42, %v4756_v2  ;;  %v4687_v10 = vadd.f32 %v13415_v56, %v4673_v31 }
0x1101   : > { %vm4790_vm7 = vcmp.ge.f32.partialorder %v4726_v8, %v4752_v15  ;;  %v15904_v8 = vld [vmem:[#allocation47_spill] sm:$0xff]  ;;  %v13478_v19 = vsel %vm4707_vm5, %v15907_v50, 0.0 }
0x1102   : > { %v4758_v51 = vrot.slane %v4757_v41, 1  ;;  %vm4798_vm15 = vmand %vm4790_vm7, %vm4718_vm13  ;;  %v15905_v39 = vrot.slane %v15904_v8, 4  ;;  %v4728_v58 = vsel %vm4720_vm11, %v4687_v10, -1e+30 }
0x1103   : > { %v4806_v47 = vsel %vm4798_vm15, %v11429_v14, 8.0  ;;  %v4760_v43 = vsel %vm1205_vm4, %v4728_v58, -inf  ;;  %v4676_v62 = vpop.xlane.xlu1 %4675 }
0x1104   : > { %9438 = vperm.xlu1 %9260, %v9437_v30   ;;  %v4759_v44 = vmax.f32 %v4757_v41, %v4758_v51  ;;  %v4826_v54 = vsel %vm1205_vm4, %v4806_v47, inf  ;;  %v13465_v30 = vsel %vm4707_vm5, %v15905_v39, 0.0  ;;  %v4761_v2 = vrot.slane %v4760_v43, 4 }
0x1105   : > { %v4827_v52 = vrot.slane %v4826_v54, 4  ;;  %vm4721_vm13 = vcmp.gt.f32.partialorder %v13465_v30, 0.0  ;;  %v4688_v15 = vadd.f32 %v13415_v56, %v4676_v62 }
0x1106   : > { %vm4791_vm6 = vcmp.ge.f32.partialorder %v4727_v20, %v4759_v44  ;;  %v4762_v44 = vmax.f32 %v4760_v43, %v4761_v2 }
0x1107   : > { %vm4799_vm12 = vmand %vm4791_vm6, %vm4719_vm8  ;;  %v4828_v9 = vmin.f32 %v4826_v54, %v4827_v52  ;;  %v4729_v54 = vsel %vm4721_vm13, %v4688_v15, -1e+30  ;;  %vm4722_vm8 = vcmp.gt.f32.partialorder %v13478_v19, 0.0 }
0x1108   : > { %v4807_v46 = vsel %vm4799_vm12, %v11429_v14, 8.0  ;;  %v4767_v8 = vsel %vm1205_vm4, %v4729_v54, -inf  ;;  %v4763_v10 = vrot.slane %v4762_v44, 2 }
0x1109   : > { %v4833_v41 = vsel %vm1205_vm4, %v4807_v46, inf  ;;  %v4829_v20 = vrot.slane %v4828_v9, 2  ;;  %v4679_v39 = vpop.xlane.xlu0 %4678  ;;  %v4768_v46 = vrot.slane %v4767_v8, 4 }
0x110a   : > { %v4834_v42 = vrot.slane %v4833_v41, 4  ;;  %v4689_v57 = vadd.f32 %v13415_v56, %v4679_v39  ;;  %v4764_v62 = vmax.f32 %v4762_v44, %v4763_v10 }
0x110b   : > { %v4830_v51 = vmin.f32 %v4828_v9, %v4829_v20  ;;  %v4769_v9 = vmax.f32 %v4767_v8, %v4768_v46  ;;  %v15908_v8 = vld [vmem:[#allocation61_spill] sm:$0xff] }
0x110c   : > { %v4835_v47 = vmin.f32 %v4833_v41, %v4834_v42  ;;  %v4730_v41 = vsel %vm4722_vm8, %v4689_v57, -1e+30  ;;  %v4765_v43 = vrot.slane %v4764_v62, 1  ;;  %vm4723_vm10 = vcmp.gt.f32.partialorder %v15908_v8, 0.0 }
0x110d   : > { %v4831_v52 = vrot.slane %v4830_v51, 1  ;;  %v4774_v42 = vsel %vm1205_vm4, %v4730_v41, -inf  ;;  %v4770_v2 = vrot.slane %v4769_v9, 2 }
0x110e   : > { %v4836_v31 = vrot.slane %v4835_v47, 2  ;;  %v4775_v15 = vrot.slane %v4774_v42, 4  ;;  %v4682_v10 = vpop.xlane.xlu1 %4681 }
0x110f   : > { %v4832_v50 = vmin.f32 %v4830_v51, %v4831_v52  ;;  %v4771_v44 = vmax.f32 %v4769_v9, %v4770_v2  ;;  %v4690_v57 = vadd.f32 %v13415_v56, %v4682_v10 }
0x1110   : > { %v4837_v34 = vmin.f32 %v4835_v47, %v4836_v31  ;;  %v4766_v47 = vmax.f32 %v4764_v62, %v4765_v43  ;;  %v4776_v52 = vmax.f32 %v4774_v42, %v4775_v15 }
0x1111   : > { %vm4870_vm5 = vcmp.eq.f32.partialorder %v11429_v14, %v4832_v50  ;;  %vm4894_vm9 = vcmp.lt.f32.partialorder %v11429_v14, %v4832_v50  ;;  %vm4918_vm14 = vcmp.gt.f32.partialorder %v11429_v14, %v4832_v50  ;;  %v4772_v46 = vrot.slane %v4771_v44, 1 }
0x1112   : > { %v4838_v20 = vrot.slane %v4837_v34, 1  ;;  %v8637_v17 = vsel %vm4870_vm5, 1.0, %v15705_v48  ;;  %v8645_v51 = vsel %vm4894_vm9, 1.0, %v15705_v48  ;;  %vm4792_vm12 = vcmp.ge.f32.partialorder %v4728_v58, %v4766_v47 }
0x1113   : > { %v9442_v31 = vpack.i.bf16 %v8645_v51, %v8637_v17  ;;  %vm4800_vm5 = vmand %vm4792_vm12, %vm4720_vm11  ;;  %v4773_v42 = vmax.f32 %v4771_v44, %v4772_v46  ;;  %v4731_v56 = vsel %vm4723_vm10, %v4690_v57, -1e+30 }
0x1114   : > { %v4839_v39 = vmin.f32 %v4837_v34, %v4838_v20  ;;  %v4777_v34 = vrot.slane %v4776_v52, 2  ;;  %v8653_v20 = vsel %vm4918_vm14, 1.0, %v15705_v48  ;;  %v4808_v58 = vsel %vm4800_vm5, %v11429_v14, 8.0 }
0x1115   : > { %9443 = vperm.xlu0 %9266, %v9442_v31   ;;  %v4840_v35 = vsel %vm1205_vm4, %v4808_v58, inf  ;;  %v4781_v2 = vsel %vm1205_vm4, %v4731_v56, -inf  ;;  %vm4793_vm11 = vcmp.ge.f32.partialorder %v4729_v54, %v4773_v42 }
0x1116   : > { %vm4895_vm7 = vcmp.lt.f32.partialorder %v11429_v14, %v4839_v39  ;;  %vm4919_vm15 = vcmp.gt.f32.partialorder %v11429_v14, %v4839_v39  ;;  %vm4871_vm6 = vcmp.eq.f32.partialorder %v11429_v14, %v4839_v39  ;;  %v4778_v43 = vmax.f32 %v4776_v52, %v4777_v34  ;;  %vm4801_vm9 = vmand %vm4793_vm11, %vm4721_vm13 }
0x1117   : > { %v8646_v17 = vsel %vm4895_vm7, 1.0, %v15705_v48  ;;  %v8654_v62 = vsel %vm4919_vm15, 1.0, %v15705_v48  ;;  %v8638_v9 = vsel %vm4871_vm6, 1.0, %v15705_v48  ;;  %v4841_v51 = vrot.slane %v4840_v35, 4 }
0x1118   : > { %v9452_v15 = vpack.i.bf16 %v8654_v62, %v8646_v17  ;;  %v9447_v39 = vpack.i.bf16 %v8638_v9, %v8653_v20  ;;  %v4779_v47 = vrot.slane %v4778_v43, 1  ;;  %v4782_v31 = vrot.slane %v4781_v2, 4 }
0x1119   : > { %v4842_v50 = vmin.f32 %v4840_v35, %v4841_v51  ;;  %v4809_v44 = vsel %vm4801_vm9, %v11429_v14, 8.0 }
0x111a   : > { %9453 = vperm.xlu0 %9266, %v9452_v15   ;;  %9448 = vperm.xlu1 %9260, %v9447_v39   ;;  %v4780_v52 = vmax.f32 %v4778_v43, %v4779_v47  ;;  %v4783_v10 = vmax.f32 %v4781_v2, %v4782_v31  ;;  %v4847_v46 = vsel %vm1205_vm4, %v4809_v44, inf }
0x111b   : > { %v4843_v34 = vrot.slane %v4842_v50, 2  ;;  %v4848_v57 = vrot.slane %v4847_v46, 4 }
0x111c   : > { %vm4794_vm14 = vcmp.ge.f32.partialorder %v4730_v41, %v4780_v52  ;;  %v4784_v17 = vrot.slane %v4783_v10, 2 }
0x111d   : > { %vm4802_vm7 = vmand %vm4794_vm14, %vm4722_vm8  ;;  %v4844_v54 = vmin.f32 %v4842_v50, %v4843_v34  ;;  %v4849_v62 = vmin.f32 %v4847_v46, %v4848_v57 }
0x111e   : > { %v4810_v30 = vsel %vm4802_vm7, %v11429_v14, 8.0  ;;  %v4785_v9 = vmax.f32 %v4783_v10, %v4784_v17 }
0x111f   : > { %v4854_v20 = vsel %vm1205_vm4, %v4810_v30, inf  ;;  %v4845_v58 = vrot.slane %v4844_v54, 1  ;;  %v4850_v42 = vrot.slane %v4849_v62, 2 }
0x1120   : > { %v4855_v43 = vrot.slane %v4854_v20, 4  ;;  %v4786_v35 = vrot.slane %v4785_v9, 1 }
0x1121   : > { %v4846_v2 = vmin.f32 %v4844_v54, %v4845_v58  ;;  %v4851_v15 = vmin.f32 %v4849_v62, %v4850_v42 }
0x1122   : > { %v4856_v39 = vmin.f32 %v4854_v20, %v4855_v43  ;;  %v4787_v51 = vmax.f32 %v4785_v9, %v4786_v35 }
0x1123   : > { %v4852_v41 = vrot.slane %v4851_v15, 1  ;;  %vm4872_vm8 = vcmp.eq.f32.partialorder %v11429_v14, %v4846_v2  ;;  %vm4896_vm6 = vcmp.lt.f32.partialorder %v11429_v14, %v4846_v2  ;;  %vm4920_vm12 = vcmp.gt.f32.partialorder %v11429_v14, %v4846_v2 }
0x1124   : > { %v4857_v47 = vrot.slane %v4856_v39, 2  ;;  %vm4795_vm13 = vcmp.ge.f32.partialorder %v4731_v56, %v4787_v51  ;;  %v8639_v19 = vsel %vm4872_vm8, 1.0, %v15705_v48  ;;  %v8647_v52 = vsel %vm4896_vm6, 1.0, %v15705_v48 }
0x1125   : > { %vm4803_vm15 = vmand %vm4795_vm13, %vm4723_vm10  ;;  %v4853_v31 = vmin.f32 %v4851_v15, %v4852_v41  ;;  %v9457_v56 = vpack.i.bf16 %v8647_v52, %v8639_v19  ;;  %v8655_v17 = vsel %vm4920_vm12, 1.0, %v15705_v48 }
0x1126   : > { %v4858_v50 = vmin.f32 %v4856_v39, %v4857_v47  ;;  %v4811_v44 = vsel %vm4803_vm15, %v11429_v14, 8.0 }
0x1127   : > { %v4861_v10 = vsel %vm1205_vm4, %v4811_v44, inf  ;;  %vm4897_vm5 = vcmp.lt.f32.partialorder %v11429_v14, %v4853_v31  ;;  %vm4921_vm10 = vcmp.gt.f32.partialorder %v11429_v14, %v4853_v31  ;;  %9458 = vperm.xlu1 %9260, %v9457_v56   ;;  %vm4873_vm11 = vcmp.eq.f32.partialorder %v11429_v14, %v4853_v31 }
0x1128   : > { %v4859_v46 = vrot.slane %v4858_v50, 1  ;;  %v4862_v34 = vrot.slane %v4861_v10, 4  ;;  %v8648_v8 = vsel %vm4897_vm5, 1.0, %v15705_v48  ;;  %v8656_v57 = vsel %vm4921_vm10, 1.0, %v15705_v48 }
0x1129   : > { %v9467_v30 = vpack.i.bf16 %v8656_v57, %v8648_v8  ;;  %v8640_v9 = vsel %vm4873_vm11, 1.0, %v15705_v48 }
0x112a   : > { %v4860_v54 = vmin.f32 %v4858_v50, %v4859_v46  ;;  %v4863_v62 = vmin.f32 %v4861_v10, %v4862_v34  ;;  %v9462_v20 = vpack.i.bf16 %v8640_v9, %v8655_v17  ;;  %v5141_v9 = vstv %s13548_s23  ;;  %s9086_s23 = spop %9085 }
0x112b   : > { %9468 = vperm.xlu1 %9260, %v9467_v30  }
0x112c   : > { %v4864_v58 = vrot.slane %v4863_v62, 2  ;;  %vm4874_vm9 = vcmp.eq.f32.partialorder %v11429_v14, %v4860_v54  ;;  %vm4898_vm14 = vcmp.lt.f32.partialorder %v11429_v14, %v4860_v54  ;;  %9463 = vperm.xlu0 %9266, %v9462_v20   ;;  %vm4922_vm7 = vcmp.gt.f32.partialorder %v11429_v14, %v4860_v54 }
0x112d   : > { %v8641_v42 = vsel %vm4874_vm9, 1.0, %v15705_v48  ;;  %v8649_v43 = vsel %vm4898_vm14, 1.0, %v15705_v48  ;;  %v8657_v47 = vsel %vm4922_vm7, 1.0, %v15705_v48  ;;  %v5181_v20 = vstv %s9080_s15 }
0x112e   : > { %v4865_v35 = vmin.f32 %v4863_v62, %v4864_v58  ;;  %v9472_v2 = vpack.i.bf16 %v8649_v43, %v8641_v42 }
0x1130   : > { %v4866_v15 = vrot.slane %v4865_v35, 1  ;;  %9473 = vperm.xlu0 %9266, %v9472_v2  }
0x1132   : > { %v4867_v39 = vmin.f32 %v4865_v35, %v4866_v15 }
0x1134   : > { %vm4899_vm13 = vcmp.lt.f32.partialorder %v11429_v14, %v4867_v39  ;;  %vm4875_vm8 = vcmp.eq.f32.partialorder %v11429_v14, %v4867_v39  ;;  %vm4923_vm15 = vcmp.gt.f32.partialorder %v11429_v14, %v4867_v39 }
0x1135   : > { %v8650_v51 = vsel %vm4899_vm13, 1.0, %v15705_v48  ;;  %v8642_v41 = vsel %vm4875_vm8, 1.0, %v15705_v48  ;;  %v8658_v31 = vsel %vm4923_vm15, 1.0, %v15705_v48 }
0x1136   : > { %5025 = vperm.xlu0 %9266, %v8650_v51   ;;  %v9477_v19 = vpack.i.bf16 %v8642_v41, %v8657_v47 }
0x1138   : > { %9478 = vperm.xlu1 %9260, %v9477_v19  }
0x113c   : > { %5081 = vperm.xlu1 %9260, %v8658_v31  }
0x117b   : > { %v9429_v50 = vpop.permute.xlu0 %9428 }
0x117c   : > { %v9431_v44 = vunpack.i.h.bf16 %v9429_v50  ;;  %v9430_v52 = vunpack.i.l.bf16 %v9429_v50 }
0x117e   : > { %v5028_v10 = vmul.f32 %v9431_v44, %v12909_v37  ;;  %v5108_v56 = vmul.f32 %v9431_v44, %v12911_v4  ;;  %v4980_v46 = vmul.f32 %v9430_v52, %v13302_v40  ;;  %v5100_v34 = vmul.f32 %v9430_v52, %v13218_v6 }
0x117f   : > { %v9434_v8 = vpop.permute.xlu1 %9433  ;;  %v5204_v40 = vmul.f32 %v5181_v20, %v12909_v37  ;;  %v5228_v6 = vmul.f32 %v5181_v20, %v12911_v4  ;;  %v5184_v52 = vstv %s9082_s19 }
0x1180   : > { %v9435_v57 = vunpack.i.l.bf16 %v9434_v8  ;;  %v5116_v17 = vadd.f32 %v5108_v56, %v5100_v34  ;;  %v5036_v54 = vadd.f32 %v5028_v10, %v4980_v46  ;;  %v9436_v58 = vunpack.i.h.bf16 %v9434_v8 }
0x1181   : > { %v5205_v34 = vmul.f32 %v5184_v52, %v12916_v36  ;;  %v5229_v8 = vmul.f32 %v5184_v52, %v12918_v60 }
0x1182   : > { %v5084_v62 = vmul.f32 %v9435_v57, %v12921_v32  ;;  %v5124_v30 = vmul.f32 %v9435_v57, %v13208_v23  ;;  %v4981_v32 = vmul.f32 %v9436_v58, %v13311_v24  ;;  %v5101_v23 = vmul.f32 %v9436_v58, %v13223_v28 }
0x1183   : > { %v9439_v42 = vpop.permute.xlu1 %9438  ;;  %v5144_v28 = vstv %s13550_s25  ;;  %s13640_s25 = spop %9087 }
0x1184   : > { %v5092_v43 = vadd.f32 %v5084_v62, %v5036_v54  ;;  %v5132_v35 = vadd.f32 %v5124_v30, %v5116_v17  ;;  %v9440_v2 = vunpack.i.l.bf16 %v9439_v42  ;;  %v9441_v15 = vunpack.i.h.bf16 %v9439_v42 }
0x1186   : > { %v5164_v39 = vmul.f32 %v5141_v9, %v5092_v43  ;;  %v5220_v51 = vmul.f32 %v5141_v9, %v5132_v35  ;;  %v5029_v41 = vmul.f32 %v9440_v2, %v12916_v36  ;;  %v5109_v47 = vmul.f32 %v9440_v2, %v12918_v60 }
0x1187   : > { %v5085_v37 = vmul.f32 %v9441_v15, %v12927_v27  ;;  %v5125_v4 = vmul.f32 %v9441_v15, %v13215_v59 }
0x1188   : > { %v13577_v19 = vadd.f32 %v5204_v40, %v5164_v39  ;;  %v13579_v31 = vadd.f32 %v5228_v6, %v5220_v51  ;;  %v5037_v50 = vadd.f32 %v5029_v41, %v4981_v32  ;;  %v5117_v44 = vadd.f32 %v5109_v47, %v5101_v23 }
0x1189   : > { %v5187_v51 = vstv %s9084_s21 }
0x118a   : > { %v5252_v10 = vrot.slane %v13577_v19, 1  ;;  %v5093_v24 = vadd.f32 %v5085_v37, %v5037_v50  ;;  %v5133_v56 = vadd.f32 %v5125_v4, %v5117_v44  ;;  %v5190_v4 = vstv %s9086_s23 }
0x118c   : > { %v13586_v46 = vsel %vm569_vm1, %v5252_v10, 0.0  ;;  %v5165_v57 = vmul.f32 %v5144_v28, %v5093_v24  ;;  %v5221_v17 = vmul.f32 %v5144_v28, %v5133_v56  ;;  %v5147_v28 = vstv %s13552_s18  ;;  %s13648_s18 = spop %9089 }
0x118d   : > { %5316 = vrot.lane.b32.xlu0 %v13586_v46, %s15653_s20 }
0x118e   : > { %v13592_v27 = vadd.f32 %v5205_v34, %v5165_v57  ;;  %v13594_v59 = vadd.f32 %v5229_v8, %v5221_v17  ;;  %v5206_v34 = vmul.f32 %v5187_v51, %v12949_v0  ;;  %v5150_v17 = vstv %s13554_s26  ;;  %s13672_s26 = spop %9091 }
0x1190   : > { %v5253_v54 = vrot.slane %v13592_v27, 1 }
0x1192   : > { %v13598_v62 = vsel %vm569_vm1, %v5253_v54, 0.0 }
0x1193   : > { %5318 = vrot.lane.b32.xlu1 %v13598_v62, %s15653_s20 }
0x1194   : > { %v9444_v36 = vpop.permute.xlu0 %9443 }
0x1195   : > { %v9446_v30 = vunpack.i.h.bf16 %v9444_v36  ;;  %v9445_v60 = vunpack.i.l.bf16 %v9444_v36 }
0x1197   : > { %v5110_v9 = vmul.f32 %v9446_v30, %v12951_v13  ;;  %v5102_v20 = vmul.f32 %v9445_v60, %v13240_v53  ;;  %v5030_v58 = vmul.f32 %v9446_v30, %v12949_v0  ;;  %v4982_v42 = vmul.f32 %v9445_v60, %v13323_v3 }
0x1199   : > { %v5118_v43 = vadd.f32 %v5110_v9, %v5102_v20  ;;  %v9454_v35 = vpop.permute.xlu0 %9453  ;;  %v9449_v2 = vpop.permute.xlu1 %9448  ;;  %v5038_v32 = vadd.f32 %v5030_v58, %v4982_v42 }
0x119a   : > { %v9456_v15 = vunpack.i.h.bf16 %v9454_v35  ;;  %v9455_v40 = vunpack.i.l.bf16 %v9454_v35  ;;  %v9451_v6 = vunpack.i.h.bf16 %v9449_v2  ;;  %v9450_v39 = vunpack.i.l.bf16 %v9449_v2 }
0x119c   : > { %v5031_v23 = vmul.f32 %v9455_v40, %v12953_v11  ;;  %v5111_v53 = vmul.f32 %v9455_v40, %v12955_v26  ;;  %v4983_v41 = vmul.f32 %v9451_v6, %v13329_v1  ;;  %v5103_v3 = vmul.f32 %v9451_v6, %v13245_v29 }
0x119d   : > { %v5086_v47 = vmul.f32 %v9450_v39, %v12966_v33  ;;  %v5126_v37 = vmul.f32 %v9450_v39, %v13230_v49  ;;  %v5087_v50 = vmul.f32 %v9456_v15, %v12969_v63  ;;  %v5127_v44 = vmul.f32 %v9456_v15, %v13237_v7 }
0x119e   : > { %v5039_v52 = vadd.f32 %v5031_v23, %v4983_v41  ;;  %v5119_v10 = vadd.f32 %v5111_v53, %v5103_v3  ;;  %v5230_v1 = vmul.f32 %v5187_v51, %v12951_v13  ;;  %v5207_v49 = vmul.f32 %v5190_v4, %v12953_v11 }
0x119f   : > { %v5094_v24 = vadd.f32 %v5086_v47, %v5038_v32  ;;  %v5134_v56 = vadd.f32 %v5126_v37, %v5118_v43  ;;  %v5231_v63 = vmul.f32 %v5190_v4, %v12955_v26  ;;  %v5153_v40 = vstv %s13556_s27  ;;  %s13675_s27 = spop %9093 }
0x11a0   : > { %v5095_v29 = vadd.f32 %v5087_v50, %v5039_v52  ;;  %v5135_v8 = vadd.f32 %v5127_v44, %v5119_v10  ;;  %v5193_v51 = vstv %s13640_s25  ;;  %v5156_v41 = vstv %s13558_s28 }
0x11a1   : > { %v5166_v33 = vmul.f32 %v5147_v28, %v5094_v24  ;;  %v5222_v57 = vmul.f32 %v5147_v28, %v5134_v56  ;;  %v5208_v44 = vmul.f32 %v5193_v51, %v12995_v16  ;;  %v5196_v52 = vstv %s13648_s18 }
0x11a2   : > { %v5167_v36 = vmul.f32 %v5150_v17, %v5095_v29  ;;  %v5223_v30 = vmul.f32 %v5150_v17, %v5135_v8  ;;  %v15909_v8 = vld [vmem:[#allocation58_spill] sm:$0xff]  ;;  %v15910_v17 = vld [vmem:[#allocation53_spill] sm:$0xff] }
0x11a3   : > { %v13620_v54 = vadd.f32 %v5206_v34, %v5166_v33  ;;  %v13622_v7 = vadd.f32 %v5230_v1, %v5222_v57 }
0x11a4   : > { %v13624_v60 = vadd.f32 %v5207_v49, %v5167_v36  ;;  %v13626_v0 = vadd.f32 %v5231_v63, %v5223_v30  ;;  %v5209_v63 = vmul.f32 %v5196_v52, %v13003_v22 }
0x11a5   : > { %v5254_v13 = vrot.slane %v13620_v54, 1 }
0x11a6   : > { %v5255_v9 = vrot.slane %v13624_v60, 1  ;;  %v9459_v11 = vpop.permute.xlu1 %9458 }
0x11a7   : > { %v13631_v20 = vsel %vm569_vm1, %v5254_v13, 0.0  ;;  %v9461_v58 = vunpack.i.h.bf16 %v9459_v11  ;;  %v9460_v42 = vunpack.i.l.bf16 %v9459_v11  ;;  %v15911_v13 = vld [vmem:[#allocation34_spill] sm:$0xff]  ;;  %v15912_v11 = vld [vmem:[#allocation52_spill] sm:$0xff] }
0x11a8   : > { %5320 = vrot.lane.b32.xlu0 %v13631_v20, %s15653_s20  ;;  %v13636_v26 = vsel %vm569_vm1, %v5255_v9, 0.0 }
0x11a9   : > { %5322 = vrot.lane.b32.xlu1 %v13636_v26, %s15653_s20  ;;  %v5032_v43 = vmul.f32 %v9461_v58, %v12995_v16  ;;  %v5112_v35 = vmul.f32 %v9461_v58, %v12997_v18  ;;  %v4984_v2 = vmul.f32 %v9460_v42, %v13335_v55  ;;  %v5104_v15 = vmul.f32 %v9460_v42, %v13263_v5 }
0x11aa   : > { %v9469_v39 = vpop.permute.xlu1 %9468 }
0x11ab   : > { %v9464_v6 = vpop.permute.xlu0 %9463  ;;  %v5120_v32 = vadd.f32 %v5112_v35, %v5104_v15  ;;  %v5040_v3 = vadd.f32 %v5032_v43, %v4984_v2  ;;  %v9471_v47 = vunpack.i.h.bf16 %v9469_v39  ;;  %v9470_v37 = vunpack.i.l.bf16 %v9469_v39 }
0x11ac   : > { %v9466_v23 = vunpack.i.h.bf16 %v9464_v6  ;;  %v9465_v53 = vunpack.i.l.bf16 %v9464_v6  ;;  %v5159_v6 = vstv %s13560_s13 }
0x11ad   : > { %v5033_v10 = vmul.f32 %v9470_v37, %v13003_v22  ;;  %v5113_v24 = vmul.f32 %v9470_v37, %v13005_v21 }
0x11ae   : > { %v4985_v4 = vmul.f32 %v9466_v23, %v13339_v45  ;;  %v5105_v55 = vmul.f32 %v9466_v23, %v13272_v38  ;;  %v5088_v5 = vmul.f32 %v9465_v53, %v13018_v25  ;;  %v5128_v50 = vmul.f32 %v9465_v53, %v13251_v61 }
0x11af   : > { %v9474_v56 = vpop.permute.xlu0 %9473  ;;  %v5089_v45 = vmul.f32 %v9471_v47, %v13021_v12  ;;  %v5129_v38 = vmul.f32 %v9471_v47, %v15909_v8  ;;  %v5232_v61 = vmul.f32 %v5193_v51, %v12997_v18  ;;  %v15913_v12 = vld [vmem:[#allocation37_spill] sm:$0xff]  ;;  %v5233_v18 = vmul.f32 %v5196_v52, %v13005_v21  ;;  %v15914_v47 = vld [vmem:[#allocation54_spill] sm:$0xff] }
0x11b0   : > { %v5096_v28 = vadd.f32 %v5088_v5, %v5040_v3  ;;  %v5136_v34 = vadd.f32 %v5128_v50, %v5120_v32  ;;  %v9476_v1 = vunpack.i.h.bf16 %v9474_v56  ;;  %v9475_v29 = vunpack.i.l.bf16 %v9474_v56  ;;  %v15916_v5 = vld [vmem:[#allocation45_spill] sm:$0xff] }
0x11b1   : > { %v5041_v33 = vadd.f32 %v5033_v10, %v4985_v4  ;;  %v5121_v25 = vadd.f32 %v5113_v24, %v5105_v55  ;;  %v5199_v3 = vstv %s13672_s26  ;;  %v15918_v10 = vld [vmem:[#allocation59_spill] sm:$0xff]  ;;  %v5202_v56 = vstv %s13675_s27 }
0x11b2   : > { %v5168_v57 = vmul.f32 %v5153_v40, %v5096_v28  ;;  %v5224_v16 = vmul.f32 %v5153_v40, %v5136_v34  ;;  %v5114_v49 = vmul.f32 %v9476_v1, %v15910_v17  ;;  %v5106_v9 = vmul.f32 %v9475_v29, %v15911_v13  ;;  %v15919_v28 = vld [vmem:[#allocation55_spill] sm:$0xff] }
0x11b3   : > { %v5097_v36 = vadd.f32 %v5089_v45, %v5041_v33  ;;  %v5137_v30 = vadd.f32 %v5129_v38, %v5121_v25  ;;  %v5034_v58 = vmul.f32 %v9476_v1, %v15912_v11  ;;  %v4986_v42 = vmul.f32 %v9475_v29, %v15913_v12  ;;  %v15920_v25 = vld [vmem:[#allocation57_spill] sm:$0xff] }
0x11b4   : > { %v13667_v43 = vadd.f32 %v5208_v44, %v5168_v57  ;;  %v13669_v35 = vadd.f32 %v5232_v61, %v5224_v16  ;;  %v5122_v22 = vadd.f32 %v5114_v49, %v5106_v9  ;;  %v15917_v44 = vld [vmem:[#allocation56_spill] sm:$0xff]  ;;  %v5210_v57 = vmul.f32 %v5199_v3, %v15912_v11  ;;  %v15921_v49 = vld [vmem:[#allocation35_spill] sm:$0xff] }
0x11b5   : > { %v5169_v2 = vmul.f32 %v5156_v41, %v5097_v36  ;;  %v5225_v15 = vmul.f32 %v5156_v41, %v5137_v30  ;;  %v5026_v40 = vpop.permute.xlu0 %5025  ;;  %v5042_v21 = vadd.f32 %v5034_v58, %v4986_v42  ;;  %v15915_v41 = vld [vmem:[#allocation14_spill] sm:$0xff]  ;;  %v5234_v30 = vmul.f32 %v5199_v3, %v15910_v17 }
0x11b6   : > { %v5035_v37 = vmul.f32 %v5026_v40, %v15914_v47  ;;  %v5256_v4 = vrot.slane %v13667_v43, 1  ;;  %v5115_v34 = vmul.f32 %v5026_v40, %v15919_v28  ;;  %v5162_v12 = vstv %s13562_s14  ;;  %s14223_s14 = spop %9095 }
0x11b7   : > { %v9479_v39 = vpop.permute.xlu1 %9478  ;;  %v13677_v23 = vadd.f32 %v5209_v63, %v5169_v2  ;;  %v13679_v53 = vadd.f32 %v5233_v18, %v5225_v15  ;;  %v5211_v18 = vmul.f32 %v5202_v56, %v15914_v47  ;;  %s14225_s15 = spop %9097 }
0x11b8   : > { %v9481_v51 = vunpack.i.h.bf16 %v9479_v39  ;;  %v9480_v32 = vunpack.i.l.bf16 %v9479_v39  ;;  %v13691_v29 = vsel %vm569_vm1, %v5256_v4, 0.0  ;;  %v15930_v4 = vld [vmem:[#allocation26_spill] sm:$0xff]  ;;  %s14227_s19 = spop %9099 }
0x11b9   : > { %v5257_v45 = vrot.slane %v13677_v23, 1  ;;  %5324 = vrot.lane.b32.xlu0 %v13691_v29, %s15653_s20  ;;  %s14229_s21 = spop %9101 }
0x11ba   : > { %v4987_v55 = vmul.f32 %v9481_v51, %v15915_v41  ;;  %v5107_v50 = vmul.f32 %v9481_v51, %v15916_v5  ;;  %v5090_v52 = vmul.f32 %v9480_v32, %v15917_v44  ;;  %v5130_v24 = vmul.f32 %v9480_v32, %v15918_v10  ;;  %v15933_v44 = vld [vmem:[#allocation29_spill] sm:$0xff]  ;;  %v15935_v10 = vld [vmem:[#allocation31_spill] sm:$0xff]  ;;  %s14231_s23 = spop %9103 }
0x11bb   : > { %v5082_v1 = vpop.permute.xlu1 %5081  ;;  %v13700_v36 = vsel %vm569_vm1, %v5257_v45, 0.0  ;;  %s14233_s25 = spop %9105 }
0x11bc   : > { %v5098_v8 = vadd.f32 %v5090_v52, %v5042_v21  ;;  %v5138_v38 = vadd.f32 %v5130_v24, %v5122_v22  ;;  %v5043_v33 = vadd.f32 %v5035_v37, %v4987_v55  ;;  %v5091_v61 = vmul.f32 %v5082_v1, %v15920_v25  ;;  %15922 = vst [vmem:[#allocation41_spill] sm:$0xff] %v13700_v36  ;;  %v15929_v37 = vld [vmem:[#allocation25_spill] sm:$0xff]  ;;  %v15931_v55 = vld [vmem:[#allocation27_spill] sm:$0xff]  ;;  %v15934_v52 = vld [vmem:[#allocation30_spill] sm:$0xff]  ;;  %s14237_s18 = spop %9107 }
0x11bd   : > { %v5123_v16 = vadd.f32 %v5115_v34, %v5107_v50  ;;  %v5131_v63 = vmul.f32 %v5082_v1, %v15921_v49  ;;  %5326 = vrot.lane.b32.xlu1 %v13700_v36, %s15653_s20  ;;  %v5235_v22 = vmul.f32 %v5202_v56, %v15919_v28  ;;  %v15932_v50 = vld [vmem:[#allocation28_spill] sm:$0xff]  ;;  %s14241_s26 = spop %9109 }
0x11be   : > { %v5170_v13 = vmul.f32 %v5159_v6, %v5098_v8  ;;  %v5226_v9 = vmul.f32 %v5159_v6, %v5138_v38  ;;  %v5099_v58 = vadd.f32 %v5091_v61, %v5043_v33  ;;  %v15936_v49 = vld [vmem:[#allocation32_spill] sm:$0xff]  ;;  %s9112_s27 = spop %9111 }
0x11bf   : > { %v5139_v42 = vadd.f32 %v5131_v63, %v5123_v16  ;;  %s9114_s28 = spop %9113 }
0x11c0   : > { %v5171_v2 = vmul.f32 %v5162_v12, %v5099_v58  ;;  %v13707_v11 = vadd.f32 %v5210_v57, %v5170_v13  ;;  %v13709_v15 = vadd.f32 %v5234_v30, %v5226_v9  ;;  %s9116_s13 = spop %9115 }
0x11c1   : > { %v5227_v40 = vmul.f32 %v5162_v12, %v5139_v42 }
0x11c2   : > { %15923 = vst [vmem:[#allocation50_spill] sm:$0xff] %v13707_v11  ;;  %15924 = vst [vmem:[#allocation24_spill] sm:$0xff] %v13709_v15  ;;  %v13712_v39 = vadd.f32 %v5211_v18, %v5171_v2  ;;  %v5258_v17 = vrot.slane %v13707_v11, 1 }
0x11c3   : > { %v13715_v6 = vadd.f32 %v5235_v22, %v5227_v40 }
0x11c4   : > { %15925 = vst [vmem:[#allocation49_spill] sm:$0xff] %v13712_v39  ;;  %v13718_v51 = vsel %vm569_vm1, %v5258_v17, 0.0  ;;  %v5259_v32 = vrot.slane %v13712_v39, 1 }
0x11c5   : > { %15926 = vst [vmem:[#allocation43_spill] sm:$0xff] %v13715_v6  ;;  %15927 = vst [vmem:[#allocation46_spill] sm:$0xff] %v13718_v51  ;;  %5328 = vrot.lane.b32.xlu0 %v13718_v51, %s15653_s20 }
0x11c6   : > { %v13724_v3 = vsel %vm569_vm1, %v5259_v32, 0.0 }
0x11c7   : > { %15928 = vst [vmem:[#allocation42_spill] sm:$0xff] %v13724_v3  ;;  %5330 = vrot.lane.b32.xlu1 %v13724_v3, %s15653_s20 }
0x11ff   : > { %v5317_v21 = vpop.permute.xlu0 %5316 }
0x1200   : > { %v5340_v47 = vsel %vm415_vm0, %v13577_v19, %v5317_v21 }
0x1201   : > { %8659 = vmatmul.mubr.msk.f32.vlgmr.msra.gmra.mrb[32].mxu1 %vm629_vm2, %v5340_v47 }
0x1202   : > { %5442 = vmatprep.mubr.f32.mxu1 %v15705_v48  ;;  %8963 = vmatpush1.bf16.msra.mxu1 %v15929_v37 }
0x1203   : > { %8960 = vmatprep.subr.bf16.mxu1 %v15930_v4 }
0x1205   : > { %v5319_v41 = vpop.permute.xlu1 %5318 }
0x1206   : > { %8964 = vmatpush1.bf16.msra.mxu1 %v15931_v55  ;;  %v5341_v5 = vsel %vm415_vm0, %v13592_v27, %v5319_v41 }
0x1207   : > { %8961 = vmatprep.subr.bf16.mxu1 %v15932_v50  ;;  %8660 = vmatmul.mubr.msk.f32.gmra.mrb[34].mxu1 %vm629_vm2, %v5341_v5 }
0x1208   : > { %5448 = vmatprep.mubr.f32.mxu1 %v15705_v48 }
0x120a   : > { %8965 = vmatpush1.bf16.msra.mxu1 %v15933_v44 }
0x120b   : > { %8962 = vmatprep.subr.bf16.mxu1 %v15934_v52 }
0x120e   : > { %8966 = vmatpush1.bf16.msra.mxu1 %v15935_v10 }
0x121a   : > { %v5321_v24 = vpop.permute.xlu0 %5320 }
0x121b   : > { %v5342_v56 = vsel %vm415_vm0, %v13620_v54, %v5321_v24  ;;  %v5323_v28 = vpop.permute.xlu1 %5322 }
0x121c   : > { %8661 = vmatmul.mubr.msk.f32.gmra.mrb[36].mxu1 %vm629_vm2, %v5342_v56  ;;  %v5343_v34 = vsel %vm415_vm0, %v13624_v60, %v5323_v28 }
0x121d   : > { %5454 = vmatprep.mubr.f32.mxu1 %v15705_v48 }
0x1220   : > { %8662 = vmatmul.mubr.msk.f32.gmra.mrb[38].mxu1 %vm629_vm2, %v5343_v34 }
0x1221   : > { %5460 = vmatprep.mubr.f32.mxu1 %v15705_v48 }
0x122b   : > { %v5325_v1 = vpop.permute.xlu0 %5324 }
0x122c   : > { %v5344_v45 = vsel %vm415_vm0, %v13667_v43, %v5325_v1 }
0x122d   : > { %8663 = vmatmul.mubr.msk.f32.gmra.mrb[40].mxu1 %vm629_vm2, %v5344_v45 }
0x122e   : > { %5466 = vmatprep.mubr.f32.mxu1 %v15705_v48 }
0x122f   : > { %v5327_v8 = vpop.permute.xlu1 %5326 }
0x1230   : > { %v5345_v38 = vsel %vm415_vm0, %v13677_v23, %v5327_v8 }
0x1231   : > { %8664 = vmatmul.mubr.msk.f32.gmra.mrb[42].mxu1 %vm629_vm2, %v5345_v38 }
0x1232   : > { %5472 = vmatprep.mubr.f32.mxu1 %v15705_v48 }
0x1237   : > { %v5329_v33 = vpop.permute.xlu0 %5328 }
0x1238   : > { %v5346_v25 = vsel %vm415_vm0, %v13707_v11, %v5329_v33 }
0x1239   : > { %v5331_v61 = vpop.permute.xlu1 %5330  ;;  %8665 = vmatmul.mubr.msk.f32.gmra.mrb[44].mxu1 %vm629_vm2, %v5346_v25 }
0x123a   : > { %5478 = vmatprep.mubr.f32.mxu1 %v15705_v48  ;;  %v5347_v57 = vsel %vm415_vm0, %v13712_v39, %v5331_v61 }
0x123d   : > { %8666 = vmatmul.mubr.msk.f32.gmra.mrb[46].mxu1 %vm629_vm2, %v5347_v57 }
0x123e   : > { %7810 = vmatprep.mubr.f32.mxu1 %v15705_v48 }
0x12d4   : > { %v5438_v16 = vpop.f32.mrb[32].mxu1 }
0x12d5   : > { %v13768_v63 = vadd.f32 %v5438_v16, %v15936_v49  ;;  %v13770_v30 = vpop.f32.mrb[33].mxu1 }
0x12d7   : > { %v8675_v13 = vmul.f32 -1.442695, %v13768_v63  ;;  %v5485_v16 = vadd.f32 1.0, %v13768_v63 }
0x12d9   : > { %10104 = vpow2.f32 %v8675_v13 }
0x12da   : > { %v5444_v9 = vpop.f32.mrb[34].mxu1 }
0x12db   : > { %v13774_v58 = vadd.f32 %v5444_v9, %v15936_v49  ;;  %v13776_v12 = vpop.f32.mrb[35].mxu1 }
0x12dd   : > { %v8676_v42 = vmul.f32 -1.442695, %v13774_v58 }
0x12df   : > { %10106 = vpow2.f32 %v8676_v42 }
0x12e3   : > { %v10105_v18 = vpop.eup %10104 }
0x12e4   : > { %v5629_v2 = vadd.f32 1.0, %v10105_v18 }
0x12e6   : > { %10108 = vrcp.f32 %v5629_v2 }
0x12e9   : > { %v10107_v22 = vpop.eup %10106 }
0x12ea   : > { %v5630_v40 = vadd.f32 1.0, %v10107_v22  ;;  %v8667_v22 = vmul.f32 -1.442695, %v5485_v16 }
0x12ec   : > { %10110 = vrcp.f32 %v5630_v40  ;;  %v5486_v40 = vadd.f32 1.0, %v13774_v58 }
0x12ef   : > { %v5450_v32 = vpop.f32.mrb[36].mxu1 }
0x12f0   : > { %v10109_v17 = vpop.eup %10108  ;;  %v13781_v21 = vadd.f32 %v5450_v32, %v15936_v49  ;;  %v13783_v47 = vpop.f32.mrb[37].mxu1 }
0x12f1   : > { %5661 = vrot.lane.b32.xlu0 %v10109_v17, %s15651_s22 }
0x12f2   : > { %v8677_v5 = vmul.f32 -1.442695, %v13781_v21 }
0x12f3   : > { %v5456_v24 = vpop.f32.mrb[38].mxu1 }
0x12f4   : > { %10112 = vpow2.f32 %v8677_v5  ;;  %v13788_v56 = vadd.f32 %v5456_v24, %v15936_v49  ;;  %v13790_v28 = vpop.f32.mrb[39].mxu1 }
0x12f6   : > { %v10111_v41 = vpop.eup %10110  ;;  %v8678_v34 = vmul.f32 -1.442695, %v13788_v56 }
0x12f7   : > { %5663 = vrot.lane.b32.xlu1 %v10111_v41, %s15651_s22 }
0x12f8   : > { %10114 = vpow2.f32 %v8678_v34  ;;  %v8668_v34 = vmul.f32 -1.442695, %v5486_v40 }
0x12fe   : > { %v10113_v1 = vpop.eup %10112 }
0x12ff   : > { %v5631_v45 = vadd.f32 1.0, %v10113_v1 }
0x1300   : > { %v5462_v33 = vpop.f32.mrb[40].mxu1 }
0x1301   : > { %10116 = vrcp.f32 %v5631_v45  ;;  %v13794_v25 = vadd.f32 %v5462_v33, %v15936_v49  ;;  %v13796_v61 = vpop.f32.mrb[41].mxu1  ;;  %v5487_v45 = vadd.f32 1.0, %v13781_v21 }
0x1302   : > { %v10115_v8 = vpop.eup %10114 }
0x1303   : > { %v5632_v38 = vadd.f32 1.0, %v10115_v8  ;;  %v8679_v57 = vmul.f32 -1.442695, %v13794_v25 }
0x1304   : > { %v5468_v13 = vpop.f32.mrb[42].mxu1 }
0x1305   : > { %10118 = vrcp.f32 %v5632_v38  ;;  %v13801_v9 = vadd.f32 %v5468_v13, %v15936_v49  ;;  %v13803_v42 = vpop.f32.mrb[43].mxu1  ;;  %v8669_v13 = vmul.f32 -1.442695, %v5487_v45 }
0x1306   : > { %10120 = vpow2.f32 %v8679_v57 }
0x1307   : > { %v8680_v18 = vmul.f32 -1.442695, %v13801_v9 }
0x1309   : > { %10122 = vpow2.f32 %v8680_v18  ;;  %v5488_v18 = vadd.f32 1.0, %v13788_v56 }
0x130a   : > { %10124 = vpow2.f32 %v8667_v22 }
0x130b   : > { %v10117_v2 = vpop.eup %10116 }
0x130c   : > { %v5474_v17 = vpop.f32.mrb[44].mxu1  ;;  %5665 = vrot.lane.b32.xlu0 %v10117_v2, %s15651_s22 }
0x130d   : > { %v13809_v32 = vadd.f32 %v5474_v17, %v15936_v49  ;;  %v13811_v41 = vpop.f32.mrb[45].mxu1  ;;  %v8670_v17 = vmul.f32 -1.442695, %v5488_v18 }
0x130f   : > { %v10119_v5 = vpop.eup %10118  ;;  %v8681_v24 = vmul.f32 -1.442695, %v13809_v32 }
0x1310   : > { %v5480_v1 = vpop.f32.mrb[46].mxu1  ;;  %5667 = vrot.lane.b32.xlu1 %v10119_v5, %s15651_s22  ;;  %v10121_v33 = vpop.eup %10120  ;;  %v5489_v5 = vadd.f32 1.0, %v13794_v25 }
0x1311   : > { %10126 = vpow2.f32 %v8681_v24  ;;  %v13817_v8 = vadd.f32 %v5480_v1, %v15936_v49  ;;  %v13819_v38 = vpop.f32.mrb[47].mxu1  ;;  %v5633_v16 = vadd.f32 1.0, %v10121_v33 }
0x1312   : > { %10128 = vpow2.f32 %v8668_v34  ;;  %v8671_v10 = vmul.f32 -1.442695, %v5489_v5  ;;  %v5490_v34 = vadd.f32 1.0, %v13801_v9 }
0x1313   : > { %v8682_v57 = vmul.f32 -1.442695, %v13817_v8  ;;  %v10123_v2 = vpop.eup %10122  ;;  %v5492_v5 = vadd.f32 1.0, %v13817_v8 }
0x1314   : > { %v5634_v22 = vadd.f32 1.0, %v10123_v2  ;;  %v10125_v40 = vpop.eup %10124  ;;  %v8672_v2 = vmul.f32 -1.442695, %v5490_v34 }
0x1315   : > { %10130 = vpow2.f32 %v8682_v57  ;;  %v5517_v1 = vadd.f32 1.0, %v10125_v40 }
0x1316   : > { %10132 = vrcp.f32 %v5633_v16 }
0x1317   : > { %10134 = vpow2.f32 %v8669_v13  ;;  %v5491_v13 = vadd.f32 1.0, %v13809_v32 }
0x1318   : > { %10136 = vrcp.f32 %v5634_v22 }
0x1319   : > { %10138 = vpow2.f32 %v8670_v17  ;;  %v8673_v17 = vmul.f32 -1.442695, %v5491_v13 }
0x131b   : > { %v10127_v24 = vpop.eup %10126 }
0x131c   : > { %v5635_v49 = vadd.f32 1.0, %v10127_v24  ;;  %v10129_v45 = vpop.eup %10128 }
0x131d   : > { %v5518_v18 = vadd.f32 1.0, %v10129_v45 }
0x131e   : > { %10140 = vrcp.f32 %v5635_v49 }
0x131f   : > { %v10131_v33 = vpop.eup %10130  ;;  %10142 = vrcp.f32 %v5517_v1 }
0x1320   : > { %v10133_v57 = vpop.eup %10132  ;;  %v5636_v16 = vadd.f32 1.0, %v10131_v33  ;;  %10144 = vpow2.f32 %v8671_v10  ;;  %v8674_v10 = vmul.f32 -1.442695, %v5492_v5 }
0x1321   : > { %5669 = vrot.lane.b32.xlu0 %v10133_v57, %s15651_s22  ;;  %v10135_v22 = vpop.eup %10134 }
0x1322   : > { %10146 = vrcp.f32 %v5636_v16  ;;  %v10137_v40 = vpop.eup %10136  ;;  %v5519_v49 = vadd.f32 1.0, %v10135_v22 }
0x1323   : > { %10148 = vpow2.f32 %v8672_v2  ;;  %5671 = vrot.lane.b32.xlu1 %v10137_v40, %s15651_s22  ;;  %v10139_v24 = vpop.eup %10138 }
0x1324   : > { %10150 = vrcp.f32 %v5518_v18  ;;  %v5520_v45 = vadd.f32 1.0, %v10139_v24 }
0x1325   : > { %10152 = vpow2.f32 %v8673_v17 }
0x1326   : > { %10154 = vrcp.f32 %v5519_v49 }
0x1327   : > { %10156 = vpow2.f32 %v8674_v10 }
0x1328   : > { %v10141_v1 = vpop.eup %10140  ;;  %10158 = vrcp.f32 %v5520_v45 }
0x1329   : > { %5673 = vrot.lane.b32.xlu0 %v10141_v1, %s15651_s22  ;;  %v13830_v34 = vpop.eup %10142 }
0x132a   : > { %v10145_v33 = vpop.eup %10144 }
0x132b   : > { %v5521_v16 = vadd.f32 1.0, %v10145_v33 }
0x132c   : > { %v10147_v57 = vpop.eup %10146 }
0x132d   : > { %5675 = vrot.lane.b32.xlu1 %v10147_v57, %s15651_s22  ;;  %5557 = vrot.lane.b32.xlu0 %v13830_v34, %s15651_s22  ;;  %v10149_v2 = vpop.eup %10148  ;;  %10160 = vrcp.f32 %v5521_v16 }
0x132e   : > { %v13835_v13 = vpop.eup %10150  ;;  %v5522_v18 = vadd.f32 1.0, %v10149_v2 }
0x132f   : > { %v10153_v22 = vpop.eup %10152 }
0x1330   : > { %v13839_v40 = vpop.eup %10154  ;;  %10162 = vrcp.f32 %v5522_v18  ;;  %v5523_v17 = vadd.f32 1.0, %v10153_v22 }
0x1331   : > { %5559 = vrot.lane.b32.xlu1 %v13835_v13, %s15651_s22  ;;  %v10157_v5 = vpop.eup %10156 }
0x1332   : > { %v13843_v49 = vpop.eup %10158  ;;  %10164 = vrcp.f32 %v5523_v17  ;;  %v5524_v24 = vadd.f32 1.0, %v10157_v5 }
0x1334   : > { %10166 = vrcp.f32 %v5524_v24 }
0x1335   : > { %5561 = vrot.lane.b32.xlu1 %v13839_v40, %s15651_s22  ;;  %10168 = vtanh.f32 %v13768_v63 }
0x1336   : > { %10170 = vtanh.f32 %v13774_v58 }
0x1337   : > { %v13847_v1 = vpop.eup %10160  ;;  %10172 = vtanh.f32 %v13781_v21 }
0x1338   : > { %10174 = vtanh.f32 %v13788_v56 }
0x1339   : > { %5563 = vrot.lane.b32.xlu1 %v13843_v49, %s15651_s22  ;;  %10176 = vtanh.f32 %v13794_v25 }
0x133a   : > { %v13851_v10 = vpop.eup %10162  ;;  %10178 = vtanh.f32 %v13801_v9 }
0x133b   : > { %10180 = vtanh.f32 %v13809_v32 }
0x133c   : > { %v13855_v45 = vpop.eup %10164  ;;  %10182 = vtanh.f32 %v13817_v8 }
0x133d   : > { %5565 = vrot.lane.b32.xlu1 %v13847_v1, %s15651_s22 }
0x133e   : > { %v13859_v33 = vpop.eup %10166 }
0x133f   : > { %v10169_v57 = vpop.eup %10168 }
0x1340   : > { %v10171_v18 = vpop.eup %10170 }
0x1341   : > { %5567 = vrot.lane.b32.xlu1 %v13851_v10, %s15651_s22  ;;  %v10173_v5 = vpop.eup %10172 }
0x1342   : > { %v10175_v63 = vpop.eup %10174 }
0x1345   : > { %5569 = vrot.lane.b32.xlu1 %v13855_v45, %s15651_s22 }
0x1349   : > { %5571 = vrot.lane.b32.xlu1 %v13859_v33, %s15651_s22 }
0x1363   : > { %v5662_v16 = vpop.permute.xlu0 %5661 }
0x1364   : > { %v5685_v2 = vmul.f32 %v10169_v57, %v5662_v16  ;;  %v10177_v57 = vpop.eup %10176 }
0x1365   : > { %v10179_v56 = vpop.eup %10178 }
0x1366   : > { %5701 = vrot.lane.b32.xlu0 %v5685_v2, %s15649_s24 }
0x1369   : > { %v5664_v22 = vpop.permute.xlu1 %5663 }
0x136a   : > { %v5686_v17 = vmul.f32 %v10171_v18, %v5664_v22  ;;  %v10181_v18 = vpop.eup %10180 }
0x136b   : > { %v10183_v25 = vpop.eup %10182 }
0x136c   : > { %5703 = vrot.lane.b32.xlu0 %v5686_v17, %s15649_s24  ;;  %v5284_v17 = vrot.slane %v13579_v31, 1 }
0x137e   : > { %v5666_v24 = vpop.permute.xlu0 %5665 }
0x137f   : > { %v5687_v52 = vmul.f32 %v10173_v5, %v5666_v24  ;;  %v13881_v5 = vsel %vm569_vm1, %v5284_v17, 0.0 }
0x1381   : > { %5705 = vrot.lane.b32.xlu0 %v5687_v52, %s15649_s24 }
0x1382   : > { %v5668_v58 = vpop.permute.xlu1 %5667 }
0x1383   : > { %v5688_v44 = vmul.f32 %v10175_v63, %v5668_v58  ;;  %v5285_v63 = vrot.slane %v13594_v59, 1  ;;  %v5541_v58 = vmul.f32 %v13830_v34, %v13579_v31 }
0x1385   : > { %5707 = vrot.lane.b32.xlu0 %v5688_v44, %s15649_s24 }
0x1393   : > { %v5670_v21 = vpop.permute.xlu0 %5669 }
0x1394   : > { %v5689_v16 = vmul.f32 %v10177_v57, %v5670_v21 }
0x1395   : > { %v5672_v52 = vpop.permute.xlu1 %5671 }
0x1396   : > { %5709 = vrot.lane.b32.xlu0 %v5689_v16, %s15649_s24  ;;  %v5690_v2 = vmul.f32 %v10179_v56, %v5672_v52  ;;  %v13888_v56 = vsel %vm569_vm1, %v5285_v63, 0.0 }
0x139a   : > { %5711 = vrot.lane.b32.xlu0 %v5690_v2, %s15649_s24 }
0x139b   : > { %v5674_v44 = vpop.permute.xlu0 %5673 }
0x139c   : > { %v5691_v22 = vmul.f32 %v10181_v18, %v5674_v44  ;;  %v5542_v18 = vmul.f32 %v13835_v13, %v13594_v59  ;;  %v5287_v13 = vrot.slane %v13626_v0, 1 }
0x139e   : > { %5713 = vrot.lane.b32.xlu0 %v5691_v22, %s15649_s24 }
0x139f   : > { %v5676_v9 = vpop.permute.xlu1 %5675  ;;  %v5558_v8 = vpop.permute.xlu0 %5557 }
0x13a0   : > { %v5692_v32 = vmul.f32 %v10183_v25, %v5676_v9  ;;  %v5581_v24 = vmul.f32 %v5558_v8, %v13881_v5 }
0x13a2   : > { %5715 = vrot.lane.b32.xlu1 %v5692_v32, %s15649_s24  ;;  %v5589_v21 = vadd.f32 %v5581_v24, %v5541_v58  ;;  %v5286_v32 = vrot.slane %v13622_v7, 1  ;;  %v5543_v58 = vmul.f32 %v13839_v40, %v13622_v7  ;;  %v5288_v40 = vrot.slane %v13669_v35, 1 }
0x13a3   : > { %v5560_v57 = vpop.permute.xlu1 %5559 }
0x13a4   : > { %v5582_v2 = vmul.f32 %v5560_v57, %v13888_v56  ;;  %v13903_v8 = vsel %vm569_vm1, %v5286_v32, 0.0  ;;  %v13910_v57 = vsel %vm569_vm1, %v5287_v13, 0.0 }
0x13a6   : > { %v5590_v44 = vadd.f32 %v5582_v2, %v5542_v18 }
0x13a7   : > { %v5562_v17 = vpop.permute.xlu1 %5561 }
0x13a8   : > { %v5583_v24 = vmul.f32 %v5562_v17, %v13903_v8 }
0x13ab   : > { %v5564_v63 = vpop.permute.xlu1 %5563 }
0x13af   : > { %v5566_v32 = vpop.permute.xlu1 %5565 }
0x13b3   : > { %v5568_v13 = vpop.permute.xlu1 %5567 }
0x13d8   : > { %v5702_v16 = vpop.permute.xlu0 %5701 }
0x13d9   : > { %v13890_v52 = vadd.f32 %v5702_v16, %v5589_v21  ;;  %v5584_v21 = vmul.f32 %v5564_v63, %v13910_v57  ;;  %v5591_v16 = vadd.f32 %v5583_v24, %v5543_v58  ;;  %v13924_v24 = vsel %vm569_vm1, %v5288_v40, 0.0 }
0x13da   : > { %v5585_v63 = vmul.f32 %v5566_v32, %v13924_v24  ;;  %v5546_v32 = vmul.f32 %v13851_v10, %v13679_v53 }
0x13db   : > { %10184 = vtanh.f32 %v13890_v52 }
0x13de   : > { %v5704_v22 = vpop.permute.xlu0 %5703 }
0x13df   : > { %v13896_v25 = vadd.f32 %v5704_v22, %v5590_v44  ;;  %v5544_v44 = vmul.f32 %v13843_v49, %v13626_v0  ;;  %v5289_v49 = vrot.slane %v13679_v53, 1 }
0x13e1   : > { %10186 = vtanh.f32 %v13896_v25  ;;  %v5592_v22 = vadd.f32 %v5584_v21, %v5544_v44  ;;  %v5545_v21 = vmul.f32 %v13847_v1, %v13669_v35  ;;  %v5570_v44 = vpop.permute.xlu1 %5569  ;;  %v5291_v1 = vrot.slane %v13715_v6, 1 }
0x13e5   : > { %v10185_v34 = vpop.eup %10184  ;;  %v5572_v55 = vpop.permute.xlu1 %5571 }
0x13e6   : > { %5797 = vrot.lane.b32.xlu0 %v10185_v34, %s15651_s22 }
0x13eb   : > { %v10187_v9 = vpop.eup %10186 }
0x13ec   : > { %5799 = vrot.lane.b32.xlu1 %v10187_v9, %s15651_s22 }
0x13f3   : > { %v5706_v2 = vpop.permute.xlu0 %5705 }
0x13f4   : > { %v13913_v18 = vadd.f32 %v5706_v2, %v5591_v16  ;;  %v13932_v16 = vsel %vm569_vm1, %v5289_v49, 0.0  ;;  %v5290_v2 = vrot.slane %v13709_v15, 1 }
0x13f5   : > { %15937 = vst [vmem:[#allocation44_spill] sm:$0xff] %v13932_v16 }
0x13f6   : > { %10188 = vtanh.f32 %v13913_v18  ;;  %v13941_v50 = vsel %vm569_vm1, %v5290_v2, 0.0 }
0x13f7   : > { %v5708_v34 = vpop.permute.xlu0 %5707  ;;  %15938 = vst [vmem:[#allocation47_spill] sm:$0xff] %v13941_v50  ;;  %v5587_v49 = vmul.f32 %v5570_v44, %v13941_v50 }
0x13f8   : > { %v13918_v9 = vadd.f32 %v5708_v34, %v5592_v22  ;;  %v5586_v22 = vmul.f32 %v5568_v13, %v13932_v16  ;;  %v5593_v34 = vadd.f32 %v5585_v63, %v5545_v21  ;;  %v5547_v63 = vmul.f32 %v13855_v45, %v13709_v15 }
0x13f9   : > { %v13951_v21 = vsel %vm569_vm1, %v5291_v1, 0.0 }
0x13fa   : > { %10190 = vtanh.f32 %v13918_v9  ;;  %15939 = vst [vmem:[#allocation60_spill] sm:$0xff] %v13951_v21  ;;  %v5588_v10 = vmul.f32 %v5572_v55, %v13951_v21  ;;  %v5595_v2 = vadd.f32 %v5587_v49, %v5547_v63  ;;  %v15957_v21 = vld [vmem:[#allocation18_spill] sm:$0xff] }
0x1400   : > { %v10189_v17 = vpop.eup %10188 }
0x1401   : > { %5801 = vrot.lane.b32.xlu0 %v10189_v17, %s15651_s22 }
0x1404   : > { %v10191_v58 = vpop.eup %10190 }
0x1405   : > { %5803 = vrot.lane.b32.xlu1 %v10191_v58, %s15651_s22  ;;  %v5594_v58 = vadd.f32 %v5586_v22, %v5546_v32  ;;  %v5548_v22 = vmul.f32 %v13859_v33, %v13715_v6  ;;  %v15942_v33 = vld [vmem:[#allocation33_spill] sm:$0xff] }
0x1408   : > { %v5710_v40 = vpop.permute.xlu0 %5709 }
0x1409   : > { %v13936_v17 = vadd.f32 %v5710_v40, %v5593_v34 }
0x140b   : > { %10192 = vtanh.f32 %v13936_v17 }
0x140c   : > { %v5712_v4 = vpop.permute.xlu0 %5711 }
0x140d   : > { %v13946_v13 = vadd.f32 %v5712_v4, %v5594_v58  ;;  %v5596_v4 = vadd.f32 %v5588_v10, %v5548_v22  ;;  %v5441_v58 = vadd.f32 %v13770_v30, %v15942_v33  ;;  %v5447_v10 = vadd.f32 %v13776_v12, %v15942_v33  ;;  %v13980_v12 = vld [vmem:[%s15423_s6] ss:$0 sm:$0xff] }
0x140e   : > { %v5459_v30 = vadd.f32 %v13790_v28, %v15942_v33 }
0x140f   : > { %10194 = vtanh.f32 %v13946_v13  ;;  %v8683_v63 = vmul.f32 -1.442695, %v5441_v58 }
0x1410   : > { %v5714_v34 = vpop.permute.xlu0 %5713 }
0x1411   : > { %v13955_v44 = vadd.f32 %v5714_v34, %v5595_v2  ;;  %v8684_v2 = vmul.f32 -1.442695, %v5447_v10  ;;  %v8686_v10 = vmul.f32 -1.442695, %v5459_v30  ;;  %v5465_v30 = vadd.f32 %v13796_v61, %v15942_v33 }
0x1413   : > { %15940 = vst [vmem:[#allocation61_spill] sm:$0xff] %v13955_v44  ;;  %10196 = vtanh.f32 %v13955_v44  ;;  %v15971_v44 = vld [vmem:[#allocation48_spill] sm:$0xff] }
0x1414   : > { %v5716_v40 = vpop.permute.xlu1 %5715 }
0x1415   : > { %v10193_v32 = vpop.eup %10192  ;;  %v13960_v45 = vadd.f32 %v5716_v40, %v5596_v4 }
0x1416   : > { %5805 = vrot.lane.b32.xlu0 %v10193_v32, %s15651_s22  ;;  %v5453_v32 = vadd.f32 %v13783_v47, %v15942_v33 }
0x1417   : > { %15941 = vst [vmem:[#allocation58_spill] sm:$0xff] %v13960_v45  ;;  %10198 = vtanh.f32 %v13960_v45 }
0x1418   : > { %10200 = vpow2.f32 %v8683_v63 }
0x1419   : > { %v10195_v55 = vpop.eup %10194  ;;  %10202 = vpow2.f32 %v8684_v2 }
0x141a   : > { %5807 = vrot.lane.b32.xlu1 %v10195_v55, %s15651_s22 }
0x141d   : > { %v10197_v1 = vpop.eup %10196 }
0x141e   : > { %5809 = vrot.lane.b32.xlu0 %v10197_v1, %s15651_s22 }
0x1421   : > { %v10199_v49 = vpop.eup %10198 }
0x1422   : > { %5811 = vrot.lane.b32.xlu1 %v10199_v49, %s15651_s22  ;;  %v10201_v34 = vpop.eup %10200  ;;  %v8685_v49 = vmul.f32 -1.442695, %v5453_v32 }
0x1423   : > { %v5757_v22 = vadd.f32 1.0, %v10201_v34  ;;  %v10203_v4 = vpop.eup %10202 }
0x1424   : > { %v5758_v40 = vadd.f32 1.0, %v10203_v4 }
0x1425   : > { %10204 = vrcp.f32 %v5757_v22 }
0x1426   : > { %10206 = vrcp.f32 %v5758_v40 }
0x1427   : > { %10208 = vpow2.f32 %v8685_v49  ;;  %v8687_v49 = vmul.f32 -1.442695, %v5465_v30 }
0x1428   : > { %10210 = vpow2.f32 %v8686_v10 }
0x142f   : > { %v10205_v55 = vpop.eup %10204 }
0x1430   : > { %v10207_v2 = vpop.eup %10206 }
0x1431   : > { %v10209_v40 = vpop.eup %10208 }
0x1432   : > { %v10211_v32 = vpop.eup %10210 }
0x1458   : > { %v5798_v1 = vpop.permute.xlu0 %5797 }
0x1459   : > { %v13975_v58 = vmul.f32 %v10205_v55, %v5798_v1  ;;  %v5759_v55 = vadd.f32 1.0, %v10209_v40  ;;  %v5760_v1 = vadd.f32 1.0, %v10211_v32 }
0x145b   : > { %v5829_v63 = vmul.f32 %v13980_v12, %v13975_v58  ;;  %10212 = vrcp.f32 %v5759_v55 }
0x145c   : > { %10214 = vrcp.f32 %v5760_v1 }
0x145d   : > { %v5837_v47 = vsel %vm415_vm0, %v5829_v63, 0.0  ;;  %v5471_v63 = vadd.f32 %v13803_v42, %v15942_v33  ;;  %10216 = vpow2.f32 %v8687_v49 }
0x145e   : > { %5838 = vadd.xlane.f32.xlu0 %v5837_v47  ;;  %v5800_v34 = vpop.permute.xlu1 %5799  ;;  %v5477_v47 = vadd.f32 %v13811_v41, %v15942_v33 }
0x145f   : > { %v13985_v28 = vmul.f32 %v10207_v2, %v5800_v34  ;;  %v8688_v10 = vmul.f32 -1.442695, %v5471_v63  ;;  %v5483_v34 = vadd.f32 %v13819_v38, %v15942_v33  ;;  %v14059_v33 = vld [vmem:[%s10863_s11 + $0x30] sm:$0xff] }
0x1460   : > { %v8689_v2 = vmul.f32 -1.442695, %v5477_v47  ;;  %15951 = vst [vmem:[#allocation59_spill] sm:$0xff] %v14059_v33 }
0x1461   : > { %v5830_v22 = vmul.f32 %v13980_v12, %v13985_v28  ;;  %10218 = vpow2.f32 %v8688_v10  ;;  %v8690_v40 = vmul.f32 -1.442695, %v5483_v34 }
0x1462   : > { %10220 = vpow2.f32 %v8689_v2 }
0x1463   : > { %v5840_v4 = vsel %vm415_vm0, %v5830_v22, 0.0  ;;  %10222 = vpow2.f32 %v8690_v40 }
0x1464   : > { %5841 = vadd.xlane.f32.xlu1 %v5840_v4 }
0x1465   : > { %v10213_v22 = vpop.eup %10212 }
0x1466   : > { %v10215_v32 = vpop.eup %10214 }
0x1467   : > { %v10217_v55 = vpop.eup %10216 }
0x1468   : > { %v5761_v49 = vadd.f32 1.0, %v10217_v55 }
0x146a   : > { %10224 = vrcp.f32 %v5761_v49 }
0x146b   : > { %v10219_v63 = vpop.eup %10218 }
0x146c   : > { %v5762_v47 = vadd.f32 1.0, %v10219_v63  ;;  %v10221_v2 = vpop.eup %10220 }
0x146d   : > { %v5763_v34 = vadd.f32 1.0, %v10221_v2 }
0x146e   : > { %10226 = vrcp.f32 %v5762_v47 }
0x146f   : > { %10228 = vrcp.f32 %v5763_v34 }
0x1473   : > { %v5802_v4 = vpop.permute.xlu0 %5801 }
0x1474   : > { %v13998_v61 = vmul.f32 %v10213_v22, %v5802_v4  ;;  %v10223_v22 = vpop.eup %10222 }
0x1475   : > { %v5764_v4 = vadd.f32 1.0, %v10223_v22 }
0x1476   : > { %v5831_v42 = vmul.f32 %v13980_v12, %v13998_v61 }
0x1477   : > { %v5804_v30 = vpop.permute.xlu1 %5803  ;;  %10230 = vrcp.f32 %v5764_v4 }
0x1478   : > { %v14002_v1 = vmul.f32 %v10215_v32, %v5804_v30  ;;  %v5843_v41 = vsel %vm415_vm0, %v5831_v42, 0.0  ;;  %v10225_v32 = vpop.eup %10224 }
0x1479   : > { %5844 = vadd.xlane.f32.xlu0 %v5843_v41  ;;  %v10227_v30 = vpop.eup %10226 }
0x147a   : > { %v5832_v38 = vmul.f32 %v13980_v12, %v14002_v1 }
0x147c   : > { %v5846_v10 = vsel %vm415_vm0, %v5832_v38, 0.0 }
0x147d   : > { %5847 = vadd.xlane.f32.xlu0 %v5846_v10  ;;  %v10229_v10 = vpop.eup %10228 }
0x1481   : > { %v10231_v4 = vpop.eup %10230 }
0x1488   : > { %v5806_v42 = vpop.permute.xlu0 %5805 }
0x1489   : > { %v14008_v40 = vmul.f32 %v10225_v32, %v5806_v42 }
0x148b   : > { %v5833_v55 = vmul.f32 %v13980_v12, %v14008_v40 }
0x148c   : > { %v5808_v41 = vpop.permute.xlu1 %5807 }
0x148d   : > { %v14012_v38 = vmul.f32 %v10227_v30, %v5808_v41  ;;  %v5849_v49 = vsel %vm415_vm0, %v5833_v55, 0.0 }
0x148e   : > { %5850 = vadd.xlane.f32.xlu1 %v5849_v49  ;;  %v14029_v49 = vld [vmem:[%s10863_s11] sm:$0xff] }
0x148f   : > { %v5834_v63 = vmul.f32 %v13980_v12, %v14012_v38  ;;  %15945 = vst [vmem:[#allocation52_spill] sm:$0xff] %v14029_v49 }
0x1490   : > { %v5810_v47 = vpop.permute.xlu0 %5809 }
0x1491   : > { %v14017_v2 = vmul.f32 %v10229_v10, %v5810_v47  ;;  %v5852_v34 = vsel %vm415_vm0, %v5834_v63, 0.0  ;;  %v15591_v63 = vrot.slane %v14029_v49, 6  ;;  %v14033_v10 = vld [vmem:[%s10863_s11 + $0x8] sm:$0xff]  ;;  %v14065_v49 = vld [vmem:[%s10863_s11 + $0x38] sm:$0xff] }
0x1492   : > { %5853 = vadd.xlane.f32.xlu0 %v5852_v34  ;;  %15946 = vst [vmem:[#allocation37_spill] sm:$0xff] %v14033_v10  ;;  %v15593_v47 = vrot.slane %v14033_v10, 6  ;;  %v14037_v34 = vld [vmem:[%s10863_s11 + $0x10] sm:$0xff]  ;;  %15953 = vst [vmem:[#allocation55_spill] sm:$0xff] %v14065_v49 }
0x1493   : > { %15943 = vst [vmem:[#allocation53_spill] sm:$0xff] %v14017_v2  ;;  %v5835_v22 = vmul.f32 %v13980_v12, %v14017_v2  ;;  %15947 = vst [vmem:[#allocation54_spill] sm:$0xff] %v14037_v34  ;;  %v15955_v10 = vld [vmem:[#allocation16_spill] sm:$0xff]  ;;  %v15972_v2 = vrot.slane %v15971_v44, 5 }
0x1494   : > { %v5812_v32 = vpop.permute.xlu1 %5811  ;;  %9127 = vpush %v15591_v63  ;;  %v7528_v37 = vrot.slane %v15955_v10, 6  ;;  %v15960_v10 = vld [vmem:[#allocation21_spill] sm:$0xff] }
0x1495   : > { %v14022_v42 = vmul.f32 %v10231_v4, %v5812_v32  ;;  %v5855_v55 = vsel %vm415_vm0, %v5835_v22, 0.0  ;;  %v15595_v22 = vrot.slane %v14037_v34, 6  ;;  %v14041_v4 = vld [vmem:[%s10863_s11 + $0x18] sm:$0xff]  ;;  %v14047_v32 = vld [vmem:[%s10863_s11 + $0x20] sm:$0xff]  ;;  %9129 = vpush %v15593_v47  ;;  %v7533_v50 = vrot.slane %v15960_v10, 6 }
0x1496   : > { %5856 = vadd.xlane.f32.xlu1 %v5855_v55  ;;  %15948 = vst [vmem:[#allocation14_spill] sm:$0xff] %v14041_v4  ;;  %15949 = vst [vmem:[#allocation45_spill] sm:$0xff] %v14047_v32  ;;  %v15952_v63 = vrot.slane %v14041_v4, 6  ;;  %v15606_v55 = vrot.slane %v14065_v49, 6  ;;  %v15954_v47 = vrot.slane %v14047_v32, 6  ;;  %v7530_v4 = vrot.slane %v15957_v21, 6 }
0x1497   : > { %15944 = vst [vmem:[#allocation34_spill] sm:$0xff] %v14022_v42  ;;  %v5836_v30 = vmul.f32 %v13980_v12, %v14022_v42  ;;  %9131 = vpush %v15595_v22  ;;  %v15605_v12 = vrot.slane %v14059_v33, 6  ;;  %v15956_v22 = vld [vmem:[#allocation17_spill] sm:$0xff]  ;;  %v15959_v32 = vld [vmem:[#allocation20_spill] sm:$0xff]  ;;  %v14131_v15 = vsel %vm5885_vm3, %v15972_v2, 0.0 }
0x1498   : > { %9133 = vpush %v15952_v63  ;;  %v7529_v34 = vrot.slane %v15956_v22, 6  ;;  %v15958_v63 = vld [vmem:[#allocation19_spill] sm:$0xff] }
0x1499   : > { %v5858_v41 = vsel %vm415_vm0, %v5836_v30, 0.0  ;;  %v14053_v30 = vld [vmem:[%s10863_s11 + $0x28] sm:$0xff]  ;;  %9135 = vpush %v15954_v47  ;;  %v7531_v3 = vrot.slane %v15958_v63, 6  ;;  %v7532_v47 = vrot.slane %v15959_v32, 6  ;;  %v14087_v32 = vld [vmem:[#allocation2] ss:$0 sm:$0xff] }
0x149a   : > { %5859 = vadd.xlane.f32.xlu0 %v5858_v41  ;;  %15950 = vst [vmem:[#allocation56_spill] sm:$0xff] %v14053_v30  ;;  %v15602_v41 = vrot.slane %v14053_v30, 6  ;;  %v15962_v22 = vld [vmem:[#allocation23_spill] sm:$0xff] }
0x149b   : > { %v7535_v33 = vrot.slane %v15962_v22, 6 }
0x149c   : > { %9137 = vpush %v15602_v41  ;;  %v15961_v41 = vld [vmem:[#allocation22_spill] sm:$0xff] }
0x149d   : > { %9139 = vpush %v15605_v12  ;;  %v7534_v30 = vrot.slane %v15961_v41, 6  ;;  %v15963_v12 = vld [vmem:[#allocation36_spill] sm:$0xff]  ;;  %v15965_v41 = vld [vmem:[#allocation15_spill] sm:$0xff] }
0x149e   : > { %9141 = vpush %v15606_v55  ;;  %v15964_v55 = vrot.slane %v15963_v12, 5 }
0x149f   : > { %9143 = vpush %v7528_v37 }
0x14a0   : > { %9145 = vpush %v7529_v34  ;;  %v5886_v49 = vsel %vm5885_vm3, %v15964_v55, 0.0 }
0x14a1   : > { %9147 = vpush %v7530_v4  ;;  %vm5894_vm6 = vcmp.gt.f32.partialorder %v5886_v49, 0.0 }
0x14a2   : > { %9149 = vpush %v7531_v3  ;;  %v15966_v3 = vrot.slane %v15965_v41, 5 }
0x14a3   : > { %9151 = vpush %v7532_v47 }
0x14a4   : > { %9153 = vpush %v7533_v50  ;;  %v5887_v22 = vsel %vm5885_vm3, %v15966_v3, 0.0 }
0x14a5   : > { %9155 = vpush %v7534_v30  ;;  %vm5895_vm12 = vcmp.gt.f32.partialorder %v5887_v22, 0.0 }
0x14a6   : > { %9157 = vpush %v7535_v33 }
0x14eb   : > { %v5839_v37 = vpop.xlane.xlu0 %5838 }
0x14ec   : > { %v5861_v34 = vadd.f32 %v14087_v32, %v5839_v37 }
0x14ee   : > { %v5902_v4 = vsel %vm5894_vm6, %v5861_v34, -1e+30 }
0x14ef   : > { %v5910_v50 = vsel %vm1205_vm4, %v5902_v4, -inf }
0x14f0   : > { %v5911_v30 = vrot.slane %v5910_v50, 4 }
0x14f1   : > { %v5842_v12 = vpop.xlane.xlu1 %5841 }
0x14f2   : > { %v5912_v33 = vmax.f32 %v5910_v50, %v5911_v30  ;;  %v5862_v55 = vadd.f32 %v14087_v32, %v5842_v12 }
0x14f4   : > { %v5913_v47 = vrot.slane %v5912_v33, 2  ;;  %v5903_v10 = vsel %vm5895_vm12, %v5862_v55, -1e+30 }
0x14f5   : > { %v5917_v37 = vsel %vm1205_vm4, %v5903_v10, -inf }
0x14f6   : > { %v5914_v63 = vmax.f32 %v5912_v33, %v5913_v47  ;;  %v5918_v21 = vrot.slane %v5917_v37, 4  ;;  %v15967_v47 = vld [vmem:[#allocation38_spill] sm:$0xff] }
0x14f8   : > { %v5915_v34 = vrot.slane %v5914_v63, 1  ;;  %v5919_v51 = vmax.f32 %v5917_v37, %v5918_v21 }
0x14fa   : > { %v5916_v41 = vmax.f32 %v5914_v63, %v5915_v34  ;;  %v5920_v45 = vrot.slane %v5919_v51, 2 }
0x14fc   : > { %vm5966_vm5 = vcmp.ge.f32.partialorder %v5902_v4, %v5916_v41  ;;  %v5921_v3 = vmax.f32 %v5919_v51, %v5920_v45  ;;  %v15968_v51 = vrot.slane %v15967_v47, 5 }
0x14fd   : > { %vm5974_vm10 = vmand %vm5966_vm5, %vm5894_vm6 }
0x14fe   : > { %v5982_v50 = vsel %vm5974_vm10, %v11429_v14, 8.0  ;;  %v5922_v12 = vrot.slane %v5921_v3, 1  ;;  %v5888_v45 = vsel %vm5885_vm3, %v15968_v51, 0.0 }
0x14ff   : > { %v5990_v30 = vsel %vm1205_vm4, %v5982_v50, inf  ;;  %vm5896_vm14 = vcmp.gt.f32.partialorder %v5888_v45, 0.0 }
0x1500   : > { %v5991_v42 = vrot.slane %v5990_v30, 4  ;;  %v5923_v6 = vmax.f32 %v5921_v3, %v5922_v12 }
0x1502   : > { %v5992_v55 = vmin.f32 %v5990_v30, %v5991_v42  ;;  %vm5967_vm11 = vcmp.ge.f32.partialorder %v5903_v10, %v5923_v6  ;;  %v15969_v6 = vld [vmem:[#allocation51_spill] sm:$0xff] }
0x1503   : > { %vm5975_vm9 = vmand %vm5967_vm11, %vm5895_vm12  ;;  %v15970_v10 = vrot.slane %v15969_v6, 5 }
0x1504   : > { %v5993_v33 = vrot.slane %v5992_v55, 2  ;;  %v5983_v21 = vsel %vm5975_vm9, %v11429_v14, 8.0  ;;  %vm5898_vm9 = vcmp.gt.f32.partialorder %v14131_v15, 0.0 }
0x1505   : > { %v5997_v4 = vsel %vm1205_vm4, %v5983_v21, inf  ;;  %v5889_v22 = vsel %vm5885_vm3, %v15970_v10, 0.0 }
0x1506   : > { %v5994_v63 = vmin.f32 %v5992_v55, %v5993_v33  ;;  %v5998_v49 = vrot.slane %v5997_v4, 4  ;;  %v5845_v42 = vpop.xlane.xlu0 %5844  ;;  %vm5897_vm8 = vcmp.gt.f32.partialorder %v5889_v22, 0.0 }
0x1507   : > { %v5863_v50 = vadd.f32 %v14087_v32, %v5845_v42 }
0x1508   : > { %v5995_v37 = vrot.slane %v5994_v63, 1  ;;  %v5999_v34 = vmin.f32 %v5997_v4, %v5998_v49 }
0x1509   : > { %v5904_v33 = vsel %vm5896_vm14, %v5863_v50, -1e+30 }
0x150a   : > { %v5996_v41 = vmin.f32 %v5994_v63, %v5995_v37  ;;  %v6000_v3 = vrot.slane %v5999_v34, 2  ;;  %v5924_v4 = vsel %vm1205_vm4, %v5904_v33, -inf  ;;  %v5848_v49 = vpop.xlane.xlu0 %5847 }
0x150b   : > { %v5925_v47 = vrot.slane %v5924_v4, 4  ;;  %v5864_v51 = vadd.f32 %v14087_v32, %v5848_v49 }
0x150c   : > { %vm6046_vm7 = vcmp.eq.f32.partialorder %v11429_v14, %v5996_v41  ;;  %vm6070_vm13 = vcmp.lt.f32.partialorder %v11429_v14, %v5996_v41  ;;  %v6001_v30 = vmin.f32 %v5999_v34, %v6000_v3  ;;  %vm6094_vm15 = vcmp.gt.f32.partialorder %v11429_v14, %v5996_v41 }
0x150d   : > { %v8691_v12 = vsel %vm6046_vm7, 1.0, %v15705_v48  ;;  %v8699_v55 = vsel %vm6070_vm13, 1.0, %v15705_v48  ;;  %v5926_v34 = vmax.f32 %v5924_v4, %v5925_v47  ;;  %v5905_v3 = vsel %vm5897_vm8, %v5864_v51, -1e+30 }
0x150e   : > { %v9482_v21 = vpack.i.bf16 %v8699_v55, %v8691_v12  ;;  %v6002_v63 = vrot.slane %v6001_v30, 1  ;;  %v8707_v42 = vsel %vm6094_vm15, 1.0, %v15705_v48  ;;  %v5931_v6 = vsel %vm1205_vm4, %v5905_v3, -inf }
0x150f   : > { %v5927_v10 = vrot.slane %v5926_v34, 2  ;;  %v5932_v41 = vrot.slane %v5931_v6, 4 }
0x1510   : > { %9483 = vperm.xlu1 %9260, %v9482_v21   ;;  %v6003_v37 = vmin.f32 %v6001_v30, %v6002_v63 }
0x1511   : > { %v5928_v21 = vmax.f32 %v5926_v34, %v5927_v10  ;;  %v5933_v63 = vmax.f32 %v5931_v6, %v5932_v41 }
0x1512   : > { %vm6047_vm6 = vcmp.eq.f32.partialorder %v11429_v14, %v6003_v37  ;;  %vm6071_vm12 = vcmp.lt.f32.partialorder %v11429_v14, %v6003_v37  ;;  %vm6095_vm5 = vcmp.gt.f32.partialorder %v11429_v14, %v6003_v37 }
0x1513   : > { %v8692_v50 = vsel %vm6047_vm6, 1.0, %v15705_v48  ;;  %v8700_v12 = vsel %vm6071_vm12, 1.0, %v15705_v48  ;;  %v8708_v55 = vsel %vm6095_vm5, 1.0, %v15705_v48  ;;  %v5929_v49 = vrot.slane %v5928_v21, 1 }
0x1514   : > { %v9487_v30 = vpack.i.bf16 %v8692_v50, %v8707_v42  ;;  %v9492_v4 = vpack.i.bf16 %v8708_v55, %v8700_v12  ;;  %v5934_v47 = vrot.slane %v5933_v63, 2  ;;  %v15973_v50 = vld [vmem:[#allocation40_spill] sm:$0xff] }
0x1515   : > { %v5930_v51 = vmax.f32 %v5928_v21, %v5929_v49 }
0x1516   : > { %9488 = vperm.xlu0 %9266, %v9487_v30   ;;  %9493 = vperm.xlu1 %9260, %v9492_v4   ;;  %v5935_v39 = vmax.f32 %v5933_v63, %v5934_v47  ;;  %v15975_v4 = vld [vmem:[#allocation13_spill] sm:$0xff] }
0x1517   : > { %vm5968_vm10 = vcmp.ge.f32.partialorder %v5904_v33, %v5930_v51  ;;  %v15974_v33 = vrot.slane %v15973_v50, 5  ;;  %v15976_v22 = vrot.slane %v15975_v4, 5 }
0x1518   : > { %v5936_v37 = vrot.slane %v5935_v39, 1  ;;  %vm5976_vm11 = vmand %vm5968_vm10, %vm5896_vm14 }
0x1519   : > { %v5984_v42 = vsel %vm5976_vm11, %v11429_v14, 8.0  ;;  %v14140_v12 = vsel %vm5885_vm3, %v15974_v33, 0.0  ;;  %v14153_v49 = vsel %vm5885_vm3, %v15976_v22, 0.0 }
0x151a   : > { %v5937_v34 = vmax.f32 %v5935_v39, %v5936_v37  ;;  %v6004_v6 = vsel %vm1205_vm4, %v5984_v42, inf  ;;  %vm5899_vm14 = vcmp.gt.f32.partialorder %v14140_v12, 0.0 }
0x151b   : > { %v6005_v10 = vrot.slane %v6004_v6, 4  ;;  %v5851_v41 = vpop.xlane.xlu1 %5850 }
0x151c   : > { %vm5969_vm7 = vcmp.ge.f32.partialorder %v5905_v3, %v5937_v34  ;;  %v5865_v44 = vadd.f32 %v14087_v32, %v5851_v41 }
0x151d   : > { %vm5977_vm13 = vmand %vm5969_vm7, %vm5897_vm8  ;;  %v6006_v2 = vmin.f32 %v6004_v6, %v6005_v10  ;;  %vm5900_vm8 = vcmp.gt.f32.partialorder %v14153_v49, 0.0 }
0x151e   : > { %v5985_v45 = vsel %vm5977_vm13, %v11429_v14, 8.0  ;;  %v5906_v30 = vsel %vm5898_vm9, %v5865_v44, -1e+30 }
0x151f   : > { %v6011_v39 = vsel %vm1205_vm4, %v5985_v45, inf  ;;  %v6007_v3 = vrot.slane %v6006_v2, 2  ;;  %v5938_v21 = vsel %vm1205_vm4, %v5906_v30, -inf  ;;  %v5854_v63 = vpop.xlane.xlu0 %5853 }
0x1520   : > { %v6012_v55 = vrot.slane %v6011_v39, 4  ;;  %v5939_v47 = vrot.slane %v5938_v21, 4  ;;  %v5866_v51 = vadd.f32 %v14087_v32, %v5854_v63  ;;  %v15977_v63 = vld [vmem:[#allocation39_spill] sm:$0xff] }
0x1521   : > { %v6008_v37 = vmin.f32 %v6006_v2, %v6007_v3  ;;  %vm5901_vm3 = vcmp.gt.f32.partialorder %v15977_v63, 0.0 }
0x1522   : > { %v6013_v42 = vmin.f32 %v6011_v39, %v6012_v55  ;;  %v5940_v34 = vmax.f32 %v5938_v21, %v5939_v47  ;;  %v5907_v6 = vsel %vm5899_vm14, %v5866_v51, -1e+30 }
0x1523   : > { %v6009_v10 = vrot.slane %v6008_v37, 1  ;;  %v5945_v50 = vsel %vm1205_vm4, %v5907_v6, -inf  ;;  %v5857_v33 = vpop.xlane.xlu1 %5856 }
0x1524   : > { %v6014_v41 = vrot.slane %v6013_v42, 2  ;;  %v5941_v44 = vrot.slane %v5940_v34, 2  ;;  %v5946_v45 = vrot.slane %v5945_v50, 4  ;;  %v5867_v4 = vadd.f32 %v14087_v32, %v5857_v33 }
0x1525   : > { %v6010_v22 = vmin.f32 %v6008_v37, %v6009_v10 }
0x1526   : > { %v6015_v11 = vmin.f32 %v6013_v42, %v6014_v41  ;;  %v5942_v2 = vmax.f32 %v5940_v34, %v5941_v44  ;;  %v5947_v39 = vmax.f32 %v5945_v50, %v5946_v45  ;;  %v5908_v3 = vsel %vm5900_vm8, %v5867_v4, -1e+30 }
0x1527   : > { %v5952_v21 = vsel %vm1205_vm4, %v5908_v3, -inf  ;;  %v5860_v47 = vpop.xlane.xlu0 %5859  ;;  %vm6048_vm15 = vcmp.eq.f32.partialorder %v11429_v14, %v6010_v22  ;;  %vm6072_vm6 = vcmp.lt.f32.partialorder %v11429_v14, %v6010_v22  ;;  %vm6096_vm12 = vcmp.gt.f32.partialorder %v11429_v14, %v6010_v22 }
0x1528   : > { %v6016_v55 = vrot.slane %v6015_v11, 1  ;;  %v5943_v51 = vrot.slane %v5942_v2, 1  ;;  %v5948_v16 = vrot.slane %v5947_v39, 2  ;;  %v5953_v33 = vrot.slane %v5952_v21, 4 }
0x1529   : > { %v5868_v37 = vadd.f32 %v14087_v32, %v5860_v47  ;;  %v8693_v34 = vsel %vm6048_vm15, 1.0, %v15705_v48  ;;  %v8701_v10 = vsel %vm6072_vm6, 1.0, %v15705_v48 }
0x152a   : > { %v6017_v42 = vmin.f32 %v6015_v11, %v6016_v55  ;;  %v5944_v41 = vmax.f32 %v5942_v2, %v5943_v51  ;;  %v5949_v50 = vmax.f32 %v5947_v39, %v5948_v16  ;;  %v5954_v44 = vmax.f32 %v5952_v21, %v5953_v33 }
0x152b   : > { %v5909_v45 = vsel %vm5901_vm3, %v5868_v37, -1e+30  ;;  %v9497_v36 = vpack.i.bf16 %v8701_v10, %v8693_v34 }
0x152c   : > { %v5959_v4 = vsel %vm1205_vm4, %v5909_v45, -inf  ;;  %vm6073_vm5 = vcmp.lt.f32.partialorder %v11429_v14, %v6017_v42  ;;  %vm6097_vm10 = vcmp.gt.f32.partialorder %v11429_v14, %v6017_v42  ;;  %vm5970_vm11 = vcmp.ge.f32.partialorder %v5906_v30, %v5944_v41 }
0x152d   : > { %v5950_v11 = vrot.slane %v5949_v50, 1  ;;  %v5955_v32 = vrot.slane %v5954_v44, 2  ;;  %v5960_v55 = vrot.slane %v5959_v4, 4  ;;  %vm5978_vm7 = vmand %vm5970_vm11, %vm5898_vm9  ;;  %9498 = vperm.xlu1 %9260, %v9497_v36   ;;  %v8702_v16 = vsel %vm6073_vm5, 1.0, %v15705_v48 }
0x152e   : > { %v8710_v2 = vsel %vm6097_vm10, 1.0, %v15705_v48  ;;  %vm6049_vm13 = vcmp.eq.f32.partialorder %v11429_v14, %v6017_v42  ;;  %v5986_v39 = vsel %vm5978_vm7, %v11429_v14, 8.0  ;;  %v8709_v36 = vsel %vm6096_vm12, 1.0, %v15705_v48 }
0x152f   : > { %v5951_v21 = vmax.f32 %v5949_v50, %v5950_v11  ;;  %v5956_v47 = vmax.f32 %v5954_v44, %v5955_v32  ;;  %v5961_v51 = vmax.f32 %v5959_v4, %v5960_v55  ;;  %v6018_v30 = vsel %vm1205_vm4, %v5986_v39, inf }
0x1530   : > { %v9507_v33 = vpack.i.bf16 %v8710_v2, %v8702_v16  ;;  %v8694_v37 = vsel %vm6049_vm13, 1.0, %v15705_v48  ;;  %v6019_v15 = vrot.slane %v6018_v30, 4 }
0x1531   : > { %vm5971_vm9 = vcmp.ge.f32.partialorder %v5907_v6, %v5951_v21  ;;  %v5957_v34 = vrot.slane %v5956_v47, 1  ;;  %v5962_v10 = vrot.slane %v5961_v51, 2  ;;  %v9502_v42 = vpack.i.bf16 %v8694_v37, %v8709_v36 }
0x1532   : > { %vm5979_vm15 = vmand %vm5971_vm9, %vm5899_vm14  ;;  %9508 = vperm.xlu1 %9260, %v9507_v33   ;;  %v6020_v41 = vmin.f32 %v6018_v30, %v6019_v15 }
0x1533   : > { %v5987_v50 = vsel %vm5979_vm15, %v11429_v14, 8.0  ;;  %v5958_v44 = vmax.f32 %v5956_v47, %v5957_v34  ;;  %v5963_v4 = vmax.f32 %v5961_v51, %v5962_v10  ;;  %9503 = vperm.xlu0 %9266, %v9502_v42  }
0x1534   : > { %v6025_v11 = vsel %vm1205_vm4, %v5987_v50, inf  ;;  %v6021_v32 = vrot.slane %v6020_v41, 2 }
0x1535   : > { %v6026_v22 = vrot.slane %v6025_v11, 4  ;;  %vm5972_vm6 = vcmp.ge.f32.partialorder %v5908_v3, %v5958_v44  ;;  %v5964_v55 = vrot.slane %v5963_v4, 1 }
0x1536   : > { %vm5980_vm12 = vmand %vm5972_vm6, %vm5900_vm8  ;;  %v6022_v6 = vmin.f32 %v6020_v41, %v6021_v32 }
0x1537   : > { %v6027_v12 = vmin.f32 %v6025_v11, %v6026_v22  ;;  %v5988_v16 = vsel %vm5980_vm12, %v11429_v14, 8.0  ;;  %v5965_v2 = vmax.f32 %v5963_v4, %v5964_v55 }
0x1538   : > { %v6032_v39 = vsel %vm1205_vm4, %v5988_v16, inf  ;;  %v6023_v21 = vrot.slane %v6022_v6, 1 }
0x1539   : > { %v6028_v47 = vrot.slane %v6027_v12, 2  ;;  %v6033_v51 = vrot.slane %v6032_v39, 4  ;;  %vm5973_vm14 = vcmp.ge.f32.partialorder %v5909_v45, %v5965_v2 }
0x153a   : > { %vm5981_vm5 = vmand %vm5973_vm14, %vm5901_vm3  ;;  %v6024_v30 = vmin.f32 %v6022_v6, %v6023_v21 }
0x153b   : > { %v6029_v3 = vmin.f32 %v6027_v12, %v6028_v47  ;;  %v6034_v33 = vmin.f32 %v6032_v39, %v6033_v51  ;;  %v5989_v49 = vsel %vm5981_vm5, %v11429_v14, 8.0 }
0x153c   : > { %v6039_v37 = vsel %vm1205_vm4, %v5989_v49, inf  ;;  %vm6050_vm8 = vcmp.eq.f32.partialorder %v11429_v14, %v6024_v30  ;;  %vm6074_vm10 = vcmp.lt.f32.partialorder %v11429_v14, %v6024_v30  ;;  %vm6098_vm11 = vcmp.gt.f32.partialorder %v11429_v14, %v6024_v30 }
0x153d   : > { %v6030_v36 = vrot.slane %v6029_v3, 1  ;;  %v6035_v15 = vrot.slane %v6034_v33, 2  ;;  %v6040_v34 = vrot.slane %v6039_v37, 4  ;;  %v8695_v10 = vsel %vm6050_vm8, 1.0, %v15705_v48 }
0x153e   : > { %v8703_v41 = vsel %vm6074_vm10, 1.0, %v15705_v48  ;;  %v8711_v22 = vsel %vm6098_vm11, 1.0, %v15705_v48  ;;  %vm7063_vm8 = vcmask 1041408  }
0x153f   : > { %v6031_v63 = vmin.f32 %v6029_v3, %v6030_v36  ;;  %v6036_v45 = vmin.f32 %v6034_v33, %v6035_v15  ;;  %v6041_v42 = vmin.f32 %v6039_v37, %v6040_v34  ;;  %v9512_v50 = vpack.i.bf16 %v8703_v41, %v8695_v10 }
0x1541   : > { %v6037_v44 = vrot.slane %v6036_v45, 1  ;;  %v6042_v4 = vrot.slane %v6041_v42, 2  ;;  %vm6075_vm3 = vcmp.lt.f32.partialorder %v11429_v14, %v6031_v63  ;;  %vm6099_vm7 = vcmp.gt.f32.partialorder %v11429_v14, %v6031_v63  ;;  %9513 = vperm.xlu0 %9266, %v9512_v50  }
0x1542   : > { %v8704_v11 = vsel %vm6075_vm3, 1.0, %v15705_v48  ;;  %v8712_v32 = vsel %vm6099_vm7, 1.0, %v15705_v48  ;;  %vm6051_vm13 = vcmp.eq.f32.partialorder %v11429_v14, %v6031_v63 }
0x1543   : > { %v6038_v55 = vmin.f32 %v6036_v45, %v6037_v44  ;;  %v6043_v6 = vmin.f32 %v6041_v42, %v6042_v4  ;;  %v9522_v12 = vpack.i.bf16 %v8712_v32, %v8704_v11  ;;  %v8696_v16 = vsel %vm6051_vm13, 1.0, %v15705_v48 }
0x1544   : > { %v9517_v2 = vpack.i.bf16 %v8696_v16, %v8711_v22 }
0x1545   : > { %vm6052_vm9 = vcmp.eq.f32.partialorder %v11429_v14, %v6038_v55  ;;  %vm6076_vm15 = vcmp.lt.f32.partialorder %v11429_v14, %v6038_v55  ;;  %v6044_v39 = vrot.slane %v6043_v6, 1  ;;  %9523 = vperm.xlu0 %9266, %v9522_v12   ;;  %vm6100_vm6 = vcmp.gt.f32.partialorder %v11429_v14, %v6038_v55 }
0x1546   : > { %9518 = vperm.xlu1 %9260, %v9517_v2   ;;  %v8697_v21 = vsel %vm6052_vm9, 1.0, %v15705_v48  ;;  %v8705_v47 = vsel %vm6076_vm15, 1.0, %v15705_v48  ;;  %v8713_v33 = vsel %vm6100_vm6, 1.0, %v15705_v48  ;;  %v6319_v2 = vstv %s14223_s14  ;;  %s9118_s14 = spop %9117 }
0x1547   : > { %v9527_v51 = vpack.i.bf16 %v8705_v47, %v8697_v21  ;;  %v6045_v30 = vmin.f32 %v6043_v6, %v6044_v39  ;;  %v6359_v39 = vstv %s9112_s27 }
0x1549   : > { %vm6053_vm12 = vcmp.eq.f32.partialorder %v11429_v14, %v6045_v30  ;;  %vm6077_vm14 = vcmp.lt.f32.partialorder %v11429_v14, %v6045_v30  ;;  %vm6101_vm5 = vcmp.gt.f32.partialorder %v11429_v14, %v6045_v30  ;;  %v6362_v30 = vstv %s9114_s28 }
0x154a   : > { %9528 = vperm.xlu1 %9260, %v9527_v51   ;;  %v8698_v3 = vsel %vm6053_vm12, 1.0, %v15705_v48  ;;  %v8706_v37 = vsel %vm6077_vm14, 1.0, %v15705_v48  ;;  %v8714_v36 = vsel %vm6101_vm5, 1.0, %v15705_v48  ;;  %v6322_v51 = vstv %s14225_s15  ;;  %s9120_s15 = spop %9119 }
0x154b   : > { %v9532_v49 = vpack.i.bf16 %v8698_v3, %v8713_v33 }
0x154d   : > { %9533 = vperm.xlu0 %9266, %v9532_v49  }
0x154e   : > { %6203 = vperm.xlu1 %9260, %v8706_v37  }
0x1551   : > { %6259 = vperm.xlu0 %9266, %v8714_v36  }
0x158f   : > { %v9484_v15 = vpop.permute.xlu1 %9483 }
0x1590   : > { %v9486_v34 = vunpack.i.h.bf16 %v9484_v15  ;;  %v9485_v10 = vunpack.i.l.bf16 %v9484_v15 }
0x1592   : > { %v6286_v63 = vmul.f32 %v9486_v34, %v13579_v31  ;;  %v6278_v45 = vmul.f32 %v9485_v10, %v13890_v52  ;;  %v6206_v42 = vmul.f32 %v9486_v34, %v13577_v19  ;;  %v6158_v41 = vmul.f32 %v9485_v10, %v13975_v58 }
0x1594   : > { %v6294_v50 = vadd.f32 %v6286_v63, %v6278_v45  ;;  %v6214_v22 = vadd.f32 %v6206_v42, %v6158_v41  ;;  %v6383_v42 = vmul.f32 %v6362_v30, %v13592_v27 }
0x1595   : > { %v9489_v44 = vpop.permute.xlu0 %9488  ;;  %v9494_v4 = vpop.permute.xlu1 %9493 }
0x1596   : > { %v9491_v11 = vunpack.i.h.bf16 %v9489_v44  ;;  %v9490_v32 = vunpack.i.l.bf16 %v9489_v44  ;;  %v9496_v55 = vunpack.i.h.bf16 %v9494_v4  ;;  %v9495_v52 = vunpack.i.l.bf16 %v9494_v4 }
0x1598   : > { %v6159_v6 = vmul.f32 %v9491_v11, %v13985_v28  ;;  %v6279_v12 = vmul.f32 %v9491_v11, %v13896_v25  ;;  %v6262_v58 = vmul.f32 %v9490_v32, %v13586_v46  ;;  %v6302_v16 = vmul.f32 %v9490_v32, %v13881_v5 }
0x1599   : > { %v6207_v21 = vmul.f32 %v9495_v52, %v13592_v27  ;;  %v6287_v47 = vmul.f32 %v9495_v52, %v13594_v59  ;;  %v6263_v49 = vmul.f32 %v9496_v55, %v13598_v62  ;;  %v6303_v28 = vmul.f32 %v9496_v55, %v13888_v56 }
0x159a   : > { %v6270_v3 = vadd.f32 %v6262_v58, %v6214_v22  ;;  %v6310_v33 = vadd.f32 %v6302_v16, %v6294_v50  ;;  %v6382_v46 = vmul.f32 %v6359_v39, %v13577_v19  ;;  %v6406_v5 = vmul.f32 %v6359_v39, %v13579_v31 }
0x159b   : > { %v6215_v37 = vadd.f32 %v6207_v21, %v6159_v6  ;;  %v6295_v25 = vadd.f32 %v6287_v47, %v6279_v12  ;;  %v6407_v62 = vmul.f32 %v6362_v30, %v13594_v59 }
0x159c   : > { %v6342_v36 = vmul.f32 %v6319_v2, %v6270_v3  ;;  %v6398_v15 = vmul.f32 %v6319_v2, %v6310_v33  ;;  %v6365_v3 = vstv %s9116_s13 }
0x159d   : > { %v6271_v34 = vadd.f32 %v6263_v49, %v6215_v37  ;;  %v6311_v10 = vadd.f32 %v6303_v28, %v6295_v25  ;;  %v6368_v37 = vstv %s9118_s14 }
0x159e   : > { %v14255_v63 = vadd.f32 %v6382_v46, %v6342_v36  ;;  %v14257_v45 = vadd.f32 %v6406_v5, %v6398_v15 }
0x159f   : > { %v6343_v41 = vmul.f32 %v6322_v51, %v6271_v34  ;;  %v6399_v56 = vmul.f32 %v6322_v51, %v6311_v10  ;;  %v6325_v10 = vstv %s14227_s19  ;;  %s14304_s19 = spop %9121 }
0x15a0   : > { %v6430_v50 = vrot.slane %v14255_v63, 1 }
0x15a1   : > { %v14262_v44 = vadd.f32 %v6383_v42, %v6343_v41  ;;  %v14264_v19 = vadd.f32 %v6407_v62, %v6399_v56  ;;  %v6384_v42 = vmul.f32 %v6365_v3, %v13620_v54  ;;  %v6328_v56 = vstv %s14229_s21  ;;  %s14307_s21 = spop %9123 }
0x15a2   : > { %v14267_v31 = vsel %vm569_vm1, %v6430_v50, 0.0 }
0x15a3   : > { %6494 = vrot.lane.b32.xlu1 %v14267_v31, %s15653_s20  ;;  %v6431_v4 = vrot.slane %v14262_v44, 1 }
0x15a5   : > { %v14273_v27 = vsel %vm569_vm1, %v6431_v4, 0.0 }
0x15a6   : > { %6496 = vrot.lane.b32.xlu0 %v14273_v27, %s15653_s20 }
0x15ac   : > { %v9499_v59 = vpop.permute.xlu1 %9498 }
0x15ad   : > { %v9501_v11 = vunpack.i.h.bf16 %v9499_v59  ;;  %v9500_v32 = vunpack.i.l.bf16 %v9499_v59 }
0x15af   : > { %v6288_v22 = vmul.f32 %v9501_v11, %v13622_v7  ;;  %v6280_v55 = vmul.f32 %v9500_v32, %v13913_v18  ;;  %v6208_v6 = vmul.f32 %v9501_v11, %v13620_v54  ;;  %v6160_v12 = vmul.f32 %v9500_v32, %v13998_v61 }
0x15b1   : > { %v9509_v52 = vpop.permute.xlu1 %9508  ;;  %v6296_v58 = vadd.f32 %v6288_v22, %v6280_v55  ;;  %v6216_v18 = vadd.f32 %v6208_v6, %v6160_v12 }
0x15b2   : > { %v9510_v16 = vunpack.i.l.bf16 %v9509_v52  ;;  %v9504_v2 = vpop.permute.xlu0 %9503  ;;  %v9511_v39 = vunpack.i.h.bf16 %v9509_v52  ;;  %v6371_v52 = vstv %s9120_s15 }
0x15b3   : > { %v9506_v51 = vunpack.i.h.bf16 %v9504_v2  ;;  %v9505_v30 = vunpack.i.l.bf16 %v9504_v2 }
0x15b4   : > { %v6209_v21 = vmul.f32 %v9510_v16, %v13624_v60  ;;  %v6289_v47 = vmul.f32 %v9510_v16, %v13626_v0  ;;  %v6265_v25 = vmul.f32 %v9511_v39, %v13636_v26  ;;  %v6305_v46 = vmul.f32 %v9511_v39, %v13910_v57 }
0x15b5   : > { %v6161_v33 = vmul.f32 %v9506_v51, %v14002_v1  ;;  %v6281_v49 = vmul.f32 %v9506_v51, %v13918_v9  ;;  %v6264_v61 = vmul.f32 %v9505_v30, %v13631_v20  ;;  %v6304_v28 = vmul.f32 %v9505_v30, %v13903_v8 }
0x15b6   : > { %v6408_v1 = vmul.f32 %v6365_v3, %v13622_v7  ;;  %v6385_v8 = vmul.f32 %v6368_v37, %v13624_v60  ;;  %v6409_v26 = vmul.f32 %v6368_v37, %v13626_v0  ;;  %v6331_v39 = vstv %s14231_s23  ;;  %s14345_s23 = spop %9125 }
0x15b7   : > { %v6217_v5 = vadd.f32 %v6209_v21, %v6161_v33  ;;  %v6297_v36 = vadd.f32 %v6289_v47, %v6281_v49  ;;  %v6272_v15 = vadd.f32 %v6264_v61, %v6216_v18  ;;  %v6312_v34 = vadd.f32 %v6304_v28, %v6296_v58 }
0x15b8   : > { %v6334_v21 = vstv %s14233_s25  ;;  %v6374_v47 = vstv %s14304_s19  ;;  %v6377_v51 = vstv %s14307_s21  ;;  %v6386_v18 = vmul.f32 %v6371_v52, %v13667_v43 }
0x15b9   : > { %v6273_v9 = vadd.f32 %v6265_v25, %v6217_v5  ;;  %v6313_v62 = vadd.f32 %v6305_v46, %v6297_v36  ;;  %v6344_v20 = vmul.f32 %v6325_v10, %v6272_v15  ;;  %v6400_v41 = vmul.f32 %v6325_v10, %v6312_v34 }
0x15ba   : > { %v6410_v28 = vmul.f32 %v6371_v52, %v13669_v35  ;;  %v6387_v15 = vmul.f32 %v6374_v47, %v13677_v23 }
0x15bb   : > { %v14295_v50 = vadd.f32 %v6384_v42, %v6344_v20  ;;  %v14297_v57 = vadd.f32 %v6408_v1, %v6400_v41  ;;  %v6345_v4 = vmul.f32 %v6328_v56, %v6273_v9  ;;  %v6401_v59 = vmul.f32 %v6328_v56, %v6313_v62 }
0x15bd   : > { %15978 = vst [vmem:[#allocation57_spill] sm:$0xff] %v14297_v57  ;;  %v14299_v11 = vadd.f32 %v6385_v8, %v6345_v4  ;;  %v14301_v54 = vadd.f32 %v6409_v26, %v6401_v59  ;;  %v6432_v7 = vrot.slane %v14295_v50, 1  ;;  %v15982_v26 = vld [vmem:[#allocation50_spill] sm:$0xff]  ;;  %v15983_v59 = vld [vmem:[#allocation24_spill] sm:$0xff] }
0x15bf   : > { %v6433_v0 = vrot.slane %v14299_v11, 1  ;;  %v14310_v55 = vsel %vm569_vm1, %v6432_v7, 0.0 }
0x15c0   : > { %v9514_v60 = vpop.permute.xlu0 %9513  ;;  %15979 = vst [vmem:[#allocation35_spill] sm:$0xff] %v14310_v55  ;;  %6498 = vrot.lane.b32.xlu1 %v14310_v55, %s15653_s20 }
0x15c1   : > { %v9516_v32 = vunpack.i.h.bf16 %v9514_v60  ;;  %v9515_v22 = vunpack.i.l.bf16 %v9514_v60  ;;  %v14315_v6 = vsel %vm569_vm1, %v6433_v0, 0.0  ;;  %v15984_v0 = vld [vmem:[#allocation53_spill] sm:$0xff] }
0x15c2   : > { %6500 = vrot.lane.b32.xlu0 %v14315_v6, %s15653_s20 }
0x15c3   : > { %v6210_v12 = vmul.f32 %v9516_v32, %v13667_v43  ;;  %v6290_v58 = vmul.f32 %v9516_v32, %v13669_v35  ;;  %v6162_v16 = vmul.f32 %v9515_v22, %v14008_v40  ;;  %v6282_v2 = vmul.f32 %v9515_v22, %v13936_v17  ;;  %v15985_v22 = vld [vmem:[#allocation61_spill] sm:$0xff] }
0x15c4   : > { %v9524_v3 = vpop.permute.xlu0 %9523  ;;  %v6411_v43 = vmul.f32 %v6374_v47, %v13679_v53 }
0x15c5   : > { %v9519_v30 = vpop.permute.xlu1 %9518  ;;  %v6298_v33 = vadd.f32 %v6290_v58, %v6282_v2  ;;  %v6218_v37 = vadd.f32 %v6210_v12, %v6162_v16  ;;  %v9526_v40 = vunpack.i.h.bf16 %v9524_v3  ;;  %v9525_v25 = vunpack.i.l.bf16 %v9524_v3  ;;  %v15986_v58 = vld [vmem:[#allocation49_spill] sm:$0xff]  ;;  %v15987_v2 = vld [vmem:[#allocation43_spill] sm:$0xff] }
0x15c6   : > { %v9521_v49 = vunpack.i.h.bf16 %v9519_v30  ;;  %v9520_v61 = vunpack.i.l.bf16 %v9519_v30 }
0x15c7   : > { %v6211_v34 = vmul.f32 %v9525_v25, %v13677_v23  ;;  %v6291_v10 = vmul.f32 %v9525_v25, %v13679_v53  ;;  %v15989_v25 = vld [vmem:[#allocation58_spill] sm:$0xff] }
0x15c8   : > { %v6163_v17 = vmul.f32 %v9521_v49, %v14012_v38  ;;  %v6283_v46 = vmul.f32 %v9521_v49, %v13946_v13  ;;  %v6266_v5 = vmul.f32 %v9520_v61, %v13691_v29  ;;  %v6306_v36 = vmul.f32 %v9520_v61, %v13924_v24  ;;  %v15980_v38 = vld [vmem:[#allocation41_spill] sm:$0xff]  ;;  %v15981_v13 = vld [vmem:[#allocation44_spill] sm:$0xff] }
0x15c9   : > { %v9529_v35 = vpop.permute.xlu1 %9528  ;;  %v6267_v20 = vmul.f32 %v9526_v40, %v15980_v38  ;;  %v6307_v41 = vmul.f32 %v9526_v40, %v15981_v13 }
0x15ca   : > { %v6274_v42 = vadd.f32 %v6266_v5, %v6218_v37  ;;  %v6314_v1 = vadd.f32 %v6306_v36, %v6298_v33  ;;  %v9531_v9 = vunpack.i.h.bf16 %v9529_v35  ;;  %v9530_v62 = vunpack.i.l.bf16 %v9529_v35  ;;  %v15988_v37 = vld [vmem:[#allocation34_spill] sm:$0xff]  ;;  %v15991_v36 = vld [vmem:[#allocation47_spill] sm:$0xff] }
0x15cb   : > { %v6219_v29 = vadd.f32 %v6211_v34, %v6163_v17  ;;  %v6299_v56 = vadd.f32 %v6291_v10, %v6283_v46  ;;  %v15990_v46 = vld [vmem:[#allocation46_spill] sm:$0xff] }
0x15cc   : > { %v6346_v24 = vmul.f32 %v6331_v39, %v6274_v42  ;;  %v6402_v8 = vmul.f32 %v6331_v39, %v6314_v1  ;;  %v6212_v4 = vmul.f32 %v9531_v9, %v15982_v26  ;;  %v6292_v7 = vmul.f32 %v9531_v9, %v15983_v59  ;;  %v9534_v23 = vpop.permute.xlu0 %9533 }
0x15cd   : > { %v6275_v60 = vadd.f32 %v6267_v20, %v6219_v29  ;;  %v6315_v53 = vadd.f32 %v6307_v41, %v6299_v56  ;;  %v6164_v32 = vmul.f32 %v9530_v62, %v15984_v0  ;;  %v6284_v52 = vmul.f32 %v9530_v62, %v15985_v22  ;;  %v6204_v12 = vpop.permute.xlu1 %6203  ;;  %v15993_v20 = vld [vmem:[#allocation42_spill] sm:$0xff] }
0x15ce   : > { %v6213_v16 = vmul.f32 %v6204_v12, %v15986_v58  ;;  %v6293_v47 = vmul.f32 %v6204_v12, %v15987_v2  ;;  %v9536_v30 = vunpack.i.h.bf16 %v9534_v23  ;;  %v9535_v3 = vunpack.i.l.bf16 %v9534_v23 }
0x15cf   : > { %v6347_v33 = vmul.f32 %v6334_v21, %v6275_v60  ;;  %v6403_v39 = vmul.f32 %v6334_v21, %v6315_v53  ;;  %v6220_v49 = vadd.f32 %v6212_v4, %v6164_v32  ;;  %v6300_v61 = vadd.f32 %v6292_v7, %v6284_v52 }
0x15d0   : > { %v6165_v40 = vmul.f32 %v9536_v30, %v15988_v37  ;;  %v6285_v17 = vmul.f32 %v9536_v30, %v15989_v25  ;;  %v6268_v5 = vmul.f32 %v9535_v3, %v15990_v46  ;;  %v6308_v34 = vmul.f32 %v9535_v3, %v15991_v36  ;;  %v6260_v10 = vpop.permute.xlu0 %6259  ;;  %v16002_v37 = vld [vmem:[#allocation26_spill] sm:$0xff]  ;;  %v16003_v25 = vld [vmem:[#allocation27_spill] sm:$0xff]  ;;  %v16005_v46 = vld [vmem:[#allocation29_spill] sm:$0xff] }
0x15d1   : > { %v14351_v35 = vadd.f32 %v6386_v18, %v6346_v24  ;;  %v14353_v42 = vadd.f32 %v6410_v28, %v6402_v8  ;;  %v14355_v21 = vadd.f32 %v6387_v15, %v6347_v33  ;;  %v14357_v1 = vadd.f32 %v6411_v43, %v6403_v39  ;;  %v15994_v15 = vld [vmem:[#allocation60_spill] sm:$0xff]  ;;  %v16007_v36 = vld [vmem:[#allocation31_spill] sm:$0xff] }
0x15d2   : > { %v6276_v9 = vadd.f32 %v6268_v5, %v6220_v49  ;;  %v6316_v62 = vadd.f32 %v6308_v34, %v6300_v61  ;;  %v6221_v38 = vadd.f32 %v6213_v16, %v6165_v40  ;;  %v6269_v13 = vmul.f32 %v6260_v10, %v15993_v20  ;;  %v16001_v61 = vld [vmem:[#allocation25_spill] sm:$0xff]  ;;  %v16006_v5 = vld [vmem:[#allocation30_spill] sm:$0xff] }
0x15d3   : > { %15992 = vst [vmem:[#allocation36_spill] sm:$0xff] %v14357_v1  ;;  %v6337_v41 = vstv %s14237_s18  ;;  %v6388_v29 = vmul.f32 %v6377_v51, %v15982_v26  ;;  %v6412_v56 = vmul.f32 %v6377_v51, %v15983_v59  ;;  %v6380_v4 = vstv %s14345_s23 }
0x15d4   : > { %v6348_v18 = vmul.f32 %v6337_v41, %v6276_v9  ;;  %v6404_v24 = vmul.f32 %v6337_v41, %v6316_v62  ;;  %v6277_v7 = vadd.f32 %v6269_v13, %v6221_v38  ;;  %v6301_v28 = vadd.f32 %v6293_v47, %v6285_v17  ;;  %v16004_v17 = vld [vmem:[#allocation28_spill] sm:$0xff] }
0x15d5   : > { %v6340_v8 = vstv %s14241_s26  ;;  %v6309_v23 = vmul.f32 %v6260_v10, %v15994_v15  ;;  %v6434_v43 = vrot.slane %v14351_v35, 1  ;;  %v6435_v60 = vrot.slane %v14355_v21, 1 }
0x15d6   : > { %v6389_v53 = vmul.f32 %v6380_v4, %v15986_v58  ;;  %v6349_v0 = vmul.f32 %v6340_v8, %v6277_v7  ;;  %v14369_v32 = vadd.f32 %v6388_v29, %v6348_v18  ;;  %v14371_v26 = vadd.f32 %v6412_v56, %v6404_v24  ;;  %v16008_v7 = vld [vmem:[#allocation32_spill] sm:$0xff] }
0x15d7   : > { %v6317_v51 = vadd.f32 %v6309_v23, %v6301_v28  ;;  %v14374_v59 = vsel %vm569_vm1, %v6434_v43, 0.0  ;;  %v14377_v22 = vsel %vm569_vm1, %v6435_v60, 0.0  ;;  %v6413_v58 = vmul.f32 %v6380_v4, %v15987_v2 }
0x15d8   : > { %15995 = vst [vmem:[#allocation15_spill] sm:$0xff] %v14371_v26  ;;  %15996 = vst [vmem:[#allocation38_spill] sm:$0xff] %v14377_v22  ;;  %6502 = vrot.lane.b32.xlu1 %v14374_v59, %s15653_s20  ;;  %6504 = vrot.lane.b32.xlu0 %v14377_v22, %s15653_s20  ;;  %v14383_v52 = vadd.f32 %v6389_v53, %v6349_v0  ;;  %v6436_v12 = vrot.slane %v14369_v32, 1 }
0x15d9   : > { %v6405_v16 = vmul.f32 %v6340_v8, %v6317_v51 }
0x15da   : > { %15997 = vst [vmem:[#allocation51_spill] sm:$0xff] %v14383_v52  ;;  %v14388_v47 = vsel %vm569_vm1, %v6436_v12, 0.0  ;;  %v6437_v30 = vrot.slane %v14383_v52, 1 }
0x15db   : > { %15998 = vst [vmem:[#allocation48_spill] sm:$0xff] %v14388_v47  ;;  %v14391_v3 = vadd.f32 %v6413_v58, %v6405_v16 }
0x15dc   : > { %6506 = vrot.lane.b32.xlu1 %v14388_v47, %s15653_s20  ;;  %v14396_v33 = vsel %vm569_vm1, %v6437_v30, 0.0 }
0x15dd   : > { %15999 = vst [vmem:[#allocation40_spill] sm:$0xff] %v14391_v3  ;;  %16000 = vst [vmem:[#allocation13_spill] sm:$0xff] %v14396_v33  ;;  %6508 = vrot.lane.b32.xlu0 %v14396_v33, %s15653_s20 }
0x1615   : > { %v6495_v39 = vpop.permute.xlu1 %6494 }
0x1616   : > { %v6518_v2 = vsel %vm415_vm0, %v14255_v63, %v6495_v39 }
0x1617   : > { %8715 = vmatmul.mubr.msk.f32.vlgmr.msra.gmra.mrb[40].mxu0 %vm629_vm2, %v6518_v2 }
0x1618   : > { %v6497_v49 = vpop.permute.xlu0 %6496  ;;  %6620 = vmatprep.mubr.f32.mxu0 %v15705_v48  ;;  %8946 = vmatpush1.bf16.msra.mxu0 %v16001_v61 }
0x1619   : > { %8948 = vmatprep.subr.bf16.mxu0 %v16002_v37  ;;  %v6519_v40 = vsel %vm415_vm0, %v14262_v44, %v6497_v49 }
0x161b   : > { %8716 = vmatmul.mubr.msk.f32.gmra.mrb[42].mxu0 %vm629_vm2, %v6519_v40 }
0x161c   : > { %6626 = vmatprep.mubr.f32.mxu0 %v15705_v48  ;;  %8950 = vmatpush1.bf16.msra.mxu0 %v16003_v25 }
0x161d   : > { %8952 = vmatprep.subr.bf16.mxu0 %v16004_v17 }
0x1620   : > { %8954 = vmatpush1.bf16.msra.mxu0 %v16005_v46 }
0x1621   : > { %8956 = vmatprep.subr.bf16.mxu0 %v16006_v5 }
0x1624   : > { %8958 = vmatpush1.bf16.msra.mxu0 %v16007_v36 }
0x1632   : > { %v6499_v34 = vpop.permute.xlu1 %6498 }
0x1633   : > { %v6520_v10 = vsel %vm415_vm0, %v14295_v50, %v6499_v34 }
0x1634   : > { %v6501_v9 = vpop.permute.xlu0 %6500  ;;  %8717 = vmatmul.mubr.msk.f32.gmra.mrb[44].mxu0 %vm629_vm2, %v6520_v10 }
0x1635   : > { %6632 = vmatprep.mubr.f32.mxu0 %v15705_v48  ;;  %v6521_v62 = vsel %vm415_vm0, %v14299_v11, %v6501_v9 }
0x1638   : > { %8718 = vmatmul.mubr.msk.f32.gmra.mrb[46].mxu0 %vm629_vm2, %v6521_v62 }
0x1639   : > { %6638 = vmatprep.mubr.f32.mxu0 %v15705_v48 }
0x164a   : > { %v6503_v38 = vpop.permute.xlu1 %6502  ;;  %v6505_v13 = vpop.permute.xlu0 %6504 }
0x164b   : > { %v6522_v20 = vsel %vm415_vm0, %v14351_v35, %v6503_v38  ;;  %v6523_v29 = vsel %vm415_vm0, %v14355_v21, %v6505_v13 }
0x164c   : > { %8719 = vmatmul.mubr.msk.f32.gmra.mrb[48].mxu0 %vm629_vm2, %v6522_v20 }
0x164d   : > { %6644 = vmatprep.mubr.f32.mxu0 %v15705_v48 }
0x164e   : > { %v6507_v41 = vpop.permute.xlu1 %6506 }
0x164f   : > { %v6524_v56 = vsel %vm415_vm0, %v14369_v32, %v6507_v41  ;;  %v6509_v4 = vpop.permute.xlu0 %6508 }
0x1650   : > { %8720 = vmatmul.mubr.msk.f32.gmra.mrb[50].mxu0 %vm629_vm2, %v6523_v29  ;;  %v6525_v18 = vsel %vm415_vm0, %v14383_v52, %v6509_v4 }
0x1651   : > { %6650 = vmatprep.mubr.f32.mxu0 %v15705_v48 }
0x1654   : > { %8721 = vmatmul.mubr.msk.f32.gmra.mrb[52].mxu0 %vm629_vm2, %v6524_v56 }
0x1655   : > { %6656 = vmatprep.mubr.f32.mxu0 %v15705_v48 }
0x1658   : > { %8722 = vmatmul.mubr.msk.f32.gmra.mrb[54].mxu0 %vm629_vm2, %v6525_v18 }
0x1659   : > { %7792 = vmatprep.mubr.f32.mxu0 %v15705_v48 }
0x16ea   : > { %v6616_v24 = vpop.f32.mrb[40].mxu0 }
0x16eb   : > { %v14440_v28 = vadd.f32 %v6616_v24, %v16008_v7  ;;  %v14442_v8 = vpop.f32.mrb[41].mxu0 }
0x16ed   : > { %v8731_v15 = vmul.f32 -1.442695, %v14440_v28  ;;  %v6663_v4 = vadd.f32 1.0, %v14440_v28 }
0x16ee   : > { %v6622_v23 = vpop.f32.mrb[42].mxu0 }
0x16ef   : > { %10232 = vpow2.f32 %v8731_v15  ;;  %v14446_v43 = vadd.f32 %v6622_v23, %v16008_v7  ;;  %v14448_v60 = vpop.f32.mrb[43].mxu0 }
0x16f1   : > { %v8732_v53 = vmul.f32 -1.442695, %v14446_v43 }
0x16f3   : > { %10234 = vpow2.f32 %v8732_v53 }
0x16f9   : > { %v10233_v0 = vpop.eup %10232 }
0x16fa   : > { %v6807_v51 = vadd.f32 1.0, %v10233_v0 }
0x16fc   : > { %10236 = vrcp.f32 %v6807_v51 }
0x16fd   : > { %v10235_v12 = vpop.eup %10234 }
0x16fe   : > { %v6808_v58 = vadd.f32 1.0, %v10235_v12  ;;  %v8723_v12 = vmul.f32 -1.442695, %v6663_v4 }
0x1700   : > { %10238 = vrcp.f32 %v6808_v58 }
0x1706   : > { %v10237_v16 = vpop.eup %10236 }
0x1707   : > { %6839 = vrot.lane.b32.xlu0 %v10237_v16, %s15651_s22  ;;  %v6628_v39 = vpop.f32.mrb[44].mxu0 }
0x1708   : > { %v14454_v2 = vadd.f32 %v6628_v39, %v16008_v7  ;;  %v14456_v49 = vpop.f32.mrb[45].mxu0  ;;  %v6664_v39 = vadd.f32 1.0, %v14446_v43 }
0x170a   : > { %v10239_v30 = vpop.eup %10238  ;;  %v8733_v61 = vmul.f32 -1.442695, %v14454_v2 }
0x170b   : > { %6841 = vrot.lane.b32.xlu0 %v10239_v30, %s15651_s22  ;;  %v6634_v37 = vpop.f32.mrb[46].mxu0 }
0x170c   : > { %10240 = vpow2.f32 %v8733_v61  ;;  %v14460_v40 = vadd.f32 %v6634_v37, %v16008_v7  ;;  %v14462_v25 = vpop.f32.mrb[47].mxu0 }
0x170e   : > { %v8734_v17 = vmul.f32 -1.442695, %v14460_v40  ;;  %v6666_v20 = vadd.f32 1.0, %v14460_v40 }
0x1710   : > { %10242 = vpow2.f32 %v8734_v17  ;;  %v8726_v24 = vmul.f32 -1.442695, %v6666_v20 }
0x1716   : > { %v10241_v46 = vpop.eup %10240 }
0x1717   : > { %v6809_v5 = vadd.f32 1.0, %v10241_v46 }
0x1719   : > { %10244 = vrcp.f32 %v6809_v5 }
0x171a   : > { %v10243_v36 = vpop.eup %10242 }
0x171b   : > { %v6810_v34 = vadd.f32 1.0, %v10243_v36  ;;  %v8724_v36 = vmul.f32 -1.442695, %v6664_v39 }
0x171d   : > { %10246 = vrcp.f32 %v6810_v34 }
0x171f   : > { %v6640_v10 = vpop.f32.mrb[48].mxu0 }
0x1720   : > { %v14466_v9 = vadd.f32 %v6640_v10, %v16008_v7  ;;  %v14468_v62 = vpop.f32.mrb[49].mxu0 }
0x1722   : > { %v8735_v38 = vmul.f32 -1.442695, %v14466_v9  ;;  %v6667_v15 = vadd.f32 1.0, %v14466_v9 }
0x1723   : > { %v6646_v13 = vpop.f32.mrb[50].mxu0  ;;  %v10245_v56 = vpop.eup %10244 }
0x1724   : > { %10248 = vpow2.f32 %v8735_v38  ;;  %v14473_v41 = vadd.f32 %v6646_v13, %v16008_v7  ;;  %v14475_v29 = vpop.f32.mrb[51].mxu0  ;;  %6843 = vrot.lane.b32.xlu0 %v10245_v56, %s15651_s22  ;;  %v8727_v16 = vmul.f32 -1.442695, %v6667_v15  ;;  %v6665_v38 = vadd.f32 1.0, %v14454_v2 }
0x1726   : > { %v8736_v18 = vmul.f32 -1.442695, %v14473_v41  ;;  %v6668_v34 = vadd.f32 1.0, %v14473_v41 }
0x1727   : > { %v6652_v23 = vpop.f32.mrb[52].mxu0  ;;  %v10247_v51 = vpop.eup %10246 }
0x1728   : > { %10250 = vpow2.f32 %v8736_v18  ;;  %v14482_v53 = vadd.f32 %v6652_v23, %v16008_v7  ;;  %v14484_v0 = vpop.f32.mrb[53].mxu0  ;;  %6845 = vrot.lane.b32.xlu1 %v10247_v51, %s15651_s22  ;;  %v8728_v13 = vmul.f32 -1.442695, %v6668_v34  ;;  %v8725_v18 = vmul.f32 -1.442695, %v6665_v38 }
0x1729   : > { %10252 = vpow2.f32 %v8726_v24 }
0x172a   : > { %v8737_v58 = vmul.f32 -1.442695, %v14482_v53  ;;  %v6669_v51 = vadd.f32 1.0, %v14482_v53 }
0x172b   : > { %v6658_v30 = vpop.f32.mrb[54].mxu0 }
0x172c   : > { %10254 = vpow2.f32 %v8737_v58  ;;  %v14490_v61 = vadd.f32 %v6658_v30, %v16008_v7  ;;  %v14492_v37 = vpop.f32.mrb[55].mxu0 }
0x172d   : > { %10256 = vpow2.f32 %v8723_v12 }
0x172e   : > { %v10249_v17 = vpop.eup %10248  ;;  %v8738_v46 = vmul.f32 -1.442695, %v14490_v61  ;;  %10258 = vpow2.f32 %v8727_v16 }
0x172f   : > { %v6811_v5 = vadd.f32 1.0, %v10249_v17  ;;  %v8729_v17 = vmul.f32 -1.442695, %v6669_v51 }
0x1730   : > { %10260 = vpow2.f32 %v8738_v46 }
0x1731   : > { %10262 = vrcp.f32 %v6811_v5 }
0x1732   : > { %v10251_v10 = vpop.eup %10250  ;;  %10264 = vpow2.f32 %v8724_v36 }
0x1733   : > { %v6812_v20 = vadd.f32 1.0, %v10251_v10  ;;  %v10253_v56 = vpop.eup %10252 }
0x1734   : > { %v6698_v23 = vadd.f32 1.0, %v10253_v56 }
0x1735   : > { %10266 = vrcp.f32 %v6812_v20 }
0x1736   : > { %v10255_v4 = vpop.eup %10254  ;;  %10268 = vpow2.f32 %v8728_v13 }
0x1737   : > { %v6813_v24 = vadd.f32 1.0, %v10255_v4  ;;  %v10257_v15 = vpop.eup %10256 }
0x1738   : > { %v10259_v12 = vpop.eup %10258  ;;  %v6695_v30 = vadd.f32 1.0, %v10257_v15 }
0x1739   : > { %10270 = vrcp.f32 %v6813_v24  ;;  %v6699_v46 = vadd.f32 1.0, %v10259_v12 }
0x173a   : > { %v10261_v58 = vpop.eup %10260  ;;  %10272 = vpow2.f32 %v8725_v18 }
0x173b   : > { %v10263_v16 = vpop.eup %10262  ;;  %v6814_v39 = vadd.f32 1.0, %v10261_v58  ;;  %10274 = vrcp.f32 %v6698_v23 }
0x173c   : > { %6847 = vrot.lane.b32.xlu1 %v10263_v16, %s15651_s22  ;;  %v10265_v5 = vpop.eup %10264 }
0x173d   : > { %10276 = vrcp.f32 %v6814_v39  ;;  %v6696_v34 = vadd.f32 1.0, %v10265_v5 }
0x173e   : > { %10278 = vrcp.f32 %v6695_v30 }
0x173f   : > { %v10267_v36 = vpop.eup %10266  ;;  %10280 = vpow2.f32 %v8729_v17 }
0x1740   : > { %6849 = vrot.lane.b32.xlu1 %v10267_v36, %s15651_s22  ;;  %10282 = vrcp.f32 %v6699_v46  ;;  %v10269_v10 = vpop.eup %10268 }
0x1741   : > { %10284 = vrcp.f32 %v6696_v34  ;;  %v6700_v13 = vadd.f32 1.0, %v10269_v10  ;;  %v6670_v10 = vadd.f32 1.0, %v14490_v61 }
0x1743   : > { %v10271_v38 = vpop.eup %10270  ;;  %10286 = vrcp.f32 %v6700_v13 }
0x1744   : > { %6851 = vrot.lane.b32.xlu1 %v10271_v38, %s15651_s22  ;;  %v10273_v20 = vpop.eup %10272 }
0x1745   : > { %v14501_v56 = vpop.eup %10274  ;;  %v6697_v24 = vadd.f32 1.0, %v10273_v20 }
0x1747   : > { %v10277_v4 = vpop.eup %10276  ;;  %10288 = vrcp.f32 %v6697_v24 }
0x1748   : > { %6853 = vrot.lane.b32.xlu0 %v10277_v4, %s15651_s22  ;;  %6741 = vrot.lane.b32.xlu1 %v14501_v56, %s15651_s22  ;;  %v14506_v18 = vpop.eup %10278 }
0x1749   : > { %v10281_v15 = vpop.eup %10280 }
0x174a   : > { %v14508_v23 = vpop.eup %10282  ;;  %v6701_v51 = vadd.f32 1.0, %v10281_v15 }
0x174b   : > { %v14514_v12 = vpop.eup %10284 }
0x174c   : > { %6735 = vrot.lane.b32.xlu0 %v14506_v18, %s15651_s22  ;;  %6743 = vrot.lane.b32.xlu1 %v14508_v23, %s15651_s22  ;;  %10290 = vrcp.f32 %v6701_v51 }
0x174d   : > { %v14518_v58 = vpop.eup %10286  ;;  %10292 = vtanh.f32 %v14440_v28  ;;  %v8730_v28 = vmul.f32 -1.442695, %v6670_v10 }
0x174e   : > { %10294 = vtanh.f32 %v14446_v43 }
0x174f   : > { %10296 = vtanh.f32 %v14454_v2 }
0x1750   : > { %6737 = vrot.lane.b32.xlu1 %v14514_v12, %s15651_s22  ;;  %10298 = vtanh.f32 %v14460_v40 }
0x1751   : > { %v14522_v16 = vpop.eup %10288  ;;  %10300 = vpow2.f32 %v8730_v28  ;;  %v6462_v28 = vrot.slane %v14257_v45, 1 }
0x1752   : > { %10302 = vtanh.f32 %v14466_v9 }
0x1753   : > { %10304 = vtanh.f32 %v14473_v41 }
0x1754   : > { %6745 = vrot.lane.b32.xlu1 %v14518_v58, %s15651_s22  ;;  %10306 = vtanh.f32 %v14482_v53 }
0x1756   : > { %v14526_v30 = vpop.eup %10290 }
0x1757   : > { %v10293_v39 = vpop.eup %10292 }
0x1758   : > { %6739 = vrot.lane.b32.xlu1 %v14522_v16, %s15651_s22  ;;  %v10295_v5 = vpop.eup %10294 }
0x1759   : > { %v10297_v38 = vpop.eup %10296 }
0x175a   : > { %v10299_v13 = vpop.eup %10298 }
0x175b   : > { %v10301_v15 = vpop.eup %10300 }
0x175c   : > { %6747 = vrot.lane.b32.xlu1 %v14526_v30, %s15651_s22  ;;  %v6702_v2 = vadd.f32 1.0, %v10301_v15  ;;  %v10303_v40 = vpop.eup %10302 }
0x175e   : > { %10308 = vrcp.f32 %v6702_v2  ;;  %v6719_v2 = vmul.f32 %v14506_v18, %v14257_v45 }
0x175f   : > { %10310 = vtanh.f32 %v14490_v61 }
0x1779   : > { %v6840_v17 = vpop.permute.xlu0 %6839 }
0x177a   : > { %v6863_v46 = vmul.f32 %v10293_v39, %v6840_v17  ;;  %v10305_v17 = vpop.eup %10304 }
0x177b   : > { %v10307_v9 = vpop.eup %10306 }
0x177c   : > { %6879 = vrot.lane.b32.xlu0 %v6863_v46, %s15649_s24  ;;  %v14545_v41 = vpop.eup %10308 }
0x177d   : > { %v6842_v36 = vpop.permute.xlu0 %6841  ;;  %v10311_v53 = vpop.eup %10310 }
0x177e   : > { %v6864_v34 = vmul.f32 %v10295_v5, %v6842_v36 }
0x1780   : > { %6881 = vrot.lane.b32.xlu0 %v6864_v34, %s15649_s24 }
0x1796   : > { %v6844_v20 = vpop.permute.xlu0 %6843 }
0x1797   : > { %v6865_v43 = vmul.f32 %v10297_v38, %v6844_v20 }
0x1799   : > { %6883 = vrot.lane.b32.xlu1 %v6865_v43, %s15649_s24 }
0x179a   : > { %v6846_v4 = vpop.permute.xlu1 %6845 }
0x179b   : > { %v6866_v24 = vmul.f32 %v10299_v13, %v6846_v4  ;;  %v14553_v13 = vsel %vm569_vm1, %v6462_v28, 0.0  ;;  %v6463_v4 = vrot.slane %v14264_v19, 1 }
0x179d   : > { %6885 = vrot.lane.b32.xlu0 %v6866_v24, %s15649_s24 }
0x17ae   : > { %v6848_v51 = vpop.permute.xlu1 %6847 }
0x17af   : > { %v6867_v39 = vmul.f32 %v10303_v40, %v6848_v51  ;;  %v14560_v40 = vsel %vm569_vm1, %v6463_v4, 0.0 }
0x17b0   : > { %16009 = vst [vmem:[#allocation39_spill] sm:$0xff] %v14560_v40 }
0x17b1   : > { %6887 = vrot.lane.b32.xlu0 %v6867_v39, %s15649_s24 }
0x17b2   : > { %v6850_v46 = vpop.permute.xlu1 %6849 }
0x17b3   : > { %v6868_v5 = vmul.f32 %v10305_v17, %v6850_v46 }
0x17b5   : > { %6889 = vrot.lane.b32.xlu0 %v6868_v5, %s15649_s24  ;;  %v6720_v5 = vmul.f32 %v14514_v12, %v14264_v19  ;;  %v6465_v12 = vrot.slane %v14301_v54, 1 }
0x17b6   : > { %v6852_v36 = vpop.permute.xlu1 %6851 }
0x17b7   : > { %v6869_v34 = vmul.f32 %v10307_v9, %v6852_v36 }
0x17b9   : > { %6749 = vrot.lane.b32.xlu0 %v14545_v41, %s15651_s22  ;;  %6891 = vrot.lane.b32.xlu1 %v6869_v34, %s15649_s24 }
0x17ba   : > { %v6854_v10 = vpop.permute.xlu0 %6853  ;;  %v6742_v38 = vpop.permute.xlu1 %6741 }
0x17bb   : > { %v6870_v61 = vmul.f32 %v10311_v53, %v6854_v10 }
0x17bd   : > { %6893 = vrot.lane.b32.xlu0 %v6870_v61, %s15649_s24  ;;  %v6464_v61 = vrot.slane %v14297_v57, 1 }
0x17be   : > { %v6744_v20 = vpop.permute.xlu1 %6743  ;;  %v6736_v43 = vpop.permute.xlu0 %6735 }
0x17bf   : > { %v6759_v24 = vmul.f32 %v6736_v43, %v14553_v13  ;;  %v14576_v43 = vsel %vm569_vm1, %v6464_v61, 0.0 }
0x17c0   : > { %16010 = vst [vmem:[#allocation41_spill] sm:$0xff] %v14576_v43 }
0x17c1   : > { %v6767_v39 = vadd.f32 %v6759_v24, %v6719_v2  ;;  %v14582_v2 = vsel %vm569_vm1, %v6465_v12, 0.0 }
0x17c2   : > { %v6738_v15 = vpop.permute.xlu1 %6737 }
0x17c3   : > { %v6760_v51 = vmul.f32 %v6738_v15, %v14560_v40  ;;  %v6721_v15 = vmul.f32 %v14522_v16, %v14297_v57  ;;  %v6466_v16 = vrot.slane %v14353_v42, 1  ;;  %v16036_v57 = vld [vmem:[#allocation45_spill] sm:$0xff] }
0x17c5   : > { %v6768_v9 = vadd.f32 %v6760_v51, %v6720_v5  ;;  %v6762_v51 = vmul.f32 %v6742_v38, %v14582_v2  ;;  %v14596_v38 = vsel %vm569_vm1, %v6466_v16, 0.0 }
0x17c6   : > { %v6746_v10 = vpop.permute.xlu1 %6745 }
0x17ca   : > { %v6740_v28 = vpop.permute.xlu1 %6739 }
0x17cb   : > { %v6761_v4 = vmul.f32 %v6740_v28, %v14576_v43  ;;  %v6467_v28 = vrot.slane %v14357_v1, 1 }
0x17ce   : > { %v6748_v24 = vpop.permute.xlu1 %6747 }
0x17ee   : > { %v6880_v17 = vpop.permute.xlu0 %6879 }
0x17ef   : > { %v14563_v46 = vadd.f32 %v6880_v17, %v6767_v39  ;;  %v6769_v39 = vadd.f32 %v6761_v4, %v6721_v15  ;;  %v6723_v4 = vmul.f32 %v14508_v23, %v14353_v42  ;;  %v14604_v15 = vsel %vm569_vm1, %v6467_v28, 0.0 }
0x17f0   : > { %16012 = vst [vmem:[#allocation50_spill] sm:$0xff] %v14604_v15  ;;  %v6469_v28 = vrot.slane %v14391_v3, 1 }
0x17f1   : > { %10312 = vtanh.f32 %v14563_v46 }
0x17f2   : > { %v6882_v36 = vpop.permute.xlu0 %6881 }
0x17f3   : > { %v14568_v34 = vadd.f32 %v6882_v36, %v6768_v9  ;;  %v6722_v9 = vmul.f32 %v14501_v56, %v14301_v54  ;;  %v6763_v56 = vmul.f32 %v6744_v20, %v14596_v38  ;;  %v6724_v20 = vmul.f32 %v14518_v58, %v14357_v1 }
0x17f4   : > { %v14624_v58 = vsel %vm569_vm1, %v6469_v28, 0.0 }
0x17f5   : > { %10314 = vtanh.f32 %v14568_v34  ;;  %v6770_v36 = vadd.f32 %v6762_v51, %v6722_v9  ;;  %v6468_v51 = vrot.slane %v14371_v26, 1  ;;  %16014 = vst [vmem:[#allocation53_spill] sm:$0xff] %v14624_v58 }
0x17fb   : > { %v10313_v18 = vpop.eup %10312 }
0x17fc   : > { %6975 = vrot.lane.b32.xlu0 %v10313_v18, %s15651_s22 }
0x17ff   : > { %v10315_v53 = vpop.eup %10314 }
0x1800   : > { %6977 = vrot.lane.b32.xlu0 %v10315_v53, %s15651_s22 }
0x180b   : > { %v6884_v17 = vpop.permute.xlu1 %6883 }
0x180c   : > { %v14585_v5 = vadd.f32 %v6884_v17, %v6769_v39  ;;  %v6764_v39 = vmul.f32 %v6746_v10, %v14604_v15  ;;  %v6771_v17 = vadd.f32 %v6763_v56, %v6723_v4  ;;  %v6725_v10 = vmul.f32 %v14526_v30, %v14371_v26 }
0x180e   : > { %16011 = vst [vmem:[#allocation44_spill] sm:$0xff] %v14585_v5  ;;  %10316 = vtanh.f32 %v14585_v5  ;;  %v6772_v16 = vadd.f32 %v6764_v39, %v6724_v20  ;;  %v6726_v39 = vmul.f32 %v14545_v41, %v14391_v3  ;;  %v16017_v41 = vld [vmem:[#allocation33_spill] sm:$0xff] }
0x180f   : > { %v6886_v18 = vpop.permute.xlu0 %6885 }
0x1810   : > { %v14590_v53 = vadd.f32 %v6886_v18, %v6770_v36  ;;  %v14613_v18 = vsel %vm569_vm1, %v6468_v51, 0.0 }
0x1811   : > { %16013 = vst [vmem:[#allocation24_spill] sm:$0xff] %v14613_v18  ;;  %v6765_v23 = vmul.f32 %v6748_v24, %v14613_v18 }
0x1812   : > { %10318 = vtanh.f32 %v14590_v53 }
0x1813   : > { %v6773_v56 = vadd.f32 %v6765_v23, %v6725_v10  ;;  %v6619_v10 = vadd.f32 %v14442_v8, %v16017_v41 }
0x1818   : > { %v10317_v61 = vpop.eup %10316 }
0x1819   : > { %6979 = vrot.lane.b32.xlu0 %v10317_v61, %s15651_s22 }
0x181c   : > { %v10319_v12 = vpop.eup %10318 }
0x181d   : > { %6981 = vrot.lane.b32.xlu1 %v10319_v12, %s15651_s22 }
0x1823   : > { %v6888_v9 = vpop.permute.xlu0 %6887 }
0x1824   : > { %v14608_v36 = vadd.f32 %v6888_v9, %v6771_v17 }
0x1826   : > { %10320 = vtanh.f32 %v14608_v36 }
0x1827   : > { %v6890_v61 = vpop.permute.xlu0 %6889 }
0x1828   : > { %v14618_v12 = vadd.f32 %v6890_v61, %v6772_v16 }
0x182a   : > { %10322 = vtanh.f32 %v14618_v12 }
0x182b   : > { %v6750_v4 = vpop.permute.xlu0 %6749  ;;  %v6892_v51 = vpop.permute.xlu1 %6891 }
0x182c   : > { %v6766_v24 = vmul.f32 %v6750_v4, %v14624_v58  ;;  %v14627_v17 = vadd.f32 %v6892_v51, %v6773_v56  ;;  %v8739_v56 = vmul.f32 -1.442695, %v6619_v10  ;;  %v6631_v10 = vadd.f32 %v14456_v49, %v16017_v41 }
0x182e   : > { %16015 = vst [vmem:[#allocation61_spill] sm:$0xff] %v14627_v17  ;;  %10324 = vtanh.f32 %v14627_v17  ;;  %v6774_v9 = vadd.f32 %v6766_v24, %v6726_v39  ;;  %v16037_v17 = vrot.slane %v16036_v57, 6 }
0x182f   : > { %v6894_v20 = vpop.permute.xlu0 %6893 }
0x1830   : > { %v10321_v30 = vpop.eup %10320  ;;  %v14632_v16 = vadd.f32 %v6894_v20, %v6774_v9  ;;  %v6625_v20 = vadd.f32 %v14448_v60, %v16017_v41  ;;  %v8741_v60 = vmul.f32 -1.442695, %v6631_v10  ;;  %v14752_v43 = vsel %vm7063_vm8, %v16037_v17, 0.0 }
0x1831   : > { %6983 = vrot.lane.b32.xlu1 %v10321_v30, %s15651_s22  ;;  %v6637_v30 = vadd.f32 %v14462_v25, %v16017_v41  ;;  %vm7076_vm6 = vcmp.gt.f32.partialorder %v14752_v43, 0.0 }
0x1832   : > { %16016 = vst [vmem:[#allocation49_spill] sm:$0xff] %v14632_v16  ;;  %10326 = vtanh.f32 %v14632_v16 }
0x1833   : > { %10328 = vpow2.f32 %v8739_v56  ;;  %v8742_v56 = vmul.f32 -1.442695, %v6637_v30  ;;  %v6655_v30 = vadd.f32 %v14484_v0, %v16017_v41 }
0x1834   : > { %v10323_v23 = vpop.eup %10322 }
0x1835   : > { %6985 = vrot.lane.b32.xlu1 %v10323_v23, %s15651_s22  ;;  %v14650_v23 = vld [vmem:[%s15423_s6] ss:$0 sm:$0xff] }
0x1838   : > { %v10325_v61 = vpop.eup %10324 }
0x1839   : > { %6987 = vrot.lane.b32.xlu1 %v10325_v61, %s15651_s22 }
0x183c   : > { %v10327_v28 = vpop.eup %10326 }
0x183d   : > { %6989 = vrot.lane.b32.xlu0 %v10327_v28, %s15651_s22  ;;  %v10329_v4 = vpop.eup %10328  ;;  %v8740_v28 = vmul.f32 -1.442695, %v6625_v20  ;;  %v6649_v20 = vadd.f32 %v14475_v29, %v16017_v41 }
0x183e   : > { %v6935_v51 = vadd.f32 1.0, %v10329_v4 }
0x183f   : > { %v8744_v49 = vmul.f32 -1.442695, %v6649_v20 }
0x1840   : > { %10330 = vrcp.f32 %v6935_v51  ;;  %v6643_v51 = vadd.f32 %v14468_v62, %v16017_v41  ;;  %v6661_v62 = vadd.f32 %v14492_v37, %v16017_v41 }
0x1841   : > { %10332 = vpow2.f32 %v8740_v28 }
0x1842   : > { %10334 = vpow2.f32 %v8742_v56  ;;  %v8743_v58 = vmul.f32 -1.442695, %v6643_v51  ;;  %v8746_v56 = vmul.f32 -1.442695, %v6661_v62 }
0x1843   : > { %10336 = vpow2.f32 %v8741_v60 }
0x184a   : > { %v10331_v24 = vpop.eup %10330 }
0x184b   : > { %v10333_v25 = vpop.eup %10332 }
0x184c   : > { %v10335_v4 = vpop.eup %10334 }
0x184d   : > { %v10337_v7 = vpop.eup %10336 }
0x186e   : > { %v6976_v39 = vpop.permute.xlu0 %6975 }
0x186f   : > { %v14641_v9 = vmul.f32 %v10331_v24, %v6976_v39  ;;  %v6936_v24 = vadd.f32 1.0, %v10333_v25  ;;  %v6938_v39 = vadd.f32 1.0, %v10335_v4 }
0x1871   : > { %v7007_v8 = vmul.f32 %v14650_v23, %v14641_v9  ;;  %10338 = vrcp.f32 %v6936_v24 }
0x1872   : > { %10340 = vrcp.f32 %v6938_v39  ;;  %v6978_v28 = vpop.permute.xlu0 %6977 }
0x1873   : > { %v7015_v61 = vsel %vm415_vm0, %v7007_v8, 0.0  ;;  %v6937_v8 = vadd.f32 1.0, %v10337_v7  ;;  %10342 = vpow2.f32 %v8743_v58 }
0x1874   : > { %7016 = vadd.xlane.f32.xlu0 %v7015_v61  ;;  %v8745_v61 = vmul.f32 -1.442695, %v6655_v30 }
0x1875   : > { %10344 = vrcp.f32 %v6937_v8 }
0x1876   : > { %10346 = vpow2.f32 %v8744_v49 }
0x1877   : > { %10348 = vpow2.f32 %v8745_v61 }
0x1878   : > { %10350 = vpow2.f32 %v8746_v56 }
0x187b   : > { %v10339_v10 = vpop.eup %10338 }
0x187c   : > { %v10341_v60 = vpop.eup %10340  ;;  %v14665_v7 = vmul.f32 %v10339_v10, %v6978_v28 }
0x187d   : > { %v10343_v29 = vpop.eup %10342 }
0x187e   : > { %v6939_v51 = vadd.f32 1.0, %v10343_v29  ;;  %v7008_v37 = vmul.f32 %v14650_v23, %v14665_v7 }
0x187f   : > { %v10345_v0 = vpop.eup %10344 }
0x1880   : > { %v10347_v39 = vpop.eup %10346  ;;  %10352 = vrcp.f32 %v6939_v51  ;;  %v7018_v62 = vsel %vm415_vm0, %v7008_v37, 0.0 }
0x1881   : > { %v6940_v49 = vadd.f32 1.0, %v10347_v39  ;;  %v10349_v30 = vpop.eup %10348 }
0x1882   : > { %v6941_v28 = vadd.f32 1.0, %v10349_v30  ;;  %v10351_v10 = vpop.eup %10350 }
0x1883   : > { %10354 = vrcp.f32 %v6940_v49 }
0x1884   : > { %10356 = vrcp.f32 %v6941_v28 }
0x188a   : > { %v10353_v29 = vpop.eup %10352 }
0x188b   : > { %v6980_v4 = vpop.permute.xlu0 %6979 }
0x188c   : > { %v14673_v20 = vmul.f32 %v10345_v0, %v6980_v4 }
0x188d   : > { %v10355_v51 = vpop.eup %10354 }
0x188e   : > { %v7009_v61 = vmul.f32 %v14650_v23, %v14673_v20  ;;  %v10357_v49 = vpop.eup %10356 }
0x188f   : > { %v6982_v25 = vpop.permute.xlu1 %6981 }
0x1890   : > { %v14667_v58 = vmul.f32 %v10341_v60, %v6982_v25  ;;  %v7021_v56 = vsel %vm415_vm0, %v7009_v61, 0.0  ;;  %v6942_v60 = vadd.f32 1.0, %v10351_v10 }
0x1892   : > { %v7010_v24 = vmul.f32 %v14650_v23, %v14667_v58  ;;  %10358 = vrcp.f32 %v6942_v60 }
0x1894   : > { %v7024_v8 = vsel %vm415_vm0, %v7010_v24, 0.0 }
0x1895   : > { %7025 = vadd.xlane.f32.xlu1 %v7024_v8 }
0x1899   : > { %7019 = vadd.xlane.f32.xlu1 %v7018_v62 }
0x189c   : > { %v10359_v10 = vpop.eup %10358 }
0x189d   : > { %7022 = vadd.xlane.f32.xlu1 %v7021_v56 }
0x18a3   : > { %v6984_v25 = vpop.permute.xlu1 %6983 }
0x18a4   : > { %v14680_v4 = vmul.f32 %v10353_v29, %v6984_v25 }
0x18a6   : > { %v7011_v0 = vmul.f32 %v14650_v23, %v14680_v4 }
0x18a7   : > { %v6986_v24 = vpop.permute.xlu1 %6985 }
0x18a8   : > { %v14684_v39 = vmul.f32 %v10355_v51, %v6986_v24  ;;  %v7027_v37 = vsel %vm415_vm0, %v7011_v0, 0.0  ;;  %v10537_v51 = vld [vmem:[%s10863_s11] sm:$0xff] }
0x18a9   : > { %7028 = vadd.xlane.f32.xlu0 %v7027_v37  ;;  %v8185_v24 = vrot.slane %v10537_v51, 7  ;;  %v10538_v37 = vld [vmem:[%s10863_s11 + $0x8] sm:$0xff] }
0x18aa   : > { %v7012_v8 = vmul.f32 %v14650_v23, %v14684_v39  ;;  %v16020_v51 = vld [vmem:[#allocation16_spill] sm:$0xff] }
0x18ab   : > { %v6988_v30 = vpop.permute.xlu1 %6987  ;;  %9159 = vpush %v8185_v24  ;;  %v8225_v18 = vrot.slane %v16020_v51, 7  ;;  %v16027_v51 = vld [vmem:[#allocation52_spill] sm:$0xff] }
0x18ac   : > { %v14689_v61 = vmul.f32 %v10357_v49, %v6988_v30  ;;  %v7030_v62 = vsel %vm415_vm0, %v7012_v8, 0.0  ;;  %v8186_v8 = vrot.slane %v10538_v37, 7  ;;  %v10539_v49 = vld [vmem:[%s10863_s11 + $0x10] sm:$0xff] }
0x18ad   : > { %7031 = vadd.xlane.f32.xlu0 %v7030_v62  ;;  %v8187_v30 = vrot.slane %v10539_v49, 7  ;;  %v10540_v62 = vld [vmem:[%s10863_s11 + $0x18] sm:$0xff] }
0x18ae   : > { %16018 = vst [vmem:[#allocation43_spill] sm:$0xff] %v14689_v61  ;;  %v7013_v28 = vmul.f32 %v14650_v23, %v14689_v61  ;;  %9161 = vpush %v8186_v8  ;;  %v16021_v37 = vld [vmem:[#allocation17_spill] sm:$0xff] }
0x18af   : > { %v6990_v56 = vpop.permute.xlu0 %6989  ;;  %9163 = vpush %v8187_v30  ;;  %v8226_v49 = vrot.slane %v16021_v37, 7  ;;  %v16024_v30 = vld [vmem:[#allocation20_spill] sm:$0xff] }
0x18b0   : > { %v14694_v60 = vmul.f32 %v10359_v10, %v6990_v56  ;;  %v7033_v29 = vsel %vm415_vm0, %v7013_v28, 0.0  ;;  %v8188_v10 = vrot.slane %v10540_v62, 7  ;;  %v10541_v28 = vld [vmem:[%s10863_s11 + $0x20] sm:$0xff] }
0x18b1   : > { %7034 = vadd.xlane.f32.xlu0 %v7033_v29  ;;  %v8189_v56 = vrot.slane %v10541_v28, 7  ;;  %v10542_v29 = vld [vmem:[%s10863_s11 + $0x28] sm:$0xff]  ;;  %v16022_v62 = vld [vmem:[#allocation18_spill] sm:$0xff] }
0x18b2   : > { %16019 = vst [vmem:[#allocation34_spill] sm:$0xff] %v14694_v60  ;;  %v7014_v25 = vmul.f32 %v14650_v23, %v14694_v60  ;;  %v8190_v41 = vrot.slane %v10542_v29, 7  ;;  %v10543_v23 = vld [vmem:[%s10863_s11 + $0x30] sm:$0xff]  ;;  %9165 = vpush %v8188_v10  ;;  %v8227_v24 = vrot.slane %v16022_v62, 7  ;;  %v16023_v28 = vld [vmem:[#allocation19_spill] sm:$0xff]  ;;  %v8229_v29 = vrot.slane %v16024_v30, 7 }
0x18b3   : > { %9167 = vpush %v8189_v56  ;;  %v8228_v8 = vrot.slane %v16023_v28, 7  ;;  %v16025_v10 = vld [vmem:[#allocation21_spill] sm:$0xff]  ;;  %v16026_v56 = vld [vmem:[#allocation22_spill] sm:$0xff] }
0x18b4   : > { %v7036_v0 = vsel %vm415_vm0, %v7014_v25, 0.0  ;;  %v8191_v25 = vrot.slane %v10543_v23, 7  ;;  %9169 = vpush %v8190_v41  ;;  %v8230_v23 = vrot.slane %v16025_v10, 7  ;;  %v16028_v41 = vrot.slane %v16027_v51, 6 }
0x18b5   : > { %7037 = vadd.xlane.f32.xlu1 %v7036_v0  ;;  %v10544_v0 = vld [vmem:[%s10863_s11 + $0x38] sm:$0xff]  ;;  %s14884_s11 = spop %9127 }
0x18b6   : > { %v8192_v33 = vrot.slane %v10544_v0, 7  ;;  %9171 = vpush %v8191_v25  ;;  %v8231_v0 = vrot.slane %v16026_v56, 7  ;;  %v7064_v37 = vsel %vm7063_vm8, %v16028_v41, 0.0  ;;  %v16029_v25 = vld [vmem:[#allocation23_spill] sm:$0xff]  ;;  %s14886_s26 = spop %9129 }
0x18b7   : > { %v8232_v62 = vrot.slane %v16029_v25, 7  ;;  %vm7072_vm10 = vcmp.gt.f32.partialorder %v7064_v37, 0.0  ;;  %v16034_v37 = vld [vmem:[#allocation54_spill] sm:$0xff]  ;;  %s14888_s27 = spop %9131 }
0x18b8   : > { %9173 = vpush %v8192_v33  ;;  %s14890_s28 = spop %9133 }
0x18b9   : > { %9175 = vpush %v8225_v18  ;;  %v14719_v18 = vld [vmem:[#allocation2] ss:$0 sm:$0xff]  ;;  %s14892_s13 = spop %9135 }
0x18ba   : > { %9177 = vpush %v8226_v49  ;;  %s14894_s14 = spop %9137 }
0x18bb   : > { %9179 = vpush %v8227_v24  ;;  %s14896_s15 = spop %9139 }
0x18bc   : > { %9181 = vpush %v8228_v8  ;;  %s14898_s19 = spop %9141 }
0x18bd   : > { %9183 = vpush %v8229_v29  ;;  %v16030_v29 = vld [vmem:[#allocation14_spill] sm:$0xff]  ;;  %s14900_s21 = spop %9143 }
0x18be   : > { %9185 = vpush %v8230_v23  ;;  %v16031_v23 = vrot.slane %v16030_v29, 6  ;;  %s14902_s23 = spop %9145 }
0x18bf   : > { %9187 = vpush %v8231_v0  ;;  %s14904_s25 = spop %9147 }
0x18c0   : > { %9189 = vpush %v8232_v62  ;;  %v7067_v25 = vsel %vm7063_vm8, %v16031_v23, 0.0  ;;  %v16032_v62 = vld [vmem:[#allocation37_spill] sm:$0xff]  ;;  %s14908_s18 = spop %9149 }
0x18c1   : > { %vm7075_vm7 = vcmp.gt.f32.partialorder %v7067_v25, 0.0  ;;  %s14911_s24 = spop %9151 }
0x18c2   : > { %s14917_s22 = spop %9153 }
0x18c3   : > { %s14919_s20 = spop %9155 }
0x1901   : > { %v7017_v33 = vpop.xlane.xlu0 %7016 }
0x1902   : > { %v7039_v49 = vadd.f32 %v14719_v18, %v7017_v33  ;;  %v16033_v33 = vrot.slane %v16032_v62, 6 }
0x1904   : > { %v7080_v24 = vsel %vm7072_vm10, %v7039_v49, -1e+30  ;;  %v7065_v49 = vsel %vm7063_vm8, %v16033_v33, 0.0 }
0x1905   : > { %v7088_v28 = vsel %vm1205_vm4, %v7080_v24, -inf  ;;  %vm7073_vm13 = vcmp.gt.f32.partialorder %v7065_v49, 0.0 }
0x1906   : > { %v7089_v30 = vrot.slane %v7088_v28, 4 }
0x1908   : > { %v7090_v10 = vmax.f32 %v7088_v28, %v7089_v30 }
0x190a   : > { %v7091_v56 = vrot.slane %v7090_v10, 2 }
0x190c   : > { %v7092_v8 = vmax.f32 %v7090_v10, %v7091_v56 }
0x190e   : > { %v7093_v51 = vrot.slane %v7092_v8, 1 }
0x1910   : > { %v7094_v41 = vmax.f32 %v7092_v8, %v7093_v51  ;;  %v16035_v8 = vrot.slane %v16034_v37, 6 }
0x1912   : > { %vm7144_vm11 = vcmp.ge.f32.partialorder %v7080_v24, %v7094_v41  ;;  %v14739_v51 = vsel %vm7063_vm8, %v16035_v8, 0.0 }
0x1913   : > { %vm7152_vm3 = vmand %vm7144_vm11, %vm7072_vm10  ;;  %vm7074_vm9 = vcmp.gt.f32.partialorder %v14739_v51, 0.0 }
0x1914   : > { %v7160_v47 = vsel %vm7152_vm3, %v11429_v14, 8.0 }
0x1915   : > { %v7168_v24 = vsel %vm1205_vm4, %v7160_v47, inf }
0x1916   : > { %v7169_v23 = vrot.slane %v7168_v24, 4 }
0x1918   : > { %v7170_v37 = vmin.f32 %v7168_v24, %v7169_v23  ;;  %v16038_v24 = vld [vmem:[#allocation56_spill] sm:$0xff] }
0x1919   : > { %v16039_v23 = vrot.slane %v16038_v24, 6 }
0x191a   : > { %v7171_v61 = vrot.slane %v7170_v37, 2 }
0x191c   : > { %v7172_v17 = vmin.f32 %v7170_v37, %v7171_v61 }
0x1922   : > { %v7026_v0 = vpop.xlane.xlu1 %7025 }
0x1923   : > { %v7042_v28 = vadd.f32 %v14719_v18, %v7026_v0 }
0x1925   : > { %v7083_v30 = vsel %vm7075_vm7, %v7042_v28, -1e+30 }
0x1926   : > { %v7109_v10 = vsel %vm1205_vm4, %v7083_v30, -inf  ;;  %v7020_v56 = vpop.xlane.xlu1 %7019 }
0x1927   : > { %v7110_v41 = vrot.slane %v7109_v10, 4  ;;  %v7040_v29 = vadd.f32 %v14719_v18, %v7020_v56 }
0x1929   : > { %v7111_v62 = vmax.f32 %v7109_v10, %v7110_v41  ;;  %v7081_v0 = vsel %vm7073_vm13, %v7040_v29, -1e+30 }
0x192a   : > { %v7095_v33 = vsel %vm1205_vm4, %v7081_v0, -inf  ;;  %v7023_v47 = vpop.xlane.xlu1 %7022 }
0x192b   : > { %v7112_v28 = vrot.slane %v7111_v62, 2  ;;  %v7096_v16 = vrot.slane %v7095_v33, 4  ;;  %v7041_v60 = vadd.f32 %v14719_v18, %v7023_v47 }
0x192d   : > { %v7113_v3 = vmax.f32 %v7111_v62, %v7112_v28  ;;  %v7097_v8 = vmax.f32 %v7095_v33, %v7096_v16  ;;  %v7082_v52 = vsel %vm7074_vm9, %v7041_v60, -1e+30  ;;  %v14757_v16 = vsel %vm7063_vm8, %v16039_v23, 0.0 }
0x192e   : > { %v7102_v56 = vsel %vm1205_vm4, %v7082_v52, -inf  ;;  %vm7077_vm14 = vcmp.gt.f32.partialorder %v14757_v16, 0.0 }
0x192f   : > { %v7114_v10 = vrot.slane %v7113_v3, 1  ;;  %v7098_v41 = vrot.slane %v7097_v8, 2  ;;  %v7103_v29 = vrot.slane %v7102_v56, 4 }
0x1931   : > { %v7115_v26 = vmax.f32 %v7113_v3, %v7114_v10  ;;  %v7099_v55 = vmax.f32 %v7097_v8, %v7098_v41  ;;  %v7104_v47 = vmax.f32 %v7102_v56, %v7103_v29  ;;  %v16040_v56 = vld [vmem:[#allocation59_spill] sm:$0xff] }
0x1932   : > { %v16041_v10 = vrot.slane %v16040_v56, 6 }
0x1933   : > { %vm7147_vm15 = vcmp.ge.f32.partialorder %v7083_v30, %v7115_v26  ;;  %v7100_v60 = vrot.slane %v7099_v55, 1  ;;  %v7105_v33 = vrot.slane %v7104_v47, 2 }
0x1934   : > { %vm7155_vm12 = vmand %vm7147_vm15, %vm7075_vm7  ;;  %v14766_v41 = vsel %vm7063_vm8, %v16041_v10, 0.0 }
0x1935   : > { %v7163_v3 = vsel %vm7155_vm12, %v11429_v14, 8.0  ;;  %v7101_v28 = vmax.f32 %v7099_v55, %v7100_v60  ;;  %v7106_v8 = vmax.f32 %v7104_v47, %v7105_v33  ;;  %v16042_v55 = vld [vmem:[#allocation55_spill] sm:$0xff]  ;;  %vm7078_vm11 = vcmp.gt.f32.partialorder %v14766_v41, 0.0 }
0x1936   : > { %v7029_v62 = vpop.xlane.xlu0 %7028  ;;  %v7189_v26 = vsel %vm1205_vm4, %v7163_v3, inf  ;;  %v16043_v47 = vrot.slane %v16042_v55, 6 }
0x1937   : > { %v7043_v57 = vadd.f32 %v14719_v18, %v7029_v62  ;;  %v7190_v25 = vrot.slane %v7189_v26, 4  ;;  %vm7145_vm5 = vcmp.ge.f32.partialorder %v7081_v0, %v7101_v28  ;;  %v7107_v37 = vrot.slane %v7106_v8, 1 }
0x1938   : > { %v14776_v24 = vsel %vm7063_vm8, %v16043_v47, 0.0  ;;  %vm7153_vm10 = vmand %vm7145_vm5, %vm7073_vm13  ;;  %v7173_v62 = vrot.slane %v7172_v17, 1 }
0x1939   : > { %v7084_v30 = vsel %vm7076_vm6, %v7043_v57, -1e+30  ;;  %v7191_v33 = vmin.f32 %v7189_v26, %v7190_v25  ;;  %v7161_v57 = vsel %vm7153_vm10, %v11429_v14, 8.0  ;;  %v7108_v3 = vmax.f32 %v7106_v8, %v7107_v37 }
0x193a   : > { %v7116_v61 = vsel %vm1205_vm4, %v7084_v30, -inf  ;;  %v7032_v29 = vpop.xlane.xlu0 %7031  ;;  %v7175_v0 = vsel %vm1205_vm4, %v7161_v57, inf  ;;  %vm7079_vm7 = vcmp.gt.f32.partialorder %v14776_v24, 0.0  ;;  %v14790_v25 = vmin.f32 %v7172_v17, %v7173_v62 }
0x193b   : > { %v7117_v23 = vrot.slane %v7116_v61, 4  ;;  %v7044_v60 = vadd.f32 %v14719_v18, %v7032_v29  ;;  %v7192_v10 = vrot.slane %v7191_v33, 2  ;;  %v7176_v55 = vrot.slane %v7175_v0, 4 }
0x193c   : > { %vm7146_vm8 = vcmp.ge.f32.partialorder %v7082_v52, %v7108_v3  ;;  %vm7224_vm13 = vcmp.eq.f32.partialorder %v11429_v14, %v14790_v25 }
0x193d   : > { %v7118_v28 = vmax.f32 %v7116_v61, %v7117_v23  ;;  %v7085_v56 = vsel %vm7077_vm14, %v7044_v60, -1e+30  ;;  %vm7154_vm3 = vmand %vm7146_vm8, %vm7074_vm9  ;;  %v7193_v61 = vmin.f32 %v7191_v33, %v7192_v10  ;;  %v7177_v37 = vmin.f32 %v7175_v0, %v7176_v55 }
0x193e   : > { %v7123_v49 = vsel %vm1205_vm4, %v7085_v56, -inf  ;;  %v7035_v47 = vpop.xlane.xlu0 %7034  ;;  %v7162_v23 = vsel %vm7154_vm3, %v11429_v14, 8.0 }
0x193f   : > { %v7119_v29 = vrot.slane %v7118_v28, 2  ;;  %v7124_v26 = vrot.slane %v7123_v49, 4  ;;  %v7045_v8 = vadd.f32 %v14719_v18, %v7035_v47  ;;  %v7182_v52 = vsel %vm1205_vm4, %v7162_v23, inf }
0x1940   : > { %v7194_v51 = vrot.slane %v7193_v61, 1  ;;  %v7178_v15 = vrot.slane %v7177_v37, 2  ;;  %v7183_v1 = vrot.slane %v7182_v52, 4 }
0x1941   : > { %v7120_v60 = vmax.f32 %v7118_v28, %v7119_v29  ;;  %v7125_v57 = vmax.f32 %v7123_v49, %v7124_v26  ;;  %v7086_v3 = vsel %vm7078_vm11, %v7045_v8, -1e+30 }
0x1942   : > { %v7130_v47 = vsel %vm1205_vm4, %v7086_v3, -inf  ;;  %v7038_v40 = vpop.xlane.xlu1 %7037  ;;  %v7195_v0 = vmin.f32 %v7193_v61, %v7194_v51  ;;  %v7179_v10 = vmin.f32 %v7177_v37, %v7178_v15  ;;  %v7184_v28 = vmin.f32 %v7182_v52, %v7183_v1 }
0x1943   : > { %v7121_v22 = vrot.slane %v7120_v60, 1  ;;  %v7126_v17 = vrot.slane %v7125_v57, 2  ;;  %v7131_v62 = vrot.slane %v7130_v47, 4  ;;  %v7046_v33 = vadd.f32 %v14719_v18, %v7038_v40 }
0x1944   : > { %v7185_v8 = vrot.slane %v7184_v28, 2  ;;  %vm7275_vm9 = vcmp.gt.f32.partialorder %v11429_v14, %v7195_v0  ;;  %v7180_v15 = vrot.slane %v7179_v10, 1  ;;  %v8747_v1 = vsel %vm7224_vm13, 1.0, %v15705_v48 }
0x1945   : > { %v7122_v55 = vmax.f32 %v7120_v60, %v7121_v22  ;;  %v7127_v49 = vmax.f32 %v7125_v57, %v7126_v17  ;;  %v7132_v29 = vmax.f32 %v7130_v47, %v7131_v62  ;;  %v7087_v26 = vsel %vm7079_vm7, %v7046_v33, -1e+30 }
0x1946   : > { %v7137_v23 = vsel %vm1205_vm4, %v7087_v26, -inf  ;;  %v8766_v22 = vsel %vm7275_vm9, 1.0, %v15705_v48  ;;  %vm7227_vm5 = vcmp.eq.f32.partialorder %v11429_v14, %v7195_v0  ;;  %v7186_v57 = vmin.f32 %v7184_v28, %v7185_v8 }
0x1947   : > { %vm7148_vm15 = vcmp.ge.f32.partialorder %v7084_v30, %v7122_v55  ;;  %v7128_v5 = vrot.slane %v7127_v49, 1  ;;  %v7133_v40 = vrot.slane %v7132_v29, 2  ;;  %v7138_v18 = vrot.slane %v7137_v23, 4 }
0x1948   : > { %vm7156_vm12 = vmand %vm7148_vm15, %vm7076_vm6  ;;  %v9542_v51 = vpack.i.bf16 %v8747_v1, %v8766_v22  ;;  %v7181_v62 = vmin.f32 %v7179_v10, %v7180_v15  ;;  %v8750_v33 = vsel %vm7227_vm5, 1.0, %v15705_v48  ;;  %vm7251_vm8 = vcmp.lt.f32.partialorder %v11429_v14, %v7195_v0 }
0x1949   : > { %v7164_v61 = vsel %vm7156_vm12, %v11429_v14, 8.0  ;;  %v7129_v37 = vmax.f32 %v7127_v49, %v7128_v5  ;;  %v7134_v60 = vmax.f32 %v7132_v29, %v7133_v40  ;;  %v7139_v52 = vmax.f32 %v7137_v23, %v7138_v18 }
0x194a   : > { %v7196_v30 = vsel %vm1205_vm4, %v7164_v61, inf  ;;  %9543 = vperm.xlu1 %9260, %v9542_v51   ;;  %v7187_v28 = vrot.slane %v7186_v57, 1  ;;  %vm7248_vm13 = vcmp.lt.f32.partialorder %v11429_v14, %v14790_v25  ;;  %vm7272_vm9 = vcmp.gt.f32.partialorder %v11429_v14, %v14790_v25 }
0x194b   : > { %v7197_v47 = vrot.slane %v7196_v30, 4  ;;  %vm7149_vm10 = vcmp.ge.f32.partialorder %v7085_v56, %v7129_v37  ;;  %v7135_v17 = vrot.slane %v7134_v60, 1  ;;  %v7140_v43 = vrot.slane %v7139_v52, 2 }
0x194c   : > { %vm7157_vm6 = vmand %vm7149_vm10, %vm7077_vm14  ;;  %v8758_v56 = vsel %vm7251_vm8, 1.0, %v15705_v48  ;;  %vm7249_vm15 = vcmp.lt.f32.partialorder %v11429_v14, %v7181_v62  ;;  %v7188_v22 = vmin.f32 %v7186_v57, %v7187_v28 }
0x194d   : > { %v7198_v5 = vmin.f32 %v7196_v30, %v7197_v47  ;;  %v7165_v55 = vsel %vm7157_vm6, %v11429_v14, 8.0  ;;  %v7136_v49 = vmax.f32 %v7134_v60, %v7135_v17  ;;  %v7141_v29 = vmax.f32 %v7139_v52, %v7140_v43 }
0x194e   : > { %v7203_v8 = vsel %vm1205_vm4, %v7165_v55, inf  ;;  %v9537_v40 = vpack.i.bf16 %v8758_v56, %v8750_v33  ;;  %v8755_v60 = vsel %vm7248_vm13, 1.0, %v15705_v48  ;;  %v8763_v52 = vsel %vm7272_vm9, 1.0, %v15705_v48 }
0x194f   : > { %v7199_v23 = vrot.slane %v7198_v5, 2  ;;  %v7204_v10 = vrot.slane %v7203_v8, 4  ;;  %vm7150_vm3 = vcmp.ge.f32.partialorder %v7086_v3, %v7136_v49  ;;  %v7142_v16 = vrot.slane %v7141_v29, 1 }
0x1950   : > { %vm7158_vm14 = vmand %vm7150_vm3, %vm7078_vm11  ;;  %9538 = vperm.xlu0 %9266, %v9537_v40   ;;  %vm7225_vm11 = vcmp.eq.f32.partialorder %v11429_v14, %v7181_v62  ;;  %v8756_v30 = vsel %vm7249_vm15, 1.0, %v15705_v48  ;;  %vm7226_vm10 = vcmp.eq.f32.partialorder %v11429_v14, %v7188_v22 }
0x1951   : > { %v7200_v0 = vmin.f32 %v7198_v5, %v7199_v23  ;;  %v7205_v18 = vmin.f32 %v7203_v8, %v7204_v10  ;;  %v7166_v15 = vsel %vm7158_vm14, %v11429_v14, 8.0  ;;  %v7143_v1 = vmax.f32 %v7141_v29, %v7142_v16 }
0x1952   : > { %v7210_v3 = vsel %vm1205_vm4, %v7166_v15, inf  ;;  %v8748_v17 = vsel %vm7225_vm11, 1.0, %v15705_v48  ;;  %vm7250_vm14 = vcmp.lt.f32.partialorder %v11429_v14, %v7188_v22 }
0x1953   : > { %v7201_v41 = vrot.slane %v7200_v0, 1  ;;  %v7206_v61 = vrot.slane %v7205_v18, 2  ;;  %v7211_v37 = vrot.slane %v7210_v3, 4  ;;  %vm7151_vm12 = vcmp.ge.f32.partialorder %v7087_v26, %v7143_v1 }
0x1954   : > { %vm7159_vm5 = vmand %vm7151_vm12, %vm7079_vm7  ;;  %vm7273_vm7 = vcmp.gt.f32.partialorder %v11429_v14, %v7181_v62 }
0x1955   : > { %v7202_v57 = vmin.f32 %v7200_v0, %v7201_v41  ;;  %v7207_v51 = vmin.f32 %v7205_v18, %v7206_v61  ;;  %v7212_v26 = vmin.f32 %v7210_v3, %v7211_v37  ;;  %v7167_v24 = vsel %vm7159_vm5, %v11429_v14, 8.0 }
0x1956   : > { %v7217_v47 = vsel %vm1205_vm4, %v7167_v24, inf  ;;  %v8764_v23 = vsel %vm7273_vm7, 1.0, %v15705_v48  ;;  %vm7274_vm4 = vcmp.gt.f32.partialorder %v11429_v14, %v7188_v22  ;;  %v8749_v61 = vsel %vm7226_vm10, 1.0, %v15705_v48 }
0x1957   : > { %v7208_v43 = vrot.slane %v7207_v51, 1  ;;  %v7213_v25 = vrot.slane %v7212_v26, 2  ;;  %v7218_v33 = vrot.slane %v7217_v47, 4  ;;  %vm7228_vm6 = vcmp.eq.f32.partialorder %v11429_v14, %v7202_v57 }
0x1958   : > { %v8751_v5 = vsel %vm7228_vm6, 1.0, %v15705_v48  ;;  %vm7252_vm8 = vcmp.lt.f32.partialorder %v11429_v14, %v7202_v57  ;;  %vm7276_vm3 = vcmp.gt.f32.partialorder %v11429_v14, %v7202_v57 }
0x1959   : > { %v7209_v55 = vmin.f32 %v7207_v51, %v7208_v43  ;;  %v7214_v49 = vmin.f32 %v7212_v26, %v7213_v25  ;;  %v7219_v29 = vmin.f32 %v7217_v47, %v7218_v33  ;;  %v9547_v28 = vpack.i.bf16 %v8751_v5, %v8755_v60 }
0x195a   : > { %v8759_v8 = vsel %vm7252_vm8, 1.0, %v15705_v48  ;;  %v8767_v56 = vsel %vm7276_vm3, 1.0, %v15705_v48  ;;  %v8765_v26 = vsel %vm7274_vm4, 1.0, %v15705_v48  ;;  %vm8288_vm8 = vcmask 1043459  }
0x195b   : > { %v7215_v10 = vrot.slane %v7214_v49, 1  ;;  %v7220_v16 = vrot.slane %v7219_v29, 2  ;;  %9548 = vperm.xlu1 %9260, %v9547_v28   ;;  %v9552_v40 = vpack.i.bf16 %v8763_v52, %v8759_v8  ;;  %vm7229_vm13 = vcmp.eq.f32.partialorder %v11429_v14, %v7209_v55 }
0x195c   : > { %v8752_v0 = vsel %vm7229_vm13, 1.0, %v15705_v48  ;;  %v9557_v18 = vpack.i.bf16 %v8748_v17, %v8767_v56  ;;  %vm7253_vm9 = vcmp.lt.f32.partialorder %v11429_v14, %v7209_v55  ;;  %vm7277_vm15 = vcmp.gt.f32.partialorder %v11429_v14, %v7209_v55 }
0x195d   : > { %v7216_v15 = vmin.f32 %v7214_v49, %v7215_v10  ;;  %v7221_v1 = vmin.f32 %v7219_v29, %v7220_v16  ;;  %9553 = vperm.xlu0 %9266, %v9552_v40   ;;  %v9562_v62 = vpack.i.bf16 %v8752_v0, %v8756_v30  ;;  %v8760_v3 = vsel %vm7253_vm9, 1.0, %v15705_v48 }
0x195e   : > { %v9567_v41 = vpack.i.bf16 %v8764_v23, %v8760_v3  ;;  %v8768_v37 = vsel %vm7277_vm15, 1.0, %v15705_v48  ;;  %v8757_v30 = vsel %vm7250_vm14, 1.0, %v15705_v48  ;;  %v7497_v55 = vstv %s14884_s11 }
0x195f   : > { %9558 = vperm.xlu1 %9260, %v9557_v18   ;;  %v9572_v60 = vpack.i.bf16 %v8749_v61, %v8768_v37  ;;  %vm7230_vm11 = vcmp.eq.f32.partialorder %v11429_v14, %v7216_v15  ;;  %vm7254_vm12 = vcmp.lt.f32.partialorder %v11429_v14, %v7216_v15  ;;  %v7222_v52 = vrot.slane %v7221_v1, 1 }
0x1960   : > { %v8753_v57 = vsel %vm7230_vm11, 1.0, %v15705_v48  ;;  %v8761_v51 = vsel %vm7254_vm12, 1.0, %v15705_v48  ;;  %vm7278_vm5 = vcmp.gt.f32.partialorder %v11429_v14, %v7216_v15  ;;  %v7500_v49 = vstv %s14886_s26 }
0x1961   : > { %9563 = vperm.xlu0 %9266, %v9562_v62   ;;  %v9577_v24 = vpack.i.bf16 %v8753_v57, %v8757_v30  ;;  %v9582_v47 = vpack.i.bf16 %v8765_v26, %v8761_v51  ;;  %v7223_v17 = vmin.f32 %v7221_v1, %v7222_v52  ;;  %v8769_v25 = vsel %vm7278_vm5, 1.0, %v15705_v48 }
0x1962   : > { %v7503_v28 = vstv %s14888_s27  ;;  %v7506_v10 = vstv %s14890_s28  ;;  %v7509_v16 = vstv %s14892_s13  ;;  %v7512_v40 = vstv %s14894_s14  ;;  %s14929_s28 = spop %9157 }
0x1963   : > { %9568 = vperm.xlu1 %9260, %v9567_v41   ;;  %vm7231_vm7 = vcmp.eq.f32.partialorder %v11429_v14, %v7223_v17  ;;  %vm7255_vm10 = vcmp.lt.f32.partialorder %v11429_v14, %v7223_v17  ;;  %vm7279_vm6 = vcmp.gt.f32.partialorder %v11429_v14, %v7223_v17  ;;  %v7515_v0 = vstv %s14896_s15  ;;  %s15318_s11 = spop %9159 }
0x1964   : > { %v8754_v43 = vsel %vm7231_vm7, 1.0, %v15705_v48  ;;  %v8762_v22 = vsel %vm7255_vm10, 1.0, %v15705_v48  ;;  %v8770_v5 = vsel %vm7279_vm6, 1.0, %v15705_v48  ;;  %v7518_v3 = vstv %s14898_s19  ;;  %s15322_s26 = spop %9161 }
0x1965   : > { %9573 = vperm.xlu0 %9266, %v9572_v60   ;;  %v9587_v33 = vpack.i.bf16 %v8754_v43, %v8769_v25  ;;  %v7537_v41 = vstv %s14900_s21  ;;  %v7540_v61 = vstv %s14902_s23  ;;  %v7543_v37 = vstv %s14904_s25  ;;  %s15324_s27 = spop %9163 }
0x1966   : > { %v7546_v51 = vstv %s14908_s18  ;;  %v7549_v26 = vstv %s14911_s24  ;;  %v14939_v25 = vmul.f32 %v7537_v41, %v14255_v63  ;;  %s16048_s24 = smov 32   ;;  %s15328_s13 = spop %9165  ;;  %vm8291_vm3 = vcmask 1044484  }
0x1967   : > { %9578 = vperm.xlu1 %9260, %v9577_v24   ;;  %v7552_v24 = vstv %s14917_s22  ;;  %s16066_s22 = smov 64   ;;  %s15332_s14 = spop %9167  ;;  %vm8294_vm14 = vcmask 1045509   ;;  %vm8297_vm4 = vcmask 1046534   ;;  %vm8300_vm13 = vcmask 1047559  }
0x1968   : > { %s15336_s15 = spop %9169 }
0x1969   : > { %9583 = vperm.xlu0 %9266, %v9582_v47   ;;  %v7558_v47 = vstv %s14929_s28  ;;  %s15340_s19 = spop %9171 }
0x196a   : > { %s15344_s21 = spop %9173 }
0x196b   : > { %9588 = vperm.xlu1 %9260, %v9587_v33   ;;  %v14942_v33 = vmul.f32 %v7537_v41, %v14257_v45  ;;  %s9176_s23 = spop %9175 }
0x196c   : > { %s9178_s25 = spop %9177 }
0x196d   : > { %7381 = vperm.xlu0 %9266, %v8762_v22   ;;  %v14945_v22 = vmul.f32 %v7540_v61, %v14262_v44  ;;  %s9180_s18 = spop %9179 }
0x196e   : > { %s9182_s28 = spop %9181 }
0x196f   : > { %7437 = vperm.xlu1 %9260, %v8770_v5   ;;  %v7587_v5 = vmul.f32 %v7546_v51, %v14301_v54 }
0x19c9   : > { %v9544_v14 = vpop.permute.xlu1 %9543 }
0x19ca   : > { %v9545_v23 = vunpack.i.l.bf16 %v9544_v14 }
0x19cc   : > { %v7443_v57 = vmul.f32 %v9545_v23, %v14315_v6  ;;  %v7483_v30 = vmul.f32 %v9545_v23, %v14582_v2  ;;  %v14948_v6 = vmul.f32 %v7540_v61, %v14264_v19  ;;  %v14953_v2 = vmul.f32 %v7543_v37, %v14295_v50 }
0x19cd   : > { %v14958_v23 = vmul.f32 %v7549_v26, %v14351_v35 }
0x19cf   : > { %v9539_v29 = vpop.permute.xlu0 %9538 }
0x19d0   : > { %v9541_v8 = vunpack.i.h.bf16 %v9539_v29  ;;  %v9540_v56 = vunpack.i.l.bf16 %v9539_v29 }
0x19d2   : > { %v7387_v18 = vmul.f32 %v9541_v8, %v14299_v11  ;;  %v7467_v15 = vmul.f32 %v9541_v8, %v14301_v54  ;;  %v7339_v1 = vmul.f32 %v9540_v56, %v14667_v58  ;;  %v7459_v62 = vmul.f32 %v9540_v56, %v14590_v53 }
0x19d3   : > { %v7555_v58 = vstv %s14919_s20  ;;  %v9546_v53 = vunpack.i.h.bf16 %v9544_v14  ;;  %v7563_v56 = vmul.f32 %v7546_v51, %v14299_v11  ;;  %s16065_s20 = smov 96  }
0x19d4   : > { %v7395_v60 = vadd.f32 %v7387_v18, %v7339_v1  ;;  %v7475_v52 = vadd.f32 %v7467_v15, %v7459_v62  ;;  %v14961_v1 = vmul.f32 %v7549_v26, %v14353_v42  ;;  %v14966_v62 = vmul.f32 %v7552_v24, %v14355_v21 }
0x19d5   : > { %v7336_v41 = vmul.f32 %v9546_v53, %v14641_v9 }
0x19d6   : > { %v7451_v17 = vadd.f32 %v7443_v57, %v7395_v60  ;;  %v7491_v43 = vadd.f32 %v7483_v30, %v7475_v52 }
0x19d8   : > { %v7523_v14 = vmul.f32 %v7506_v10, %v7451_v17  ;;  %v7579_v8 = vmul.f32 %v7506_v10, %v7491_v43  ;;  %v7456_v10 = vmul.f32 %v9546_v53, %v14563_v46 }
0x19da   : > { %v9549_v29 = vpop.permute.xlu1 %9548  ;;  %v14969_v61 = vadd.f32 %v7587_v5, %v7579_v8  ;;  %v14976_v17 = vadd.f32 %v7563_v56, %v7523_v14 }
0x19db   : > { %v9551_v18 = vunpack.i.h.bf16 %v9549_v29  ;;  %v9550_v15 = vunpack.i.l.bf16 %v9549_v29 }
0x19dc   : > { %v9554_v54 = vpop.permute.xlu0 %9553 }
0x19dd   : > { %v9556_v11 = vunpack.i.h.bf16 %v9554_v54  ;;  %v9555_v60 = vunpack.i.l.bf16 %v9554_v54  ;;  %v7460_v52 = vmul.f32 %v9551_v18, %v14608_v36  ;;  %v7340_v57 = vmul.f32 %v9551_v18, %v14680_v4 }
0x19de   : > { %v7384_v30 = vmul.f32 %v9550_v15, %v14255_v63  ;;  %v7464_v51 = vmul.f32 %v9550_v15, %v14257_v45  ;;  %v9559_v26 = vpop.permute.xlu1 %9558  ;;  %v14985_v63 = vmul.f32 %v7555_v58, %v14369_v32 }
0x19df   : > { %v7440_v9 = vmul.f32 %v9556_v11, %v14267_v31  ;;  %v7480_v43 = vmul.f32 %v9556_v11, %v14553_v13  ;;  %v7388_v46 = vmul.f32 %v9555_v60, %v14351_v35  ;;  %v7468_v53 = vmul.f32 %v9555_v60, %v14353_v42 }
0x19e0   : > { %v7392_v5 = vadd.f32 %v7384_v30, %v7336_v41  ;;  %v7472_v29 = vadd.f32 %v7464_v51, %v7456_v10  ;;  %v9564_v36 = vpop.permute.xlu0 %9563  ;;  %v9561_v8 = vunpack.i.h.bf16 %v9559_v26  ;;  %v9560_v4 = vunpack.i.l.bf16 %v9559_v26 }
0x19e1   : > { %v7476_v45 = vadd.f32 %v7468_v53, %v7460_v52  ;;  %v9566_v14 = vunpack.i.h.bf16 %v9564_v36  ;;  %v9565_v56 = vunpack.i.l.bf16 %v9564_v36  ;;  %v7611_v42 = vrot.slane %v14976_v17, 1  ;;  %v16045_v36 = vld [vmem:[#allocation38_spill] sm:$0xff] }
0x19e2   : > { %v7448_v31 = vadd.f32 %v7440_v9, %v7392_v5  ;;  %v14987_v18 = vadd.f32 %v7480_v43, %v7472_v29  ;;  %v7457_v35 = vmul.f32 %v9561_v8, %v14568_v34  ;;  %v9569_v13 = vpop.permute.xlu1 %9568  ;;  %v7396_v15 = vadd.f32 %v7388_v46, %v7340_v57  ;;  %v16044_v5 = vld [vmem:[#allocation44_spill] sm:$0xff] }
0x19e3   : > { %v7385_v41 = vmul.f32 %v9565_v56, %v14262_v44  ;;  %v7465_v54 = vmul.f32 %v9565_v56, %v14264_v19  ;;  %v7337_v10 = vmul.f32 %v9561_v8, %v14665_v7  ;;  %v7444_v11 = vmul.f32 %v9560_v4, %v14374_v59 }
0x19e4   : > { %v7484_v60 = vmul.f32 %v9560_v4, %v14596_v38  ;;  %v7520_v52 = vmul.f32 %v7497_v55, %v7448_v31  ;;  %v9574_v30 = vpop.permute.xlu0 %9573  ;;  %v9571_v51 = vunpack.i.h.bf16 %v9569_v13  ;;  %v7341_v34 = vmul.f32 %v9566_v14, %v14684_v39 }
0x19e5   : > { %v7473_v26 = vadd.f32 %v7465_v54, %v7457_v35  ;;  %v9576_v9 = vunpack.i.h.bf16 %v9574_v30  ;;  %v9575_v57 = vunpack.i.l.bf16 %v9574_v30  ;;  %v7461_v44 = vmul.f32 %v9566_v14, %v14618_v12  ;;  %v16046_v12 = vld [vmem:[#allocation39_spill] sm:$0xff] }
0x19e6   : > { %v7452_v43 = vadd.f32 %v7444_v11, %v7396_v15  ;;  %v15000_v19 = vadd.f32 %v7484_v60, %v7476_v45  ;;  %v7441_v7 = vmul.f32 %v9571_v51, %v14273_v27  ;;  %v9579_v59 = vpop.permute.xlu1 %9578  ;;  %v7393_v46 = vadd.f32 %v7385_v41, %v7337_v10  ;;  %v16047_v15 = vld [vmem:[#allocation36_spill] sm:$0xff]  ;;  %v16049_v10 = vld [vmem:[#allocation50_spill] sm:$0xff] }
0x19e7   : > { %v15004_v38 = vadd.f32 %v14939_v25, %v7520_v52  ;;  %v7338_v53 = vmul.f32 %v9576_v9, %v14673_v20  ;;  %v7458_v29 = vmul.f32 %v9576_v9, %v16044_v5  ;;  %v7445_v8 = vmul.f32 %v9575_v57, %v16045_v36  ;;  %v16050_v52 = vld [vmem:[#allocation35_spill] sm:$0xff] }
0x19e8   : > { %v7524_v39 = vmul.f32 %v7509_v16, %v7452_v43  ;;  %v7481_v4 = vmul.f32 %v9571_v51, %v16046_v12  ;;  %v9570_v45 = vunpack.i.l.bf16 %v9569_v13  ;;  %v9584_v14 = vpop.permute.xlu0 %9583  ;;  %v7449_v56 = vadd.f32 %v7441_v7, %v7393_v46  ;;  %v16051_v9 = vld [vmem:[#allocation15_spill] sm:$0xff]  ;;  %v16054_v12 = vld [vmem:[#allocation61_spill] sm:$0xff] }
0x19e9   : > { %v7627_v27 = vsel %vm569_vm1, %v7611_v42, 0.0  ;;  %v9586_v31 = vunpack.i.h.bf16 %v9584_v14  ;;  %v9585_v35 = vunpack.i.l.bf16 %v9584_v14  ;;  %v9581_v54 = vunpack.i.h.bf16 %v9579_v59  ;;  %v16052_v7 = vld [vmem:[#allocation43_spill] sm:$0xff] }
0x19ea   : > { %v7389_v25 = vmul.f32 %v9570_v45, %v14355_v21  ;;  %v7469_v20 = vmul.f32 %v9570_v45, %v16047_v15  ;;  %v7489_v41 = vadd.f32 %v7481_v4, %v7473_v26  ;;  %7678 = vrot.lane.b32.xlu0 %v7627_v27, %s16048_s24  ;;  %v7485_v11 = vmul.f32 %v9575_v57, %v16049_v10  ;;  %v9589_v5 = vpop.permute.xlu1 %9588  ;;  %v16053_v26 = vld [vmem:[#allocation41_spill] sm:$0xff] }
0x19eb   : > { %v7521_v60 = vmul.f32 %v7500_v49, %v7449_v56  ;;  %v7442_v13 = vmul.f32 %v9586_v31, %v16050_v52  ;;  %v7390_v30 = vmul.f32 %v9585_v35, %v14369_v32  ;;  %v7470_v43 = vmul.f32 %v9585_v35, %v16051_v9  ;;  %v16055_v35 = vld [vmem:[#allocation57_spill] sm:$0xff] }
0x19ec   : > { %v7397_v51 = vadd.f32 %v7389_v25, %v7341_v34  ;;  %v7477_v42 = vadd.f32 %v7469_v20, %v7461_v44  ;;  %v7342_v21 = vmul.f32 %v9581_v54, %v16052_v7  ;;  %v7382_v46 = vpop.permute.xlu0 %7381  ;;  %v7482_v36 = vmul.f32 %v9586_v31, %v16053_v26  ;;  %v16056_v31 = vld [vmem:[#allocation51_spill] sm:$0xff]  ;;  %v16061_v7 = vld [vmem:[#allocation24_spill] sm:$0xff] }
0x19ed   : > { %v7462_v4 = vmul.f32 %v9581_v54, %v16054_v12  ;;  %v9580_v45 = vunpack.i.l.bf16 %v9579_v59  ;;  %v15026_v57 = vadd.f32 %v14958_v23, %v7524_v39  ;;  %v15031_v32 = vadd.f32 %v14945_v22, %v7521_v60  ;;  %v16057_v54 = vld [vmem:[#allocation40_spill] sm:$0xff]  ;;  %v16058_v60 = vld [vmem:[#allocation34_spill] sm:$0xff] }
0x19ee   : > { %v7453_v14 = vadd.f32 %v7445_v8, %v7397_v51  ;;  %v15028_v56 = vadd.f32 %v7485_v11, %v7477_v42  ;;  %v7398_v34 = vadd.f32 %v7390_v30, %v7342_v21  ;;  %v7391_v20 = vmul.f32 %v7382_v46, %v16056_v31  ;;  %v16060_v42 = vld [vmem:[#allocation48_spill] sm:$0xff] }
0x19ef   : > { %v7478_v44 = vadd.f32 %v7470_v43, %v7462_v4  ;;  %v7386_v27 = vmul.f32 %v9580_v45, %v14295_v50  ;;  %v7466_v25 = vmul.f32 %v9580_v45, %v16055_v35  ;;  %v7471_v59 = vmul.f32 %v7382_v46, %v16057_v54  ;;  %v16059_v50 = vld [vmem:[#allocation49_spill] sm:$0xff]  ;;  %v7438_v46 = vpop.permute.xlu1 %7437 }
0x19f0   : > { %v9591_v10 = vunpack.i.h.bf16 %v9589_v5  ;;  %v9590_v23 = vunpack.i.l.bf16 %v9589_v5  ;;  %v7608_v39 = vrot.slane %v15004_v38, 1  ;;  %v7612_v52 = vrot.slane %v15026_v57, 1 }
0x19f1   : > { %v7394_v8 = vadd.f32 %v7386_v27, %v7338_v53  ;;  %v7474_v11 = vadd.f32 %v7466_v25, %v7458_v29  ;;  %v7525_v22 = vmul.f32 %v7512_v40, %v7453_v14  ;;  %v7609_v14 = vrot.slane %v15031_v32, 1  ;;  %v16062_v27 = vld [vmem:[#allocation13_spill] sm:$0xff] }
0x19f2   : > { %v7343_v30 = vmul.f32 %v9591_v10, %v16058_v60  ;;  %v7463_v51 = vmul.f32 %v9591_v10, %v16059_v50  ;;  %v7446_v43 = vmul.f32 %v9590_v23, %v16060_v42  ;;  %v7486_v21 = vmul.f32 %v9590_v23, %v16061_v7  ;;  %v16063_v23 = vld [vmem:[#allocation53_spill] sm:$0xff] }
0x19f3   : > { %v7450_v5 = vadd.f32 %v7442_v13, %v7394_v8  ;;  %v7490_v26 = vadd.f32 %v7482_v36, %v7474_v11  ;;  %v7624_v53 = vsel %vm569_vm1, %v7608_v39, 0.0  ;;  %v7628_v29 = vsel %vm569_vm1, %v7612_v52, 0.0 }
0x19f4   : > { %v7454_v12 = vadd.f32 %v7446_v43, %v7398_v34  ;;  %v7494_v4 = vadd.f32 %v7486_v21, %v7478_v44  ;;  %7672 = vrot.lane.b32.xlu1 %v7624_v53, %s16048_s24  ;;  %7680 = vrot.lane.b32.xlu0 %v7628_v29, %s16048_s24  ;;  %v15050_v45 = vadd.f32 %v14966_v62, %v7525_v22  ;;  %v7625_v39 = vsel %vm569_vm1, %v7609_v14, 0.0 }
0x19f5   : > { %v7522_v13 = vmul.f32 %v7503_v28, %v7450_v5  ;;  %v7399_v36 = vadd.f32 %v7391_v20, %v7343_v30  ;;  %v7447_v25 = vmul.f32 %v7438_v46, %v16062_v27  ;;  %v7479_v34 = vadd.f32 %v7471_v59, %v7463_v51  ;;  %v16064_v27 = vld [vmem:[#allocation32_spill] sm:$0xff] }
0x19f6   : > { %v7567_v44 = vmul.f32 %v7558_v47, %v16056_v31  ;;  %v7526_v10 = vmul.f32 %v7515_v0, %v7454_v12  ;;  %v7487_v62 = vmul.f32 %v7438_v46, %v16063_v23  ;;  %v7613_v11 = vrot.slane %v15050_v45, 1 }
0x19f7   : > { %v7455_v8 = vadd.f32 %v7447_v25, %v7399_v36  ;;  %v15065_v52 = vadd.f32 %v14953_v2, %v7522_v13  ;;  %v7577_v20 = vmul.f32 %v7500_v49, %v7489_v41  ;;  %v7576_v59 = vmul.f32 %v7497_v55, %v14987_v18 }
0x19f8   : > { %v7495_v22 = vadd.f32 %v7487_v62, %v7479_v34  ;;  %7674 = vrot.lane.b32.xlu1 %v7625_v39, %s16048_s24  ;;  %v15071_v31 = vadd.f32 %v14985_v63, %v7526_v10  ;;  %v7580_v60 = vmul.f32 %v7509_v16, %v15000_v19  ;;  %v7629_v30 = vsel %vm569_vm1, %v7613_v11, 0.0 }
0x19f9   : > { %v7527_v2 = vmul.f32 %v7518_v3, %v7455_v8  ;;  %v7610_v49 = vrot.slane %v15065_v52, 1  ;;  %v15084_v41 = vadd.f32 %v14948_v6, %v7577_v20  ;;  %7682 = vrot.lane.b32.xlu0 %v7629_v30, %s16048_s24  ;;  %v15091_v16 = vadd.f32 %v14942_v33, %v7576_v59 }
0x19fa   : > { %v7583_v63 = vmul.f32 %v7518_v3, %v7495_v22  ;;  %v7614_v55 = vrot.slane %v15071_v31, 1  ;;  %v15097_v50 = vadd.f32 %v14961_v1, %v7580_v60  ;;  %v7586_v3 = vmul.f32 %v7543_v37, %v16055_v35 }
0x19fb   : > { %v15093_v18 = vadd.f32 %v7567_v44, %v7527_v2  ;;  %v7626_v19 = vsel %vm569_vm1, %v7610_v49, 0.0  ;;  %v7578_v51 = vmul.f32 %v7503_v28, %v7490_v26  ;;  %v7591_v33 = vmul.f32 %v7558_v47, %v16057_v54 }
0x19fc   : > { %7676 = vrot.lane.b32.xlu1 %v7626_v19, %s16048_s24  ;;  %v7630_v6 = vsel %vm569_vm1, %v7614_v55, 0.0  ;;  %v7589_v43 = vmul.f32 %v7552_v24, %v16047_v15  ;;  %v7581_v37 = vmul.f32 %v7512_v40, %v15028_v56  ;;  %v7590_v35 = vmul.f32 %v7555_v58, %v16051_v9 }
0x19fd   : > { %v7615_v42 = vrot.slane %v15093_v18, 1  ;;  %7684 = vrot.lane.b32.xlu0 %v7630_v6, %s16048_s24  ;;  %v15114_v1 = vadd.f32 %v7586_v3, %v7578_v51  ;;  %v7582_v7 = vmul.f32 %v7515_v0, %v7494_v4  ;;  %v15125_v47 = vadd.f32 %v7591_v33, %v7583_v63 }
0x19fe   : > { %v15128_v54 = vadd.f32 %v7589_v43, %v7581_v37 }
0x19ff   : > { %v7631_v28 = vsel %vm569_vm1, %v7615_v42, 0.0  ;;  %v15130_v24 = vadd.f32 %v7590_v35, %v7582_v7 }
0x1a00   : > { %7686 = vrot.lane.b32.xlu1 %v7631_v28, %s16048_s24  ;;  %s9184_s24 = spop %9183 }
0x1a5c   : > { %v7679_v15 = vpop.permute.xlu0 %7678 }
0x1a5d   : > { %v7699_v21 = vsel %vm415_vm0, %v14976_v17, %v7679_v15 }
0x1a5e   : > { %8774 = vmatmul.mubr.msk.f32.vlgmr.msra.gmra.mrb[48].mxu1 %vm629_vm2, %v7699_v21 }
0x1a5f   : > { %7816 = vmatprep.mubr.f32.mxu1 %v15705_v48 }
0x1a66   : > { %v7673_v40 = vpop.permute.xlu1 %7672  ;;  %v7681_v58 = vpop.permute.xlu0 %7680 }
0x1a67   : > { %v7696_v0 = vsel %vm415_vm0, %v15004_v38, %v7673_v40  ;;  %v7700_v9 = vsel %vm415_vm0, %v15026_v57, %v7681_v58 }
0x1a68   : > { %8771 = vmatmul.mubr.msk.f32.vlgmr.msra.gmra.mrb[56].mxu0 %vm629_vm2, %v7696_v0  ;;  %8775 = vmatmul.mubr.msk.f32.gmra.mrb[50].mxu1 %vm629_vm2, %v7700_v9 }
0x1a69   : > { %7798 = vmatprep.mubr.f32.mxu0 %v15705_v48  ;;  %7822 = vmatprep.mubr.f32.mxu1 %v15705_v48 }
0x1a6a   : > { %v7675_v56 = vpop.permute.xlu1 %7674 }
0x1a6b   : > { %v7697_v46 = vsel %vm415_vm0, %v15031_v32, %v7675_v56  ;;  %v7683_v5 = vpop.permute.xlu0 %7682 }
0x1a6c   : > { %8772 = vmatmul.mubr.msk.f32.gmra.mrb[58].mxu0 %vm629_vm2, %v7697_v46  ;;  %v7701_v26 = vsel %vm415_vm0, %v15050_v45, %v7683_v5 }
0x1a6d   : > { %7804 = vmatprep.mubr.f32.mxu0 %v15705_v48  ;;  %8776 = vmatmul.mubr.msk.f32.gmra.mrb[52].mxu1 %vm629_vm2, %v7701_v26 }
0x1a6e   : > { %v7677_v53 = vpop.permute.xlu1 %7676  ;;  %7828 = vmatprep.mubr.f32.mxu1 %v15705_v48 }
0x1a6f   : > { %v7698_v29 = vsel %vm415_vm0, %v15065_v52, %v7677_v53  ;;  %v7685_v12 = vpop.permute.xlu0 %7684 }
0x1a70   : > { %8773 = vmatmul.mubr.msk.f32.gmra.mrb[60].mxu0 %vm629_vm2, %v7698_v29  ;;  %v7702_v4 = vsel %vm415_vm0, %v15071_v31, %v7685_v12 }
0x1a71   : > { %8777 = vmatmul.mubr.msk.f32.gmra.mrb[54].mxu1 %vm629_vm2, %v7702_v4 }
0x1a72   : > { %v7687_v14 = vpop.permute.xlu1 %7686  ;;  %7834 = vmatprep.mubr.f32.mxu1 %v15705_v48 }
0x1a73   : > { %v7703_v13 = vsel %vm415_vm0, %v15093_v18, %v7687_v14 }
0x1a75   : > { %8778 = vmatmul.mubr.msk.f32.gmra.mrb[56].mxu1 %vm629_vm2, %v7703_v13  ;;  %vm8285_vm2 = vcmask 1042434  }
0x1b31   : > { %v7812_v36 = vpop.f32.mrb[48].mxu1 }
0x1b32   : > { %v15163_v25 = vadd.f32 %v7812_v36, %v16064_v27  ;;  %v15165_v34 = vpop.f32.mrb[49].mxu1 }
0x1b34   : > { %v7844_v44 = vadd.f32 1.0, %v15163_v25 }
0x1b36   : > { %v8782_v10 = vmul.f32 -1.442695, %v7844_v44 }
0x1b38   : > { %10360 = vpow2.f32 %v8782_v10 }
0x1b3b   : > { %v7794_v23 = vpop.f32.mrb[56].mxu0  ;;  %v7818_v62 = vpop.f32.mrb[50].mxu1 }
0x1b3c   : > { %v15169_v39 = vadd.f32 %v7794_v23, %v16064_v27  ;;  %v15171_v48 = vpop.f32.mrb[57].mxu0  ;;  %v15174_v8 = vadd.f32 %v7818_v62, %v16064_v27  ;;  %v15176_v11 = vpop.f32.mrb[51].mxu1  ;;  %v8790_v62 = vmul.f32 -1.442695, %v15163_v25 }
0x1b3e   : > { %v7841_v20 = vadd.f32 1.0, %v15169_v39  ;;  %v8787_v22 = vmul.f32 -1.442695, %v15169_v39  ;;  %v7845_v59 = vadd.f32 1.0, %v15174_v8  ;;  %v8791_v28 = vmul.f32 -1.442695, %v15174_v8 }
0x1b3f   : > { %v7800_v2 = vpop.f32.mrb[58].mxu0 }
0x1b40   : > { %v8779_v60 = vmul.f32 -1.442695, %v7841_v20  ;;  %10362 = vpow2.f32 %v8787_v22  ;;  %v15182_v30 = vadd.f32 %v7800_v2, %v16064_v27  ;;  %v15184_v49 = vpop.f32.mrb[59].mxu0  ;;  %v7824_v63 = vpop.f32.mrb[52].mxu1  ;;  %v8783_v19 = vmul.f32 -1.442695, %v7845_v59 }
0x1b41   : > { %v15186_v3 = vpop.f32.mrb[53].mxu1  ;;  %v15190_v42 = vadd.f32 %v7824_v63, %v16064_v27 }
0x1b42   : > { %v10361_v55 = vpop.eup %10360  ;;  %10364 = vpow2.f32 %v8779_v60  ;;  %v7842_v51 = vadd.f32 1.0, %v15182_v30  ;;  %v8788_v15 = vmul.f32 -1.442695, %v15182_v30 }
0x1b43   : > { %v7876_v6 = vadd.f32 1.0, %v10361_v55  ;;  %v7806_v33 = vpop.f32.mrb[60].mxu0  ;;  %v7846_v21 = vadd.f32 1.0, %v15190_v42 }
0x1b44   : > { %v15192_v43 = vpop.f32.mrb[61].mxu0  ;;  %v8780_v37 = vmul.f32 -1.442695, %v7842_v51  ;;  %v7830_v35 = vpop.f32.mrb[54].mxu1  ;;  %v15202_v26 = vadd.f32 %v7806_v33, %v16064_v27 }
0x1b45   : > { %10366 = vrcp.f32 %v7876_v6  ;;  %v15195_v7 = vpop.f32.mrb[55].mxu1  ;;  %v8784_v46 = vmul.f32 -1.442695, %v7846_v21  ;;  %v15212_v10 = vadd.f32 %v7830_v35, %v16064_v27 }
0x1b46   : > { %10368 = vpow2.f32 %v8783_v19  ;;  %v7843_v14 = vadd.f32 1.0, %v15202_v26  ;;  %v8789_v2 = vmul.f32 -1.442695, %v15202_v26 }
0x1b47   : > { %10370 = vpow2.f32 %v8780_v37  ;;  %v7847_v63 = vadd.f32 1.0, %v15212_v10  ;;  %v8792_v37 = vmul.f32 -1.442695, %v15190_v42  ;;  %v8793_v21 = vmul.f32 -1.442695, %v15212_v10 }
0x1b48   : > { %v7836_v40 = vpop.f32.mrb[56].mxu1  ;;  %10372 = vpow2.f32 %v8791_v28  ;;  %v8781_v22 = vmul.f32 -1.442695, %v7843_v14 }
0x1b49   : > { %v15199_v0 = vpop.f32.mrb[57].mxu1  ;;  %10374 = vpow2.f32 %v8788_v15  ;;  %v15221_v19 = vadd.f32 %v7836_v40, %v16064_v27  ;;  %v8785_v35 = vmul.f32 -1.442695, %v7847_v63 }
0x1b4a   : > { %v10363_v58 = vpop.eup %10362 }
0x1b4b   : > { %v7985_v9 = vadd.f32 1.0, %v10363_v58  ;;  %v7848_v15 = vadd.f32 1.0, %v15221_v19 }
0x1b4c   : > { %v10365_v56 = vpop.eup %10364 }
0x1b4d   : > { %v7873_v5 = vadd.f32 1.0, %v10365_v56  ;;  %10376 = vrcp.f32 %v7985_v9  ;;  %v8786_v58 = vmul.f32 -1.442695, %v7848_v15 }
0x1b4f   : > { %v15204_v53 = vpop.eup %10366  ;;  %10378 = vrcp.f32 %v7873_v5 }
0x1b50   : > { %v10369_v29 = vpop.eup %10368  ;;  %10380 = vpow2.f32 %v8784_v46  ;;  %v15208_v12 = vmul.f32 %v15204_v53, %v14969_v61 }
0x1b51   : > { %v7877_v4 = vadd.f32 1.0, %v10369_v29  ;;  %v10371_v13 = vpop.eup %10370  ;;  %v8794_v29 = vmul.f32 -1.442695, %v15221_v19 }
0x1b52   : > { %v10373_v36 = vpop.eup %10372  ;;  %v7874_v44 = vadd.f32 1.0, %v10371_v13 }
0x1b53   : > { %10382 = vrcp.f32 %v7877_v4  ;;  %v10375_v23 = vpop.eup %10374  ;;  %v7989_v60 = vadd.f32 1.0, %v10373_v36 }
0x1b54   : > { %10384 = vrcp.f32 %v7874_v44  ;;  %v7986_v20 = vadd.f32 1.0, %v10375_v23 }
0x1b56   : > { %10386 = vrcp.f32 %v7986_v20 }
0x1b57   : > { %v10377_v59 = vpop.eup %10376  ;;  %10388 = vpow2.f32 %v8790_v62 }
0x1b58   : > { %8017 = vrot.lane.b32.xlu0 %v10377_v59, %s16065_s20  ;;  %10390 = vpow2.f32 %v8781_v22 }
0x1b59   : > { %v15218_v55 = vpop.eup %10378  ;;  %10392 = vrcp.f32 %v7989_v60 }
0x1b5a   : > { %v10381_v6 = vpop.eup %10380  ;;  %v15225_v51 = vmul.f32 %v15218_v55, %v15091_v16  ;;  %10394 = vpow2.f32 %v8789_v2 }
0x1b5b   : > { %v7878_v33 = vadd.f32 1.0, %v10381_v6 }
0x1b5d   : > { %v10383_v28 = vpop.eup %10382  ;;  %10396 = vrcp.f32 %v7878_v33 }
0x1b5e   : > { %v15231_v27 = vmul.f32 %v10383_v28, %v15097_v50  ;;  %10398 = vpow2.f32 %v8792_v37  ;;  %v10385_v40 = vpop.eup %10384 }
0x1b5f   : > { %10400 = vpow2.f32 %v8785_v35  ;;  %v15234_v9 = vmul.f32 %v10385_v40, %v15084_v41 }
0x1b60   : > { %v10387_v56 = vpop.eup %10386  ;;  %10402 = vpow2.f32 %v8793_v21 }
0x1b61   : > { %v10389_v46 = vpop.eup %10388  ;;  %8019 = vrot.lane.b32.xlu0 %v10387_v56, %s16065_s20  ;;  %10404 = vpow2.f32 %v8786_v58 }
0x1b62   : > { %v10391_v5 = vpop.eup %10390  ;;  %v7988_v23 = vadd.f32 1.0, %v10389_v46 }
0x1b63   : > { %v10393_v4 = vpop.eup %10392  ;;  %v7875_v14 = vadd.f32 1.0, %v10391_v5 }
0x1b64   : > { %v10395_v13 = vpop.eup %10394 }
0x1b65   : > { %10406 = vrcp.f32 %v7875_v14  ;;  %v7987_v44 = vadd.f32 1.0, %v10395_v13  ;;  %8025 = vrot.lane.b32.xlu0 %v10393_v4, %s16065_s20 }
0x1b66   : > { %10408 = vpow2.f32 %v8794_v29 }
0x1b67   : > { %v10397_v36 = vpop.eup %10396  ;;  %10410 = vrcp.f32 %v7987_v44 }
0x1b68   : > { %v15240_v62 = vmul.f32 %v10397_v36, %v15128_v54  ;;  %v10399_v20 = vpop.eup %10398  ;;  %10412 = vrcp.f32 %v7988_v23 }
0x1b69   : > { %v10401_v22 = vpop.eup %10400  ;;  %v7990_v2 = vadd.f32 1.0, %v10399_v20 }
0x1b6a   : > { %v7879_v59 = vadd.f32 1.0, %v10401_v22  ;;  %v10403_v60 = vpop.eup %10402 }
0x1b6b   : > { %v7991_v63 = vadd.f32 1.0, %v10403_v60  ;;  %v10405_v6 = vpop.eup %10404 }
0x1b6c   : > { %10414 = vrcp.f32 %v7879_v59  ;;  %v7880_v33 = vadd.f32 1.0, %v10405_v6 }
0x1b6d   : > { %10416 = vrcp.f32 %v7991_v63 }
0x1b6e   : > { %10418 = vrcp.f32 %v7990_v2 }
0x1b6f   : > { %v10407_v37 = vpop.eup %10406  ;;  %10420 = vrcp.f32 %v7880_v33 }
0x1b70   : > { %v10409_v35 = vpop.eup %10408  ;;  %v15243_v15 = vmul.f32 %v10407_v37, %v15114_v1 }
0x1b71   : > { %v10411_v21 = vpop.eup %10410  ;;  %v7992_v58 = vadd.f32 1.0, %v10409_v35 }
0x1b72   : > { %8021 = vrot.lane.b32.xlu1 %v10411_v21, %s16065_s20  ;;  %v10413_v56 = vpop.eup %10412  ;;  %v7640_v21 = vrot.slane %v15091_v16, 1 }
0x1b73   : > { %10422 = vrcp.f32 %v7992_v58 }
0x1b74   : > { %10424 = vtanh.f32 %v15169_v39 }
0x1b75   : > { %10426 = vtanh.f32 %v15182_v30 }
0x1b76   : > { %v10415_v46 = vpop.eup %10414  ;;  %8023 = vrot.lane.b32.xlu1 %v10413_v56, %s16065_s20  ;;  %10428 = vtanh.f32 %v15202_v26 }
0x1b77   : > { %v15248_v5 = vmul.f32 %v10415_v46, %v15130_v24  ;;  %v10417_v29 = vpop.eup %10416  ;;  %10430 = vtanh.f32 %v15163_v25 }
0x1b78   : > { %8029 = vrot.lane.b32.xlu0 %v10417_v29, %s16065_s20  ;;  %v10419_v4 = vpop.eup %10418  ;;  %10432 = vtanh.f32 %v15174_v8  ;;  %v7641_v8 = vrot.slane %v15084_v41, 1 }
0x1b79   : > { %v10421_v14 = vpop.eup %10420  ;;  %10434 = vtanh.f32 %v15190_v42 }
0x1b7a   : > { %8027 = vrot.lane.b32.xlu1 %v10419_v4, %s16065_s20  ;;  %v15253_v13 = vmul.f32 %v10421_v14, %v15125_v47  ;;  %10436 = vtanh.f32 %v15212_v10 }
0x1b7b   : > { %10438 = vtanh.f32 %v15221_v19  ;;  %v7657_v19 = vsel %vm569_vm1, %v7641_v8, 0.0 }
0x1b7c   : > { %7915 = vrot.lane.b32.xlu0 %v10385_v40, %s16065_s20 }
0x1b7d   : > { %v10423_v44 = vpop.eup %10422 }
0x1b7e   : > { %8031 = vrot.lane.b32.xlu1 %v10423_v44, %s16065_s20  ;;  %v10425_v40 = vpop.eup %10424 }
0x1b7f   : > { %v10427_v20 = vpop.eup %10426 }
0x1b80   : > { %7913 = vrot.lane.b32.xlu0 %v15218_v55, %s16065_s20  ;;  %v10429_v39 = vpop.eup %10428 }
0x1b81   : > { %v10431_v59 = vpop.eup %10430 }
0x1b82   : > { %7917 = vrot.lane.b32.xlu1 %v10407_v37, %s16065_s20  ;;  %v10433_v60 = vpop.eup %10432 }
0x1b83   : > { %v10435_v6 = vpop.eup %10434 }
0x1b84   : > { %7921 = vrot.lane.b32.xlu0 %v10383_v28, %s16065_s20  ;;  %v10437_v42 = vpop.eup %10436 }
0x1b85   : > { %v10439_v41 = vpop.eup %10438 }
0x1b86   : > { %7919 = vrot.lane.b32.xlu1 %v15204_v53, %s16065_s20 }
0x1b8a   : > { %7923 = vrot.lane.b32.xlu1 %v10397_v36, %s16065_s20 }
0x1b8e   : > { %7925 = vrot.lane.b32.xlu1 %v10415_v46, %s16065_s20  ;;  %v7642_v46 = vrot.slane %v15114_v1, 1 }
0x1b90   : > { %v7658_v16 = vsel %vm569_vm1, %v7642_v46, 0.0 }
0x1b92   : > { %7927 = vrot.lane.b32.xlu1 %v10421_v14, %s16065_s20  ;;  %v7656_v14 = vsel %vm569_vm1, %v7640_v21, 0.0 }
0x1bca   : > { %v8018_v23 = vpop.permute.xlu0 %8017 }
0x1bcb   : > { %v8041_v55 = vmul.f32 %v10425_v40, %v8018_v23  ;;  %v7644_v40 = vrot.slane %v15097_v50, 1 }
0x1bcd   : > { %8057 = vrot.lane.b32.xlu0 %v8041_v55, %s16066_s22  ;;  %v7660_v1 = vsel %vm569_vm1, %v7644_v40, 0.0 }
0x1bd3   : > { %v8020_v28 = vpop.permute.xlu0 %8019 }
0x1bd4   : > { %v8042_v22 = vmul.f32 %v10427_v20, %v8020_v28  ;;  %v7643_v20 = vrot.slane %v14969_v61, 1 }
0x1bd6   : > { %8059 = vrot.lane.b32.xlu0 %v8042_v22, %s16066_s22 }
0x1bd7   : > { %v8026_v30 = vpop.permute.xlu0 %8025 }
0x1bd8   : > { %v8045_v26 = vmul.f32 %v10433_v60, %v8026_v30 }
0x1be4   : > { %v8022_v53 = vpop.permute.xlu1 %8021 }
0x1be5   : > { %v8043_v36 = vmul.f32 %v10429_v39, %v8022_v53  ;;  %v7659_v53 = vsel %vm569_vm1, %v7643_v20, 0.0 }
0x1be7   : > { %8061 = vrot.lane.b32.xlu0 %v8043_v36, %s16066_s22  ;;  %v7645_v36 = vrot.slane %v15128_v54, 1 }
0x1be8   : > { %v8024_v2 = vpop.permute.xlu1 %8023 }
0x1be9   : > { %v8044_v63 = vmul.f32 %v10431_v59, %v8024_v2  ;;  %v7661_v61 = vsel %vm569_vm1, %v7645_v36, 0.0 }
0x1bea   : > { %v8030_v25 = vpop.permute.xlu0 %8029 }
0x1beb   : > { %8063 = vrot.lane.b32.xlu1 %v8044_v63, %s16066_s22  ;;  %8065 = vrot.lane.b32.xlu0 %v8045_v26, %s16066_s22  ;;  %v8047_v33 = vmul.f32 %v10437_v42, %v8030_v25 }
0x1bec   : > { %v8028_v10 = vpop.permute.xlu1 %8027 }
0x1bed   : > { %v8046_v37 = vmul.f32 %v10435_v6, %v8028_v10  ;;  %v7647_v6 = vrot.slane %v15125_v47, 1 }
0x1bee   : > { %v7916_v35 = vpop.permute.xlu0 %7915 }
0x1bef   : > { %v7938_v58 = vmul.f32 %v7916_v35, %v7657_v19  ;;  %8067 = vrot.lane.b32.xlu1 %v8046_v37, %s16066_s22  ;;  %8069 = vrot.lane.b32.xlu0 %v8047_v33, %s16066_s22 }
0x1bf0   : > { %v8032_v56 = vpop.permute.xlu1 %8031 }
0x1bf1   : > { %v8048_v29 = vmul.f32 %v10439_v41, %v8032_v56  ;;  %v7946_v4 = vadd.f32 %v7938_v58, %v15234_v9 }
0x1bf2   : > { %v7914_v44 = vpop.permute.xlu0 %7913 }
0x1bf3   : > { %v7937_v23 = vmul.f32 %v7914_v44, %v7656_v14  ;;  %8071 = vrot.lane.b32.xlu1 %v8048_v29, %s16066_s22 }
0x1bf4   : > { %v7918_v55 = vpop.permute.xlu1 %7917 }
0x1bf5   : > { %v7939_v28 = vmul.f32 %v7918_v55, %v7658_v16  ;;  %v7945_v22 = vadd.f32 %v7937_v23, %v15225_v51  ;;  %v7646_v51 = vrot.slane %v15130_v24, 1 }
0x1bf6   : > { %v7922_v39 = vpop.permute.xlu0 %7921 }
0x1bf7   : > { %v7941_v9 = vmul.f32 %v7922_v39, %v7660_v1  ;;  %v7947_v30 = vadd.f32 %v7939_v28, %v15243_v15  ;;  %v7662_v15 = vsel %vm569_vm1, %v7646_v51, 0.0  ;;  %v16067_v1 = vld [vmem:[#allocation33_spill] sm:$0xff] }
0x1bf8   : > { %v7920_v50 = vpop.permute.xlu1 %7919  ;;  %v7797_v39 = vadd.f32 %v15171_v48, %v16067_v1 }
0x1bf9   : > { %v7940_v59 = vmul.f32 %v7920_v50, %v7659_v53  ;;  %v7949_v60 = vadd.f32 %v7941_v9, %v15231_v27  ;;  %v7663_v27 = vsel %vm569_vm1, %v7647_v6, 0.0  ;;  %v7803_v9 = vadd.f32 %v15184_v49, %v16067_v1 }
0x1bfa   : > { %v7815_v49 = vadd.f32 %v15165_v34, %v16067_v1  ;;  %v7833_v34 = vadd.f32 %v15195_v7, %v16067_v1  ;;  %vm8282_vm1 = vcmask 1041409  }
0x1bfb   : > { %v7948_v2 = vadd.f32 %v7940_v59, %v15208_v12  ;;  %v8796_v53 = vmul.f32 -1.442695, %v7803_v9  ;;  %v7809_v59 = vadd.f32 %v15192_v43, %v16067_v1  ;;  %v8243_v9 = vstv %s9182_s28 }
0x1bfc   : > { %v7924_v26 = vpop.permute.xlu1 %7923  ;;  %v8798_v43 = vmul.f32 -1.442695, %v7815_v49 }
0x1bfd   : > { %v7942_v63 = vmul.f32 %v7924_v26, %v7661_v61  ;;  %v7821_v61 = vadd.f32 %v15176_v11, %v16067_v1  ;;  %v7827_v26 = vadd.f32 %v15186_v3, %v16067_v1  ;;  %v8801_v3 = vmul.f32 -1.442695, %v7833_v34 }
0x1bff   : > { %v7950_v25 = vadd.f32 %v7942_v63, %v15240_v62  ;;  %v8799_v51 = vmul.f32 -1.442695, %v7821_v61  ;;  %v8800_v11 = vmul.f32 -1.442695, %v7827_v26  ;;  %v7839_v63 = vadd.f32 %v15199_v0, %v16067_v1 }
0x1c00   : > { %v7926_v8 = vpop.permute.xlu1 %7925  ;;  %v8234_v0 = vstv %s9176_s23  ;;  %v8209_v26 = vstv %s15336_s15 }
0x1c01   : > { %v7943_v42 = vmul.f32 %v7926_v8, %v7662_v15  ;;  %v8802_v8 = vmul.f32 -1.442695, %v7839_v63 }
0x1c03   : > { %v7951_v54 = vadd.f32 %v7943_v42, %v15248_v5 }
0x1c04   : > { %v7928_v10 = vpop.permute.xlu1 %7927 }
0x1c05   : > { %v7944_v12 = vmul.f32 %v7928_v10, %v7663_v27  ;;  %v8197_v27 = vstv %s15322_s26  ;;  %v8237_v10 = vstv %s9178_s25 }
0x1c07   : > { %v7952_v33 = vadd.f32 %v7944_v12, %v15253_v13 }
0x1c3f   : > { %v8058_v37 = vpop.permute.xlu0 %8057 }
0x1c40   : > { %v8081_v19 = vadd.f32 %v8058_v37, %v7945_v22 }
0x1c42   : > { %10440 = vtanh.f32 %v8081_v19 }
0x1c48   : > { %v8060_v24 = vpop.permute.xlu0 %8059 }
0x1c49   : > { %v8082_v35 = vadd.f32 %v8060_v24, %v7946_v4  ;;  %v8258_v24 = vmul.f32 %v8237_v10, %v15031_v32 }
0x1c4b   : > { %10442 = vtanh.f32 %v8082_v35 }
0x1c4c   : > { %v10441_v62 = vpop.eup %10440 }
0x1c4d   : > { %8153 = vrot.lane.b32.xlu0 %v10441_v62, %s16065_s20 }
0x1c55   : > { %v10443_v21 = vpop.eup %10442 }
0x1c56   : > { %8155 = vrot.lane.b32.xlu0 %v10443_v21, %s16065_s20 }
0x1c59   : > { %v8062_v47 = vpop.permute.xlu0 %8061 }
0x1c5a   : > { %v8083_v5 = vadd.f32 %v8062_v47, %v7947_v30  ;;  %v8795_v30 = vmul.f32 -1.442695, %v7797_v39  ;;  %v8257_v47 = vmul.f32 %v8234_v0, %v15004_v38  ;;  %v8203_v39 = vstv %s15328_s13  ;;  %s8804_s13 = sshll.u32 %s10755_s7, 7 }
0x1c5b   : > { %s15372_s23 = scalar_lea.hbm %s15425_s8, %s8804_s13 }
0x1c5c   : > { %10444 = vtanh.f32 %v8083_v5 }
0x1c5d   : > { %v8064_v58 = vpop.permute.xlu1 %8063  ;;  %v8066_v41 = vpop.permute.xlu0 %8065 }
0x1c5e   : > { %v8084_v56 = vadd.f32 %v8064_v58, %v7948_v2  ;;  %v8085_v46 = vadd.f32 %v8066_v41, %v7949_v60  ;;  %v8797_v2 = vmul.f32 -1.442695, %v7809_v59 }
0x1c60   : > { %10446 = vtanh.f32 %v8084_v56 }
0x1c61   : > { %10448 = vtanh.f32 %v8085_v46  ;;  %v8068_v13 = vpop.permute.xlu1 %8067  ;;  %v8070_v29 = vpop.permute.xlu0 %8069 }
0x1c62   : > { %v8086_v14 = vadd.f32 %v8068_v13, %v7950_v25  ;;  %v8087_v4 = vadd.f32 %v8070_v29, %v7951_v54  ;;  %v8194_v54 = vstv %s15318_s11  ;;  %s345_s11 = sand.u32 1, %s10664_s30  }
0x1c63   : > { %s8305_s7 = scalar_lea.sflag [#allocation5], %s345_s11 }
0x1c64   : > { %10450 = vtanh.f32 %v8086_v14 }
0x1c65   : > { %10452 = vtanh.f32 %v8087_v4  ;;  %v8072_v44 = vpop.permute.xlu1 %8071 }
0x1c66   : > { %v10445_v40 = vpop.eup %10444  ;;  %v8088_v23 = vadd.f32 %v8072_v44, %v7952_v33 }
0x1c67   : > { %8157 = vrot.lane.b32.xlu1 %v10445_v40, %s16065_s20 }
0x1c68   : > { %10454 = vtanh.f32 %v8088_v23  ;;  %v8200_v23 = vstv %s15324_s27  ;;  %s15362_s27 = sshll.u32 %s345_s11, 3 }
0x1c69   : > { %10456 = vpow2.f32 %v8795_v30 }
0x1c6a   : > { %v10447_v16 = vpop.eup %10446  ;;  %10458 = vpow2.f32 %v8796_v53 }
0x1c6b   : > { %v10449_v55 = vpop.eup %10448  ;;  %8159 = vrot.lane.b32.xlu1 %v10447_v16, %s16065_s20  ;;  %v8240_v16 = vstv %s9180_s18  ;;  %s10685_s18 = smov [#allocation8]  }
0x1c6c   : > { %8161 = vrot.lane.b32.xlu0 %v10449_v55, %s16065_s20  ;;  %s10606_s28 = sshll.u32 %s10685_s18, 4  ;;  %s10607_s28 = int_to_ptr.vmem [resolvable:$false] %s10606_s28 }
0x1c6e   : > { %v10451_v20 = vpop.eup %10450 }
0x1c6f   : > { %v10453_v28 = vpop.eup %10452  ;;  %8163 = vrot.lane.b32.xlu1 %v10451_v20, %s16065_s20 }
0x1c70   : > { %8165 = vrot.lane.b32.xlu0 %v10453_v28, %s16065_s20  ;;  %v8259_v28 = vmul.f32 %v8240_v16, %v15065_v52 }
0x1c72   : > { %v10455_v22 = vpop.eup %10454 }
0x1c73   : > { %8167 = vrot.lane.b32.xlu1 %v10455_v22, %s16065_s20  ;;  %v10457_v50 = vpop.eup %10456  ;;  %s9186_s20 = spop %9185 }
0x1c74   : > { %v10459_v36 = vpop.eup %10458  ;;  %v8113_v60 = vadd.f32 1.0, %v10457_v50  ;;  %v8206_v50 = vstv %s15332_s14  ;;  %s9188_s22 = spop %9187  ;;  %v8249_v34 = vstv %s9186_s20  ;;  %s347_s14 = scalar_lea.vmem [#allocation8], %s15362_s27 }
0x1c75   : > { %v8114_v48 = vadd.f32 1.0, %v10459_v36  ;;  %v8246_v36 = vstv %s9184_s24  ;;  %s9190_s26 = spop %9189  ;;  %s8318_s15 = sshll.u32 %s347_s14, 4  ;;  %s15374_s15 = int_to_ptr.vmem [resolvable:$true] %s8318_s15 }
0x1c76   : > { %10460 = vrcp.f32 %v8113_v60  ;;  %v8255_v0 = vstv %s9190_s26  ;;  %s10602_s25 = scalar_lea.vmem %s15374_s15, 128  ;;  %s10608_s24 = scalar_lea.vmem %s10607_s28, 256 }
0x1c77   : > { %10462 = vrcp.f32 %v8114_v48  ;;  %p10603_p12 = scmp.ne.s32.totalorder %s15374_s15, %s10602_s25  ;;  %p10609_p4 = scmp.lt.s32.totalorder %s15374_s15, %s10607_s28 }
0x1c78   : > { %10464 = vpow2.f32 %v8797_v2  ;;  %v8260_v2 = vmul.f32 %v8243_v9, %v14976_v17  ;;  %v8212_v17 = vstv %s15340_s19  ;;  %p10610_p7 = scmp.lt.s32.totalorder %s10608_s24, %s10602_s25 }
0x1c79   : > { %10466 = vpow2.f32 %v8798_v43  ;;  %p10604_p2 = pnand %p10603_p12, %p16068_p1 }
0x1c7a   : > { %10468 = vpow2.f32 %v8799_v51  ;;  %v8261_v51 = vmul.f32 %v8246_v36, %v15026_v57  ;;  %p10611_p8 = por %p10610_p7, %p10609_p4 }
0x1c7b   : > { %10470 = vpow2.f32 %v8800_v11  ;;  %p10605_p3 = pneg %p10604_p2 }
0x1c7c   : > { %10472 = vpow2.f32 %v8801_v3 }
0x1c7d   : > { %10474 = vpow2.f32 %v8802_v8  ;;  %p10612_p11 = pnand %p10611_p8, %p10605_p3 }
0x1c80   : > { %v10461_v15 = vpop.eup %10460 }
0x1c81   : > { %v10463_v6 = vpop.eup %10462 }
0x1c82   : > { %v10465_v42 = vpop.eup %10464 }
0x1c83   : > { %v8115_v37 = vadd.f32 1.0, %v10465_v42  ;;  %v10467_v62 = vpop.eup %10466 }
0x1c84   : > { %v10469_v21 = vpop.eup %10468  ;;  %v8116_v58 = vadd.f32 1.0, %v10467_v62 }
0x1c85   : > { %10476 = vrcp.f32 %v8115_v37  ;;  %v10471_v46 = vpop.eup %10470  ;;  %v8117_v13 = vadd.f32 1.0, %v10469_v21 }
0x1c86   : > { %v10473_v29 = vpop.eup %10472  ;;  %10478 = vrcp.f32 %v8116_v58  ;;  %v8118_v4 = vadd.f32 1.0, %v10471_v46  ;;  %v8264_v58 = vmul.f32 %v8255_v0, %v15093_v18 }
0x1c87   : > { %v10475_v44 = vpop.eup %10474  ;;  %10480 = vrcp.f32 %v8117_v13  ;;  %v8119_v32 = vadd.f32 1.0, %v10473_v29 }
0x1c88   : > { %10482 = vrcp.f32 %v8118_v4  ;;  %v8120_v40 = vadd.f32 1.0, %v10475_v44 }
0x1c89   : > { %10484 = vrcp.f32 %v8119_v32 }
0x1c8a   : > { %10486 = vrcp.f32 %v8120_v40 }
0x1c8f   : > { %v10477_v38 = vpop.eup %10476 }
0x1c90   : > { %v10479_v1 = vpop.eup %10478 }
0x1c91   : > { %v10481_v53 = vpop.eup %10480 }
0x1c92   : > { %v10483_v43 = vpop.eup %10482 }
0x1c93   : > { %v10485_v3 = vpop.eup %10484 }
0x1cbf   : > { %v8154_v25 = vpop.permute.xlu0 %8153 }
0x1cc0   : > { %v8177_v7 = vmul.f32 %v10461_v15, %v8154_v25  ;;  %v8252_v25 = vstv %s9188_s22 }
0x1cc2   : > { %v8217_v19 = vmul.f32 %v8194_v54, %v8177_v7 }
0x1cc4   : > { %v8265_v41 = vadd.f32 %v8257_v47, %v8217_v19  ;;  %v8215_v47 = vstv %s15344_s21 }
0x1cc8   : > { %v8156_v12 = vpop.permute.xlu0 %8155 }
0x1cc9   : > { %v8178_v33 = vmul.f32 %v10463_v6, %v8156_v12  ;;  %v10487_v12 = vpop.eup %10486 }
0x1ccb   : > { %v8218_v35 = vmul.f32 %v8197_v27, %v8178_v33  ;;  %v8262_v27 = vmul.f32 %v8249_v34, %v15050_v45  ;;  %v8263_v33 = vmul.f32 %v8252_v25, %v15071_v31 }
0x1ccd   : > { %v8266_v5 = vadd.f32 %v8258_v24, %v8218_v35 }
0x1ccf   : > { %v8281_v56 = vrot.slane %v8266_v5, 7 }
0x1cd1   : > { %v8283_v14 = vsel %vm8282_vm1, %v8281_v56, %v8265_v41 }
0x1cd9   : > { %v8158_v55 = vpop.permute.xlu1 %8157 }
0x1cda   : > { %v8179_v20 = vmul.f32 %v10477_v38, %v8158_v55 }
0x1cdc   : > { %v8219_v22 = vmul.f32 %v8200_v23, %v8179_v20 }
0x1cdd   : > { %v8160_v30 = vpop.permute.xlu1 %8159 }
0x1cde   : > { %v8267_v59 = vadd.f32 %v8259_v28, %v8219_v22  ;;  %v8180_v60 = vmul.f32 %v10479_v1, %v8160_v30  ;;  %v8162_v48 = vpop.permute.xlu0 %8161 }
0x1cdf   : > { %v8181_v49 = vmul.f32 %v10481_v53, %v8162_v48 }
0x1ce0   : > { %v8284_v52 = vrot.slane %v8267_v59, 6  ;;  %v8220_v61 = vmul.f32 %v8203_v39, %v8180_v60 }
0x1ce1   : > { %v8221_v11 = vmul.f32 %v8206_v50, %v8181_v49  ;;  %v8164_v63 = vpop.permute.xlu1 %8163 }
0x1ce2   : > { %v8286_v15 = vsel %vm8285_vm2, %v8284_v52, %v8283_v14  ;;  %v8268_v8 = vadd.f32 %v8260_v2, %v8220_v61  ;;  %v8182_v6 = vmul.f32 %v10483_v43, %v8164_v63  ;;  %v8166_v7 = vpop.permute.xlu0 %8165 }
0x1ce3   : > { %v8269_v42 = vadd.f32 %v8261_v51, %v8221_v11  ;;  %v8183_v54 = vmul.f32 %v10485_v3, %v8166_v7 }
0x1ce4   : > { %v8287_v57 = vrot.slane %v8268_v8, 5  ;;  %v8222_v10 = vmul.f32 %v8209_v26, %v8182_v6 }
0x1ce5   : > { %v8290_v37 = vrot.slane %v8269_v42, 4  ;;  %v8223_v19 = vmul.f32 %v8212_v17, %v8183_v54  ;;  %v8168_v24 = vpop.permute.xlu1 %8167 }
0x1ce6   : > { %v8289_v35 = vsel %vm8288_vm8, %v8287_v57, %v8286_v15  ;;  %v8270_v62 = vadd.f32 %v8262_v27, %v8222_v10  ;;  %v8184_v21 = vmul.f32 %v10487_v12, %v8168_v24 }
0x1ce7   : > { %v8292_v45 = vsel %vm8291_vm3, %v8290_v37, %v8289_v35  ;;  %v8271_v5 = vadd.f32 %v8263_v33, %v8223_v19 }
0x1ce8   : > { %v8293_v41 = vrot.slane %v8270_v62, 3  ;;  %v8224_v56 = vmul.f32 %v8215_v47, %v8184_v21 }
0x1ce9   : > { %v8296_v31 = vrot.slane %v8271_v5, 2 }
0x1cea   : > { %v8295_v46 = vsel %vm8294_vm14, %v8293_v41, %v8292_v45  ;;  %v8272_v13 = vadd.f32 %v8264_v58, %v8224_v56 }
0x1ceb   : > { %v8298_v29 = vsel %vm8297_vm4, %v8296_v31, %v8295_v46 }
0x1cec   : > { %v8299_v14 = vrot.slane %v8272_v13, 1 }
0x1cee   : > { %v8301_v18 = vsel %vm8300_vm13, %v8299_v14, %v8298_v29 }
0x1cef   : > { %8303 = vst.msk [vmem:[%s347_s14] sm:$0xff] %vm415_vm0, %v8301_v18 }
0x1cf0   : > { %10615 = shalt.err (!%p10612_p11)
}
0x1cf1   : > { %s10616_s20 = scalar_lea.hbm %s15372_s23, 128  ;;  %s10620_s26 = scalar_lea.hbm %s15425_s8, 256 }
0x1cf2   : > { %p10617_p13 = scmp.ne.s32.totalorder %s15372_s23, %s10616_s20  ;;  %p10621_p6 = scmp.lt.u32.totalorder %s15372_s23, %s15425_s8 }
0x1cf3   : > { %p10622_p9 = scmp.lt.u32.totalorder %s10620_s26, %s10616_s20  ;;  %p10624_p12 = scmp.lt.u32.totalorder %s10616_s20, %s15372_s23 }
0x1cf4   : > { %p10618_p0 = pnand %p10617_p13, %p16068_p1 }
0x1cf5   : > { %p10623_p10 = por %p10622_p9, %p10621_p6 }
0x1cf6   : > { %p10619_p5 = pneg %p10618_p0 }
0x1cf7   : > { %p10625_p2 = por %p10624_p12, %p10623_p10 }
0x1cf9   : > { %p10626_p3 = pnand %p10625_p2, %p10619_p5 }
0x1cfb   : > { %10629 = shalt.err (!%p10626_p3)
}
0x1cfc   : > { %9199 = dma.vmem_to_hbm [thread:$0]  (%p16068_p1), %s15374_s15, 128, %s15372_s23, %s8305_s7  }
0x1cfd PF: > { %p9216_p4 = scmp.ge.s32.totalorder %s10672_s10, 2  ;;  %s8330_s14 = sand.u32 1, %s10660_s29  }
0x1cfe   : > { %p16069_p7 = scmp.ne.s32.totalorder %s15657_s17, 0  ;;  %s8331_s19 = scalar_lea.sflag [#allocation5], %s8330_s14 }
0x1d00   : > { %p9209_p8 = pnand %p9216_p4, %p16069_p7 }
0x1d02   : > { %10655 = dma.done.wait (!%p9209_p8), %s8331_s19, 128  }
0x1d03   : > { %10657 = vsyncadd (!%p9209_p8), %s8331_s19, 4294967168  ;;  %s16070_s21 = sld [smem:[#allocation12_spill]]  ;;  %p22_p11 = scmp.ge.s32.totalorder %s10759_s12, 4  }
0x1d04   : > { %s16071_s29 = smov %s10664_s30  ;;  %s16072_s30 = smov %s10668_s9 }
0x1d05   : > { %s16074_s10 = smov %s10759_s12  ;;  %24 = sbr.rel (!%p22_p11) target bundleno = 8 (0x8), region = 99 }
0x1d09   : > { %s16073_s9 = smov %s16070_s21 }
0x1d0c   :  { %8336 = vsyncpa [#allocation4], 1 }
0x1d0d   :  { %8338 = vsyncpa [#allocation4 + $0x1], 1 }
0x1d0e   :  { %8339 = vsyncpa [#allocation7], 1 }
0x1d0f   :  { %8340 = vsyncpa [#allocation5], 1 }
0x1d10   :  { %8342 = vsyncpa [#allocation5 + $0x1], 1 }

</bundles_post_ra>
